<compile_context>
chip_gen: v7x
topology: tpu7x:2x2x1
jax: 0.10.0
libtpu: 0.0.40
codegen_flags: <defaults>
</compile_context>

<pallas_src>
import functools
import math

import jax
import jax.numpy as jnp
from jax.experimental import pallas as pl
from jax.experimental.pallas import tpu as pltpu

EPS = 1e-5  # PyTorch GroupNorm default eps


def _round_up(a, b):
    return (a + b - 1) // b * b


def _linear_res_kernel(x_ref, wxt_ref, w2t_ref, aff_ref, o_ref, *, n_out, gs):
    """One (tm, n_in) row tile -> (tm, n_out) output tile."""
    x = x_ref[...]                                    # (tm, n_in) f32
    tm = x.shape[0]

    # --- fused first-layer matmul: x @ [W1^T | Wt^T] -> (tm, 2*n_out), bf16 MXU
    hh = jnp.dot(x.astype(jnp.bfloat16), wxt_ref[...],
                 preferred_element_type=jnp.float32)
    h = hh[:, :n_out]                                 # main branch pre-GN1
    t = hh[:, n_out:]                                 # residual branch pre-GN_t

    aff = aff_ref[...]                                # (8, n_out) f32 affine pack

    # lane index, shared by all GroupNorm calls (groups = gs consecutive lanes)
    lane = jax.lax.broadcasted_iota(jnp.int32, (2 * tm, n_out), 1)
    inv_gs = jnp.float32(1.0 / gs)

    def group_stats(v):
        # v: (tm, n_out) f32.  Returns (mean, E[v^2]) broadcast per-channel,
        # both (tm, n_out), computed lane-dense (no reshape) via an in-group
        # butterfly of pltpu.roll ops.  sum and sum-of-squares share the rolls
        # by stacking [v, v*v] along sublanes.
        s = jnp.concatenate([v, v * v], axis=0)       # (2*tm, n_out)
        d = 1
        while d < gs:                                 # static unroll (gs pow2)
            up = pltpu.roll(s, n_out - d, axis=1)     # s[i + d]
            dn = pltpu.roll(s, d, axis=1)             # s[i - d]
            s = s + jnp.where((lane % (2 * d)) < d, up, dn)
            d *= 2
        return s[:tm] * inv_gs, s[tm:] * inv_gs

    def gn(v, gamma, beta):
        mean, ex2 = group_stats(v)
        var = jnp.maximum(ex2 - mean * mean, 0.0)     # biased variance, one pass
        return (v - mean) * jax.lax.rsqrt(var + EPS) * gamma + beta

    # main branch: GN1 -> relu -> linear2 -> GN2
    h = gn(h, aff[0:1, :], aff[1:2, :])
    h = jnp.maximum(h, 0.0)
    h = jnp.dot(h.astype(jnp.bfloat16), w2t_ref[...],
                preferred_element_type=jnp.float32)
    h = gn(h, aff[2:3, :], aff[3:4, :])

    # residual branch (transform = linear -> GN; n_in != n_out)
    t = gn(t, aff[4:5, :], aff[5:6, :])

    o_ref[...] = jnp.maximum(h + t, 0.0).astype(o_ref.dtype)


def linear_res(x, params, *, num_groups, tm=256,
               vmem_limit_bytes=32 * 1024 * 1024):
    """x: (N, n_in) float32. params: dict of weights (see __main__)."""
    n, n_in = x.shape
    n_out = params["w1t"].shape[1]
    gs = n_out // num_groups
    assert gs * num_groups == n_out
    assert gs & (gs - 1) == 0, "kernel assumes a power-of-two group size"
    # TODO(synk): n_in == n_out path (identity residual, no transform) and
    # BN/SyncBN norms are not implemented; only the GN + transform config is.

    # pick a row tile: multiple of 8, no larger than the (padded) batch
    tm = max(8, min(_round_up(tm, 8), _round_up(n, 8)))
    n_pad = _round_up(n, tm)
    xp = x if n_pad == n else jnp.pad(x, ((0, n_pad - n), (0, 0)))

    # fuse the two x-consuming matmuls; bf16 operands for the MXU
    wx = jnp.concatenate([params["w1t"], params["wtt"]],
                         axis=1).astype(jnp.bfloat16)          # (n_in, 2*n_out)
    w2 = params["w2t"].astype(jnp.bfloat16)                    # (n_out, n_out)
    # pack the six (1, n_out) affine vectors into one (8, n_out) f32 tile
    aff = jnp.concatenate(
        [params["g1"], params["b1"], params["g2"], params["b2"],
         params["gt"], params["bt"],
         jnp.zeros((2, n_out), jnp.float32)], axis=0)

    kernel = functools.partial(_linear_res_kernel, n_out=n_out, gs=gs)

    out = pl.pallas_call(
        kernel,
        out_shape=jax.ShapeDtypeStruct((n_pad, n_out), jnp.float32),
        grid_spec=pltpu.PrefetchScalarGridSpec(
            num_scalar_prefetch=0,
            grid=(n_pad // tm,),
            in_specs=[
                pl.BlockSpec((tm, n_in), lambda i: (i, 0)),          # x tile
                pl.BlockSpec((n_in, 2 * n_out), lambda i: (0, 0)),   # [W1|Wt]^T
                pl.BlockSpec((n_out, n_out), lambda i: (0, 0)),      # W2^T
                pl.BlockSpec((8, n_out), lambda i: (0, 0)),          # affine pack
            ],
            out_specs=pl.BlockSpec((tm, n_out), lambda i: (i, 0)),
        ),
        compiler_params=pltpu.CompilerParams(
            dimension_semantics=("parallel",),
            vmem_limit_bytes=vmem_limit_bytes),
    )(xp, wx, w2, aff)

    return out[:n] if n_pad != n else out


def _reference(x, params, num_groups):
    """Plain-JAX forward, precision-matched to the kernel's bf16 MXU operands
    and one-pass variance (math is the PyTorch LinearRes forward)."""
    def gn(h, g, b):
        n, c = h.shape
        gs = c // num_groups
        hg = h.reshape(n, num_groups, gs)
        mean = hg.mean(-1, keepdims=True)
        ex2 = (hg * hg).mean(-1, keepdims=True)
        var = jnp.maximum(ex2 - mean * mean, 0.0)
        return ((hg - mean) * jax.lax.rsqrt(var + EPS)).reshape(n, c) * g + b

    def mm(a, w):
        return jnp.dot(a.astype(jnp.bfloat16), w.astype(jnp.bfloat16),
                       preferred_element_type=jnp.float32)

    h = jnp.maximum(gn(mm(x, params["w1t"]), params["g1"], params["b1"]), 0.0)
    h = gn(mm(h, params["w2t"]), params["g2"], params["b2"])
    t = gn(mm(x, params["wtt"]), params["gt"], params["bt"])
    return jnp.maximum(h + t, 0.0)


if __name__ == "__main__":
    # LinearRes(n_in=64, n_out=128, ng=32) -> GroupNorm(32, 128), groups of 4.
    N, n_in, n_out, ng = 512, 64, 128, 32
    num_groups = math.gcd(ng, n_out)

    key = jax.random.PRNGKey(0)
    ks = jax.random.split(key, 8)

    x = jax.random.normal(ks[0], (N, n_in), dtype=jnp.float32)

    # nn.Linear weight is (out, in); store pre-transposed (in, out).
    params = {
        "w1t": jax.random.normal(ks[1], (n_in, n_out), jnp.float32) * 0.1,
        "w2t": jax.random.normal(ks[2], (n_out, n_out), jnp.float32) * 0.1,
        "wtt": jax.random.normal(ks[3], (n_in, n_out), jnp.float32) * 0.1,
        # GroupNorm affine params (PyTorch default init is gamma=1, beta=0;
        # use deterministic random values to exercise the affine path).
        "g1": 1.0 + 0.1 * jax.random.normal(ks[4], (1, n_out), jnp.float32),
        "b1": 0.1 * jax.random.normal(ks[5], (1, n_out), jnp.float32),
        "g2": 1.0 + 0.1 * jax.random.normal(ks[6], (1, n_out), jnp.float32),
        "b2": 0.1 * jax.random.normal(ks[7], (1, n_out), jnp.float32),
        "gt": jnp.ones((1, n_out), jnp.float32),
        "bt": jnp.zeros((1, n_out), jnp.float32),
    }

    out = linear_res(x, params, num_groups=num_groups, tm=256)
    out = jax.block_until_ready(out)

    ref = _reference(x, params, num_groups)
    assert out.shape == (N, n_out)
    # bf16 MXU operands -> ~1e-2-level agreement with the bf16-matched reference
    assert jnp.allclose(out, ref, atol=2e-2, rtol=2e-2), float(
        jnp.max(jnp.abs(out - ref)))

    print("KERNEL_OK")
</pallas_src>

<mosaic_0001>
module attributes {stable_mosaic.version = 11 : i64} {
  func.func @_linear_res_kernel(%arg0: i32, %arg1: memref<256x64xf32, #tpu.memory_space<vmem>>, %arg2: memref<64x256xbf16, #tpu.memory_space<vmem>>, %arg3: memref<128x128xbf16, #tpu.memory_space<vmem>>, %arg4: memref<8x128xf32, #tpu.memory_space<vmem>>, %arg5: memref<256x128xf32, #tpu.memory_space<vmem>>) attributes {dimension_semantics = [#tpu.dimension_semantics<parallel>], iteration_bounds = array<i64: 2>, scalar_prefetch = 0 : i64, scratch_operands = 0 : i64, tpu.core_type = #tpu.core_type<tc>, window_params = [{transform_indices = @transform_0, window_bounds = array<i64: 256, 64>}, {pipeline_mode = #tpu.pipeline_mode<synchronous>, transform_indices = @transform_1, window_bounds = array<i64: 64, 256>}, {pipeline_mode = #tpu.pipeline_mode<synchronous>, transform_indices = @transform_2, window_bounds = array<i64: 128, 128>}, {pipeline_mode = #tpu.pipeline_mode<synchronous>, transform_indices = @transform_3, window_bounds = array<i64: 8, 128>}, {transform_indices = @transform_4, window_bounds = array<i64: 256, 128>}]} {
    %c0 = arith.constant 0 : index
    %c0_0 = arith.constant 0 : index
    %0 = vector.load %arg1[%c0, %c0_0] : memref<256x64xf32, #tpu.memory_space<vmem>>, vector<256x64xf32>
    %1 = arith.truncf %0 : vector<256x64xf32> to vector<256x64xbf16>
    %c0_1 = arith.constant 0 : index
    %c0_2 = arith.constant 0 : index
    %2 = vector.load %arg2[%c0_1, %c0_2] : memref<64x256xbf16, #tpu.memory_space<vmem>>, vector<64x256xbf16>
    %cst = arith.constant dense<0.000000e+00> : vector<256x256xf32>
    %3 = tpu.matmul %1, %2, %cst {dimension_numbers = #tpu.dot_dimension_numbers<[1], [0], [0], [1], [0, 0, 1, 1], [], []>} : vector<256x64xbf16>, vector<64x256xbf16>, vector<256x256xf32> -> vector<256x256xf32>
    %4 = vector.extract_strided_slice %3 {offsets = [0, 0], sizes = [256, 128], strides = [1, 1]} : vector<256x256xf32> to vector<256x128xf32>
    %5 = vector.extract_strided_slice %3 {offsets = [0, 128], sizes = [256, 128], strides = [1, 1]} : vector<256x256xf32> to vector<256x128xf32>
    %c0_3 = arith.constant 0 : index
    %c0_4 = arith.constant 0 : index
    %6 = vector.load %arg4[%c0_3, %c0_4] : memref<8x128xf32, #tpu.memory_space<vmem>>, vector<8x128xf32>
    %7 = tpu.iota {dimensions = array<i32: 1>} : vector<512x128xi32>
    %8 = vector.extract_strided_slice %6 {offsets = [0, 0], sizes = [1, 128], strides = [1, 1]} : vector<8x128xf32> to vector<1x128xf32>
    %9 = vector.extract_strided_slice %6 {offsets = [1, 0], sizes = [1, 128], strides = [1, 1]} : vector<8x128xf32> to vector<1x128xf32>
    %10 = arith.mulf %4, %4 : vector<256x128xf32>
    %11 = tpu.concatenate %4, %10 in 0 : vector<256x128xf32>, vector<256x128xf32> -> vector<512x128xf32>
    %c127_i32 = arith.constant 127 : i32
    %12 = tpu.dynamic_rotate %11 by %c127_i32 dim 1 : vector<512x128xf32>, i32 -> vector<512x128xf32>
    %c1_i32 = arith.constant 1 : i32
    %13 = tpu.dynamic_rotate %11 by %c1_i32 dim 1 : vector<512x128xf32>, i32 -> vector<512x128xf32>
    %c2_i32 = arith.constant 2 : i32
    %c0_i32 = arith.constant 0 : i32
    %14 = arith.cmpi eq, %c2_i32, %c0_i32 : i32
    %c1_i32_5 = arith.constant 1 : i32
    %15 = arith.select %14, %c1_i32_5, %c2_i32 : i32
    %16 = vector.broadcast %15 : i32 to vector<512x128xi32>
    %17 = arith.remsi %7, %16 : vector<512x128xi32>
    %c0_i32_6 = arith.constant 0 : i32
    %18 = vector.broadcast %c0_i32_6 : i32 to vector<512x128xi32>
    %19 = arith.cmpi ne, %17, %18 : vector<512x128xi32>
    %c0_i32_7 = arith.constant 0 : i32
    %20 = vector.broadcast %c0_i32_7 : i32 to vector<512x128xi32>
    %21 = arith.cmpi slt, %17, %20 : vector<512x128xi32>
    %c0_i32_8 = arith.constant 0 : i32
    %22 = arith.cmpi slt, %15, %c0_i32_8 : i32
    %23 = vector.broadcast %22 : i1 to vector<512x128xi1>
    %24 = vector.broadcast %23 : vector<512x128xi1> to vector<512x128xi1>
    %25 = arith.xori %21, %24 : vector<512x128xi1>
    %26 = arith.andi %25, %19 : vector<512x128xi1>
    %27 = vector.broadcast %15 : i32 to vector<512x128xi32>
    %28 = arith.addi %17, %27 : vector<512x128xi32>
    %29 = arith.select %26, %28, %17 : vector<512x128xi1>, vector<512x128xi32>
    %c1_i32_9 = arith.constant 1 : i32
    %30 = vector.broadcast %c1_i32_9 : i32 to vector<512x128xi32>
    %31 = arith.cmpi slt, %29, %30 : vector<512x128xi32>
    %32 = arith.select %31, %12, %13 : vector<512x128xi1>, vector<512x128xf32>
    %33 = arith.addf %11, %32 : vector<512x128xf32>
    %c126_i32 = arith.constant 126 : i32
    %34 = tpu.dynamic_rotate %33 by %c126_i32 dim 1 : vector<512x128xf32>, i32 -> vector<512x128xf32>
    %c2_i32_10 = arith.constant 2 : i32
    %35 = tpu.dynamic_rotate %33 by %c2_i32_10 dim 1 : vector<512x128xf32>, i32 -> vector<512x128xf32>
    %c4_i32 = arith.constant 4 : i32
    %c0_i32_11 = arith.constant 0 : i32
    %36 = arith.cmpi eq, %c4_i32, %c0_i32_11 : i32
    %c1_i32_12 = arith.constant 1 : i32
    %37 = arith.select %36, %c1_i32_12, %c4_i32 : i32
    %38 = vector.broadcast %37 : i32 to vector<512x128xi32>
    %39 = arith.remsi %7, %38 : vector<512x128xi32>
    %c0_i32_13 = arith.constant 0 : i32
    %40 = vector.broadcast %c0_i32_13 : i32 to vector<512x128xi32>
    %41 = arith.cmpi ne, %39, %40 : vector<512x128xi32>
    %c0_i32_14 = arith.constant 0 : i32
    %42 = vector.broadcast %c0_i32_14 : i32 to vector<512x128xi32>
    %43 = arith.cmpi slt, %39, %42 : vector<512x128xi32>
    %c0_i32_15 = arith.constant 0 : i32
    %44 = arith.cmpi slt, %37, %c0_i32_15 : i32
    %45 = vector.broadcast %44 : i1 to vector<512x128xi1>
    %46 = vector.broadcast %45 : vector<512x128xi1> to vector<512x128xi1>
    %47 = arith.xori %43, %46 : vector<512x128xi1>
    %48 = arith.andi %47, %41 : vector<512x128xi1>
    %49 = vector.broadcast %37 : i32 to vector<512x128xi32>
    %50 = arith.addi %39, %49 : vector<512x128xi32>
    %51 = arith.select %48, %50, %39 : vector<512x128xi1>, vector<512x128xi32>
    %c2_i32_16 = arith.constant 2 : i32
    %52 = vector.broadcast %c2_i32_16 : i32 to vector<512x128xi32>
    %53 = arith.cmpi slt, %51, %52 : vector<512x128xi32>
    %54 = arith.select %53, %34, %35 : vector<512x128xi1>, vector<512x128xf32>
    %55 = arith.addf %33, %54 : vector<512x128xf32>
    %56 = vector.extract_strided_slice %55 {offsets = [0, 0], sizes = [256, 128], strides = [1, 1]} : vector<512x128xf32> to vector<256x128xf32>
    %cst_17 = arith.constant 2.500000e-01 : f32
    %57 = vector.broadcast %cst_17 : f32 to vector<256x128xf32>
    %58 = arith.mulf %56, %57 : vector<256x128xf32>
    %59 = vector.extract_strided_slice %55 {offsets = [256, 0], sizes = [256, 128], strides = [1, 1]} : vector<512x128xf32> to vector<256x128xf32>
    %cst_18 = arith.constant 2.500000e-01 : f32
    %60 = vector.broadcast %cst_18 : f32 to vector<256x128xf32>
    %61 = arith.mulf %59, %60 : vector<256x128xf32>
    %62 = arith.mulf %58, %58 : vector<256x128xf32>
    %63 = arith.subf %61, %62 : vector<256x128xf32>
    %cst_19 = arith.constant 0.000000e+00 : f32
    %64 = vector.broadcast %cst_19 : f32 to vector<256x128xf32>
    %65 = arith.maximumf %63, %64 : vector<256x128xf32>
    %66 = arith.subf %4, %58 : vector<256x128xf32>
    %cst_20 = arith.constant 9.99999974E-6 : f32
    %67 = vector.broadcast %cst_20 : f32 to vector<256x128xf32>
    %68 = arith.addf %65, %67 : vector<256x128xf32>
    %69 = math.rsqrt %68 : vector<256x128xf32>
    %70 = arith.mulf %66, %69 : vector<256x128xf32>
    %71 = vector.broadcast %8 : vector<1x128xf32> to vector<256x128xf32>
    %72 = arith.mulf %70, %71 : vector<256x128xf32>
    %73 = vector.broadcast %9 : vector<1x128xf32> to vector<256x128xf32>
    %74 = arith.addf %72, %73 : vector<256x128xf32>
    %cst_21 = arith.constant 0.000000e+00 : f32
    %75 = vector.broadcast %cst_21 : f32 to vector<256x128xf32>
    %76 = arith.maximumf %74, %75 : vector<256x128xf32>
    %77 = arith.truncf %76 : vector<256x128xf32> to vector<256x128xbf16>
    %c0_22 = arith.constant 0 : index
    %c0_23 = arith.constant 0 : index
    %78 = vector.load %arg3[%c0_22, %c0_23] : memref<128x128xbf16, #tpu.memory_space<vmem>>, vector<128x128xbf16>
    %cst_24 = arith.constant dense<0.000000e+00> : vector<256x128xf32>
    %79 = tpu.matmul %77, %78, %cst_24 {dimension_numbers = #tpu.dot_dimension_numbers<[1], [0], [0], [1], [0, 0, 1, 1], [], []>} : vector<256x128xbf16>, vector<128x128xbf16>, vector<256x128xf32> -> vector<256x128xf32>
    %80 = vector.extract_strided_slice %6 {offsets = [2, 0], sizes = [1, 128], strides = [1, 1]} : vector<8x128xf32> to vector<1x128xf32>
    %81 = vector.extract_strided_slice %6 {offsets = [3, 0], sizes = [1, 128], strides = [1, 1]} : vector<8x128xf32> to vector<1x128xf32>
    %82 = arith.mulf %79, %79 : vector<256x128xf32>
    %83 = tpu.concatenate %79, %82 in 0 : vector<256x128xf32>, vector<256x128xf32> -> vector<512x128xf32>
    %c127_i32_25 = arith.constant 127 : i32
    %84 = tpu.dynamic_rotate %83 by %c127_i32_25 dim 1 : vector<512x128xf32>, i32 -> vector<512x128xf32>
    %c1_i32_26 = arith.constant 1 : i32
    %85 = tpu.dynamic_rotate %83 by %c1_i32_26 dim 1 : vector<512x128xf32>, i32 -> vector<512x128xf32>
    %c2_i32_27 = arith.constant 2 : i32
    %c0_i32_28 = arith.constant 0 : i32
    %86 = arith.cmpi eq, %c2_i32_27, %c0_i32_28 : i32
    %c1_i32_29 = arith.constant 1 : i32
    %87 = arith.select %86, %c1_i32_29, %c2_i32_27 : i32
    %88 = vector.broadcast %87 : i32 to vector<512x128xi32>
    %89 = arith.remsi %7, %88 : vector<512x128xi32>
    %c0_i32_30 = arith.constant 0 : i32
    %90 = vector.broadcast %c0_i32_30 : i32 to vector<512x128xi32>
    %91 = arith.cmpi ne, %89, %90 : vector<512x128xi32>
    %c0_i32_31 = arith.constant 0 : i32
    %92 = vector.broadcast %c0_i32_31 : i32 to vector<512x128xi32>
    %93 = arith.cmpi slt, %89, %92 : vector<512x128xi32>
    %c0_i32_32 = arith.constant 0 : i32
    %94 = arith.cmpi slt, %87, %c0_i32_32 : i32
    %95 = vector.broadcast %94 : i1 to vector<512x128xi1>
    %96 = vector.broadcast %95 : vector<512x128xi1> to vector<512x128xi1>
    %97 = arith.xori %93, %96 : vector<512x128xi1>
    %98 = arith.andi %97, %91 : vector<512x128xi1>
    %99 = vector.broadcast %87 : i32 to vector<512x128xi32>
    %100 = arith.addi %89, %99 : vector<512x128xi32>
    %101 = arith.select %98, %100, %89 : vector<512x128xi1>, vector<512x128xi32>
    %c1_i32_33 = arith.constant 1 : i32
    %102 = vector.broadcast %c1_i32_33 : i32 to vector<512x128xi32>
    %103 = arith.cmpi slt, %101, %102 : vector<512x128xi32>
    %104 = arith.select %103, %84, %85 : vector<512x128xi1>, vector<512x128xf32>
    %105 = arith.addf %83, %104 : vector<512x128xf32>
    %c126_i32_34 = arith.constant 126 : i32
    %106 = tpu.dynamic_rotate %105 by %c126_i32_34 dim 1 : vector<512x128xf32>, i32 -> vector<512x128xf32>
    %c2_i32_35 = arith.constant 2 : i32
    %107 = tpu.dynamic_rotate %105 by %c2_i32_35 dim 1 : vector<512x128xf32>, i32 -> vector<512x128xf32>
    %c4_i32_36 = arith.constant 4 : i32
    %c0_i32_37 = arith.constant 0 : i32
    %108 = arith.cmpi eq, %c4_i32_36, %c0_i32_37 : i32
    %c1_i32_38 = arith.constant 1 : i32
    %109 = arith.select %108, %c1_i32_38, %c4_i32_36 : i32
    %110 = vector.broadcast %109 : i32 to vector<512x128xi32>
    %111 = arith.remsi %7, %110 : vector<512x128xi32>
    %c0_i32_39 = arith.constant 0 : i32
    %112 = vector.broadcast %c0_i32_39 : i32 to vector<512x128xi32>
    %113 = arith.cmpi ne, %111, %112 : vector<512x128xi32>
    %c0_i32_40 = arith.constant 0 : i32
    %114 = vector.broadcast %c0_i32_40 : i32 to vector<512x128xi32>
    %115 = arith.cmpi slt, %111, %114 : vector<512x128xi32>
    %c0_i32_41 = arith.constant 0 : i32
    %116 = arith.cmpi slt, %109, %c0_i32_41 : i32
    %117 = vector.broadcast %116 : i1 to vector<512x128xi1>
    %118 = vector.broadcast %117 : vector<512x128xi1> to vector<512x128xi1>
    %119 = arith.xori %115, %118 : vector<512x128xi1>
    %120 = arith.andi %119, %113 : vector<512x128xi1>
    %121 = vector.broadcast %109 : i32 to vector<512x128xi32>
    %122 = arith.addi %111, %121 : vector<512x128xi32>
    %123 = arith.select %120, %122, %111 : vector<512x128xi1>, vector<512x128xi32>
    %c2_i32_42 = arith.constant 2 : i32
    %124 = vector.broadcast %c2_i32_42 : i32 to vector<512x128xi32>
    %125 = arith.cmpi slt, %123, %124 : vector<512x128xi32>
    %126 = arith.select %125, %106, %107 : vector<512x128xi1>, vector<512x128xf32>
    %127 = arith.addf %105, %126 : vector<512x128xf32>
    %128 = vector.extract_strided_slice %127 {offsets = [0, 0], sizes = [256, 128], strides = [1, 1]} : vector<512x128xf32> to vector<256x128xf32>
    %cst_43 = arith.constant 2.500000e-01 : f32
    %129 = vector.broadcast %cst_43 : f32 to vector<256x128xf32>
    %130 = arith.mulf %128, %129 : vector<256x128xf32>
    %131 = vector.extract_strided_slice %127 {offsets = [256, 0], sizes = [256, 128], strides = [1, 1]} : vector<512x128xf32> to vector<256x128xf32>
    %cst_44 = arith.constant 2.500000e-01 : f32
    %132 = vector.broadcast %cst_44 : f32 to vector<256x128xf32>
    %133 = arith.mulf %131, %132 : vector<256x128xf32>
    %134 = arith.mulf %130, %130 : vector<256x128xf32>
    %135 = arith.subf %133, %134 : vector<256x128xf32>
    %cst_45 = arith.constant 0.000000e+00 : f32
    %136 = vector.broadcast %cst_45 : f32 to vector<256x128xf32>
    %137 = arith.maximumf %135, %136 : vector<256x128xf32>
    %138 = arith.subf %79, %130 : vector<256x128xf32>
    %cst_46 = arith.constant 9.99999974E-6 : f32
    %139 = vector.broadcast %cst_46 : f32 to vector<256x128xf32>
    %140 = arith.addf %137, %139 : vector<256x128xf32>
    %141 = math.rsqrt %140 : vector<256x128xf32>
    %142 = arith.mulf %138, %141 : vector<256x128xf32>
    %143 = vector.broadcast %80 : vector<1x128xf32> to vector<256x128xf32>
    %144 = arith.mulf %142, %143 : vector<256x128xf32>
    %145 = vector.broadcast %81 : vector<1x128xf32> to vector<256x128xf32>
    %146 = arith.addf %144, %145 : vector<256x128xf32>
    %147 = vector.extract_strided_slice %6 {offsets = [4, 0], sizes = [1, 128], strides = [1, 1]} : vector<8x128xf32> to vector<1x128xf32>
    %148 = vector.extract_strided_slice %6 {offsets = [5, 0], sizes = [1, 128], strides = [1, 1]} : vector<8x128xf32> to vector<1x128xf32>
    %149 = arith.mulf %5, %5 : vector<256x128xf32>
    %150 = tpu.concatenate %5, %149 in 0 : vector<256x128xf32>, vector<256x128xf32> -> vector<512x128xf32>
    %c127_i32_47 = arith.constant 127 : i32
    %151 = tpu.dynamic_rotate %150 by %c127_i32_47 dim 1 : vector<512x128xf32>, i32 -> vector<512x128xf32>
    %c1_i32_48 = arith.constant 1 : i32
    %152 = tpu.dynamic_rotate %150 by %c1_i32_48 dim 1 : vector<512x128xf32>, i32 -> vector<512x128xf32>
    %c2_i32_49 = arith.constant 2 : i32
    %c0_i32_50 = arith.constant 0 : i32
    %153 = arith.cmpi eq, %c2_i32_49, %c0_i32_50 : i32
    %c1_i32_51 = arith.constant 1 : i32
    %154 = arith.select %153, %c1_i32_51, %c2_i32_49 : i32
    %155 = vector.broadcast %154 : i32 to vector<512x128xi32>
    %156 = arith.remsi %7, %155 : vector<512x128xi32>
    %c0_i32_52 = arith.constant 0 : i32
    %157 = vector.broadcast %c0_i32_52 : i32 to vector<512x128xi32>
    %158 = arith.cmpi ne, %156, %157 : vector<512x128xi32>
    %c0_i32_53 = arith.constant 0 : i32
    %159 = vector.broadcast %c0_i32_53 : i32 to vector<512x128xi32>
    %160 = arith.cmpi slt, %156, %159 : vector<512x128xi32>
    %c0_i32_54 = arith.constant 0 : i32
    %161 = arith.cmpi slt, %154, %c0_i32_54 : i32
    %162 = vector.broadcast %161 : i1 to vector<512x128xi1>
    %163 = vector.broadcast %162 : vector<512x128xi1> to vector<512x128xi1>
    %164 = arith.xori %160, %163 : vector<512x128xi1>
    %165 = arith.andi %164, %158 : vector<512x128xi1>
    %166 = vector.broadcast %154 : i32 to vector<512x128xi32>
    %167 = arith.addi %156, %166 : vector<512x128xi32>
    %168 = arith.select %165, %167, %156 : vector<512x128xi1>, vector<512x128xi32>
    %c1_i32_55 = arith.constant 1 : i32
    %169 = vector.broadcast %c1_i32_55 : i32 to vector<512x128xi32>
    %170 = arith.cmpi slt, %168, %169 : vector<512x128xi32>
    %171 = arith.select %170, %151, %152 : vector<512x128xi1>, vector<512x128xf32>
    %172 = arith.addf %150, %171 : vector<512x128xf32>
    %c126_i32_56 = arith.constant 126 : i32
    %173 = tpu.dynamic_rotate %172 by %c126_i32_56 dim 1 : vector<512x128xf32>, i32 -> vector<512x128xf32>
    %c2_i32_57 = arith.constant 2 : i32
    %174 = tpu.dynamic_rotate %172 by %c2_i32_57 dim 1 : vector<512x128xf32>, i32 -> vector<512x128xf32>
    %c4_i32_58 = arith.constant 4 : i32
    %c0_i32_59 = arith.constant 0 : i32
    %175 = arith.cmpi eq, %c4_i32_58, %c0_i32_59 : i32
    %c1_i32_60 = arith.constant 1 : i32
    %176 = arith.select %175, %c1_i32_60, %c4_i32_58 : i32
    %177 = vector.broadcast %176 : i32 to vector<512x128xi32>
    %178 = arith.remsi %7, %177 : vector<512x128xi32>
    %c0_i32_61 = arith.constant 0 : i32
    %179 = vector.broadcast %c0_i32_61 : i32 to vector<512x128xi32>
    %180 = arith.cmpi ne, %178, %179 : vector<512x128xi32>
    %c0_i32_62 = arith.constant 0 : i32
    %181 = vector.broadcast %c0_i32_62 : i32 to vector<512x128xi32>
    %182 = arith.cmpi slt, %178, %181 : vector<512x128xi32>
    %c0_i32_63 = arith.constant 0 : i32
    %183 = arith.cmpi slt, %176, %c0_i32_63 : i32
    %184 = vector.broadcast %183 : i1 to vector<512x128xi1>
    %185 = vector.broadcast %184 : vector<512x128xi1> to vector<512x128xi1>
    %186 = arith.xori %182, %185 : vector<512x128xi1>
    %187 = arith.andi %186, %180 : vector<512x128xi1>
    %188 = vector.broadcast %176 : i32 to vector<512x128xi32>
    %189 = arith.addi %178, %188 : vector<512x128xi32>
    %190 = arith.select %187, %189, %178 : vector<512x128xi1>, vector<512x128xi32>
    %c2_i32_64 = arith.constant 2 : i32
    %191 = vector.broadcast %c2_i32_64 : i32 to vector<512x128xi32>
    %192 = arith.cmpi slt, %190, %191 : vector<512x128xi32>
    %193 = arith.select %192, %173, %174 : vector<512x128xi1>, vector<512x128xf32>
    %194 = arith.addf %172, %193 : vector<512x128xf32>
    %195 = vector.extract_strided_slice %194 {offsets = [0, 0], sizes = [256, 128], strides = [1, 1]} : vector<512x128xf32> to vector<256x128xf32>
    %cst_65 = arith.constant 2.500000e-01 : f32
    %196 = vector.broadcast %cst_65 : f32 to vector<256x128xf32>
    %197 = arith.mulf %195, %196 : vector<256x128xf32>
    %198 = vector.extract_strided_slice %194 {offsets = [256, 0], sizes = [256, 128], strides = [1, 1]} : vector<512x128xf32> to vector<256x128xf32>
    %cst_66 = arith.constant 2.500000e-01 : f32
    %199 = vector.broadcast %cst_66 : f32 to vector<256x128xf32>
    %200 = arith.mulf %198, %199 : vector<256x128xf32>
    %201 = arith.mulf %197, %197 : vector<256x128xf32>
    %202 = arith.subf %200, %201 : vector<256x128xf32>
    %cst_67 = arith.constant 0.000000e+00 : f32
    %203 = vector.broadcast %cst_67 : f32 to vector<256x128xf32>
    %204 = arith.maximumf %202, %203 : vector<256x128xf32>
    %205 = arith.subf %5, %197 : vector<256x128xf32>
    %cst_68 = arith.constant 9.99999974E-6 : f32
    %206 = vector.broadcast %cst_68 : f32 to vector<256x128xf32>
    %207 = arith.addf %204, %206 : vector<256x128xf32>
    %208 = math.rsqrt %207 : vector<256x128xf32>
    %209 = arith.mulf %205, %208 : vector<256x128xf32>
    %210 = vector.broadcast %147 : vector<1x128xf32> to vector<256x128xf32>
    %211 = arith.mulf %209, %210 : vector<256x128xf32>
    %212 = vector.broadcast %148 : vector<1x128xf32> to vector<256x128xf32>
    %213 = arith.addf %211, %212 : vector<256x128xf32>
    %214 = arith.addf %146, %213 : vector<256x128xf32>
    %cst_69 = arith.constant 0.000000e+00 : f32
    %215 = vector.broadcast %cst_69 : f32 to vector<256x128xf32>
    %216 = arith.maximumf %214, %215 : vector<256x128xf32>
    %c0_70 = arith.constant 0 : index
    %c0_71 = arith.constant 0 : index
    %217 = vector.load %arg5[%c0_70, %c0_71] : memref<256x128xf32, #tpu.memory_space<vmem>>, vector<256x128xf32>
    tpu.vector_store %arg5[%c0_70, %c0_71], %216 {strides = array<i32>} : memref<256x128xf32, #tpu.memory_space<vmem>>, vector<256x128xf32>,
    return
  }
  func.func @transform_0(%arg0: i32) -> (i32, i32) {
    %c0_i32 = arith.constant 0 : i32
    %c0_i32_0 = arith.constant 0 : i32
    return %arg0, %c0_i32 : i32, i32
  }
  func.func @transform_1(%arg0: i32) -> (i32, i32) {
    %c0_i32 = arith.constant 0 : i32
    %c0_i32_0 = arith.constant 0 : i32
    %c0_i32_1 = arith.constant 0 : i32
    return %c0_i32, %c0_i32_0 : i32, i32
  }
  func.func @transform_2(%arg0: i32) -> (i32, i32) {
    %c0_i32 = arith.constant 0 : i32
    %c0_i32_0 = arith.constant 0 : i32
    %c0_i32_1 = arith.constant 0 : i32
    return %c0_i32, %c0_i32_0 : i32, i32
  }
  func.func @transform_3(%arg0: i32) -> (i32, i32) {
    %c0_i32 = arith.constant 0 : i32
    %c0_i32_0 = arith.constant 0 : i32
    %c0_i32_1 = arith.constant 0 : i32
    return %c0_i32, %c0_i32_0 : i32, i32
  }
  func.func @transform_4(%arg0: i32) -> (i32, i32) {
    %c0_i32 = arith.constant 0 : i32
    %c0_i32_0 = arith.constant 0 : i32
    return %arg0, %c0_i32 : i32, i32
  }
}

</mosaic_0001>

<bundles_post_ra>
// kernel: tpu_custom_call.1
= control target key start
LH: loop header
LB: loop body
LE: loop exit
PB: predicated region body
PF: predicated region fallthrough
CT: control target
= control target key end

     0   :  { %9 = vsyncpa [#allocation3], 0  ;;  %s12261_s0 = inlined_call_operand.vmem [shape: f32[512,64], index: 0, kind: input, shape index: {}]   ;;  %s12262_s1 = inlined_call_operand.vmem [shape: bf16[64,256], index: 1, kind: input, shape index: {}]   ;;  %s12263_s2 = inlined_call_operand.vmem [shape: bf16[128,128], index: 2, kind: input, shape index: {}]   ;;  %s12264_s3 = inlined_call_operand.vmem [shape: f32[8,128], index: 3, kind: input, shape index: {}]   ;;  %s12265_s4 = inlined_call_operand.hbm [shape: f32[512,128], index: 4, kind: output, shape index: {}]  }
   0x1   :  { %11 = vsyncpa [#allocation3 + $0x1], 0  ;;  %s4974_s15 = smov 0   ;;  %s4976_s16 = smov 0  }
   0x2   :  { %s4978_s17 = smov 0   ;;  %s4980_s18 = smov 0  }
   0x3 LB: > { %s4995_s19 = sadd.s32 4294967295, %s4939_s18   ;;  %s4492_s20 = sadd.s32 4294967294, %s4939_s18   ;;  %s4939_s18 = sphi %s4980_s18, %s14780_s18   ;;  %s4935_s17 = sphi %s4978_s17, %s14779_s17   ;;  %s4931_s16 = sphi %s4976_s16, %s14778_s16   ;;  %s4927_s15 = sphi %s4974_s15, %s14777_s15  }
   0x4   : > { %s4999_s21 = sadd.s32 1, %s4939_s18   ;;  %s113_s22 = sadd.s32 1, %s4935_s17 }
   0x5   : > { %s110_s23 = ssub.s32 %s4939_s18, %s4999_s21  ;;  %p123_p0 = scmp.ne.s32.totalorder %s4935_s17, %s4931_s16 }
   0x6   : > { %p111_p1 = scmp.eq.s32.totalorder %s110_s23, 0  ;;  %p124_p2 = scmp.eq.s32.totalorder %s4995_s19, 1 }
   0x7   : > { %p129_p3 = scmp.ne.s32.totalorder %s4931_s16, %s4927_s15  ;;  %p130_p4 = scmp.eq.s32.totalorder %s4492_s20, 1 }
   0x8   : > { %s5010_s24 = scalar_select %p111_p1, %s4935_s17, %s113_s22  }
   0x9   : > { %p5012_p5 = por %p124_p2, %p123_p0  ;;  %p5016_p6 = por %p130_p4, %p129_p3 }
   0xa   : > { %p4495_p7 = scmp.ge.s32.totalorder %s4939_s18, 1  ;;  %p166_p8 = scmp.lt.s32.totalorder %s4939_s18, 3 }
   0xc   : > { %p167_p9 = pnand %p4495_p7, %p166_p8 }
   0xe   : > { %170 = sbr.rel (%p167_p9) target bundleno = 2295 (0x8f7), region = 36 }
  0x15   : > { %v4663_v0 = vld [vmem:[%s12262_s1 + $0x4] ss:$8 sps:$4 sm:$0xff]   ;;  %s4497_s29 = sshll.u32 %s4995_s19, 5  ;;  %v4665_v1 = vld [vmem:[%s12262_s1] ss:$8 sps:$4 sm:$0xff]   ;;  %v4941_v2 = vmov 0  }
  0x16   : > { %377 = vmatprep.mubr.bf16.mxu0 %v4941_v2  ;;  %497 = vmatprep.mubr.bf16.mxu1 %v4941_v2  ;;  %p193_p10 = scmp.lt.s32.totalorder %s4497_s29, 63  ;;  %v4666_v3 = vld [vmem:[%s12262_s1 + $0x14] ss:$8 sps:$4 sm:$0xff]   ;;  %v4668_v4 = vld [vmem:[%s12262_s1 + $0x10] ss:$8 sps:$4 sm:$0xff]   ;;  %vm296_vm0 = vcmask 523264  }
  0x17   : > { %345 = vmatprep.subr.bf16.mxu0 %v4663_v0  ;;  %4609 = vmatprep.subr.bf16.mxu1 %v4663_v0  ;;  %v4669_v5 = vld [vmem:[%s12262_s1 + $0x24] ss:$8 sps:$4 sm:$0xff]   ;;  %v4671_v6 = vld [vmem:[%s12262_s1 + $0x20] ss:$8 sps:$4 sm:$0xff]   ;;  %v4672_v7 = vld [vmem:[%s12262_s1 + $0x34] ss:$8 sps:$4 sm:$0xff]  }
  0x18   : > { %346 = vmatpush1.bf16.msra.mxu0 %v4665_v1  ;;  %4613 = vmatpush1.bf16.msra.mxu1 %v4665_v1  ;;  %s14782_s29 = smov (!%p193_p10, %s4497_s29), 63  ;;  %v4674_v8 = vld [vmem:[%s12262_s1 + $0x30] ss:$8 sps:$4 sm:$0xff]   ;;  %s4942_s5 = smov 127  }
  0x19   : > { %347 = vmatprep.subr.bf16.mxu0 %v4666_v3  ;;  %4610 = vmatprep.subr.bf16.mxu1 %v4666_v3  ;;  %s4498_s12 = sshll.u32 %s14782_s29, 3  ;;  %s4943_s6 = smov 1  }
  0x1a   : > { %s5046_s23 = scalar_lea.vmem %s12261_s0, %s4498_s12  ;;  %s4944_s7 = smov 126  }
  0x1b   : > { %v200_v9 = vld [vmem:[%s5046_s23] sm:$0xff]  ;;  %v201_v10 = vld [vmem:[%s5046_s23 + $0x8] sm:$0xff]  ;;  %v202_v15 = vld [vmem:[%s5046_s23 + $0x10] sm:$0xff]  ;;  %s4945_s8 = smov 2   ;;  %s189_s14 = sand.u32 1, %s4931_s16  }
  0x1c   : > { %348 = vmatpush1.bf16.msra.mxu0 %v4668_v4  ;;  %4614 = vmatpush1.bf16.msra.mxu1 %v4668_v4  ;;  %v224_v11 = vld [vmem:[%s5046_s23 + $0xc0] sm:$0xff]  ;;  %v225_v12 = vld [vmem:[%s5046_s23 + $0xc8] sm:$0xff]  ;;  %v232_v13 = vpack.c.bf16 %v201_v10, %v200_v9  ;;  %v203_v16 = vld [vmem:[%s5046_s23 + $0x18] sm:$0xff]  ;;  %s4496_s20 = sshll.u32 %s189_s14, 8  ;;  %s12220_s9 = scalar_lea.sflag [#allocation3], %s189_s14 }
  0x1d   : > { %349 = vmatprep.subr.bf16.mxu0 %v4669_v5  ;;  %4611 = vmatprep.subr.bf16.mxu1 %v4669_v5  ;;  %v244_v14 = vpack.c.bf16 %v225_v12, %v224_v11  ;;  %v226_v17 = vld [vmem:[%s5046_s23 + $0xd0] sm:$0xff]  ;;  %v227_v18 = vld [vmem:[%s5046_s23 + $0xd8] sm:$0xff]  ;;  %v233_v19 = vpack.c.bf16 %v203_v16, %v202_v15  ;;  %v204_v21 = vld [vmem:[%s5046_s23 + $0x20] sm:$0xff]  ;;  %s11888_s22 = scalar_lea.vmem [#allocation2], %s4496_s20  ;;  %s4946_s10 = smov [#allocation2]  }
  0x1e   : > { %v245_v20 = vpack.c.bf16 %v227_v18, %v226_v17  ;;  %v205_v22 = vld [vmem:[%s5046_s23 + $0x28] sm:$0xff]  ;;  %v228_v23 = vld [vmem:[%s5046_s23 + $0xe0] sm:$0xff]  ;;  %v206_v27 = vld [vmem:[%s5046_s23 + $0x30] sm:$0xff]  ;;  %s4430_s27 = sshll.u32 %s11888_s22, 4  ;;  %s4881_s11 = sshll.u32 %s4946_s10, 4  ;;  %s12215_s27 = int_to_ptr.vmem [resolvable:$true] %s4430_s27  ;;  %s4882_s11 = int_to_ptr.vmem [resolvable:$false] %s4881_s11 }
  0x1f   : > { %v229_v24 = vld [vmem:[%s5046_s23 + $0xe8] sm:$0xff]  ;;  %v234_v25 = vpack.c.bf16 %v205_v22, %v204_v21  ;;  %v207_v28 = vld [vmem:[%s5046_s23 + $0x38] sm:$0xff]  ;;  %v230_v29 = vld [vmem:[%s5046_s23 + $0xf0] sm:$0xff]  ;;  %s4883_s12 = scalar_lea.vmem %s4882_s11, 8192  ;;  %p4884_p0 = scmp.lt.s32.totalorder %s12215_s27, %s4882_s11 }
  0x20   : > { %350 = vmatpush1.bf16.msra.mxu0 %v4671_v6  ;;  %4615 = vmatpush1.bf16.msra.mxu1 %v4671_v6  ;;  %v246_v26 = vpack.c.bf16 %v229_v24, %v228_v23  ;;  %v231_v30 = vld [vmem:[%s5046_s23 + $0xf8] sm:$0xff]  ;;  %v235_v31 = vpack.c.bf16 %v207_v28, %v206_v27  ;;  %v208_v33 = vld [vmem:[%s5046_s23 + $0x40] sm:$0xff]  ;;  %v209_v34 = vld [vmem:[%s5046_s23 + $0x48] sm:$0xff] }
  0x21   : > { %351 = vmatprep.subr.bf16.mxu0 %v4672_v7  ;;  %4612 = vmatprep.subr.bf16.mxu1 %v4672_v7  ;;  %v247_v32 = vpack.c.bf16 %v231_v30, %v230_v29  ;;  %v236_v35 = vpack.c.bf16 %v209_v34, %v208_v33  ;;  %v210_v36 = vld [vmem:[%s5046_s23 + $0x50] sm:$0xff]  ;;  %v211_v37 = vld [vmem:[%s5046_s23 + $0x58] sm:$0xff]  ;;  %v212_v39 = vld [vmem:[%s5046_s23 + $0x60] sm:$0xff] }
  0x22   : > { %v237_v38 = vpack.c.bf16 %v211_v37, %v210_v36  ;;  %v213_v40 = vld [vmem:[%s5046_s23 + $0x68] sm:$0xff]  ;;  %v214_v42 = vld [vmem:[%s5046_s23 + $0x70] sm:$0xff]  ;;  %v215_v43 = vld [vmem:[%s5046_s23 + $0x78] sm:$0xff] }
  0x23   : > { %v238_v41 = vpack.c.bf16 %v213_v40, %v212_v39  ;;  %v239_v44 = vpack.c.bf16 %v215_v43, %v214_v42  ;;  %v216_v45 = vld [vmem:[%s5046_s23 + $0x80] sm:$0xff]  ;;  %v217_v46 = vld [vmem:[%s5046_s23 + $0x88] sm:$0xff]  ;;  %v218_v48 = vld [vmem:[%s5046_s23 + $0x90] sm:$0xff] }
  0x24   : > { %352 = vmatpush1.bf16.msra.mxu0 %v4674_v8  ;;  %4616 = vmatpush1.bf16.msra.mxu1 %v4674_v8  ;;  %v240_v47 = vpack.c.bf16 %v217_v46, %v216_v45  ;;  %v219_v49 = vld [vmem:[%s5046_s23 + $0x98] sm:$0xff]  ;;  %v220_v51 = vld [vmem:[%s5046_s23 + $0xa0] sm:$0xff]  ;;  %v221_v52 = vld [vmem:[%s5046_s23 + $0xa8] sm:$0xff] }
  0x25   : > { %v241_v50 = vpack.c.bf16 %v219_v49, %v218_v48  ;;  %v242_v53 = vpack.c.bf16 %v221_v52, %v220_v51  ;;  %v222_v54 = vld [vmem:[%s5046_s23 + $0xb0] sm:$0xff]  ;;  %v223_v55 = vld [vmem:[%s5046_s23 + $0xb8] sm:$0xff]  ;;  %s4536_s23 = sshll.u32 %s4995_s19, 12  ;;  %s4877_s19 = scalar_lea.vmem %s12215_s27, 4096 }
  0x26   : > { %v243_v56 = vpack.c.bf16 %v223_v55, %v222_v54  ;;  %s12213_s30 = scalar_lea.hbm %s12265_s4, %s4536_s23  ;;  %p4878_p11 = scmp.ne.s32.totalorder %s12215_s27, %s4877_s19 }
  0x27   : > { %4507 = vmatmul.mubr.msk.bf16.vlgmr.msra.gmra.mrb[0].mxu0 %vm296_vm0, %v232_v13  ;;  %4519 = vmatmul.mubr.msk.bf16.vlgmr.msra.gmra.mrb[0].mxu1 %vm296_vm0, %v244_v14  ;;  %p4885_p1 = scmp.lt.s32.totalorder %s4883_s12, %s4877_s19 }
  0x28   : > { %387 = vmatprep.mubr.bf16.mxu0 %v4941_v2  ;;  %507 = vmatprep.mubr.bf16.mxu1 %v4941_v2  ;;  %p4879_p12 = pnand %p4878_p11, %p5012_p5 }
  0x29   : > { %p4886_p2 = por %p4885_p1, %p4884_p0 }
  0x2a   : > { %p4880_p13 = pneg %p4879_p12 }
  0x2c   : > { %p4887_p3 = pnand %p4886_p2, %p4880_p13 }
  0x2f   : > { %4508 = vmatmul.mubr.msk.bf16.gmra.mrb[4].mxu0 %vm296_vm0, %v233_v19  ;;  %4520 = vmatmul.mubr.msk.bf16.gmra.mrb[4].mxu1 %vm296_vm0, %v245_v20 }
  0x30   : > { %397 = vmatprep.mubr.bf16.mxu0 %v4941_v2  ;;  %517 = vmatprep.mubr.bf16.mxu1 %v4941_v2 }
  0x37   : > { %4509 = vmatmul.mubr.msk.bf16.gmra.mrb[8].mxu0 %vm296_vm0, %v234_v25  ;;  %4521 = vmatmul.mubr.msk.bf16.gmra.mrb[8].mxu1 %vm296_vm0, %v246_v26 }
  0x38   : > { %407 = vmatprep.mubr.bf16.mxu0 %v4941_v2  ;;  %527 = vmatprep.mubr.bf16.mxu1 %v4941_v2 }
  0x3f   : > { %4510 = vmatmul.mubr.msk.bf16.gmra.mrb[12].mxu0 %vm296_vm0, %v235_v31  ;;  %4522 = vmatmul.mubr.msk.bf16.gmra.mrb[12].mxu1 %vm296_vm0, %v247_v32 }
  0x40   : > { %417 = vmatprep.mubr.bf16.mxu0 %v4941_v2 }
  0x47   : > { %4511 = vmatmul.mubr.msk.bf16.gmra.mrb[16].mxu0 %vm296_vm0, %v236_v35 }
  0x48   : > { %427 = vmatprep.mubr.bf16.mxu0 %v4941_v2 }
  0x4f   : > { %4512 = vmatmul.mubr.msk.bf16.gmra.mrb[20].mxu0 %vm296_vm0, %v237_v38 }
  0x50   : > { %437 = vmatprep.mubr.bf16.mxu0 %v4941_v2 }
  0x57   : > { %4513 = vmatmul.mubr.msk.bf16.gmra.mrb[24].mxu0 %vm296_vm0, %v238_v41 }
  0x58   : > { %447 = vmatprep.mubr.bf16.mxu0 %v4941_v2 }
  0x5f   : > { %4514 = vmatmul.mubr.msk.bf16.gmra.mrb[28].mxu0 %vm296_vm0, %v239_v44 }
  0x60   : > { %457 = vmatprep.mubr.bf16.mxu0 %v4941_v2 }
  0x67   : > { %4515 = vmatmul.mubr.msk.bf16.gmra.mrb[32].mxu0 %vm296_vm0, %v240_v47 }
  0x68   : > { %467 = vmatprep.mubr.bf16.mxu0 %v4941_v2 }
  0x6f   : > { %4516 = vmatmul.mubr.msk.bf16.gmra.mrb[36].mxu0 %vm296_vm0, %v241_v50 }
  0x70   : > { %477 = vmatprep.mubr.bf16.mxu0 %v4941_v2 }
  0x77   : > { %4517 = vmatmul.mubr.msk.bf16.gmra.mrb[40].mxu0 %vm296_vm0, %v242_v53 }
  0x78   : > { %487 = vmatprep.mubr.bf16.mxu0 %v4941_v2 }
  0x7f   : > { %4518 = vmatmul.mubr.msk.bf16.gmra.mrb[44].mxu0 %vm296_vm0, %v243_v56 }
  0xfa   : > { %v5116_v57 = vpop.f32.mrb[0].mxu0  ;;  %v5118_v58 = vpop.f32.mrb[0].mxu1 }
  0xfb   : > { %12851 = vst [vmem:[#allocation5_spill] sm:$0xff] %v5116_v57  ;;  %12852 = vst [vmem:[#allocation6_spill] sm:$0xff] %v5118_v58  ;;  %v5120_v59 = vpop.f32.mrb[1].mxu1  ;;  %573 = vrot.lane.b32.xlu0 %v5116_v57, %s4942_s5  ;;  %v5124_v60 = vpop.f32.mrb[1].mxu0  ;;  %v5190_v17 = vmul.f32 %v5116_v57, %v5116_v57  ;;  %v5202_v20 = vmul.f32 %v5118_v58, %v5118_v58 }
  0xfc   : > { %12853 = vst [vmem:[#allocation7_spill] sm:$0xff] %v5120_v59  ;;  %12854 = vst [vmem:[#allocation8_spill] sm:$0xff] %v5124_v60  ;;  %v5126_v61 = vpop.f32.mrb[2].mxu0  ;;  %v5128_v62 = vpop.f32.mrb[2].mxu1 }
  0xfd   : > { %12855 = vst [vmem:[#allocation9_spill] sm:$0xff] %v5126_v61  ;;  %12856 = vst [vmem:[#allocation10_spill] sm:$0xff] %v5128_v62  ;;  %623 = vrot.lane.b32.xlu1 %v5128_v62, %s4942_s5  ;;  %v5132_v63 = vpop.f32.mrb[3].mxu0  ;;  %v5134_v0 = vpop.f32.mrb[3].mxu1  ;;  %v5164_v9 = vmul.f32 %v5126_v61, %v5126_v61  ;;  %v5176_v12 = vmul.f32 %v5128_v62, %v5128_v62 }
  0xfe   : > { %12857 = vst [vmem:[#allocation11_spill] sm:$0xff] %v5132_v63  ;;  %12858 = vst [vmem:[#allocation12_spill] sm:$0xff] %v5134_v0 }
  0xff   : > { %621 = vrot.lane.b32.xlu0 %v5118_v58, %s4942_s5 }
 0x101   : > { %703 = vrot.lane.b32.xlu1 %v5126_v61, %s4943_s6 }
 0x102   : > { %v5140_v1 = vpop.f32.mrb[4].mxu0  ;;  %v5142_v2 = vpop.f32.mrb[4].mxu1 }
 0x103   : > { %12859 = vst [vmem:[#allocation13_spill] sm:$0xff] %v5140_v1  ;;  %12860 = vst [vmem:[#allocation14_spill] sm:$0xff] %v5142_v2  ;;  %701 = vrot.lane.b32.xlu0 %v5116_v57, %s4943_s6  ;;  %v5146_v3 = vpop.f32.mrb[5].mxu0  ;;  %v5148_v4 = vpop.f32.mrb[5].mxu1  ;;  %v5262_v37 = vmul.f32 %v5140_v1, %v5140_v1  ;;  %v5280_v42 = vmul.f32 %v5142_v2, %v5142_v2 }
 0x104   : > { %12861 = vst [vmem:[#allocation15_spill] sm:$0xff] %v5146_v3  ;;  %12862 = vst [vmem:[#allocation16_spill] sm:$0xff] %v5148_v4  ;;  %v5150_v5 = vpop.f32.mrb[6].mxu0  ;;  %v5152_v6 = vpop.f32.mrb[6].mxu1 }
 0x105   : > { %12863 = vst [vmem:[#allocation17_spill] sm:$0xff] %v5150_v5  ;;  %12864 = vst [vmem:[#allocation18_spill] sm:$0xff] %v5152_v6  ;;  %751 = vrot.lane.b32.xlu1 %v5128_v62, %s4943_s6  ;;  %v5156_v7 = vpop.f32.mrb[7].mxu0  ;;  %v5158_v8 = vpop.f32.mrb[7].mxu1  ;;  %v5270_v39 = vmul.f32 %v5150_v5, %v5150_v5  ;;  %v5288_v44 = vmul.f32 %v5152_v6, %v5152_v6 }
 0x106   : > { %12865 = vst [vmem:[#allocation19_spill] sm:$0xff] %v5156_v7  ;;  %12866 = vst [vmem:[#allocation20_spill] sm:$0xff] %v5158_v8 }
 0x107   : > { %749 = vrot.lane.b32.xlu0 %v5118_v58, %s4943_s6  ;;  %12895 = vst [vmem:[#allocation49_spill] sm:$0xff] %v5288_v44 }
 0x109   : > { %639 = vrot.lane.b32.xlu1 %v5164_v9, %s4942_s5 }
 0x10a   : > { %v5168_v10 = vpop.f32.mrb[8].mxu0  ;;  %v5170_v11 = vpop.f32.mrb[8].mxu1 }
 0x10b   : > { %12867 = vst [vmem:[#allocation21_spill] sm:$0xff] %v5168_v10  ;;  %12868 = vst [vmem:[#allocation22_spill] sm:$0xff] %v5170_v11  ;;  %575 = vrot.lane.b32.xlu0 %v5126_v61, %s4942_s5  ;;  %v5178_v13 = vpop.f32.mrb[9].mxu0  ;;  %v5180_v14 = vpop.f32.mrb[9].mxu1  ;;  %v5338_v55 = vmul.f32 %v5168_v10, %v5168_v10 }
 0x10c   : > { %12869 = vst [vmem:[#allocation23_spill] sm:$0xff] %v5178_v13  ;;  %12870 = vst [vmem:[#allocation24_spill] sm:$0xff] %v5180_v14  ;;  %v5182_v15 = vpop.f32.mrb[10].mxu0  ;;  %v5184_v16 = vpop.f32.mrb[10].mxu1 }
 0x10d   : > { %12871 = vst [vmem:[#allocation25_spill] sm:$0xff] %v5182_v15  ;;  %12872 = vst [vmem:[#allocation26_spill] sm:$0xff] %v5184_v16  ;;  %687 = vrot.lane.b32.xlu1 %v5176_v12, %s4942_s5  ;;  %v5192_v18 = vpop.f32.mrb[11].mxu0  ;;  %v5194_v19 = vpop.f32.mrb[11].mxu1  ;;  %v5360_v14 = vmul.f32 %v5184_v16, %v5184_v16 }
 0x10e   : > { %12873 = vst [vmem:[#allocation27_spill] sm:$0xff] %v5192_v18  ;;  %12874 = vst [vmem:[#allocation28_spill] sm:$0xff] %v5194_v19  ;;  %v5354_v19 = vmul.f32 %v5170_v11, %v5170_v11 }
 0x10f   : > { %637 = vrot.lane.b32.xlu0 %v5190_v17, %s4942_s5  ;;  %12906 = vst [vmem:[#allocation60_spill] sm:$0xff] %v5338_v55  ;;  %12911 = vst [vmem:[#allocation65_spill] sm:$0xff] %v5360_v14 }
 0x110   : > { %12910 = vst [vmem:[#allocation64_spill] sm:$0xff] %v5354_v19 }
 0x111   : > { %767 = vrot.lane.b32.xlu1 %v5164_v9, %s4943_s6 }
 0x112   : > { %v5204_v21 = vpop.f32.mrb[12].mxu0  ;;  %v5206_v22 = vpop.f32.mrb[12].mxu1 }
 0x113   : > { %12875 = vst [vmem:[#allocation29_spill] sm:$0xff] %v5204_v21  ;;  %12876 = vst [vmem:[#allocation30_spill] sm:$0xff] %v5206_v22  ;;  %685 = vrot.lane.b32.xlu0 %v5202_v20, %s4942_s5  ;;  %v5210_v23 = vpop.f32.mrb[13].mxu0  ;;  %v5212_v24 = vpop.f32.mrb[13].mxu1 }
 0x114   : > { %12877 = vst [vmem:[#allocation31_spill] sm:$0xff] %v5210_v23  ;;  %12878 = vst [vmem:[#allocation32_spill] sm:$0xff] %v5212_v24  ;;  %v5214_v25 = vpop.f32.mrb[14].mxu0  ;;  %v5216_v26 = vpop.f32.mrb[14].mxu1  ;;  %v5348_v24 = vmul.f32 %v5182_v15, %v5182_v15 }
 0x115   : > { %12879 = vst [vmem:[#allocation33_spill] sm:$0xff] %v5214_v25  ;;  %12880 = vst [vmem:[#allocation34_spill] sm:$0xff] %v5216_v26  ;;  %815 = vrot.lane.b32.xlu1 %v5176_v12, %s4943_s6  ;;  %v5220_v27 = vpop.f32.mrb[15].mxu0  ;;  %v5222_v28 = vpop.f32.mrb[15].mxu1 }
 0x116   : > { %12881 = vst [vmem:[#allocation35_spill] sm:$0xff] %v5220_v27  ;;  %12882 = vst [vmem:[#allocation36_spill] sm:$0xff] %v5222_v28 }
 0x117   : > { %765 = vrot.lane.b32.xlu0 %v5190_v17, %s4943_s6  ;;  %12909 = vst [vmem:[#allocation63_spill] sm:$0xff] %v5348_v24 }
 0x119   : > { %577 = vrot.lane.b32.xlu1 %v5140_v1, %s4942_s5 }
 0x11a   : > { %v5228_v29 = vpop.f32.mrb[16].mxu0 }
 0x11b   : > { %12883 = vst [vmem:[#allocation37_spill] sm:$0xff] %v5228_v29  ;;  %813 = vrot.lane.b32.xlu0 %v5202_v20, %s4943_s6  ;;  %v5232_v30 = vpop.f32.mrb[17].mxu0  ;;  %v5468_v13 = vmul.f32 %v5228_v29, %v5228_v29 }
 0x11c   : > { %12884 = vst [vmem:[#allocation38_spill] sm:$0xff] %v5232_v30  ;;  %v5234_v31 = vpop.f32.mrb[18].mxu0 }
 0x11d   : > { %12885 = vst [vmem:[#allocation39_spill] sm:$0xff] %v5234_v31  ;;  %579 = vrot.lane.b32.xlu1 %v5150_v5, %s4942_s5  ;;  %v5238_v32 = vpop.f32.mrb[19].mxu0  ;;  %12924 = vst [vmem:[#allocation78_spill] sm:$0xff] %v5468_v13  ;;  %v5476_v3 = vmul.f32 %v5234_v31, %v5234_v31 }
 0x11e   : > { %12886 = vst [vmem:[#allocation40_spill] sm:$0xff] %v5238_v32 }
 0x11f   : > { %625 = vrot.lane.b32.xlu0 %v5142_v2, %s4942_s5  ;;  %12925 = vst [vmem:[#allocation79_spill] sm:$0xff] %v5476_v3 }
 0x121   : > { %627 = vrot.lane.b32.xlu1 %v5152_v6, %s4942_s5 }
 0x122   : > { %v5244_v33 = vpop.f32.mrb[20].mxu0 }
 0x123   : > { %12887 = vst [vmem:[#allocation41_spill] sm:$0xff] %v5244_v33  ;;  %705 = vrot.lane.b32.xlu0 %v5140_v1, %s4943_s6  ;;  %v5248_v34 = vpop.f32.mrb[21].mxu0 }
 0x124   : > { %12888 = vst [vmem:[#allocation42_spill] sm:$0xff] %v5248_v34  ;;  %v5250_v35 = vpop.f32.mrb[22].mxu0 }
 0x125   : > { %12889 = vst [vmem:[#allocation43_spill] sm:$0xff] %v5250_v35  ;;  %707 = vrot.lane.b32.xlu1 %v5150_v5, %s4943_s6  ;;  %v5254_v36 = vpop.f32.mrb[23].mxu0 }
 0x126   : > { %12890 = vst [vmem:[#allocation44_spill] sm:$0xff] %v5254_v36 }
 0x127   : > { %753 = vrot.lane.b32.xlu0 %v5142_v2, %s4943_s6 }
 0x129   : > { %755 = vrot.lane.b32.xlu1 %v5152_v6, %s4943_s6 }
 0x12a   : > { %v5264_v38 = vpop.f32.mrb[24].mxu0 }
 0x12b   : > { %12891 = vst [vmem:[#allocation45_spill] sm:$0xff] %v5264_v38  ;;  %641 = vrot.lane.b32.xlu0 %v5262_v37, %s4942_s5  ;;  %v5272_v40 = vpop.f32.mrb[25].mxu0 }
 0x12c   : > { %12892 = vst [vmem:[#allocation46_spill] sm:$0xff] %v5272_v40  ;;  %v5274_v41 = vpop.f32.mrb[26].mxu0 }
 0x12d   : > { %12893 = vst [vmem:[#allocation47_spill] sm:$0xff] %v5274_v41  ;;  %643 = vrot.lane.b32.xlu1 %v5270_v39, %s4942_s5  ;;  %v5282_v43 = vpop.f32.mrb[27].mxu0 }
 0x12e   : > { %12894 = vst [vmem:[#allocation48_spill] sm:$0xff] %v5282_v43 }
 0x12f   : > { %689 = vrot.lane.b32.xlu0 %v5280_v42, %s4942_s5 }
 0x131   : > { %691 = vrot.lane.b32.xlu1 %v5288_v44, %s4942_s5 }
 0x132   : > { %v5292_v45 = vpop.f32.mrb[28].mxu0 }
 0x133   : > { %12896 = vst [vmem:[#allocation50_spill] sm:$0xff] %v5292_v45  ;;  %769 = vrot.lane.b32.xlu0 %v5262_v37, %s4943_s6  ;;  %v5296_v46 = vpop.f32.mrb[29].mxu0 }
 0x134   : > { %12897 = vst [vmem:[#allocation51_spill] sm:$0xff] %v5296_v46  ;;  %v5298_v47 = vpop.f32.mrb[30].mxu0 }
 0x135   : > { %12898 = vst [vmem:[#allocation52_spill] sm:$0xff] %v5298_v47  ;;  %771 = vrot.lane.b32.xlu1 %v5270_v39, %s4943_s6  ;;  %v5302_v48 = vpop.f32.mrb[31].mxu0 }
 0x136   : > { %12899 = vst [vmem:[#allocation53_spill] sm:$0xff] %v5302_v48 }
 0x137   : > { %817 = vrot.lane.b32.xlu0 %v5280_v42, %s4943_s6 }
 0x139   : > { %819 = vrot.lane.b32.xlu1 %v5288_v44, %s4943_s6 }
 0x13a   : > { %v5308_v49 = vpop.f32.mrb[32].mxu0 }
 0x13b   : > { %12900 = vst [vmem:[#allocation54_spill] sm:$0xff] %v5308_v49  ;;  %581 = vrot.lane.b32.xlu0 %v5168_v10, %s4942_s5  ;;  %v5312_v50 = vpop.f32.mrb[33].mxu0 }
 0x13c   : > { %12901 = vst [vmem:[#allocation55_spill] sm:$0xff] %v5312_v50  ;;  %v5314_v51 = vpop.f32.mrb[34].mxu0  ;;  %v5412_v50 = vmul.f32 %v5214_v25, %v5214_v25 }
 0x13d   : > { %12902 = vst [vmem:[#allocation56_spill] sm:$0xff] %v5314_v51  ;;  %583 = vrot.lane.b32.xlu1 %v5182_v15, %s4942_s5  ;;  %v5318_v52 = vpop.f32.mrb[35].mxu0 }
 0x13e   : > { %12903 = vst [vmem:[#allocation57_spill] sm:$0xff] %v5318_v52  ;;  %12921 = vst [vmem:[#allocation75_spill] sm:$0xff] %v5412_v50 }
 0x13f   : > { %629 = vrot.lane.b32.xlu0 %v5170_v11, %s4942_s5 }
 0x141   : > { %631 = vrot.lane.b32.xlu1 %v5184_v16, %s4942_s5 }
 0x142   : > { %v5330_v53 = vpop.f32.mrb[36].mxu0 }
 0x143   : > { %709 = vrot.lane.b32.xlu0 %v5168_v10, %s4943_s6  ;;  %12904 = vst [vmem:[#allocation58_spill] sm:$0xff] %v5330_v53  ;;  %v5332_v54 = vpop.f32.mrb[37].mxu0  ;;  %v5596_v10 = vmul.f32 %v5298_v47, %v5298_v47 }
 0x144   : > { %12905 = vst [vmem:[#allocation59_spill] sm:$0xff] %v5332_v54  ;;  %v5340_v56 = vpop.f32.mrb[38].mxu0 }
 0x145   : > { %711 = vrot.lane.b32.xlu1 %v5182_v15, %s4943_s6  ;;  %12907 = vst [vmem:[#allocation61_spill] sm:$0xff] %v5340_v56  ;;  %v5342_v28 = vpop.f32.mrb[39].mxu0  ;;  %12934 = vst [vmem:[#allocation88_spill] sm:$0xff] %v5596_v10 }
 0x146   : > { %12908 = vst [vmem:[#allocation62_spill] sm:$0xff] %v5342_v28  ;;  %v5402_v28 = vmul.f32 %v5204_v21, %v5204_v21 }
 0x147   : > { %757 = vrot.lane.b32.xlu0 %v5170_v11, %s4943_s6 }
 0x148   : > { %12918 = vst [vmem:[#allocation72_spill] sm:$0xff] %v5402_v28 }
 0x149   : > { %759 = vrot.lane.b32.xlu1 %v5184_v16, %s4943_s6 }
 0x14a   : > { %v5370_v8 = vpop.f32.mrb[40].mxu0 }
 0x14b   : > { %645 = vrot.lane.b32.xlu0 %v5338_v55, %s4942_s5  ;;  %12912 = vst [vmem:[#allocation66_spill] sm:$0xff] %v5370_v8  ;;  %v5372_v4 = vpop.f32.mrb[41].mxu0 }
 0x14c   : > { %12913 = vst [vmem:[#allocation67_spill] sm:$0xff] %v5372_v4  ;;  %v5376_v0 = vpop.f32.mrb[42].mxu0 }
 0x14d   : > { %647 = vrot.lane.b32.xlu1 %v5348_v24, %s4942_s5  ;;  %12914 = vst [vmem:[#allocation68_spill] sm:$0xff] %v5376_v0  ;;  %v5378_v59 = vpop.f32.mrb[43].mxu0 }
 0x14e   : > { %12915 = vst [vmem:[#allocation69_spill] sm:$0xff] %v5378_v59 }
 0x14f   : > { %693 = vrot.lane.b32.xlu0 %v5354_v19, %s4942_s5 }
 0x151   : > { %695 = vrot.lane.b32.xlu1 %v5360_v14, %s4942_s5 }
 0x152   : > { %v5394_v59 = vpop.f32.mrb[44].mxu0 }
 0x153   : > { %773 = vrot.lane.b32.xlu0 %v5338_v55, %s4943_s6  ;;  %12916 = vst [vmem:[#allocation70_spill] sm:$0xff] %v5394_v59  ;;  %v5396_v4 = vpop.f32.mrb[45].mxu0 }
 0x154   : > { %12917 = vst [vmem:[#allocation71_spill] sm:$0xff] %v5396_v4  ;;  %v5404_v54 = vpop.f32.mrb[46].mxu0  ;;  %v5420_v4 = vmul.f32 %v5206_v22, %v5206_v22 }
 0x155   : > { %775 = vrot.lane.b32.xlu1 %v5348_v24, %s4943_s6  ;;  %12919 = vst [vmem:[#allocation73_spill] sm:$0xff] %v5404_v54  ;;  %v5406_v52 = vpop.f32.mrb[47].mxu0 }
 0x156   : > { %12920 = vst [vmem:[#allocation74_spill] sm:$0xff] %v5406_v52  ;;  %12922 = vst [vmem:[#allocation76_spill] sm:$0xff] %v5420_v4  ;;  %v5428_v52 = vmul.f32 %v5216_v26, %v5216_v26 }
 0x157   : > { %821 = vrot.lane.b32.xlu0 %v5354_v19, %s4943_s6  ;;  %v5556_v19 = vmul.f32 %v5274_v41, %v5274_v41 }
 0x158   : > { %12923 = vst [vmem:[#allocation77_spill] sm:$0xff] %v5428_v52 }
 0x159   : > { %823 = vrot.lane.b32.xlu1 %v5360_v14, %s4943_s6  ;;  %12929 = vst [vmem:[#allocation83_spill] sm:$0xff] %v5556_v19 }
 0x15b   : > { %585 = vrot.lane.b32.xlu0 %v5204_v21, %s4942_s5 }
 0x15d   : > { %587 = vrot.lane.b32.xlu1 %v5214_v25, %s4942_s5 }
 0x15f   : > { %633 = vrot.lane.b32.xlu0 %v5206_v22, %s4942_s5 }
 0x161   : > { %635 = vrot.lane.b32.xlu1 %v5216_v26, %s4942_s5 }
 0x163   : > { %713 = vrot.lane.b32.xlu0 %v5204_v21, %s4943_s6 }
 0x165   : > { %715 = vrot.lane.b32.xlu1 %v5214_v25, %s4943_s6 }
 0x167   : > { %761 = vrot.lane.b32.xlu0 %v5206_v22, %s4943_s6 }
 0x169   : > { %763 = vrot.lane.b32.xlu1 %v5216_v26, %s4943_s6 }
 0x16b   : > { %649 = vrot.lane.b32.xlu0 %v5402_v28, %s4942_s5 }
 0x16d   : > { %v5414_v48 = vpop.permute.xlu0 %573  ;;  %651 = vrot.lane.b32.xlu1 %v5412_v50, %s4942_s5 }
 0x16f   : > { %v5422_v46 = vpop.permute.xlu1 %623  ;;  %697 = vrot.lane.b32.xlu0 %v5420_v4, %s4942_s5 }
 0x171   : > { %v5430_v43 = vpop.permute.xlu0 %621  ;;  %699 = vrot.lane.b32.xlu1 %v5428_v52, %s4942_s5 }
 0x173   : > { %v5434_v40 = vpop.permute.xlu1 %703  ;;  %777 = vrot.lane.b32.xlu0 %v5402_v28, %s4943_s6  ;;  %v5516_v28 = vmul.f32 %v5250_v35, %v5250_v35 }
 0x175   : > { %v5438_v36 = vpop.permute.xlu0 %701  ;;  %779 = vrot.lane.b32.xlu1 %v5412_v50, %s4943_s6  ;;  %12927 = vst [vmem:[#allocation81_spill] sm:$0xff] %v5516_v28 }
 0x177   : > { %v5442_v34 = vpop.permute.xlu1 %751  ;;  %825 = vrot.lane.b32.xlu0 %v5420_v4, %s4943_s6 }
 0x179   : > { %v5446_v32 = vpop.permute.xlu0 %749  ;;  %827 = vrot.lane.b32.xlu1 %v5428_v52, %s4943_s6 }
 0x17b   : > { %v5450_v30 = vpop.permute.xlu1 %639  ;;  %589 = vrot.lane.b32.xlu0 %v5228_v29, %s4942_s5 }
 0x17d   : > { %v5454_v27 = vpop.permute.xlu0 %575  ;;  %591 = vrot.lane.b32.xlu1 %v5234_v31, %s4942_s5 }
 0x17f   : > { %v5458_v23 = vpop.permute.xlu1 %687  ;;  %717 = vrot.lane.b32.xlu0 %v5228_v29, %s4943_s6 }
 0x181   : > { %v5462_v18 = vpop.permute.xlu0 %637  ;;  %719 = vrot.lane.b32.xlu1 %v5234_v31, %s4943_s6 }
 0x183   : > { %v5470_v7 = vpop.permute.xlu1 %767  ;;  %653 = vrot.lane.b32.xlu0 %v5468_v13, %s4942_s5 }
 0x185   : > { %v5478_v63 = vpop.permute.xlu0 %685  ;;  %655 = vrot.lane.b32.xlu1 %v5476_v3, %s4942_s5 }
 0x187   : > { %v5482_v60 = vpop.permute.xlu1 %815  ;;  %781 = vrot.lane.b32.xlu0 %v5468_v13, %s4943_s6 }
 0x189   : > { %v5486_v29 = vpop.permute.xlu0 %765  ;;  %783 = vrot.lane.b32.xlu1 %v5476_v3, %s4943_s6  ;;  %v5508_v3 = vmul.f32 %v5244_v33, %v5244_v33 }
 0x18b   : > { %v5490_v52 = vpop.permute.xlu1 %577  ;;  %593 = vrot.lane.b32.xlu0 %v5244_v33, %s4942_s5  ;;  %12926 = vst [vmem:[#allocation80_spill] sm:$0xff] %v5508_v3 }
 0x18d   : > { %v5494_v31 = vpop.permute.xlu0 %813  ;;  %595 = vrot.lane.b32.xlu1 %v5250_v35, %s4942_s5 }
 0x18f   : > { %v5498_v4 = vpop.permute.xlu1 %579  ;;  %721 = vrot.lane.b32.xlu0 %v5244_v33, %s4943_s6 }
 0x191   : > { %v5502_v13 = vpop.permute.xlu0 %625  ;;  %723 = vrot.lane.b32.xlu1 %v5250_v35, %s4943_s6 }
 0x193   : > { %v5510_v50 = vpop.permute.xlu1 %627  ;;  %657 = vrot.lane.b32.xlu0 %v5508_v3, %s4942_s5 }
 0x195   : > { %v5518_v26 = vpop.permute.xlu0 %705  ;;  %659 = vrot.lane.b32.xlu1 %v5516_v28, %s4942_s5 }
 0x197   : > { %v5522_v22 = vpop.permute.xlu1 %707  ;;  %785 = vrot.lane.b32.xlu0 %v5508_v3, %s4943_s6 }
 0x199   : > { %v5526_v33 = vpop.permute.xlu0 %753  ;;  %787 = vrot.lane.b32.xlu1 %v5516_v28, %s4943_s6  ;;  %v5548_v28 = vmul.f32 %v5264_v38, %v5264_v38 }
 0x19b   : > { %v5530_v25 = vpop.permute.xlu1 %755  ;;  %597 = vrot.lane.b32.xlu0 %v5264_v38, %s4942_s5  ;;  %12928 = vst [vmem:[#allocation82_spill] sm:$0xff] %v5548_v28 }
 0x19d   : > { %v5534_v35 = vpop.permute.xlu0 %641  ;;  %599 = vrot.lane.b32.xlu1 %v5274_v41, %s4942_s5 }
 0x19f   : > { %v5538_v21 = vpop.permute.xlu1 %643  ;;  %725 = vrot.lane.b32.xlu0 %v5264_v38, %s4943_s6 }
 0x1a1   : > { %v5542_v3 = vpop.permute.xlu0 %689  ;;  %727 = vrot.lane.b32.xlu1 %v5274_v41, %s4943_s6 }
 0x1a3   : > { %v5550_v14 = vpop.permute.xlu1 %691  ;;  %661 = vrot.lane.b32.xlu0 %v5548_v28, %s4942_s5 }
 0x1a5   : > { %v5558_v24 = vpop.permute.xlu0 %769  ;;  %663 = vrot.lane.b32.xlu1 %v5556_v19, %s4942_s5 }
 0x1a7   : > { %v5562_v55 = vpop.permute.xlu1 %771  ;;  %789 = vrot.lane.b32.xlu0 %v5548_v28, %s4943_s6 }
 0x1a9   : > { %v5566_v38 = vpop.permute.xlu0 %817  ;;  %791 = vrot.lane.b32.xlu1 %v5556_v19, %s4943_s6  ;;  %v5588_v19 = vmul.f32 %v5292_v45, %v5292_v45 }
 0x1ab   : > { %v5570_v16 = vpop.permute.xlu1 %819  ;;  %601 = vrot.lane.b32.xlu0 %v5292_v45, %s4942_s5  ;;  %12932 = vst [vmem:[#allocation86_spill] sm:$0xff] %v5588_v19 }
 0x1ad   : > { %v5574_v41 = vpop.permute.xlu0 %581  ;;  %603 = vrot.lane.b32.xlu1 %v5298_v47, %s4942_s5 }
 0x1af   : > { %v5578_v11 = vpop.permute.xlu1 %583  ;;  %729 = vrot.lane.b32.xlu0 %v5292_v45, %s4943_s6 }
 0x1b0   : > { %12930 = vst [vmem:[#allocation84_spill] sm:$0xff] %v5578_v11 }
 0x1b1   : > { %v5582_v28 = vpop.permute.xlu0 %629  ;;  %731 = vrot.lane.b32.xlu1 %v5298_v47, %s4943_s6 }
 0x1b2   : > { %12931 = vst [vmem:[#allocation85_spill] sm:$0xff] %v5582_v28 }
 0x1b3   : > { %v5590_v15 = vpop.permute.xlu1 %631  ;;  %665 = vrot.lane.b32.xlu0 %v5588_v19, %s4942_s5 }
 0x1b4   : > { %12933 = vst [vmem:[#allocation87_spill] sm:$0xff] %v5590_v15 }
 0x1b5   : > { %v5598_v11 = vpop.permute.xlu0 %709  ;;  %667 = vrot.lane.b32.xlu1 %v5596_v10, %s4942_s5 }
 0x1b7   : > { %v5602_v28 = vpop.permute.xlu1 %711  ;;  %793 = vrot.lane.b32.xlu0 %v5588_v19, %s4943_s6 }
 0x1b9   : > { %v5606_v45 = vpop.permute.xlu0 %757  ;;  %795 = vrot.lane.b32.xlu1 %v5596_v10, %s4943_s6  ;;  %v5628_v10 = vmul.f32 %v5308_v49, %v5308_v49 }
 0x1bb   : > { %v5610_v15 = vpop.permute.xlu1 %759  ;;  %605 = vrot.lane.b32.xlu0 %v5308_v49, %s4942_s5  ;;  %12939 = vst [vmem:[#allocation93_spill] sm:$0xff] %v5628_v10 }
 0x1bc   : > { %12935 = vst [vmem:[#allocation89_spill] sm:$0xff] %v5610_v15 }
 0x1bd   : > { %v5614_v47 = vpop.permute.xlu0 %645  ;;  %607 = vrot.lane.b32.xlu1 %v5314_v51, %s4942_s5 }
 0x1be   : > { %12936 = vst [vmem:[#allocation90_spill] sm:$0xff] %v5614_v47 }
 0x1bf   : > { %v5618_v44 = vpop.permute.xlu1 %647  ;;  %733 = vrot.lane.b32.xlu0 %v5308_v49, %s4943_s6 }
 0x1c0   : > { %12937 = vst [vmem:[#allocation91_spill] sm:$0xff] %v5618_v44  ;;  %v5636_v44 = vmul.f32 %v5314_v51, %v5314_v51 }
 0x1c1   : > { %v5622_v19 = vpop.permute.xlu0 %693  ;;  %735 = vrot.lane.b32.xlu1 %v5314_v51, %s4943_s6 }
 0x1c2   : > { %12938 = vst [vmem:[#allocation92_spill] sm:$0xff] %v5622_v19  ;;  %12941 = vst [vmem:[#allocation95_spill] sm:$0xff] %v5636_v44 }
 0x1c3   : > { %v5630_v15 = vpop.permute.xlu1 %695  ;;  %669 = vrot.lane.b32.xlu0 %v5628_v10, %s4942_s5 }
 0x1c4   : > { %12940 = vst [vmem:[#allocation94_spill] sm:$0xff] %v5630_v15 }
 0x1c5   : > { %v5638_v47 = vpop.permute.xlu0 %773  ;;  %671 = vrot.lane.b32.xlu1 %v5636_v44, %s4942_s5 }
 0x1c6   : > { %12942 = vst [vmem:[#allocation96_spill] sm:$0xff] %v5638_v47 }
 0x1c7   : > { %v5642_v19 = vpop.permute.xlu1 %775  ;;  %797 = vrot.lane.b32.xlu0 %v5628_v10, %s4943_s6 }
 0x1c9   : > { %v5646_v49 = vpop.permute.xlu0 %821  ;;  %799 = vrot.lane.b32.xlu1 %v5636_v44, %s4943_s6  ;;  %v5668_v44 = vmul.f32 %v5330_v53, %v5330_v53 }
 0x1cb   : > { %v5650_v15 = vpop.permute.xlu1 %823  ;;  %609 = vrot.lane.b32.xlu0 %v5330_v53, %s4942_s5  ;;  %12947 = vst [vmem:[#allocation101_spill] sm:$0xff] %v5668_v44 }
 0x1cc   : > { %12943 = vst [vmem:[#allocation97_spill] sm:$0xff] %v5650_v15 }
 0x1cd   : > { %v5654_v51 = vpop.permute.xlu0 %585  ;;  %611 = vrot.lane.b32.xlu1 %v5340_v56, %s4942_s5 }
 0x1ce   : > { %12944 = vst [vmem:[#allocation98_spill] sm:$0xff] %v5654_v51 }
 0x1cf   : > { %v5658_v47 = vpop.permute.xlu1 %587  ;;  %737 = vrot.lane.b32.xlu0 %v5330_v53, %s4943_s6 }
 0x1d0   : > { %12945 = vst [vmem:[#allocation99_spill] sm:$0xff] %v5658_v47  ;;  %v5676_v47 = vmul.f32 %v5340_v56, %v5340_v56 }
 0x1d1   : > { %v5662_v10 = vpop.permute.xlu0 %633  ;;  %739 = vrot.lane.b32.xlu1 %v5340_v56, %s4943_s6 }
 0x1d2   : > { %12946 = vst [vmem:[#allocation100_spill] sm:$0xff] %v5662_v10  ;;  %12949 = vst [vmem:[#allocation103_spill] sm:$0xff] %v5676_v47 }
 0x1d3   : > { %v5670_v15 = vpop.permute.xlu1 %635  ;;  %673 = vrot.lane.b32.xlu0 %v5668_v44, %s4942_s5 }
 0x1d4   : > { %12948 = vst [vmem:[#allocation102_spill] sm:$0xff] %v5670_v15 }
 0x1d5   : > { %v5678_v51 = vpop.permute.xlu0 %713  ;;  %675 = vrot.lane.b32.xlu1 %v5676_v47, %s4942_s5 }
 0x1d6   : > { %12950 = vst [vmem:[#allocation104_spill] sm:$0xff] %v5678_v51 }
 0x1d7   : > { %v5682_v10 = vpop.permute.xlu1 %715  ;;  %801 = vrot.lane.b32.xlu0 %v5668_v44, %s4943_s6 }
 0x1d9   : > { %v5686_v53 = vpop.permute.xlu0 %761  ;;  %803 = vrot.lane.b32.xlu1 %v5676_v47, %s4943_s6  ;;  %v5708_v47 = vmul.f32 %v5370_v8, %v5370_v8 }
 0x1da   : > { %12951 = vst [vmem:[#allocation105_spill] sm:$0xff] %v5686_v53 }
 0x1db   : > { %v5690_v15 = vpop.permute.xlu1 %763  ;;  %613 = vrot.lane.b32.xlu0 %v5370_v8, %s4942_s5  ;;  %12956 = vst [vmem:[#allocation110_spill] sm:$0xff] %v5708_v47 }
 0x1dc   : > { %12952 = vst [vmem:[#allocation106_spill] sm:$0xff] %v5690_v15 }
 0x1dd   : > { %v5694_v56 = vpop.permute.xlu0 %649  ;;  %615 = vrot.lane.b32.xlu1 %v5376_v0, %s4942_s5 }
 0x1de   : > { %12953 = vst [vmem:[#allocation107_spill] sm:$0xff] %v5694_v56 }
 0x1df   : > { %v5698_v51 = vpop.permute.xlu1 %651  ;;  %741 = vrot.lane.b32.xlu0 %v5370_v8, %s4943_s6 }
 0x1e0   : > { %12954 = vst [vmem:[#allocation108_spill] sm:$0xff] %v5698_v51  ;;  %v5716_v51 = vmul.f32 %v5376_v0, %v5376_v0 }
 0x1e1   : > { %v5702_v44 = vpop.permute.xlu0 %697  ;;  %743 = vrot.lane.b32.xlu1 %v5376_v0, %s4943_s6 }
 0x1e2   : > { %12955 = vst [vmem:[#allocation109_spill] sm:$0xff] %v5702_v44  ;;  %12958 = vst [vmem:[#allocation112_spill] sm:$0xff] %v5716_v51  ;;  %v12365_v44 = vlaneseq }
 0x1e3   : > { %v5710_v15 = vpop.permute.xlu1 %699  ;;  %677 = vrot.lane.b32.xlu0 %v5708_v47, %s4942_s5 }
 0x1e4   : > { %12957 = vst [vmem:[#allocation111_spill] sm:$0xff] %v5710_v15  ;;  %v5731_v15 = vand.u32 127, %v12365_v44  ;;  %v5752_v44 = vmul.f32 %v5394_v59, %v5394_v59 }
 0x1e5   : > { %v5718_v56 = vpop.permute.xlu0 %777  ;;  %679 = vrot.lane.b32.xlu1 %v5716_v51, %s4942_s5 }
 0x1e6   : > { %12959 = vst [vmem:[#allocation113_spill] sm:$0xff] %v5718_v56  ;;  %12961 = vst [vmem:[#allocation115_spill] sm:$0xff] %v5731_v15 }
 0x1e7   : > { %v5722_v53 = vpop.permute.xlu1 %779  ;;  %805 = vrot.lane.b32.xlu0 %v5708_v47, %s4943_s6  ;;  %v833_v47 = vand.u32 1, %v5731_v15  ;;  %12965 = vst [vmem:[#allocation119_spill] sm:$0xff] %v5752_v44  ;;  %v5764_v15 = vmul.f32 %v5404_v54, %v5404_v54 }
 0x1e8   : > { %12960 = vst [vmem:[#allocation114_spill] sm:$0xff] %v5722_v53 }
 0x1e9   : > { %v5726_v8 = vpop.permute.xlu0 %825  ;;  %807 = vrot.lane.b32.xlu1 %v5716_v51, %s4943_s6  ;;  %vm5754_vm1 = vcmp.lt.s32.totalorder %v833_v47, 1 }
 0x1ea   : > { %v842_v47 = vsel %vm5754_vm1, %v5414_v48, %v5438_v36  ;;  %v866_v36 = vsel %vm5754_vm1, %v5430_v43, %v5446_v32 }
 0x1eb   : > { %v5733_v0 = vpop.permute.xlu1 %827  ;;  %617 = vrot.lane.b32.xlu0 %v5394_v59, %s4942_s5 }
 0x1ec   : > { %12962 = vst [vmem:[#allocation116_spill] sm:$0xff] %v5733_v0 }
 0x1ed   : > { %v5737_v56 = vpop.permute.xlu0 %589  ;;  %619 = vrot.lane.b32.xlu1 %v5404_v54, %s4942_s5 }
 0x1ee   : > { %12963 = vst [vmem:[#allocation117_spill] sm:$0xff] %v5737_v56  ;;  %v12966_v56 = vmov 0 }
 0x1ef   : > { %v5742_v53 = vpop.permute.xlu1 %591  ;;  %745 = vrot.lane.b32.xlu0 %v5394_v59, %s4943_s6  ;;  %v12967_v56 = vsel %vm5754_vm1, 4294967295, %v12966_v56 }
 0x1f0   : > { %12964 = vst [vmem:[#allocation118_spill] sm:$0xff] %v5742_v53  ;;  %12968 = vst [vmem:[#allocation120_spill] sm:$0xff] %v12967_v56 }
 0x1f1   : > { %v5746_v51 = vpop.permute.xlu0 %717  ;;  %747 = vrot.lane.b32.xlu1 %v5404_v54, %s4943_s6  ;;  %v843_v54 = vsel %vm5754_vm1, %v5454_v27, %v5434_v40  ;;  %v867_v27 = vsel %vm5754_vm1, %v5422_v46, %v5442_v34  ;;  %v5805_v40 = vadd.f32 %v866_v36, %v5118_v58  ;;  %v874_v36 = vsel %vm5754_vm1, %v5462_v18, %v5486_v29 }
 0x1f2   : > { %v5794_v48 = vadd.f32 %v843_v54, %v5126_v61  ;;  %v5812_v32 = vadd.f32 %v867_v27, %v5128_v62  ;;  %v875_v62 = vsel %vm5754_vm1, %v5450_v30, %v5470_v7  ;;  %v5843_v58 = vadd.f32 %v874_v36, %v5190_v17 }
 0x1f3   : > { %v5758_v0 = vpop.permute.xlu1 %719  ;;  %681 = vrot.lane.b32.xlu0 %v5752_v44, %s4942_s5  ;;  %12973 = vst [vmem:[#allocation125_spill] sm:$0xff] %v5805_v40  ;;  %v898_v18 = vsel %vm5754_vm1, %v5478_v63, %v5494_v31  ;;  %v5854_v29 = vadd.f32 %v875_v62, %v5164_v9  ;;  %v899_v7 = vsel %vm5754_vm1, %v5458_v23, %v5482_v60 }
 0x1f4   : > { %12969 = vst [vmem:[#allocation121_spill] sm:$0xff] %v5758_v0  ;;  %12972 = vst [vmem:[#allocation124_spill] sm:$0xff] %v5794_v48  ;;  %v5865_v17 = vadd.f32 %v898_v18, %v5202_v20  ;;  %v844_v62 = vsel %vm5754_vm1, %v5490_v52, %v5518_v26  ;;  %v5876_v63 = vadd.f32 %v899_v7, %v5176_v12 }
 0x1f5   : > { %v5766_v53 = vpop.permute.xlu0 %653  ;;  %683 = vrot.lane.b32.xlu1 %v5764_v15, %s4942_s5  ;;  %12974 = vst [vmem:[#allocation126_spill] sm:$0xff] %v5812_v32  ;;  %12975 = vst [vmem:[#allocation127_spill] sm:$0xff] %v5843_v58  ;;  %v845_v60 = vsel %vm5754_vm1, %v5498_v4, %v5522_v22  ;;  %v5887_v20 = vadd.f32 %v844_v62, %v5140_v1  ;;  %v868_v12 = vsel %vm5754_vm1, %v5502_v13, %v5526_v33  ;;  %v13003_v1 = vld [vmem:[#allocation60_spill] sm:$0xff] }
 0x1f6   : > { %12970 = vst [vmem:[#allocation122_spill] sm:$0xff] %v5766_v53  ;;  %v5783_v53 = vadd.f32 %v842_v47, %v5116_v57  ;;  %12976 = vst [vmem:[#allocation128_spill] sm:$0xff] %v5854_v29  ;;  %v5898_v26 = vadd.f32 %v845_v60, %v5150_v5  ;;  %v869_v4 = vsel %vm5754_vm1, %v5510_v50, %v5530_v25 }
 0x1f7   : > { %v5774_v59 = vpop.permute.xlu1 %655  ;;  %809 = vrot.lane.b32.xlu0 %v5752_v44, %s4943_s6  ;;  %12977 = vst [vmem:[#allocation129_spill] sm:$0xff] %v5865_v17  ;;  %12978 = vst [vmem:[#allocation130_spill] sm:$0xff] %v5876_v63  ;;  %v5909_v22 = vadd.f32 %v868_v12, %v5142_v2  ;;  %v5916_v13 = vadd.f32 %v869_v4, %v5152_v6  ;;  %v876_v18 = vsel %vm5754_vm1, %v5534_v35, %v5558_v24 }
 0x1f8   : > { %12971 = vst [vmem:[#allocation123_spill] sm:$0xff] %v5783_v53  ;;  %12979 = vst [vmem:[#allocation131_spill] sm:$0xff] %v5887_v20  ;;  %v877_v62 = vsel %vm5754_vm1, %v5538_v21, %v5562_v55  ;;  %v5947_v60 = vadd.f32 %v876_v18, %v5262_v37  ;;  %v900_v24 = vsel %vm5754_vm1, %v5542_v3, %v5566_v38  ;;  %v12986_v38 = vld [vmem:[#allocation49_spill] sm:$0xff] }
 0x1f9   : > { %v5785_v0 = vpop.permute.xlu0 %781  ;;  %811 = vrot.lane.b32.xlu1 %v5764_v15, %s4943_s6  ;;  %12980 = vst [vmem:[#allocation132_spill] sm:$0xff] %v5898_v26  ;;  %12981 = vst [vmem:[#allocation133_spill] sm:$0xff] %v5909_v22  ;;  %v5958_v35 = vadd.f32 %v877_v62, %v5270_v39  ;;  %v901_v21 = vsel %vm5754_vm1, %v5550_v14, %v5570_v16  ;;  %v5969_v37 = vadd.f32 %v900_v24, %v5280_v42  ;;  %v12988_v14 = vld [vmem:[#allocation84_spill] sm:$0xff]  ;;  %v12989_v42 = vld [vmem:[#allocation21_spill] sm:$0xff] }
 0x1fa   : > { %12982 = vst [vmem:[#allocation134_spill] sm:$0xff] %v5916_v13  ;;  %12983 = vst [vmem:[#allocation135_spill] sm:$0xff] %v5947_v60  ;;  %v846_v3 = vsel %vm5754_vm1, %v5574_v41, %v5598_v11  ;;  %v5980_v39 = vadd.f32 %v901_v21, %v12986_v38  ;;  %v847_v16 = vsel %vm5754_vm1, %v12988_v14, %v5602_v28  ;;  %v12991_v11 = vld [vmem:[#allocation85_spill] sm:$0xff] }
 0x1fb   : > { %v5796_v44 = vpop.permute.xlu1 %783  ;;  %970 = vrot.lane.b32.xlu0 %v5783_v53, %s4944_s7  ;;  %12984 = vst [vmem:[#allocation136_spill] sm:$0xff] %v5958_v35  ;;  %12985 = vst [vmem:[#allocation137_spill] sm:$0xff] %v5969_v37  ;;  %v5991_v62 = vadd.f32 %v846_v3, %v12989_v42  ;;  %v870_v41 = vsel %vm5754_vm1, %v12991_v11, %v5606_v45  ;;  %v12992_v21 = vld [vmem:[#allocation25_spill] sm:$0xff]  ;;  %v12995_v3 = vld [vmem:[#allocation87_spill] sm:$0xff] }
 0x1fc   : > { %12987 = vst [vmem:[#allocation49_spill] sm:$0xff] %v5980_v39  ;;  %v6002_v38 = vadd.f32 %v847_v16, %v12992_v21  ;;  %v12994_v28 = vld [vmem:[#allocation89_spill] sm:$0xff]  ;;  %v12996_v42 = vld [vmem:[#allocation22_spill] sm:$0xff] }
 0x1fd   : > { %v5807_v47 = vpop.permute.xlu0 %593  ;;  %972 = vrot.lane.b32.xlu1 %v5794_v48, %s4944_s7  ;;  %12990 = vst [vmem:[#allocation84_spill] sm:$0xff] %v5991_v62  ;;  %v871_v14 = vsel %vm5754_vm1, %v12995_v3, %v12994_v28  ;;  %v6013_v2 = vadd.f32 %v870_v41, %v12996_v42  ;;  %v12998_v45 = vld [vmem:[#allocation26_spill] sm:$0xff]  ;;  %v13000_v41 = vld [vmem:[#allocation96_spill] sm:$0xff] }
 0x1fe   : > { %12993 = vst [vmem:[#allocation85_spill] sm:$0xff] %v6002_v38  ;;  %v6020_v16 = vadd.f32 %v871_v14, %v12998_v45  ;;  %v13001_v28 = vld [vmem:[#allocation90_spill] sm:$0xff]  ;;  %v13002_v14 = vld [vmem:[#allocation91_spill] sm:$0xff] }
 0x1ff   : > { %v5814_v43 = vpop.permute.xlu1 %595  ;;  %1018 = vrot.lane.b32.xlu0 %v5805_v40, %s4944_s7  ;;  %12997 = vst [vmem:[#allocation89_spill] sm:$0xff] %v6013_v2  ;;  %v878_v3 = vsel %vm5754_vm1, %v13001_v28, %v13000_v41  ;;  %v879_v45 = vsel %vm5754_vm1, %v13002_v14, %v5642_v19  ;;  %v13005_v41 = vld [vmem:[#allocation92_spill] sm:$0xff]  ;;  %v13009_v19 = vld [vmem:[#allocation94_spill] sm:$0xff] }
 0x200   : > { %12999 = vst [vmem:[#allocation87_spill] sm:$0xff] %v6020_v16  ;;  %v902_v28 = vsel %vm5754_vm1, %v13005_v41, %v5646_v49  ;;  %v13010_v14 = vld [vmem:[#allocation64_spill] sm:$0xff]  ;;  %v13014_v41 = vld [vmem:[#allocation65_spill] sm:$0xff] }
 0x201   : > { %v5818_v54 = vpop.permute.xlu0 %721  ;;  %1020 = vrot.lane.b32.xlu1 %v5812_v32, %s4944_s7  ;;  %v13012_v49 = vld [vmem:[#allocation104_spill] sm:$0xff] }
 0x203   : > { %v5822_v34 = vpop.permute.xlu1 %723  ;;  %1098 = vrot.lane.b32.xlu0 %v5783_v53, %s4945_s8 }
 0x205   : > { %v5826_v46 = vpop.permute.xlu0 %657  ;;  %1100 = vrot.lane.b32.xlu1 %v5794_v48, %s4945_s8 }
 0x207   : > { %v5834_v27 = vpop.permute.xlu1 %659  ;;  %1146 = vrot.lane.b32.xlu0 %v5805_v40, %s4945_s8 }
 0x209   : > { %v5845_v61 = vpop.permute.xlu0 %785  ;;  %1148 = vrot.lane.b32.xlu1 %v5812_v32, %s4945_s8 }
 0x20b   : > { %v5856_v57 = vpop.permute.xlu1 %787  ;;  %1034 = vrot.lane.b32.xlu0 %v5843_v58, %s4944_s7 }
 0x20d   : > { %v5867_v30 = vpop.permute.xlu0 %597  ;;  %1036 = vrot.lane.b32.xlu1 %v5854_v29, %s4944_s7 }
 0x20f   : > { %v5878_v9 = vpop.permute.xlu1 %599  ;;  %1082 = vrot.lane.b32.xlu0 %v5865_v17, %s4944_s7  ;;  %v13033_v17 = vld [vmem:[#allocation72_spill] sm:$0xff] }
 0x211   : > { %v5889_v23 = vpop.permute.xlu0 %725  ;;  %1084 = vrot.lane.b32.xlu1 %v5876_v63, %s4944_s7 }
 0x213   : > { %v5900_v31 = vpop.permute.xlu1 %727  ;;  %974 = vrot.lane.b32.xlu0 %v5887_v20, %s4944_s7 }
 0x215   : > { %v5911_v52 = vpop.permute.xlu0 %661  ;;  %976 = vrot.lane.b32.xlu1 %v5898_v26, %s4944_s7 }
 0x217   : > { %v5918_v33 = vpop.permute.xlu1 %663  ;;  %1022 = vrot.lane.b32.xlu0 %v5909_v22, %s4944_s7 }
 0x219   : > { %v5922_v36 = vpop.permute.xlu0 %789  ;;  %1024 = vrot.lane.b32.xlu1 %v5916_v13, %s4944_s7 }
 0x21b   : > { %v5926_v25 = vpop.permute.xlu1 %791  ;;  %1102 = vrot.lane.b32.xlu0 %v5887_v20, %s4945_s8 }
 0x21d   : > { %v5930_v50 = vpop.permute.xlu0 %601  ;;  %1104 = vrot.lane.b32.xlu1 %v5898_v26, %s4945_s8  ;;  %v13006_v26 = vld [vmem:[#allocation63_spill] sm:$0xff] }
 0x21f   : > { %v5938_v7 = vpop.permute.xlu1 %603  ;;  %1150 = vrot.lane.b32.xlu0 %v5909_v22, %s4945_s8 }
 0x221   : > { %v5949_v12 = vpop.permute.xlu0 %729  ;;  %1152 = vrot.lane.b32.xlu1 %v5916_v13, %s4945_s8  ;;  %v6043_v13 = vadd.f32 %v878_v3, %v13003_v1  ;;  %v13008_v1 = vld [vmem:[#allocation97_spill] sm:$0xff] }
 0x222   : > { %v903_v3 = vsel %vm5754_vm1, %v13009_v19, %v13008_v1  ;;  %v13017_v19 = vld [vmem:[#allocation29_spill] sm:$0xff] }
 0x223   : > { %v5960_v4 = vpop.permute.xlu1 %731  ;;  %1038 = vrot.lane.b32.xlu0 %v5947_v60, %s4944_s7  ;;  %13004 = vst [vmem:[#allocation96_spill] sm:$0xff] %v6043_v13  ;;  %v6076_v40 = vadd.f32 %v903_v3, %v13014_v41  ;;  %v13019_v3 = vld [vmem:[#allocation105_spill] sm:$0xff] }
 0x224   : > { %v13021_v41 = vld [vmem:[#allocation33_spill] sm:$0xff] }
 0x225   : > { %v5971_v55 = vpop.permute.xlu0 %665  ;;  %1040 = vrot.lane.b32.xlu1 %v5958_v35, %s4944_s7  ;;  %13015 = vst [vmem:[#allocation60_spill] sm:$0xff] %v6076_v40  ;;  %v13036_v35 = vld [vmem:[#allocation75_spill] sm:$0xff] }
 0x227   : > { %v5982_v18 = vpop.permute.xlu1 %667  ;;  %1086 = vrot.lane.b32.xlu0 %v5969_v37, %s4944_s7 }
 0x229   : > { %v5993_v24 = vpop.permute.xlu0 %793  ;;  %1088 = vrot.lane.b32.xlu1 %v5980_v39, %s4944_s7 }
 0x22b   : > { %v6004_v6 = vpop.permute.xlu1 %795  ;;  %978 = vrot.lane.b32.xlu0 %v5991_v62, %s4944_s7 }
 0x22d   : > { %v6015_v5 = vpop.permute.xlu0 %605  ;;  %980 = vrot.lane.b32.xlu1 %v6002_v38, %s4944_s7 }
 0x22f   : > { %v6022_v11 = vpop.permute.xlu1 %607  ;;  %1026 = vrot.lane.b32.xlu0 %v6013_v2, %s4944_s7 }
 0x231   : > { %v6026_v21 = vpop.permute.xlu0 %733  ;;  %1028 = vrot.lane.b32.xlu1 %v6020_v16, %s4944_s7 }
 0x233   : > { %v6034_v42 = vpop.permute.xlu1 %735  ;;  %1106 = vrot.lane.b32.xlu0 %v5991_v62, %s4945_s8  ;;  %v6054_v62 = vadd.f32 %v879_v45, %v13006_v26  ;;  %v13013_v26 = vld [vmem:[#allocation98_spill] sm:$0xff] }
 0x234   : > { %v848_v45 = vsel %vm5754_vm1, %v13013_v26, %v13012_v49  ;;  %v13020_v49 = vld [vmem:[#allocation100_spill] sm:$0xff] }
 0x235   : > { %v6045_v22 = vpop.permute.xlu0 %669  ;;  %1108 = vrot.lane.b32.xlu1 %v6002_v38, %s4945_s8  ;;  %13007 = vst [vmem:[#allocation90_spill] sm:$0xff] %v6054_v62  ;;  %v6065_v38 = vadd.f32 %v902_v28, %v13010_v14  ;;  %v13016_v28 = vld [vmem:[#allocation99_spill] sm:$0xff]  ;;  %v6087_v14 = vadd.f32 %v848_v45, %v13017_v19  ;;  %v872_v26 = vsel %vm5754_vm1, %v13020_v49, %v13019_v3  ;;  %v13024_v45 = vld [vmem:[#allocation102_spill] sm:$0xff] }
 0x236   : > { %v849_v1 = vsel %vm5754_vm1, %v13016_v28, %v5682_v10  ;;  %v13023_v10 = vld [vmem:[#allocation106_spill] sm:$0xff] }
 0x237   : > { %v6056_v20 = vpop.permute.xlu1 %671  ;;  %1042 = vrot.lane.b32.xlu0 %v6043_v13, %s4944_s7  ;;  %13011 = vst [vmem:[#allocation91_spill] sm:$0xff] %v6065_v38  ;;  %13018 = vst [vmem:[#allocation92_spill] sm:$0xff] %v6087_v14  ;;  %v873_v28 = vsel %vm5754_vm1, %v13024_v45, %v13023_v10  ;;  %v13025_v19 = vld [vmem:[#allocation30_spill] sm:$0xff]  ;;  %v13030_v10 = vld [vmem:[#allocation107_spill] sm:$0xff] }
 0x239   : > { %v6067_v32 = vpop.permute.xlu0 %797  ;;  %1044 = vrot.lane.b32.xlu1 %v6054_v62, %s4944_s7 }
 0x23b   : > { %v6078_v48 = vpop.permute.xlu1 %799  ;;  %1090 = vrot.lane.b32.xlu0 %v6065_v38, %s4944_s7  ;;  %v6098_v38 = vadd.f32 %v849_v1, %v13021_v41  ;;  %v13027_v1 = vld [vmem:[#allocation34_spill] sm:$0xff] }
 0x23c   : > { %v6116_v3 = vadd.f32 %v873_v28, %v13027_v1  ;;  %v13031_v28 = vld [vmem:[#allocation114_spill] sm:$0xff]  ;;  %v13032_v1 = vld [vmem:[#allocation108_spill] sm:$0xff] }
 0x23d   : > { %v6089_v53 = vpop.permute.xlu0 %609  ;;  %1092 = vrot.lane.b32.xlu1 %v6076_v40, %s4944_s7  ;;  %13022 = vst [vmem:[#allocation63_spill] sm:$0xff] %v6098_v38  ;;  %v6109_v40 = vadd.f32 %v872_v26, %v13025_v19  ;;  %v13029_v26 = vld [vmem:[#allocation113_spill] sm:$0xff]  ;;  %v881_v63 = vsel %vm5754_vm1, %v13032_v1, %v13031_v28  ;;  %v13039_v1 = vld [vmem:[#allocation111_spill] sm:$0xff]  ;;  %v13040_v28 = vld [vmem:[#allocation76_spill] sm:$0xff] }
 0x23e   : > { %13028 = vst [vmem:[#allocation94_spill] sm:$0xff] %v6116_v3  ;;  %v880_v45 = vsel %vm5754_vm1, %v13030_v10, %v13029_v26  ;;  %v13035_v26 = vld [vmem:[#allocation109_spill] sm:$0xff] }
 0x23f   : > { %v6100_v39 = vpop.permute.xlu1 %611  ;;  %982 = vrot.lane.b32.xlu0 %v6087_v14, %s4944_s7  ;;  %13026 = vst [vmem:[#allocation97_spill] sm:$0xff] %v6109_v40  ;;  %v6139_v62 = vadd.f32 %v880_v45, %v13033_v17  ;;  %v904_v10 = vsel %vm5754_vm1, %v13035_v26, %v5726_v8  ;;  %v13038_v17 = vld [vmem:[#allocation116_spill] sm:$0xff]  ;;  %v13042_v8 = vld [vmem:[#allocation117_spill] sm:$0xff] }
 0x240   : > { %v905_v45 = vsel %vm5754_vm1, %v13039_v1, %v13038_v17  ;;  %v13046_v17 = vld [vmem:[#allocation118_spill] sm:$0xff] }
 0x241   : > { %v6111_v37 = vpop.permute.xlu0 %737  ;;  %984 = vrot.lane.b32.xlu1 %v6098_v38, %s4944_s7  ;;  %13034 = vst [vmem:[#allocation64_spill] sm:$0xff] %v6139_v62 }
 0x243   : > { %v6118_v49 = vpop.permute.xlu1 %739  ;;  %1030 = vrot.lane.b32.xlu0 %v6109_v40, %s4944_s7 }
 0x245   : > { %v6122_v41 = vpop.permute.xlu0 %673  ;;  %1032 = vrot.lane.b32.xlu1 %v6116_v3, %s4944_s7 }
 0x247   : > { %v6130_v19 = vpop.permute.xlu1 %675  ;;  %1110 = vrot.lane.b32.xlu0 %v6087_v14, %s4945_s8  ;;  %v6150_v14 = vadd.f32 %v881_v63, %v13036_v35  ;;  %v850_v63 = vsel %vm5754_vm1, %v13042_v8, %v5746_v51  ;;  %v13043_v35 = vld [vmem:[#allocation77_spill] sm:$0xff]  ;;  %v13049_v51 = vld [vmem:[#allocation39_spill] sm:$0xff] }
 0x248   : > { %v6172_v26 = vadd.f32 %v905_v45, %v13043_v35 }
 0x249   : > { %v6141_v13 = vpop.permute.xlu0 %801  ;;  %1112 = vrot.lane.b32.xlu1 %v6098_v38, %s4945_s8  ;;  %13037 = vst [vmem:[#allocation104_spill] sm:$0xff] %v6150_v14  ;;  %v6161_v38 = vadd.f32 %v904_v10, %v13040_v28  ;;  %v13045_v10 = vld [vmem:[#allocation121_spill] sm:$0xff] }
 0x24a   : > { %13044 = vst [vmem:[#allocation65_spill] sm:$0xff] %v6172_v26  ;;  %v851_v1 = vsel %vm5754_vm1, %v13046_v17, %v13045_v10  ;;  %v13047_v28 = vld [vmem:[#allocation37_spill] sm:$0xff] }
 0x24b   : > { %v6152_v60 = vpop.permute.xlu1 %803  ;;  %1046 = vrot.lane.b32.xlu0 %v6139_v62, %s4944_s7  ;;  %13041 = vst [vmem:[#allocation98_spill] sm:$0xff] %v6161_v38  ;;  %v6190_v45 = vadd.f32 %v851_v1, %v13049_v51  ;;  %v883_v1 = vsel %vm5754_vm1, %v5774_v59, %v5796_v44  ;;  %v13051_v51 = vld [vmem:[#allocation78_spill] sm:$0xff]  ;;  %v853_v59 = vsel %vm5754_vm1, %v5814_v43, %v5822_v34  ;;  %v13055_v44 = vld [vmem:[#allocation41_spill] sm:$0xff] }
 0x24c   : > { %v884_v43 = vsel %vm5754_vm1, %v5826_v46, %v5845_v61  ;;  %v854_v61 = vsel %vm5754_vm1, %v5867_v30, %v5889_v23  ;;  %v13061_v46 = vld [vmem:[#allocation81_spill] sm:$0xff]  ;;  %v13065_v30 = vld [vmem:[#allocation47_spill] sm:$0xff] }
 0x24d   : > { %v6163_v29 = vpop.permute.xlu0 %613  ;;  %1048 = vrot.lane.b32.xlu1 %v6150_v14, %s4944_s7  ;;  %v6183_v14 = vadd.f32 %v850_v63, %v13047_v28  ;;  %v13050_v63 = vld [vmem:[#allocation122_spill] sm:$0xff] }
 0x24e   : > { %v882_v10 = vsel %vm5754_vm1, %v13050_v63, %v5785_v0  ;;  %v852_v0 = vsel %vm5754_vm1, %v5807_v47, %v5818_v54  ;;  %v13053_v63 = vld [vmem:[#allocation79_spill] sm:$0xff] }
 0x24f   : > { %v6174_v62 = vpop.permute.xlu1 %615  ;;  %1094 = vrot.lane.b32.xlu0 %v6161_v38, %s4944_s7  ;;  %13048 = vst [vmem:[#allocation99_spill] sm:$0xff] %v6183_v14  ;;  %v6213_v28 = vadd.f32 %v882_v10, %v13051_v51  ;;  %v6235_v51 = vadd.f32 %v852_v0, %v13055_v44  ;;  %v13057_v47 = vld [vmem:[#allocation43_spill] sm:$0xff]  ;;  %v885_v0 = vsel %vm5754_vm1, %v5834_v27, %v5856_v57 }
 0x250   : > { %v6242_v54 = vadd.f32 %v853_v59, %v13057_v47  ;;  %v13059_v59 = vld [vmem:[#allocation80_spill] sm:$0xff]  ;;  %v855_v27 = vsel %vm5754_vm1, %v5878_v9, %v5900_v31  ;;  %v886_v9 = vsel %vm5754_vm1, %v5911_v52, %v5922_v36  ;;  %v856_v52 = vsel %vm5754_vm1, %v5930_v50, %v5949_v12  ;;  %v13069_v36 = vld [vmem:[#allocation83_spill] sm:$0xff] }
 0x251   : > { %v6185_v58 = vpop.permute.xlu0 %741  ;;  %1096 = vrot.lane.b32.xlu1 %v6172_v26, %s4944_s7  ;;  %13052 = vst [vmem:[#allocation105_spill] sm:$0xff] %v6213_v28  ;;  %13056 = vst [vmem:[#allocation106_spill] sm:$0xff] %v6235_v51  ;;  %v6265_v47 = vadd.f32 %v884_v43, %v13059_v59  ;;  %v13063_v43 = vld [vmem:[#allocation45_spill] sm:$0xff]  ;;  %v6294_v23 = vadd.f32 %v855_v27, %v13065_v30  ;;  %v13067_v27 = vld [vmem:[#allocation82_spill] sm:$0xff] }
 0x252   : > { %13058 = vst [vmem:[#allocation102_spill] sm:$0xff] %v6242_v54  ;;  %v6287_v59 = vadd.f32 %v854_v61, %v13063_v43  ;;  %v887_v61 = vsel %vm5754_vm1, %v5918_v33, %v5926_v25  ;;  %v6317_v30 = vadd.f32 %v886_v9, %v13067_v27  ;;  %v857_v25 = vsel %vm5754_vm1, %v5938_v7, %v5960_v4  ;;  %v13071_v9 = vld [vmem:[#allocation50_spill] sm:$0xff]  ;;  %v13073_v50 = vld [vmem:[#allocation52_spill] sm:$0xff] }
 0x253   : > { %v6192_v8 = vpop.permute.xlu1 %743  ;;  %986 = vrot.lane.b32.xlu0 %v6183_v14, %s4944_s7  ;;  %13060 = vst [vmem:[#allocation113_spill] sm:$0xff] %v6265_v47  ;;  %13066 = vst [vmem:[#allocation108_spill] sm:$0xff] %v6294_v23  ;;  %v6339_v27 = vadd.f32 %v856_v52, %v13071_v9  ;;  %v6346_v12 = vadd.f32 %v857_v25, %v13073_v50  ;;  %v888_v7 = vsel %vm5754_vm1, %v5971_v55, %v5993_v24  ;;  %v13074_v25 = vld [vmem:[#allocation86_spill] sm:$0xff]  ;;  %v13077_v24 = vld [vmem:[#allocation88_spill] sm:$0xff] }
 0x254   : > { %13064 = vst [vmem:[#allocation114_spill] sm:$0xff] %v6287_v59  ;;  %13068 = vst [vmem:[#allocation72_spill] sm:$0xff] %v6317_v30  ;;  %v889_v52 = vsel %vm5754_vm1, %v5982_v18, %v6004_v6  ;;  %v6369_v50 = vadd.f32 %v888_v7, %v13074_v25  ;;  %v858_v55 = vsel %vm5754_vm1, %v6015_v5, %v6026_v21  ;;  %v13080_v7 = vld [vmem:[#allocation54_spill] sm:$0xff]  ;;  %v13082_v5 = vld [vmem:[#allocation56_spill] sm:$0xff] }
 0x255   : > { %v6196_v35 = vpop.permute.xlu0 %677  ;;  %988 = vrot.lane.b32.xlu1 %v6190_v45, %s4944_s7  ;;  %13072 = vst [vmem:[#allocation75_spill] sm:$0xff] %v6339_v27  ;;  %v859_v18 = vsel %vm5754_vm1, %v6022_v11, %v6034_v42  ;;  %v6391_v25 = vadd.f32 %v858_v55, %v13080_v7  ;;  %v890_v42 = vsel %vm5754_vm1, %v6045_v22, %v6067_v32  ;;  %v13086_v22 = vld [vmem:[#allocation95_spill] sm:$0xff] }
 0x256   : > { %13075 = vst [vmem:[#allocation116_spill] sm:$0xff] %v6369_v50  ;;  %v6398_v21 = vadd.f32 %v859_v18, %v13082_v5  ;;  %v891_v55 = vsel %vm5754_vm1, %v6056_v20, %v6078_v48  ;;  %v13084_v18 = vld [vmem:[#allocation93_spill] sm:$0xff]  ;;  %v860_v32 = vsel %vm5754_vm1, %v6089_v53, %v6111_v37  ;;  %v861_v20 = vsel %vm5754_vm1, %v6100_v39, %v6118_v49 }
 0x257   : > { %v6204_v17 = vpop.permute.xlu1 %679  ;;  %1114 = vrot.lane.b32.xlu0 %v6183_v14, %s4945_s8  ;;  %v6224_v14 = vadd.f32 %v883_v1, %v13053_v63  ;;  %v13089_v53 = vld [vmem:[#allocation61_spill] sm:$0xff]  ;;  %v892_v39 = vsel %vm5754_vm1, %v6122_v41, %v6141_v13  ;;  %v862_v13 = vsel %vm5754_vm1, %v6163_v29, %v6185_v58  ;;  %v13093_v41 = vld [vmem:[#allocation103_spill] sm:$0xff]  ;;  %v13099_v58 = vld [vmem:[#allocation68_spill] sm:$0xff] }
 0x258   : > { %v6450_v37 = vadd.f32 %v861_v20, %v13089_v53  ;;  %v13090_v20 = vld [vmem:[#allocation101_spill] sm:$0xff] }
 0x259   : > { %v6215_v26 = vpop.permute.xlu0 %805  ;;  %1116 = vrot.lane.b32.xlu1 %v6190_v45, %s4945_s8  ;;  %13054 = vst [vmem:[#allocation100_spill] sm:$0xff] %v6224_v14  ;;  %v6473_v53 = vadd.f32 %v892_v39, %v13090_v20  ;;  %v13096_v39 = vld [vmem:[#allocation66_spill] sm:$0xff] }
 0x25a   : > { %v6495_v20 = vadd.f32 %v862_v13, %v13096_v39  ;;  %v13127_v39 = vld [vmem:[#allocation136_spill] sm:$0xff] }
 0x25b   : > { %v6226_v38 = vpop.permute.xlu1 %807  ;;  %1050 = vrot.lane.b32.xlu0 %v6213_v28, %s4944_s7  ;;  %13091 = vst [vmem:[#allocation78_spill] sm:$0xff] %v6473_v53 }
 0x25c   : > { %13097 = vst [vmem:[#allocation82_spill] sm:$0xff] %v6495_v20  ;;  %v895_v13 = vsel %vm5754_vm1, %v6204_v17, %v6226_v38 }
 0x25d   : > { %v6237_v10 = vpop.permute.xlu0 %617  ;;  %1052 = vrot.lane.b32.xlu1 %v6224_v14, %s4944_s7 }
 0x25f   : > { %990 = vrot.lane.b32.xlu0 %v6235_v51, %s4944_s7  ;;  %v6246_v1 = vpop.permute.xlu1 %619 }
 0x261   : > { %v6248_v63 = vpop.permute.xlu0 %745  ;;  %992 = vrot.lane.b32.xlu1 %v6242_v54, %s4944_s7 }
 0x263   : > { %1118 = vrot.lane.b32.xlu0 %v6235_v51, %s4945_s8  ;;  %v6258_v34 = vpop.permute.xlu1 %747  ;;  %v6276_v51 = vadd.f32 %v885_v0, %v13061_v46 }
 0x264   : > { %v865_v17 = vsel %vm5754_vm1, %v6246_v1, %v6258_v34 }
 0x265   : > { %v6267_v44 = vpop.permute.xlu0 %681  ;;  %1120 = vrot.lane.b32.xlu1 %v6242_v54, %s4945_s8  ;;  %13062 = vst [vmem:[#allocation107_spill] sm:$0xff] %v6276_v51 }
 0x267   : > { %1054 = vrot.lane.b32.xlu0 %v6265_v47, %s4944_s7  ;;  %v6280_v57 = vpop.permute.xlu1 %683 }
 0x269   : > { %v6289_v54 = vpop.permute.xlu0 %809  ;;  %1056 = vrot.lane.b32.xlu1 %v6276_v51, %s4944_s7 }
 0x26a   : > { %v896_v1 = vsel %vm5754_vm1, %v6267_v44, %v6289_v54 }
 0x26b   : > { %994 = vrot.lane.b32.xlu0 %v6287_v59, %s4944_s7  ;;  %v6298_v0 = vpop.permute.xlu1 %811 }
 0x26c   : > { %v897_v44 = vsel %vm5754_vm1, %v6280_v57, %v6298_v0 }
 0x26d   : > { %v6300_v46 = vpop.permute.xlu0 %970  ;;  %996 = vrot.lane.b32.xlu1 %v6294_v23, %s4944_s7 }
 0x26f   : > { %1122 = vrot.lane.b32.xlu0 %v6287_v59, %s4945_s8  ;;  %v6310_v31 = vpop.permute.xlu1 %972  ;;  %v6328_v59 = vadd.f32 %v887_v61, %v13069_v36 }
 0x271   : > { %v6319_v43 = vpop.permute.xlu0 %1018  ;;  %1124 = vrot.lane.b32.xlu1 %v6294_v23, %s4945_s8  ;;  %13070 = vst [vmem:[#allocation109_spill] sm:$0xff] %v6328_v59 }
 0x273   : > { %1058 = vrot.lane.b32.xlu0 %v6317_v30, %s4944_s7  ;;  %v6332_v33 = vpop.permute.xlu1 %1020 }
 0x275   : > { %v6341_v23 = vpop.permute.xlu0 %1098  ;;  %1060 = vrot.lane.b32.xlu1 %v6328_v59, %s4944_s7 }
 0x277   : > { %998 = vrot.lane.b32.xlu0 %v6339_v27, %s4944_s7  ;;  %v6350_v61 = vpop.permute.xlu1 %1100 }
 0x279   : > { %v6352_v36 = vpop.permute.xlu0 %1146  ;;  %1000 = vrot.lane.b32.xlu1 %v6346_v12, %s4944_s7 }
 0x27b   : > { %1126 = vrot.lane.b32.xlu0 %v6339_v27, %s4945_s8  ;;  %v6362_v4 = vpop.permute.xlu1 %1148  ;;  %v6380_v27 = vadd.f32 %v889_v52, %v13077_v24 }
 0x27d   : > { %v6371_v9 = vpop.permute.xlu0 %1034  ;;  %1128 = vrot.lane.b32.xlu1 %v6346_v12, %s4945_s8  ;;  %13078 = vst [vmem:[#allocation76_spill] sm:$0xff] %v6380_v27 }
 0x27e   : > { %13076 = vst [vmem:[#allocation111_spill] sm:$0xff] %v6371_v9 }
 0x27f   : > { %1062 = vrot.lane.b32.xlu0 %v6369_v50, %s4944_s7  ;;  %v6384_v6 = vpop.permute.xlu1 %1036 }
 0x280   : > { %13079 = vst [vmem:[#allocation117_spill] sm:$0xff] %v6384_v6  ;;  %v6432_v6 = vadd.f32 %v891_v55, %v13086_v22 }
 0x281   : > { %v6393_v9 = vpop.permute.xlu0 %1082  ;;  %1064 = vrot.lane.b32.xlu1 %v6380_v27, %s4944_s7 }
 0x282   : > { %13081 = vst [vmem:[#allocation77_spill] sm:$0xff] %v6393_v9  ;;  %13087 = vst [vmem:[#allocation122_spill] sm:$0xff] %v6432_v6 }
 0x283   : > { %1002 = vrot.lane.b32.xlu0 %v6391_v25, %s4944_s7  ;;  %v6402_v52 = vpop.permute.xlu1 %1084 }
 0x284   : > { %13083 = vst [vmem:[#allocation121_spill] sm:$0xff] %v6402_v52  ;;  %v6421_v52 = vadd.f32 %v890_v42, %v13084_v18  ;;  %v13088_v42 = vld [vmem:[#allocation58_spill] sm:$0xff] }
 0x285   : > { %v6404_v24 = vpop.permute.xlu0 %974  ;;  %1004 = vrot.lane.b32.xlu1 %v6398_v21, %s4944_s7  ;;  %v6443_v18 = vadd.f32 %v860_v32, %v13088_v42  ;;  %v893_v32 = vsel %vm5754_vm1, %v6130_v19, %v6152_v60  ;;  %v863_v19 = vsel %vm5754_vm1, %v6174_v62, %v6192_v8  ;;  %v894_v62 = vsel %vm5754_vm1, %v6196_v35, %v6215_v26  ;;  %v13105_v35 = vld [vmem:[#allocation112_spill] sm:$0xff] }
 0x286   : > { %13085 = vst [vmem:[#allocation118_spill] sm:$0xff] %v6421_v52  ;;  %v6484_v7 = vadd.f32 %v893_v32, %v13093_v41  ;;  %v6502_v29 = vadd.f32 %v863_v19, %v13099_v58  ;;  %v13102_v19 = vld [vmem:[#allocation110_spill] sm:$0xff]  ;;  %v864_v26 = vsel %vm5754_vm1, %v6237_v10, %v6248_v63  ;;  %v13110_v10 = vld [vmem:[#allocation73_spill] sm:$0xff] }
 0x287   : > { %1130 = vrot.lane.b32.xlu0 %v6391_v25, %s4945_s8  ;;  %v6414_v11 = vpop.permute.xlu1 %976  ;;  %v6554_v63 = vadd.f32 %v865_v17, %v13110_v10 }
 0x288   : > { %13094 = vst [vmem:[#allocation80_spill] sm:$0xff] %v6484_v7  ;;  %13100 = vst [vmem:[#allocation86_spill] sm:$0xff] %v6502_v29 }
 0x289   : > { %v6423_v9 = vpop.permute.xlu0 %1022  ;;  %1132 = vrot.lane.b32.xlu1 %v6398_v21, %s4945_s8  ;;  %13111 = vst [vmem:[#allocation112_spill] sm:$0xff] %v6554_v63 }
 0x28b   : > { %1066 = vrot.lane.b32.xlu0 %v6421_v52, %s4944_s7  ;;  %v6436_v48 = vpop.permute.xlu1 %1024 }
 0x28d   : > { %v6445_v5 = vpop.permute.xlu0 %1102  ;;  %1068 = vrot.lane.b32.xlu1 %v6432_v6, %s4944_s7 }
 0x28f   : > { %1006 = vrot.lane.b32.xlu0 %v6443_v18, %s4944_s7  ;;  %v6454_v55 = vpop.permute.xlu1 %1104 }
 0x291   : > { %v6456_v22 = vpop.permute.xlu0 %1150  ;;  %1008 = vrot.lane.b32.xlu1 %v6450_v37, %s4944_s7 }
 0x293   : > { %1134 = vrot.lane.b32.xlu0 %v6443_v18, %s4945_s8  ;;  %v6466_v49 = vpop.permute.xlu1 %1152 }
 0x295   : > { %v6475_v42 = vpop.permute.xlu0 %1038  ;;  %1136 = vrot.lane.b32.xlu1 %v6450_v37, %s4945_s8 }
 0x296   : > { %13092 = vst [vmem:[#allocation79_spill] sm:$0xff] %v6475_v42 }
 0x297   : > { %1070 = vrot.lane.b32.xlu0 %v6473_v53, %s4944_s7  ;;  %v6488_v60 = vpop.permute.xlu1 %1040 }
 0x298   : > { %13095 = vst [vmem:[#allocation81_spill] sm:$0xff] %v6488_v60  ;;  %v6536_v60 = vadd.f32 %v895_v13, %v13105_v35 }
 0x299   : > { %v6497_v42 = vpop.permute.xlu0 %1086  ;;  %1072 = vrot.lane.b32.xlu1 %v6484_v7, %s4944_s7 }
 0x29a   : > { %13098 = vst [vmem:[#allocation83_spill] sm:$0xff] %v6497_v42  ;;  %13106 = vst [vmem:[#allocation101_spill] sm:$0xff] %v6536_v60 }
 0x29b   : > { %1010 = vrot.lane.b32.xlu0 %v6495_v20, %s4944_s7  ;;  %v6506_v32 = vpop.permute.xlu1 %1088 }
 0x29c   : > { %13101 = vst [vmem:[#allocation88_spill] sm:$0xff] %v6506_v32  ;;  %v6525_v32 = vadd.f32 %v894_v62, %v13102_v19  ;;  %v13108_v62 = vld [vmem:[#allocation70_spill] sm:$0xff] }
 0x29d   : > { %v6508_v41 = vpop.permute.xlu0 %978  ;;  %1012 = vrot.lane.b32.xlu1 %v6502_v29, %s4944_s7  ;;  %v6547_v19 = vadd.f32 %v864_v26, %v13108_v62  ;;  %v13114_v26 = vld [vmem:[#allocation119_spill] sm:$0xff] }
 0x29e   : > { %13103 = vst [vmem:[#allocation93_spill] sm:$0xff] %v6525_v32  ;;  %v6573_v17 = vadd.f32 %v896_v1, %v13114_v26  ;;  %v4675_v1 = vld [vmem:[%s12263_s2] sm:$0xff]   ;;  %v6595_v26 = vadd.f32 %v897_v44, %v5764_v15  ;;  %v4676_v15 = vld [vmem:[%s12263_s2 + $0x8] sm:$0xff]   ;;  %v13121_v44 = vld [vmem:[#allocation127_spill] sm:$0xff] }
 0x29f   : > { %1138 = vrot.lane.b32.xlu0 %v6495_v20, %s4945_s8  ;;  %v6518_v8 = vpop.permute.xlu1 %980  ;;  %13109 = vst [vmem:[#allocation110_spill] sm:$0xff] %v6547_v19  ;;  %4561 = vmatprep.subr.bf16.mxu1 %v4675_v1 }
 0x2a0   : > { %13115 = vst [vmem:[#allocation119_spill] sm:$0xff] %v6573_v17  ;;  %13118 = vst [vmem:[#allocation142_spill] sm:$0xff] %v6595_v26  ;;  %4562 = vmatpush3.bf16.msra.mxu1 %v4675_v1 }
 0x2a1   : > { %v6527_v42 = vpop.permute.xlu0 %1026  ;;  %1140 = vrot.lane.b32.xlu1 %v6502_v29, %s4945_s8  ;;  %4563 = vmatprep.subr.bf16.mxu1 %v4676_v15 }
 0x2a2   : > { %13104 = vst [vmem:[#allocation95_spill] sm:$0xff] %v6527_v42 }
 0x2a3   : > { %1074 = vrot.lane.b32.xlu0 %v6525_v32, %s4944_s7  ;;  %v6540_v38 = vpop.permute.xlu1 %1028 }
 0x2a4   : > { %13107 = vst [vmem:[#allocation103_spill] sm:$0xff] %v6540_v38  ;;  %4564 = vmatpush3.bf16.msra.mxu1 %v4676_v15 }
 0x2a5   : > { %v6549_v58 = vpop.permute.xlu0 %1106  ;;  %1076 = vrot.lane.b32.xlu1 %v6536_v60, %s4944_s7 }
 0x2a7   : > { %1014 = vrot.lane.b32.xlu0 %v6547_v19, %s4944_s7  ;;  %v6558_v13 = vpop.permute.xlu1 %1108 }
 0x2a9   : > { %v6560_v35 = vpop.permute.xlu0 %1042  ;;  %1016 = vrot.lane.b32.xlu1 %v6554_v63, %s4944_s7 }
 0x2aa   : > { %13112 = vst [vmem:[#allocation138_spill] sm:$0xff] %v6560_v35 }
 0x2ab   : > { %1142 = vrot.lane.b32.xlu0 %v6547_v19, %s4945_s8  ;;  %v6570_v34 = vpop.permute.xlu1 %1044 }
 0x2ac   : > { %13113 = vst [vmem:[#allocation139_spill] sm:$0xff] %v6570_v34 }
 0x2ad   : > { %v6575_v10 = vpop.permute.xlu0 %1090  ;;  %1156 = vrot.lane.b32.xlu1 %v6020_v16, %s4945_s8 }
 0x2ae   : > { %13116 = vst [vmem:[#allocation140_spill] sm:$0xff] %v6575_v10  ;;  %v4677_v10 = vld [vmem:[%s12263_s2 + $0x10] sm:$0xff]  }
 0x2af   : > { %1078 = vrot.lane.b32.xlu0 %v6573_v17, %s4944_s7  ;;  %v6581_v35 = vpop.permute.xlu1 %1092  ;;  %4565 = vmatprep.subr.bf16.mxu1 %v4677_v10 }
 0x2b0   : > { %13117 = vst [vmem:[#allocation141_spill] sm:$0xff] %v6581_v35  ;;  %4566 = vmatpush3.bf16.msra.mxu1 %v4677_v10 }
 0x2b1   : > { %v6587_v54 = vpop.permute.xlu0 %982  ;;  %1144 = vrot.lane.b32.xlu1 %v6554_v63, %s4945_s8 }
 0x2b3   : > { %1154 = vrot.lane.b32.xlu0 %v6013_v2, %s4945_s8  ;;  %v6599_v35 = vpop.permute.xlu1 %984 }
 0x2b5   : > { %v6601_v56 = vpop.permute.xlu0 %1030  ;;  %1080 = vrot.lane.b32.xlu1 %v6595_v26, %s4944_s7 }
 0x2b6   : > { %13119 = vst [vmem:[#allocation143_spill] sm:$0xff] %v6601_v56 }
 0x2b7   : > { %1158 = vrot.lane.b32.xlu0 %v6109_v40, %s4945_s8  ;;  %v6607_v57 = vpop.permute.xlu1 %1032  ;;  %v4678_v40 = vld [vmem:[%s12263_s2 + $0x18] sm:$0xff]  }
 0x2b8   : > { %13120 = vst [vmem:[#allocation144_spill] sm:$0xff] %v6607_v57  ;;  %v13123_v57 = vld [vmem:[#allocation128_spill] sm:$0xff]  ;;  %4567 = vmatprep.subr.bf16.mxu1 %v4678_v40 }
 0x2b9   : > { %v6612_v0 = vpop.permute.xlu0 %1110  ;;  %1160 = vrot.lane.b32.xlu1 %v6116_v3, %s4945_s8  ;;  %v13124_v3 = vld [vmem:[#allocation135_spill] sm:$0xff]  ;;  %4568 = vmatpush3.bf16.msra.mxu1 %v4678_v40 }
 0x2bb   : > { %1162 = vrot.lane.b32.xlu0 %v13121_v44, %s4945_s8  ;;  %v6618_v1 = vpop.permute.xlu1 %1112 }
 0x2bd   : > { %v6623_v34 = vpop.permute.xlu0 %1046  ;;  %1164 = vrot.lane.b32.xlu1 %v13123_v57, %s4945_s8  ;;  %v13130_v57 = vld [vmem:[#allocation90_spill] sm:$0xff] }
 0x2be   : > { %13122 = vst [vmem:[#allocation145_spill] sm:$0xff] %v6623_v34  ;;  %v13128_v34 = vld [vmem:[#allocation96_spill] sm:$0xff] }
 0x2bf   : > { %1166 = vrot.lane.b32.xlu0 %v13124_v3, %s4945_s8  ;;  %v6629_v15 = vpop.permute.xlu1 %1048 }
 0x2c0   : > { %13125 = vst [vmem:[#allocation146_spill] sm:$0xff] %v6629_v15  ;;  %v4679_v15 = vld [vmem:[%s12263_s2 + $0x20] sm:$0xff]  }
 0x2c1   : > { %v6634_v62 = vpop.permute.xlu0 %1094  ;;  %1168 = vrot.lane.b32.xlu1 %v13127_v39, %s4945_s8  ;;  %4569 = vmatprep.subr.bf16.mxu1 %v4679_v15  ;;  %v13132_v39 = vld [vmem:[#allocation104_spill] sm:$0xff] }
 0x2c2   : > { %13126 = vst [vmem:[#allocation147_spill] sm:$0xff] %v6634_v62  ;;  %4570 = vmatpush3.bf16.msra.mxu1 %v4679_v15  ;;  %v13131_v62 = vld [vmem:[#allocation64_spill] sm:$0xff] }
 0x2c3   : > { %1170 = vrot.lane.b32.xlu0 %v13128_v34, %s4945_s8  ;;  %v6640_v10 = vpop.permute.xlu1 %1096 }
 0x2c4   : > { %13129 = vst [vmem:[#allocation148_spill] sm:$0xff] %v6640_v10  ;;  %v4680_v10 = vld [vmem:[%s12263_s2 + $0x28] sm:$0xff]  }
 0x2c5   : > { %v6645_v3 = vpop.permute.xlu0 %986  ;;  %1172 = vrot.lane.b32.xlu1 %v13130_v57, %s4945_s8  ;;  %4571 = vmatprep.subr.bf16.mxu1 %v4680_v10 }
 0x2c6   : > { %4572 = vmatpush3.bf16.msra.mxu1 %v4680_v10 }
 0x2c7   : > { %1174 = vrot.lane.b32.xlu0 %v13131_v62, %s4945_s8  ;;  %v6651_v40 = vpop.permute.xlu1 %988  ;;  %v4681_v62 = vld [vmem:[%s12263_s2 + $0x30] sm:$0xff]  }
 0x2c8   : > { %4573 = vmatprep.subr.bf16.mxu1 %v4681_v62 }
 0x2c9   : > { %v6656_v34 = vpop.permute.xlu0 %1114  ;;  %1176 = vrot.lane.b32.xlu1 %v13132_v39, %s4945_s8 }
 0x2ca   : > { %4574 = vmatpush3.bf16.msra.mxu1 %v4681_v62 }
 0x2cb   : > { %1178 = vrot.lane.b32.xlu0 %v6213_v28, %s4945_s8  ;;  %v6662_v15 = vpop.permute.xlu1 %1116  ;;  %v4682_v28 = vld [vmem:[%s12263_s2 + $0x38] sm:$0xff]  }
 0x2cc   : > { %4575 = vmatprep.subr.bf16.mxu1 %v4682_v28 }
 0x2cd   : > { %v6667_v57 = vpop.permute.xlu0 %1050  ;;  %1180 = vrot.lane.b32.xlu1 %v6224_v14, %s4945_s8 }
 0x2ce   : > { %13133 = vst [vmem:[#allocation149_spill] sm:$0xff] %v6667_v57  ;;  %4576 = vmatpush3.bf16.msra.mxu1 %v4682_v28  ;;  %v13146_v57 = vld [vmem:[#allocation60_spill] sm:$0xff] }
 0x2cf   : > { %1182 = vrot.lane.b32.xlu0 %v6265_v47, %s4945_s8  ;;  %v6673_v10 = vpop.permute.xlu1 %1052 }
 0x2d0   : > { %13134 = vst [vmem:[#allocation150_spill] sm:$0xff] %v6673_v10 }
 0x2d1   : > { %v6678_v39 = vpop.permute.xlu0 %990  ;;  %1184 = vrot.lane.b32.xlu1 %v6276_v51, %s4945_s8 }
 0x2d3   : > { %1186 = vrot.lane.b32.xlu0 %v6317_v30, %s4945_s8  ;;  %v6684_v62 = vpop.permute.xlu1 %992 }
 0x2d5   : > { %v6686_v14 = vpop.permute.xlu0 %1118  ;;  %1188 = vrot.lane.b32.xlu1 %v6328_v59, %s4945_s8 }
 0x2d7   : > { %1190 = vrot.lane.b32.xlu0 %v6369_v50, %s4945_s8  ;;  %v6692_v47 = vpop.permute.xlu1 %1120 }
 0x2d9   : > { %v6694_v10 = vpop.permute.xlu0 %1054  ;;  %1192 = vrot.lane.b32.xlu1 %v6380_v27, %s4945_s8 }
 0x2da   : > { %13135 = vst [vmem:[#allocation151_spill] sm:$0xff] %v6694_v10 }
 0x2db   : > { %1194 = vrot.lane.b32.xlu0 %v6421_v52, %s4945_s8  ;;  %v6700_v28 = vpop.permute.xlu1 %1056 }
 0x2dc   : > { %13136 = vst [vmem:[#allocation152_spill] sm:$0xff] %v6700_v28  ;;  %v13143_v28 = vld [vmem:[#allocation49_spill] sm:$0xff] }
 0x2dd   : > { %v6702_v30 = vpop.permute.xlu0 %994  ;;  %1196 = vrot.lane.b32.xlu1 %v6432_v6, %s4945_s8 }
 0x2df   : > { %1198 = vrot.lane.b32.xlu0 %v6473_v53, %s4945_s8  ;;  %v6708_v50 = vpop.permute.xlu1 %996 }
 0x2e1   : > { %v6710_v59 = vpop.permute.xlu0 %1122  ;;  %1200 = vrot.lane.b32.xlu1 %v6484_v7, %s4945_s8  ;;  %v13139_v7 = vld [vmem:[#allocation129_spill] sm:$0xff] }
 0x2e3   : > { %1202 = vrot.lane.b32.xlu0 %v6525_v32, %s4945_s8  ;;  %v6716_v52 = vpop.permute.xlu1 %1124 }
 0x2e5   : > { %v6718_v27 = vpop.permute.xlu0 %1058  ;;  %1204 = vrot.lane.b32.xlu1 %v6536_v60, %s4945_s8  ;;  %v13141_v60 = vld [vmem:[#allocation137_spill] sm:$0xff] }
 0x2e6   : > { %13137 = vst [vmem:[#allocation153_spill] sm:$0xff] %v6718_v27  ;;  %v13140_v27 = vld [vmem:[#allocation130_spill] sm:$0xff] }
 0x2e7   : > { %1206 = vrot.lane.b32.xlu0 %v6573_v17, %s4945_s8  ;;  %v6724_v53 = vpop.permute.xlu1 %1060 }
 0x2e8   : > { %13138 = vst [vmem:[#allocation154_spill] sm:$0xff] %v6724_v53 }
 0x2e9   : > { %v6726_v6 = vpop.permute.xlu0 %998  ;;  %1208 = vrot.lane.b32.xlu1 %v6595_v26, %s4945_s8  ;;  %v13144_v26 = vld [vmem:[#allocation91_spill] sm:$0xff] }
 0x2eb   : > { %1210 = vrot.lane.b32.xlu0 %v13139_v7, %s4945_s8  ;;  %v6732_v32 = vpop.permute.xlu1 %1000 }
 0x2ed   : > { %v6734_v51 = vpop.permute.xlu0 %1126  ;;  %1212 = vrot.lane.b32.xlu1 %v13140_v27, %s4945_s8  ;;  %v13147_v27 = vld [vmem:[#allocation98_spill] sm:$0xff] }
 0x2ef   : > { %1214 = vrot.lane.b32.xlu0 %v13141_v60, %s4945_s8  ;;  %v6740_v17 = vpop.permute.xlu1 %1128 }
 0x2f1   : > { %v6742_v53 = vpop.permute.xlu0 %1062  ;;  %1216 = vrot.lane.b32.xlu1 %v13143_v28, %s4945_s8 }
 0x2f2   : > { %13142 = vst [vmem:[#allocation155_spill] sm:$0xff] %v6742_v53  ;;  %v13148_v53 = vld [vmem:[#allocation65_spill] sm:$0xff] }
 0x2f3   : > { %1218 = vrot.lane.b32.xlu0 %v13144_v26, %s4945_s8  ;;  %v6748_v7 = vpop.permute.xlu1 %1064 }
 0x2f4   : > { %13145 = vst [vmem:[#allocation156_spill] sm:$0xff] %v6748_v7  ;;  %v13150_v7 = vld [vmem:[#allocation115_spill] sm:$0xff] }
 0x2f5   : > { %v6750_v10 = vpop.permute.xlu0 %1002  ;;  %1220 = vrot.lane.b32.xlu1 %v13146_v57, %s4945_s8  ;;  %v1230_v56 = vand.u32 3, %v13150_v7  ;;  %v13152_v57 = vmov 0 }
 0x2f7   : > { %1222 = vrot.lane.b32.xlu0 %v13147_v27, %s4945_s8  ;;  %v6756_v60 = vpop.permute.xlu1 %1004  ;;  %vm6771_vm2 = vcmp.lt.s32.totalorder %v1230_v56, 2 }
 0x2f8   : > { %v13153_v57 = vsel %vm6771_vm2, 4294967295, %v13152_v57  ;;  %v1240_v7 = vsel %vm6771_vm2, %v6310_v31, %v6350_v61  ;;  %v1263_v56 = vsel %vm6771_vm2, %v6319_v43, %v6352_v36  ;;  %v1264_v19 = vsel %vm6771_vm2, %v6332_v33, %v6362_v4  ;;  %v13157_v61 = vld [vmem:[#allocation125_spill] sm:$0xff]  ;;  %v13158_v43 = vld [vmem:[#allocation126_spill] sm:$0xff] }
 0x2f9   : > { %v6758_v44 = vpop.permute.xlu0 %1130  ;;  %1224 = vrot.lane.b32.xlu1 %v13148_v53, %s4945_s8  ;;  %13154 = vst [vmem:[#allocation158_spill] sm:$0xff] %v13153_v57  ;;  %v1239_v53 = vsel %vm6771_vm2, %v6300_v46, %v6341_v23  ;;  %v13156_v46 = vld [vmem:[#allocation124_spill] sm:$0xff]  ;;  %v1241_v31 = vsel %vm6771_vm2, %v6404_v24, %v6445_v5  ;;  %v1327_v29 = vadd.f32 %v1263_v56, %v13157_v61 }
 0x2fa   : > { %v1304_v38 = vadd.f32 %v1240_v7, %v13156_v46  ;;  %v1328_v36 = vadd.f32 %v1264_v19, %v13158_v43  ;;  %v1242_v33 = vsel %vm6771_vm2, %v6414_v11, %v6454_v55  ;;  %v1265_v5 = vsel %vm6771_vm2, %v6423_v9, %v6456_v22  ;;  %v13163_v22 = vld [vmem:[#allocation133_spill] sm:$0xff] }
 0x2fb   : > { %v6762_v28 = vpop.permute.xlu1 %1132  ;;  %v1266_v19 = vsel %vm6771_vm2, %v6436_v48, %v6466_v49  ;;  %v6828_v56 = vmul.f32 0.25, %v1327_v29  ;;  %v1243_v55 = vsel %vm6771_vm2, %v6508_v41, %v6549_v58  ;;  %v1244_v48 = vsel %vm6771_vm2, %v6518_v8, %v6558_v13  ;;  %v13164_v29 = vld [vmem:[#allocation5_spill] sm:$0xff]  ;;  %v13165_v58 = vld [vmem:[#allocation134_spill] sm:$0xff]  ;;  %v13167_v13 = vld [vmem:[#allocation84_spill] sm:$0xff] }
 0x2fc   : > { %v6822_v7 = vmul.f32 0.25, %v1304_v38  ;;  %v6837_v9 = vmul.f32 0.25, %v1328_v36  ;;  %v1329_v38 = vadd.f32 %v1265_v5, %v13163_v22  ;;  %v1330_v41 = vadd.f32 %v1266_v19, %v13165_v58 }
 0x2fd   : > { %v6764_v26 = vpop.permute.xlu0 %1066  ;;  %v1245_v5 = vsel %vm6771_vm2, %v6587_v54, %v6612_v0  ;;  %v1246_v58 = vsel %vm6771_vm2, %v6599_v35, %v6618_v1  ;;  %v13175_v35 = vld [vmem:[#allocation92_spill] sm:$0xff] }
 0x2fe   : > { %13149 = vst [vmem:[#allocation157_spill] sm:$0xff] %v6764_v26  ;;  %v13155_v26 = vld [vmem:[#allocation123_spill] sm:$0xff]  ;;  %13162 = vst [vmem:[#allocation124_spill] sm:$0xff] %v6837_v9  ;;  %v6857_v36 = vmul.f32 %v6822_v7, %v6822_v7  ;;  %v6883_v54 = vmul.f32 %v6837_v9, %v6837_v9  ;;  %v1309_v1 = vadd.f32 %v1245_v5, %v13175_v35 }
 0x2ff   : > { %v6767_v2 = vpop.permute.xlu1 %1068  ;;  %v1303_v16 = vadd.f32 %v1239_v53, %v13155_v26  ;;  %v13159_v53 = vld [vmem:[#allocation131_spill] sm:$0xff]  ;;  %13160 = vst [vmem:[#allocation123_spill] sm:$0xff] %v6828_v56 }
 0x300   : > { %13151 = vst [vmem:[#allocation115_spill] sm:$0xff] %v6767_v2  ;;  %v1305_v26 = vadd.f32 %v1241_v31, %v13159_v53  ;;  %v1307_v53 = vadd.f32 %v1243_v55, %v13167_v13  ;;  %13171 = vst [vmem:[#allocation126_spill] sm:$0xff] %v6883_v54  ;;  %v6887_v31 = vmul.f32 0.25, %v1329_v38  ;;  %v1247_v13 = vsel %vm6771_vm2, %v6645_v3, %v6656_v34  ;;  %v13177_v55 = vld [vmem:[#allocation13_spill] sm:$0xff]  ;;  %v13179_v9 = vld [vmem:[#allocation63_spill] sm:$0xff] }
 0x301   : > { %v6769_v63 = vpop.permute.xlu0 %1006  ;;  %v6813_v4 = vmul.f32 0.25, %v1303_v16  ;;  %v13161_v16 = vld [vmem:[#allocation132_spill] sm:$0xff]  ;;  %v1310_v0 = vadd.f32 %v1246_v58, %v13179_v9  ;;  %v13180_v3 = vld [vmem:[#allocation17_spill] sm:$0xff]  ;;  %v13187_v58 = vld [vmem:[#allocation99_spill] sm:$0xff] }
 0x302   : > { %v1306_v11 = vadd.f32 %v1242_v33, %v13161_v16  ;;  %v6850_v61 = vmul.f32 0.25, %v1305_v26  ;;  %v13166_v33 = vld [vmem:[#allocation9_spill] sm:$0xff]  ;;  %v6868_v26 = vmul.f32 %v6828_v56, %v6828_v56  ;;  %13173 = vst [vmem:[#allocation131_spill] sm:$0xff] %v6887_v31  ;;  %v6904_v38 = vmul.f32 0.25, %v1307_v53 }
 0x303   : > { %v6775_v27 = vpop.permute.xlu1 %1008  ;;  %v6846_v49 = vmul.f32 %v6813_v4, %v6813_v4  ;;  %v13169_v16 = vld [vmem:[#allocation85_spill] sm:$0xff]  ;;  %v13183_v53 = vlaneseq  ;;  %v6926_v9 = vmul.f32 %v6887_v31, %v6887_v31 }
 0x304   : > { %13168 = vst [vmem:[#allocation125_spill] sm:$0xff] %v6868_v26  ;;  %v6870_v19 = vmul.f32 0.25, %v1306_v11  ;;  %v1308_v22 = vadd.f32 %v1244_v48, %v13169_v16  ;;  %v6891_v48 = vmul.f32 %v6850_v61, %v6850_v61  ;;  %v6893_v16 = vmul.f32 0.25, %v1330_v41  ;;  %13178 = vst [vmem:[#allocation5_spill] sm:$0xff] %v6904_v38 }
 0x305   : > { %v6777_v42 = vpop.permute.xlu0 %1134  ;;  %v1248_v41 = vsel %vm6771_vm2, %v6651_v40, %v6662_v15  ;;  %v6922_v11 = vshrl.u32 %v13183_v53, 7  ;;  %13185 = vst [vmem:[#allocation85_spill] sm:$0xff] %v6926_v9  ;;  %v1311_v26 = vadd.f32 %v1247_v13, %v13187_v58  ;;  %v6939_v53 = vmul.f32 0.25, %v1309_v1  ;;  %v13194_v1 = vld [vmem:[#allocation102_spill] sm:$0xff] }
 0x306   : > { %13174 = vst [vmem:[#allocation132_spill] sm:$0xff] %v6893_v16  ;;  %v6913_v5 = vmul.f32 %v6870_v19, %v6870_v19  ;;  %v6917_v35 = vmul.f32 0.25, %v1308_v22  ;;  %v1249_v22 = vsel %vm6771_vm2, %v6678_v39, %v6686_v14  ;;  %v6937_v34 = vmul.f32 %v6893_v16, %v6893_v16  ;;  %v13199_v39 = vld [vmem:[#allocation114_spill] sm:$0xff] }
 0x307   : > { %v6787_v2 = vpop.permute.xlu1 %1136  ;;  %13184 = vst [vmem:[#allocation84_spill] sm:$0xff] %v6922_v11  ;;  %13189 = vst [vmem:[#allocation13_spill] sm:$0xff] %v6939_v53  ;;  %v1250_v15 = vsel %vm6771_vm2, %v6684_v62, %v6692_v47  ;;  %v6952_v14 = vmul.f32 %v6904_v38, %v6904_v38  ;;  %v6956_v40 = vmul.f32 0.25, %v1310_v0  ;;  %v1251_v62 = vsel %vm6771_vm2, %v6702_v30, %v6710_v59 }
 0x308   : > { %13181 = vst [vmem:[#allocation134_spill] sm:$0xff] %v6917_v35  ;;  %13188 = vst [vmem:[#allocation92_spill] sm:$0xff] %v6937_v34  ;;  %v1657_v16 = vsub.s32 0, %v6922_v11  ;;  %v6970_v13 = vmul.f32 0.25, %v1311_v26  ;;  %v1314_v0 = vadd.f32 %v1250_v15, %v13194_v1  ;;  %v1252_v34 = vsel %vm6771_vm2, %v6708_v50, %v6716_v52  ;;  %v13198_v52 = vld [vmem:[#allocation33_spill] sm:$0xff]  ;;  %v13201_v1 = vld [vmem:[#allocation108_spill] sm:$0xff] }
 0x309   : > { %v6798_v23 = vpop.permute.xlu0 %1070  ;;  %v6985_v26 = vmul.f32 %v6939_v53, %v6939_v53  ;;  %v6993_v50 = vmul.f32 %v6956_v40, %v6956_v40  ;;  %v1253_v30 = vsel %vm6771_vm2, %v6726_v6, %v6734_v51  ;;  %v1254_v53 = vsel %vm6771_vm2, %v6732_v32, %v6740_v17  ;;  %v13204_v17 = vld [vmem:[#allocation75_spill] sm:$0xff] }
 0x30a   : > { %13193 = vst [vmem:[#allocation63_spill] sm:$0xff] %v6970_v13  ;;  %v1255_v51 = vsel %vm6771_vm2, %v6750_v10, %v6758_v44 }
 0x30b   : > { %v6806_v20 = vpop.permute.xlu1 %1072 }
 0x30d   : > { %v6820_v24 = vpop.permute.xlu0 %1010 }
 0x30f   : > { %v6835_v46 = vpop.permute.xlu1 %1012 }
 0x311   : > { %v6853_v43 = vpop.permute.xlu0 %1138 }
 0x313   : > { %v6877_v8 = vpop.permute.xlu1 %1140 }
 0x315   : > { %v6900_v56 = vpop.permute.xlu0 %1074 }
 0x316   : > { %13176 = vst [vmem:[#allocation133_spill] sm:$0xff] %v6900_v56  ;;  %v1315_v56 = vadd.f32 %v1251_v62, %v13199_v39  ;;  %v7013_v39 = vmul.f32 %v6970_v13, %v6970_v13  ;;  %v7015_v62 = vmul.f32 0.25, %v1314_v0  ;;  %v1256_v0 = vsel %vm6771_vm2, %v6756_v60, %v6762_v28  ;;  %v13246_v13 = vld [vmem:[#allocation79_spill] sm:$0xff] }
 0x317   : > { %v6919_v54 = vpop.permute.xlu1 %1076  ;;  %v1319_v60 = vadd.f32 %v1255_v51, %v6391_v25  ;;  %v1258_v28 = vsel %vm6771_vm2, %v6775_v27, %v6787_v2  ;;  %v1259_v25 = vsel %vm6771_vm2, %v6820_v24, %v6853_v43  ;;  %v1260_v27 = vsel %vm6771_vm2, %v6835_v46, %v6877_v8  ;;  %v13214_v8 = vld [vmem:[#allocation82_spill] sm:$0xff] }
 0x318   : > { %13182 = vst [vmem:[#allocation9_spill] sm:$0xff] %v6919_v54  ;;  %v1312_v54 = vadd.f32 %v1248_v41, %v6190_v45  ;;  %v6960_v45 = vmul.f32 %v6917_v35, %v6917_v35  ;;  %v13192_v41 = vld [vmem:[#allocation106_spill] sm:$0xff]  ;;  %v1322_v24 = vadd.f32 %v1258_v28, %v6450_v37  ;;  %v1323_v51 = vadd.f32 %v1259_v25, %v13214_v8 }
 0x319   : > { %v6946_v31 = vpop.permute.xlu0 %1014  ;;  %v1313_v47 = vadd.f32 %v1249_v22, %v13192_v41  ;;  %v538_v22 = vld [vmem:[%s12264_s3] sm:$0xff]  ;;  %v1693_v41 = vsub.s32 1, %v6922_v11  ;;  %13202 = vst [vmem:[#allocation106_spill] sm:$0xff] %v7015_v62  ;;  %v7092_v46 = vmul.f32 0.25, %v1319_v60  ;;  %v13220_v25 = vld [vmem:[#allocation110_spill] sm:$0xff] }
 0x31a   : > { %v6989_v9 = vmul.f32 0.25, %v1312_v54  ;;  %v1316_v54 = vadd.f32 %v1252_v34, %v13201_v1  ;;  %v7009_v59 = vrot.slane %v538_v22, %v1657_v16  ;;  %v13203_v34 = vld [vmem:[#allocation37_spill] sm:$0xff]  ;;  %v1317_v16 = vadd.f32 %v1253_v30, %v13204_v17 }
 0x31b   : > { %v6967_v58 = vpop.permute.xlu1 %1016  ;;  %v7002_v35 = vmul.f32 0.25, %v1313_v47  ;;  %v7021_v6 = vrot.slane %v538_v22, %v1693_v41  ;;  %v7038_v22 = vmul.f32 0.25, %v1315_v56  ;;  %v1318_v41 = vadd.f32 %v1254_v53, %v6346_v12  ;;  %13213 = vst [vmem:[#allocation37_spill] sm:$0xff] %v7092_v46 }
 0x31c   : > { %13197 = vst [vmem:[#allocation17_spill] sm:$0xff] %v6989_v9  ;;  %v7027_v32 = vmul.f32 %v6989_v9, %v6989_v9  ;;  %v1257_v47 = vsel %vm6771_vm2, %v6769_v63, %v6777_v42  ;;  %v7049_v17 = vmul.f32 0.25, %v1316_v54  ;;  %v7060_v42 = vmul.f32 %v7015_v62, %v7015_v62  ;;  %v13217_v62 = vld [vmem:[#allocation86_spill] sm:$0xff]  ;;  %v13235_v54 = vld [vmem:[#allocation111_spill] sm:$0xff]  ;;  %v13245_v9 = vld [vmem:[#allocation97_spill] sm:$0xff] }
 0x31d   : > { %v1143_v38 = vpop.permute.xlu0 %1142  ;;  %13200 = vst [vmem:[#allocation99_spill] sm:$0xff] %v7002_v35  ;;  %13206 = vst [vmem:[#allocation102_spill] sm:$0xff] %v7038_v22  ;;  %v7047_v30 = vmul.f32 %v7002_v35, %v7002_v35  ;;  %v1320_v63 = vadd.f32 %v1256_v0, %v6398_v21  ;;  %v7069_v10 = vmul.f32 0.25, %v1317_v16  ;;  %v1321_v2 = vadd.f32 %v1257_v47, %v6443_v18 }
 0x31e   : > { %13207 = vst [vmem:[#allocation33_spill] sm:$0xff] %v7049_v17  ;;  %v7078_v21 = vmul.f32 %v7038_v22, %v7038_v22  ;;  %v7080_v0 = vmul.f32 0.25, %v1318_v41  ;;  %v1261_v43 = vsel %vm6771_vm2, %v6946_v31, %v1143_v38  ;;  %v7090_v16 = vmul.f32 %v7049_v17, %v7049_v17  ;;  %v13218_v38 = vld [vmem:[#allocation103_spill] sm:$0xff] }
 0x31f   : > { %v1157_v15 = vpop.permute.xlu1 %1156  ;;  %13210 = vst [vmem:[#allocation114_spill] sm:$0xff] %v7069_v10  ;;  %v7099_v28 = vmul.f32 0.25, %v1320_v63  ;;  %v1324_v31 = vadd.f32 %v1260_v27, %v13217_v62  ;;  %v7107_v22 = vmul.f32 %v7069_v10, %v7069_v10  ;;  %v7109_v60 = vmul.f32 0.25, %v1321_v2 }
 0x320   : > { %13211 = vst [vmem:[#allocation108_spill] sm:$0xff] %v7080_v0  ;;  %v1268_v47 = vsel %vm6771_vm2, %v13218_v38, %v1157_v15  ;;  %v1325_v8 = vadd.f32 %v1261_v43, %v13220_v25  ;;  %v7119_v27 = vmul.f32 %v7080_v0, %v7080_v0  ;;  %v7123_v41 = vmul.f32 0.25, %v1322_v24  ;;  %v13226_v25 = vld [vmem:[#allocation95_spill] sm:$0xff]  ;;  %v13229_v0 = vld [vmem:[#allocation112_spill] sm:$0xff] }
 0x321   : > { %v7034_v1 = vpop.permute.xlu0 %1078  ;;  %13216 = vst [vmem:[#allocation75_spill] sm:$0xff] %v7099_v28  ;;  %13219 = vst [vmem:[#allocation82_spill] sm:$0xff] %v7109_v60  ;;  %v7127_v2 = vmul.f32 %v7092_v46, %v7092_v46  ;;  %v7129_v43 = vmul.f32 0.25, %v1323_v51  ;;  %v7139_v24 = vmul.f32 %v7099_v28, %v7099_v28  ;;  %v7141_v38 = vmul.f32 0.25, %v1324_v31 }
 0x322   : > { %13223 = vst [vmem:[#allocation86_spill] sm:$0xff] %v7123_v41  ;;  %v7156_v46 = vmul.f32 %v7123_v41, %v7123_v41 }
 0x323   : > { %v1145_v56 = vpop.permute.xlu1 %1144  ;;  %13224 = vst [vmem:[#allocation103_spill] sm:$0xff] %v7129_v43  ;;  %13228 = vst [vmem:[#allocation110_spill] sm:$0xff] %v7141_v38  ;;  %v7166_v51 = vmul.f32 %v7129_v43, %v7129_v43 }
 0x324   : > { %v1262_v37 = vsel %vm6771_vm2, %v6967_v58, %v1145_v56  ;;  %v13225_v58 = vld [vmem:[#allocation87_spill] sm:$0xff] }
 0x325   : > { %v1155_v53 = vpop.permute.xlu0 %1154  ;;  %v1332_v56 = vadd.f32 %v1268_v47, %v13225_v58  ;;  %v1326_v15 = vadd.f32 %v1262_v37, %v13229_v0  ;;  %v7148_v47 = vmul.f32 %v7109_v60, %v7109_v60  ;;  %v13234_v37 = vld [vmem:[#allocation89_spill] sm:$0xff]  ;;  %v13237_v58 = vld [vmem:[#allocation143_spill] sm:$0xff] }
 0x326   : > { %v1267_v62 = vsel %vm6771_vm2, %v13226_v25, %v1155_v53  ;;  %v7152_v25 = vmul.f32 0.25, %v1325_v8  ;;  %v13238_v53 = vld [vmem:[#allocation127_spill] sm:$0xff] }
 0x327   : > { %v7095_v11 = vpop.permute.xlu1 %1080  ;;  %v1331_v17 = vadd.f32 %v1267_v62, %v13234_v37  ;;  %v7168_v8 = vmul.f32 0.25, %v1332_v56  ;;  %v7178_v37 = vmul.f32 %v7141_v38, %v7141_v38 }
 0x328   : > { %13232 = vst [vmem:[#allocation87_spill] sm:$0xff] %v7152_v25 }
 0x329   : > { %v1159_v63 = vpop.permute.xlu0 %1158  ;;  %13236 = vst [vmem:[#allocation95_spill] sm:$0xff] %v7168_v8 }
 0x32a   : > { %v1269_v60 = vsel %vm6771_vm2, %v13237_v58, %v1159_v63 }
 0x32b   : > { %v1161_v10 = vpop.permute.xlu1 %1160  ;;  %v1333_v44 = vadd.f32 %v1269_v60, %v13245_v9  ;;  %v13250_v60 = vld [vmem:[#allocation144_spill] sm:$0xff] }
 0x32d   : > { %v1163_v18 = vpop.permute.xlu0 %1162  ;;  %v7226_v41 = vmul.f32 0.25, %v1333_v44 }
 0x32e   : > { %v1271_v28 = vsel %vm6771_vm2, %v13235_v54, %v1163_v18  ;;  %v7180_v54 = vmul.f32 0.25, %v1326_v15  ;;  %v13241_v18 = vld [vmem:[#allocation117_spill] sm:$0xff]  ;;  %v7194_v15 = vmul.f32 0.25, %v1331_v17 }
 0x32f   : > { %v1335_v35 = vadd.f32 %v1271_v28, %v13238_v53  ;;  %v1165_v12 = vpop.permute.xlu1 %1164  ;;  %v7189_v28 = vmul.f32 %v7152_v25, %v7152_v25  ;;  %v13243_v53 = vld [vmem:[#allocation128_spill] sm:$0xff] }
 0x330   : > { %13240 = vst [vmem:[#allocation112_spill] sm:$0xff] %v7180_v54  ;;  %v1272_v56 = vsel %vm6771_vm2, %v13241_v18, %v1165_v12  ;;  %v7202_v18 = vmul.f32 %v7168_v8, %v7168_v8  ;;  %v7210_v9 = vmul.f32 %v7180_v54, %v7180_v54  ;;  %v7224_v0 = vmul.f32 %v7194_v15, %v7194_v15  ;;  %v13258_v54 = vld [vmem:[#allocation96_spill] sm:$0xff] }
 0x331   : > { %v1399_v63 = vmul.f32 0.25, %v1335_v35  ;;  %v1336_v58 = vadd.f32 %v1272_v56, %v13243_v53  ;;  %v1167_v62 = vpop.permute.xlu0 %1166  ;;  %v13248_v56 = vld [vmem:[#allocation135_spill] sm:$0xff] }
 0x332   : > { %v1273_v12 = vsel %vm6771_vm2, %v13246_v13, %v1167_v62  ;;  %13247 = vst [vmem:[#allocation89_spill] sm:$0xff] %v7202_v18  ;;  %v1270_v13 = vsel %vm6771_vm2, %v13250_v60, %v1161_v10  ;;  %v13251_v62 = vld [vmem:[#allocation81_spill] sm:$0xff]  ;;  %13254 = vst [vmem:[#allocation111_spill] sm:$0xff] %v7224_v0  ;;  %v13255_v10 = vld [vmem:[#allocation138_spill] sm:$0xff] }
 0x333   : > { %v1463_v35 = vsub.f32 %v1399_v63, %v6846_v49  ;;  %v1400_v31 = vmul.f32 0.25, %v1336_v58  ;;  %v1337_v53 = vadd.f32 %v1273_v12, %v13248_v56  ;;  %v1169_v38 = vpop.permute.xlu1 %1168  ;;  %v13252_v12 = vld [vmem:[#allocation136_spill] sm:$0xff]  ;;  %v13259_v18 = vld [vmem:[#allocation139_spill] sm:$0xff] }
 0x334   : > { %v1274_v25 = vsel %vm6771_vm2, %v13251_v62, %v1169_v38  ;;  %v13264_v62 = vld [vmem:[#allocation104_spill] sm:$0xff] }
 0x335   : > { %v1495_v49 = vmax.f32 %v1463_v35, 0.0  ;;  %v1464_v63 = vsub.f32 %v1400_v31, %v6857_v36  ;;  %v1401_v58 = vmul.f32 0.25, %v1337_v53  ;;  %v1338_v56 = vadd.f32 %v1274_v25, %v13252_v12  ;;  %v1171_v43 = vpop.permute.xlu0 %1170  ;;  %v13256_v53 = vld [vmem:[#allocation22_spill] sm:$0xff] }
 0x336   : > { %v1275_v38 = vsel %vm6771_vm2, %v13255_v10, %v1171_v43  ;;  %v13257_v12 = vld [vmem:[#allocation94_spill] sm:$0xff] }
 0x337   : > { %v1559_v35 = vadd.f32 1e-05, %v1495_v49  ;;  %v1496_v60 = vmax.f32 %v1464_v63, 0.0  ;;  %v1465_v36 = vsub.f32 %v1401_v58, %v6891_v48  ;;  %v1402_v31 = vmul.f32 0.25, %v1338_v56  ;;  %v1173_v25 = vpop.permute.xlu1 %1172  ;;  %v13260_v56 = vld [vmem:[#allocation90_spill] sm:$0xff] }
 0x338   : > { %v1334_v8 = vadd.f32 %v1270_v13, %v13257_v12  ;;  %v1339_v17 = vadd.f32 %v1275_v38, %v13258_v54  ;;  %v1276_v44 = vsel %vm6771_vm2, %v13259_v18, %v1173_v25  ;;  %v7242_v48 = vmul.f32 %v7226_v41, %v7226_v41  ;;  %v13261_v13 = vld [vmem:[#allocation145_spill] sm:$0xff]  ;;  %v13263_v12 = vld [vmem:[#allocation146_spill] sm:$0xff] }
 0x339   : > { %4683 = vrsqrt.f32 %v1559_v35  ;;  %v1560_v0 = vadd.f32 1e-05, %v1496_v60  ;;  %v1497_v43 = vmax.f32 %v1465_v36, 0.0  ;;  %v1466_v49 = vsub.f32 %v1402_v31, %v6913_v5  ;;  %v1175_v63 = vpop.permute.xlu0 %1174  ;;  %v13262_v35 = vld [vmem:[#allocation64_spill] sm:$0xff] }
 0x33a   : > { %v1403_v58 = vmul.f32 0.25, %v1339_v17  ;;  %v1340_v10 = vadd.f32 %v1276_v44, %v13260_v56  ;;  %v1277_v54 = vsel %vm6771_vm2, %v13261_v13, %v1175_v63  ;;  %v7249_v25 = vmul.f32 0.25, %v1334_v8 }
 0x33b   : > { %4685 = vrsqrt.f32 %v1560_v0  ;;  %v1561_v38 = vadd.f32 1e-05, %v1497_v43  ;;  %v1498_v18 = vmax.f32 %v1466_v49, 0.0  ;;  %v1341_v60 = vadd.f32 %v1277_v54, %v13262_v35  ;;  %v1177_v36 = vpop.permute.xlu1 %1176  ;;  %v13265_v43 = vld [vmem:[#allocation30_spill] sm:$0xff]  ;;  %v13266_v54 = vld [vmem:[#allocation149_spill] sm:$0xff] }
 0x33c   : > { %v1467_v5 = vsub.f32 %v1403_v58, %v6952_v14  ;;  %v1404_v31 = vmul.f32 0.25, %v1340_v10  ;;  %v1278_v17 = vsel %vm6771_vm2, %v13263_v12, %v1177_v36 }
 0x33d   : > { %4687 = vrsqrt.f32 %v1561_v38  ;;  %v1562_v44 = vadd.f32 1e-05, %v1498_v18  ;;  %v1405_v56 = vmul.f32 0.25, %v1341_v60  ;;  %v1342_v63 = vadd.f32 %v1278_v17, %v13264_v62  ;;  %v1179_v0 = vpop.permute.xlu0 %1178  ;;  %v13267_v38 = vld [vmem:[#allocation105_spill] sm:$0xff] }
 0x33e   : > { %v1499_v13 = vmax.f32 %v1467_v5, 0.0  ;;  %v1468_v8 = vsub.f32 %v1404_v31, %v6960_v45  ;;  %v1279_v14 = vsel %vm6771_vm2, %v13266_v54, %v1179_v0  ;;  %v7266_v62 = vmul.f32 %v7249_v25, %v7249_v25  ;;  %v13268_v5 = vld [vmem:[#allocation150_spill] sm:$0xff] }
 0x33f   : > { %4689 = vrsqrt.f32 %v1562_v44  ;;  %v1469_v58 = vsub.f32 %v1405_v56, %v6985_v26  ;;  %v1406_v10 = vmul.f32 0.25, %v1342_v63  ;;  %v1343_v18 = vadd.f32 %v1279_v14, %v13267_v38  ;;  %v1181_v35 = vpop.permute.xlu1 %1180  ;;  %v13269_v44 = vld [vmem:[#allocation100_spill] sm:$0xff]  ;;  %v13270_v63 = vld [vmem:[#allocation34_spill] sm:$0xff]  ;;  %v13271_v14 = vld [vmem:[#allocation151_spill] sm:$0xff] }
 0x340   : > { %v1563_v60 = vadd.f32 1e-05, %v1499_v13  ;;  %v1500_v36 = vmax.f32 %v1468_v8, 0.0  ;;  %v1280_v45 = vsel %vm6771_vm2, %v13268_v5, %v1181_v35  ;;  %v1558_v0 = vsub.f32 %v13270_v63, %v7249_v25  ;;  %v13273_v5 = vld [vmem:[#allocation152_spill] sm:$0xff] }
 0x341   : > { %v1501_v31 = vmax.f32 %v1469_v58, 0.0  ;;  %v1470_v12 = vsub.f32 %v1406_v10, %v6993_v50  ;;  %v1407_v17 = vmul.f32 0.25, %v1343_v18  ;;  %v1344_v26 = vadd.f32 %v1280_v45, %v13269_v44  ;;  %v1183_v56 = vpop.permute.xlu0 %1182  ;;  %v13272_v10 = vld [vmem:[#allocation113_spill] sm:$0xff] }
 0x342   : > { %4691 = vrsqrt.f32 %v1563_v60  ;;  %v1564_v54 = vadd.f32 1e-05, %v1500_v36  ;;  %v1281_v13 = vsel %vm6771_vm2, %v13271_v14, %v1183_v56  ;;  %v13274_v60 = vsub.f32 %v13164_v29, %v6813_v4  ;;  %v13276_v14 = vld [vmem:[#allocation153_spill] sm:$0xff] }
 0x343   : > { %v4684_v8 = vpop.eup %4683  ;;  %v1565_v38 = vadd.f32 1e-05, %v1501_v31  ;;  %v1502_v49 = vmax.f32 %v1470_v12, 0.0  ;;  %v1471_v58 = vsub.f32 %v1407_v17, %v7013_v39  ;;  %v1408_v35 = vmul.f32 0.25, %v1344_v26  ;;  %v1185_v50 = vpop.permute.xlu1 %1184  ;;  %v13275_v26 = vld [vmem:[#allocation107_spill] sm:$0xff] }
 0x344   : > { %4693 = vrsqrt.f32 %v1564_v54  ;;  %v1345_v18 = vadd.f32 %v1281_v13, %v13272_v10  ;;  %v1282_v45 = vsel %vm6771_vm2, %v13273_v5, %v1185_v50  ;;  %v1623_v36 = vmul.f32 %v4684_v8, %v13274_v60 }
 0x345   : > { %v4686_v44 = vpop.eup %4685  ;;  %4695 = vrsqrt.f32 %v1565_v38  ;;  %v1566_v56 = vadd.f32 1e-05, %v1502_v49  ;;  %v1503_v31 = vmax.f32 %v1471_v58, 0.0  ;;  %v1472_v12 = vsub.f32 %v1408_v35, %v7027_v32  ;;  %v1187_v39 = vpop.permute.xlu0 %1186  ;;  %v13278_v49 = vld [vmem:[#allocation72_spill] sm:$0xff] }
 0x346   : > { %v1409_v17 = vmul.f32 0.25, %v1345_v18  ;;  %v1346_v54 = vadd.f32 %v1282_v45, %v13275_v26  ;;  %v1283_v13 = vsel %vm6771_vm2, %v13276_v14, %v1187_v39  ;;  %v13277_v50 = vsub.f32 %v13166_v33, %v6822_v7  ;;  %v13280_v45 = vld [vmem:[#allocation154_spill] sm:$0xff] }
 0x347   : > { %v4688_v4 = vpop.eup %4687  ;;  %4697 = vrsqrt.f32 %v1566_v56  ;;  %v1567_v29 = vadd.f32 1e-05, %v1503_v31  ;;  %v1504_v8 = vmax.f32 %v1472_v12, 0.0  ;;  %v1347_v38 = vadd.f32 %v1283_v13, %v13278_v49  ;;  %v1189_v58 = vpop.permute.xlu1 %1188  ;;  %v13281_v56 = vld [vmem:[#allocation109_spill] sm:$0xff]  ;;  %v13284_v13 = vld [vmem:[#allocation116_spill] sm:$0xff] }
 0x348   : > { %v1624_v10 = vmul.f32 %v4686_v44, %v13277_v50  ;;  %v13279_v32 = vsub.f32 %v13177_v55, %v6850_v61  ;;  %v1473_v18 = vsub.f32 %v1409_v17, %v7047_v30  ;;  %v1410_v5 = vmul.f32 0.25, %v1346_v54  ;;  %v13283_v17 = vld [vmem:[#allocation155_spill] sm:$0xff] }
 0x349   : > { %v1284_v7 = vsel %vm6771_vm2, %v13280_v45, %v1189_v58  ;;  %v4690_v33 = vpop.eup %4689  ;;  %4699 = vrsqrt.f32 %v1567_v29  ;;  %v1568_v60 = vadd.f32 1e-05, %v1504_v8  ;;  %v1411_v44 = vmul.f32 0.25, %v1347_v38  ;;  %v1191_v12 = vpop.permute.xlu0 %1190 }
 0x34a   : > { %v7298_v35 = vmul.f32 %v4688_v4, %v13279_v32  ;;  %v1348_v31 = vadd.f32 %v1284_v7, %v13281_v56  ;;  %v13282_v39 = vsub.f32 %v13180_v3, %v6870_v19  ;;  %v1505_v55 = vmax.f32 %v1473_v18, 0.0  ;;  %v13285_v3 = vld [vmem:[#allocation156_spill] sm:$0xff] }
 0x34b   : > { %v1474_v30 = vsub.f32 %v1410_v5, %v7060_v42  ;;  %v1285_v26 = vsel %vm6771_vm2, %v13283_v17, %v1191_v12  ;;  %4701 = vrsqrt.f32 %v1568_v60  ;;  %v1475_v54 = vsub.f32 %v1411_v44, %v7078_v21  ;;  %v1193_v4 = vpop.permute.xlu1 %1192  ;;  %v13286_v18 = vld [vmem:[#allocation76_spill] sm:$0xff]  ;;  %v13289_v17 = vld [vmem:[#allocation115_spill] sm:$0xff] }
 0x34c   : > { %v7308_v61 = vmul.f32 %v4690_v33, %v13282_v39  ;;  %v1412_v14 = vmul.f32 0.25, %v1348_v31  ;;  %v1349_v50 = vadd.f32 %v1285_v26, %v13284_v13  ;;  %v7316_v29 = vpop.eup %4691  ;;  %v1569_v8 = vadd.f32 1e-05, %v1505_v55  ;;  %v13287_v33 = vld [vmem:[#allocation157_spill] sm:$0xff]  ;;  %v13288_v55 = vld [vmem:[#allocation118_spill] sm:$0xff] }
 0x34d   : > { %v1506_v19 = vmax.f32 %v1474_v30, 0.0  ;;  %v1286_v49 = vsel %vm6771_vm2, %v13285_v3, %v1193_v4  ;;  %v1659_v42 = vmul.f32 %v7009_v59, %v1623_v36  ;;  %v1507_v38 = vmax.f32 %v1475_v54, 0.0  ;;  %v1195_v5 = vpop.permute.xlu0 %1194 }
 0x34e   : > { %v1476_v58 = vsub.f32 %v1412_v14, %v7090_v16  ;;  %v1413_v32 = vmul.f32 0.25, %v1349_v50  ;;  %v1350_v21 = vadd.f32 %v1286_v49, %v13286_v18  ;;  %v7324_v45 = vpop.eup %4693  ;;  %4703 = vrsqrt.f32 %v1569_v8  ;;  %v13290_v8 = vld [vmem:[#allocation122_spill] sm:$0xff] }
 0x34f   : > { %v1570_v7 = vadd.f32 1e-05, %v1506_v19  ;;  %v1287_v60 = vsel %vm6771_vm2, %v13287_v33, %v1195_v5  ;;  %v1660_v44 = vmul.f32 %v7009_v59, %v1624_v10  ;;  %v7330_v56 = vpop.eup %4695  ;;  %v1571_v36 = vadd.f32 1e-05, %v1507_v38  ;;  %v1197_v39 = vpop.permute.xlu1 %1196 }
 0x350   : > { %v1508_v31 = vmax.f32 %v1476_v58, 0.0  ;;  %v1477_v16 = vsub.f32 %v1413_v32, %v7107_v22  ;;  %v1414_v12 = vmul.f32 0.25, %v1350_v21  ;;  %v1351_v30 = vadd.f32 %v1287_v60, %v13288_v55  ;;  %v13292_v55 = vld [vmem:[#allocation80_spill] sm:$0xff] }
 0x351   : > { %4705 = vrsqrt.f32 %v1570_v7  ;;  %v1288_v26 = vsel %vm6771_vm2, %v13289_v17, %v1197_v39  ;;  %v1695_v54 = vadd.f32 %v7021_v6, %v1659_v42  ;;  %v7338_v14 = vpop.eup %4697  ;;  %v1199_v4 = vpop.permute.xlu0 %1198  ;;  %v1696_v3 = vadd.f32 %v7021_v6, %v1660_v44  ;;  %v13291_v7 = vld [vmem:[#allocation78_spill] sm:$0xff] }
 0x352   : > { %4707 = vrsqrt.f32 %v1571_v36  ;;  %v1572_v10 = vadd.f32 1e-05, %v1508_v31  ;;  %v1509_v13 = vmax.f32 %v1477_v16, 0.0  ;;  %v1478_v50 = vsub.f32 %v1414_v12, %v7119_v27 }
 0x353   : > { %v1415_v22 = vmul.f32 0.25, %v1351_v30  ;;  %v1352_v19 = vadd.f32 %v1288_v26, %v13290_v8  ;;  %v1727_v49 = vmax.f32 %v1695_v54, 0.0  ;;  %v7343_v38 = vpop.eup %4699  ;;  %v1289_v42 = vsel %vm6771_vm2, %v6798_v23, %v1199_v4  ;;  %v1201_v18 = vpop.permute.xlu1 %1200 }
 0x354   : > { %4709 = vrsqrt.f32 %v1572_v10  ;;  %v1573_v58 = vadd.f32 1e-05, %v1509_v13  ;;  %v1510_v32 = vmax.f32 %v1478_v50, 0.0  ;;  %v1728_v5 = vmax.f32 %v1696_v3, 0.0  ;;  %v13293_v50 = vld [vmem:[#allocation133_spill] sm:$0xff] }
 0x355   : > { %v1479_v21 = vsub.f32 %v1415_v22, %v7127_v2  ;;  %v1416_v27 = vmul.f32 0.25, %v1352_v19  ;;  %v1353_v33 = vadd.f32 %v1289_v42, %v13291_v7  ;;  %v7350_v60 = vpop.eup %4701  ;;  %v1290_v36 = vsel %vm6771_vm2, %v6806_v20, %v1201_v18  ;;  %v1203_v16 = vpop.permute.xlu0 %1202  ;;  %v13294_v19 = vld [vmem:[#allocation93_spill] sm:$0xff] }
 0x356   : > { %4711 = vrsqrt.f32 %v1573_v58  ;;  %v1574_v44 = vadd.f32 1e-05, %v1510_v32  ;;  %v1661_v31 = vmul.f32 %v7009_v59, %v7298_v35  ;;  %v1759_v2 = vpack.c.bf16 %v1728_v5, %v1727_v49  ;;  %v13295_v42 = vld [vmem:[#allocation9_spill] sm:$0xff] }
 0x357   : > { %v1511_v23 = vmax.f32 %v1479_v21, 0.0  ;;  %v1480_v12 = vsub.f32 %v1416_v27, %v7139_v24  ;;  %v1417_v39 = vmul.f32 0.25, %v1353_v33  ;;  %v1354_v30 = vadd.f32 %v1290_v36, %v13292_v55  ;;  %v1205_v54 = vpop.permute.xlu1 %1204  ;;  %v13296_v7 = vld [vmem:[#allocation101_spill] sm:$0xff] }
 0x358   : > { %4713 = vrsqrt.f32 %v1574_v44  ;;  %v1662_v17 = vmul.f32 %v7009_v59, %v7308_v61  ;;  %v1697_v26 = vadd.f32 %v7021_v6, %v1661_v31  ;;  %v7362_v10 = vpop.eup %4703  ;;  %4577 = vmatprep.mubr.bf16.mxu1 %v1759_v2  ;;  %v1291_v24 = vsel %vm6771_vm2, %v13293_v50, %v1203_v16  ;;  %v13297_v36 = vld [vmem:[#allocation21_spill] sm:$0xff]  ;;  %v13301_v2 = vld [vmem:[#allocation134_spill] sm:$0xff] }
 0x359   : > { %v1575_v20 = vadd.f32 1e-05, %v1511_v23  ;;  %v1512_v13 = vmax.f32 %v1480_v12, 0.0  ;;  %v1481_v35 = vsub.f32 %v1417_v39, %v7148_v47  ;;  %v1418_v4 = vmul.f32 0.25, %v1354_v30  ;;  %v1207_v3 = vpop.permute.xlu0 %1206  ;;  %v13298_v31 = vld [vmem:[#allocation5_spill] sm:$0xff] }
 0x35a   : > { %v1698_v22 = vadd.f32 %v7021_v6, %v1662_v17  ;;  %v1729_v8 = vmax.f32 %v1697_v26, 0.0  ;;  %v1355_v61 = vadd.f32 %v1291_v24, %v13294_v19  ;;  %v1292_v47 = vsel %vm6771_vm2, %v13295_v42, %v1205_v54  ;;  %v13300_v12 = vld [vmem:[#allocation25_spill] sm:$0xff] }
 0x35b   : > { %v7370_v49 = vpop.eup %4705  ;;  %4715 = vrsqrt.f32 %v1575_v20  ;;  %v1576_v58 = vadd.f32 1e-05, %v1512_v13  ;;  %v1513_v32 = vmax.f32 %v1481_v35, 0.0  ;;  %v1482_v21 = vsub.f32 %v1418_v4, %v7156_v46  ;;  %v1209_v30 = vpop.permute.xlu1 %1208 }
 0x35c   : > { %v7375_v18 = vpop.eup %4707  ;;  %v1730_v27 = vmax.f32 %v1698_v22, 0.0  ;;  %v1419_v5 = vmul.f32 0.25, %v1355_v61  ;;  %v1356_v33 = vadd.f32 %v1292_v47, %v13296_v7  ;;  %v13299_v16 = vsub.f32 %v13297_v36, %v13298_v31  ;;  %v13303_v22 = vld [vmem:[#allocation119_spill] sm:$0xff] }
 0x35d   : > { %4717 = vrsqrt.f32 %v1576_v58  ;;  %v1577_v44 = vadd.f32 1e-05, %v1513_v32  ;;  %v13302_v39 = vsub.f32 %v13300_v12, %v13301_v2  ;;  %v1514_v46 = vmax.f32 %v1482_v21, 0.0  ;;  %v13304_v32 = vld [vmem:[#allocation29_spill] sm:$0xff] }
 0x35e   : > { %v1627_v23 = vmul.f32 %v7316_v29, %v13299_v16  ;;  %v7387_v17 = vpop.eup %4709  ;;  %v1760_v26 = vpack.c.bf16 %v1730_v27, %v1729_v8  ;;  %v1483_v54 = vsub.f32 %v1419_v5, %v7166_v51  ;;  %v1420_v20 = vmul.f32 0.25, %v1356_v33  ;;  %v1211_v51 = vpop.permute.xlu0 %1210  ;;  %v13307_v33 = vld [vmem:[#allocation142_spill] sm:$0xff] }
 0x35f   : > { %v1628_v55 = vmul.f32 %v7324_v45, %v13302_v39  ;;  %4719 = vrsqrt.f32 %v1577_v44  ;;  %v1293_v29 = vsel %vm6771_vm2, %v7034_v1, %v1207_v3  ;;  %v1578_v45 = vadd.f32 1e-05, %v1514_v46  ;;  %v13305_v1 = vld [vmem:[#allocation13_spill] sm:$0xff]  ;;  %v1213_v31 = vpop.permute.xlu1 %1212 }
 0x360   : > { %v1663_v13 = vmul.f32 %v7009_v59, %v1627_v23  ;;  %v7395_v50 = vpop.eup %4711  ;;  %4578 = vmatmul.mubr.bf16.vlgmr.msra.gmra.mrb[16].mxu1 %v1760_v26  ;;  %v1515_v24 = vmax.f32 %v1483_v54, 0.0  ;;  %v1484_v4 = vsub.f32 %v1420_v20, %v7178_v37  ;;  %v1357_v8 = vadd.f32 %v1293_v29, %v13303_v22 }
 0x361   : > { %v1664_v35 = vmul.f32 %v7009_v59, %v1628_v55  ;;  %v1294_v58 = vsel %vm6771_vm2, %v7095_v11, %v1209_v30  ;;  %v13306_v3 = vsub.f32 %v13304_v32, %v13305_v1  ;;  %4721 = vrsqrt.f32 %v1578_v45  ;;  %v13309_v30 = vld [vmem:[#allocation77_spill] sm:$0xff]  ;;  %v13312_v45 = vld [vmem:[#allocation63_spill] sm:$0xff] }
 0x362   : > { %v1699_v19 = vadd.f32 %v7021_v6, %v1663_v13  ;;  %v7408_v47 = vpop.eup %4713  ;;  %v1579_v37 = vadd.f32 1e-05, %v1515_v24  ;;  %v1516_v21 = vmax.f32 %v1484_v4, 0.0  ;;  %v1421_v27 = vmul.f32 0.25, %v1357_v8  ;;  %v1215_v54 = vpop.permute.xlu0 %1214  ;;  %v13315_v1 = vld [vmem:[#allocation39_spill] sm:$0xff] }
 0x363   : > { %v1700_v61 = vadd.f32 %v7021_v6, %v1664_v35  ;;  %v1629_v42 = vmul.f32 %v7330_v56, %v13306_v3  ;;  %v1358_v44 = vadd.f32 %v1294_v58, %v13307_v33  ;;  %v13308_v36 = vsub.f32 %v13198_v52, %v6956_v40  ;;  %v13311_v35 = vld [vmem:[#allocation121_spill] sm:$0xff] }
 0x364   : > { %v1731_v5 = vmax.f32 %v1699_v19, 0.0  ;;  %4723 = vrsqrt.f32 %v1579_v37  ;;  %v1580_v16 = vadd.f32 1e-05, %v1516_v21  ;;  %v1485_v56 = vsub.f32 %v1421_v27, %v7189_v28  ;;  %v13314_v19 = vld [vmem:[#allocation130_spill] sm:$0xff]  ;;  %v13316_v3 = vld [vmem:[#allocation17_spill] sm:$0xff]  ;;  %v1217_v27 = vpop.permute.xlu1 %1216 }
 0x365   : > { %v1732_v7 = vmax.f32 %v1700_v61, 0.0  ;;  %v1630_v11 = vmul.f32 %v7338_v14, %v13308_v36  ;;  %v1665_v23 = vmul.f32 %v7009_v59, %v1629_v42  ;;  %v7417_v12 = vpop.eup %4715  ;;  %v1422_v39 = vmul.f32 0.25, %v1358_v44  ;;  %v13310_v14 = vld [vmem:[#allocation129_spill] sm:$0xff] }
 0x366   : > { %v1295_v46 = vsel %vm6771_vm2, %v13309_v30, %v1211_v51  ;;  %4725 = vrsqrt.f32 %v1580_v16  ;;  %v1517_v40 = vmax.f32 %v1485_v56, 0.0  ;;  %v1296_v29 = vsel %vm6771_vm2, %v13311_v35, %v1213_v31  ;;  %v13320_v56 = vld [vmem:[#allocation126_spill] sm:$0xff] }
 0x367   : > { %v1761_v2 = vpack.c.bf16 %v1732_v7, %v1731_v5  ;;  %v1666_v55 = vmul.f32 %v7009_v59, %v1630_v11  ;;  %v1701_v52 = vadd.f32 %v7021_v6, %v1665_v23  ;;  %v1359_v26 = vadd.f32 %v1295_v46, %v13310_v14  ;;  %v7425_v28 = vpop.eup %4717  ;;  %v13319_v7 = vld [vmem:[#allocation83_spill] sm:$0xff]  ;;  %v1219_v46 = vpop.permute.xlu0 %1218  ;;  %v13323_v14 = vld [vmem:[#allocation49_spill] sm:$0xff] }
 0x368   : > { %v1486_v20 = vsub.f32 %v1422_v39, %v7210_v9  ;;  %v13313_v24 = vsub.f32 %v13203_v34, %v13312_v45  ;;  %v1581_v22 = vadd.f32 1e-05, %v1517_v40  ;;  %v1360_v61 = vadd.f32 %v1296_v29, %v13314_v19  ;;  %v13318_v34 = vld [vmem:[#allocation125_spill] sm:$0xff]  ;;  %v13325_v45 = vld [vmem:[#allocation99_spill] sm:$0xff]  ;;  %v13328_v19 = vld [vmem:[#allocation106_spill] sm:$0xff] }
 0x369   : > { %4581 = vmatprep.mubr.bf16.mxu1 %v1761_v2  ;;  %v1702_v13 = vadd.f32 %v7021_v6, %v1666_v55  ;;  %v1733_v8 = vmax.f32 %v1701_v52, 0.0  ;;  %v1423_v51 = vmul.f32 0.25, %v1359_v26  ;;  %v7437_v58 = vpop.eup %4719  ;;  %v13317_v42 = vsub.f32 %v13315_v1, %v13316_v3  ;;  %v13321_v2 = vld [vmem:[#allocation137_spill] sm:$0xff]  ;;  %v13322_v55 = vld [vmem:[#allocation88_spill] sm:$0xff]  ;;  %v1221_v3 = vpop.permute.xlu1 %1220 }
 0x36a   : > { %v1631_v4 = vmul.f32 %v7343_v38, %v13313_v24  ;;  %v1518_v32 = vmax.f32 %v1486_v20, 0.0  ;;  %4727 = vrsqrt.f32 %v1581_v22  ;;  %v1424_v5 = vmul.f32 0.25, %v1360_v61  ;;  %v13324_v29 = vld [vmem:[#allocation41_spill] sm:$0xff] }
 0x36b   : > { %v1734_v9 = vmax.f32 %v1702_v13, 0.0  ;;  %v1632_v37 = vmul.f32 %v7350_v60, %v13317_v42  ;;  %v1487_v38 = vsub.f32 %v1423_v51, %v13318_v34  ;;  %v1297_v33 = vsel %vm6771_vm2, %v13319_v7, %v1215_v54  ;;  %v7450_v16 = vpop.eup %4721  ;;  %v13327_v51 = vld [vmem:[#allocation43_spill] sm:$0xff] }
 0x36c   : > { %v1667_v21 = vmul.f32 %v7009_v59, %v1631_v4  ;;  %v1582_v44 = vadd.f32 1e-05, %v1518_v32  ;;  %v1488_v23 = vsub.f32 %v1424_v5, %v13320_v56  ;;  %v1361_v39 = vadd.f32 %v1297_v33, %v13321_v2  ;;  %v13333_v33 = vld [vmem:[#allocation91_spill] sm:$0xff]  ;;  %v13335_v2 = vld [vmem:[#allocation60_spill] sm:$0xff] }
 0x36d   : > { %v1762_v36 = vpack.c.bf16 %v1734_v9, %v1733_v8  ;;  %v1668_v11 = vmul.f32 %v7009_v59, %v1632_v37  ;;  %v1519_v60 = vmax.f32 %v1487_v38, 0.0  ;;  %v1298_v30 = vsel %vm6771_vm2, %v13322_v55, %v1217_v27  ;;  %v13330_v9 = vld [vmem:[#allocation140_spill] sm:$0xff]  ;;  %v1223_v55 = vpop.permute.xlu0 %1222 }
 0x36e   : > { %v1703_v31 = vadd.f32 %v7021_v6, %v1667_v21  ;;  %4729 = vrsqrt.f32 %v1582_v44  ;;  %v1362_v26 = vadd.f32 %v1298_v30, %v13323_v14  ;;  %v7459_v54 = vpop.eup %4723  ;;  %v1520_v13 = vmax.f32 %v1488_v23, 0.0  ;;  %v13331_v21 = vld [vmem:[#allocation85_spill] sm:$0xff]  ;;  %v13332_v38 = vld [vmem:[#allocation92_spill] sm:$0xff]  ;;  %v13337_v14 = vld [vmem:[#allocation102_spill] sm:$0xff] }
 0x36f   : > { %4582 = vmatmul.mubr.bf16.gmra.mrb[20].mxu1 %v1762_v36  ;;  %v1704_v40 = vadd.f32 %v7021_v6, %v1668_v11  ;;  %v1583_v20 = vadd.f32 1e-05, %v1519_v60  ;;  %v1425_v35 = vmul.f32 0.25, %v1361_v39  ;;  %v13326_v24 = vsub.f32 %v13324_v29, %v13325_v45  ;;  %v13334_v11 = vld [vmem:[#allocation141_spill] sm:$0xff] }
 0x370   : > { %v1735_v52 = vmax.f32 %v1703_v31, 0.0  ;;  %v1426_v8 = vmul.f32 0.25, %v1362_v26  ;;  %v13329_v61 = vsub.f32 %v13327_v51, %v13328_v19  ;;  %v1299_v1 = vsel %vm6771_vm2, %v13330_v9, %v1219_v46  ;;  %v7472_v42 = vpop.eup %4725  ;;  %v1225_v19 = vpop.permute.xlu1 %1224  ;;  %v13343_v9 = vld [vmem:[#allocation147_spill] sm:$0xff] }
 0x371   : > { %v1633_v4 = vmul.f32 %v7362_v10, %v13326_v24  ;;  %v1736_v22 = vmax.f32 %v1704_v40, 0.0  ;;  %4731 = vrsqrt.f32 %v1583_v20  ;;  %v1584_v37 = vadd.f32 1e-05, %v1520_v13  ;;  %v13339_v13 = vld [vmem:[#allocation47_spill] sm:$0xff] }
 0x372   : > { %v1634_v32 = vmul.f32 %v7370_v49, %v13329_v61  ;;  %v1489_v27 = vsub.f32 %v1425_v35, %v13331_v21  ;;  %v1490_v5 = vsub.f32 %v1426_v8, %v13332_v38  ;;  %v1363_v49 = vadd.f32 %v1299_v1, %v13333_v33  ;;  %v13340_v35 = vld [vmem:[#allocation33_spill] sm:$0xff] }
 0x373   : > { %v1669_v10 = vmul.f32 %v7009_v59, %v1633_v4  ;;  %v1763_v34 = vpack.c.bf16 %v1736_v22, %v1735_v52  ;;  %4733 = vrsqrt.f32 %v1584_v37  ;;  %v1300_v31 = vsel %vm6771_vm2, %v13334_v11, %v1221_v3  ;;  %v13336_v52 = vld [vmem:[#allocation45_spill] sm:$0xff]  ;;  %v13342_v22 = vld [vmem:[#allocation111_spill] sm:$0xff]  ;;  %v13348_v11 = vld [vmem:[#allocation50_spill] sm:$0xff] }
 0x374   : > { %v1670_v7 = vmul.f32 %v7009_v59, %v1634_v32  ;;  %v1521_v44 = vmax.f32 %v1489_v27, 0.0  ;;  %v1522_v60 = vmax.f32 %v1490_v5, 0.0  ;;  %v1427_v23 = vmul.f32 0.25, %v1363_v49  ;;  %v7485_v30 = vpop.eup %4727  ;;  %v13344_v37 = vld [vmem:[#allocation89_spill] sm:$0xff]  ;;  %v13346_v5 = vld [vmem:[#allocation148_spill] sm:$0xff] }
 0x375   : > { %v1705_v36 = vadd.f32 %v7021_v6, %v1669_v10  ;;  %4585 = vmatprep.mubr.bf16.mxu1 %v1763_v34  ;;  %v1364_v39 = vadd.f32 %v1300_v31, %v13335_v2  ;;  %v13338_v26 = vsub.f32 %v13336_v52, %v13337_v14  ;;  %v13341_v29 = vsub.f32 %v13339_v13, %v13340_v35  ;;  %v13345_v34 = vld [vmem:[#allocation98_spill] sm:$0xff] }
 0x376   : > { %v1706_v56 = vadd.f32 %v7021_v6, %v1670_v7  ;;  %v1585_v46 = vadd.f32 1e-05, %v1521_v44  ;;  %v1586_v24 = vadd.f32 1e-05, %v1522_v60  ;;  %v1491_v8 = vsub.f32 %v1427_v23, %v13342_v22  ;;  %v13347_v44 = vld [vmem:[#allocation65_spill] sm:$0xff]  ;;  %v13349_v31 = vld [vmem:[#allocation114_spill] sm:$0xff] }
 0x377   : > { %v1737_v40 = vmax.f32 %v1705_v36, 0.0  ;;  %v1635_v20 = vmul.f32 %v7375_v18, %v13338_v26  ;;  %v1636_v45 = vmul.f32 %v7387_v17, %v13341_v29  ;;  %v1428_v51 = vmul.f32 0.25, %v1364_v39 }
 0x378   : > { %v1738_v4 = vmax.f32 %v1706_v56, 0.0  ;;  %4735 = vrsqrt.f32 %v1585_v46  ;;  %v1301_v18 = vsel %vm6771_vm2, %v13343_v9, %v1223_v55  ;;  %v7501_v1 = vpop.eup %4729  ;;  %v1523_v17 = vmax.f32 %v1491_v8, 0.0  ;;  %v13351_v46 = vld [vmem:[#allocation52_spill] sm:$0xff] }
 0x379   : > { %v1671_v61 = vmul.f32 %v7009_v59, %v1635_v20  ;;  %v1672_v32 = vmul.f32 %v7009_v59, %v1636_v45  ;;  %4737 = vrsqrt.f32 %v1586_v24  ;;  %v1492_v21 = vsub.f32 %v1428_v51, %v13344_v37  ;;  %v13354_v24 = vld [vmem:[#allocation54_spill] sm:$0xff] }
 0x37a   : > { %v1764_v3 = vpack.c.bf16 %v1738_v4, %v1737_v40  ;;  %v1365_v38 = vadd.f32 %v1301_v18, %v13345_v34  ;;  %v1302_v7 = vsel %vm6771_vm2, %v13346_v5, %v1225_v19  ;;  %v1587_v33 = vadd.f32 1e-05, %v1523_v17  ;;  %v13352_v40 = vld [vmem:[#allocation108_spill] sm:$0xff]  ;;  %v13355_v4 = vld [vmem:[#allocation37_spill] sm:$0xff]  ;;  %v13360_v17 = vld [vmem:[#allocation58_spill] sm:$0xff] }
 0x37b   : > { %v1707_v27 = vadd.f32 %v7021_v6, %v1671_v61  ;;  %v1708_v10 = vadd.f32 %v7021_v6, %v1672_v32  ;;  %v1524_v49 = vmax.f32 %v1492_v21, 0.0  ;;  %v1366_v36 = vadd.f32 %v1302_v7, %v13347_v44  ;;  %v4732_v23 = vpop.eup %4731  ;;  %v13357_v19 = vld [vmem:[#allocation56_spill] sm:$0xff]  ;;  %v13358_v61 = vld [vmem:[#allocation75_spill] sm:$0xff]  ;;  %v13361_v37 = vld [vmem:[#allocation82_spill] sm:$0xff] }
 0x37c   : > { %4586 = vmatmul.mubr.bf16.gmra.mrb[24].mxu1 %v1764_v3  ;;  %v13350_v60 = vsub.f32 %v13348_v11, %v13349_v31  ;;  %v1429_v55 = vmul.f32 0.25, %v1365_v38  ;;  %v13353_v52 = vsub.f32 %v13351_v46, %v13352_v40  ;;  %4739 = vrsqrt.f32 %v1587_v33  ;;  %v13363_v34 = vld [vmem:[#allocation61_spill] sm:$0xff]  ;;  %v13364_v38 = vld [vmem:[#allocation86_spill] sm:$0xff] }
 0x37d   : > { %v1739_v2 = vmax.f32 %v1707_v27, 0.0  ;;  %v1740_v39 = vmax.f32 %v1708_v10, 0.0  ;;  %v1588_v26 = vadd.f32 1e-05, %v1524_v49  ;;  %v1430_v20 = vmul.f32 0.25, %v1366_v36  ;;  %v4734_v35 = vpop.eup %4733 }
 0x37e   : > { %v1637_v56 = vmul.f32 %v7395_v50, %v13350_v60  ;;  %v1638_v14 = vmul.f32 %v7408_v47, %v13353_v52  ;;  %v1493_v45 = vsub.f32 %v1429_v55, %v7242_v48  ;;  %v13356_v22 = vsub.f32 %v13354_v24, %v13355_v4  ;;  %v13372_v24 = vld [vmem:[#allocation70_spill] sm:$0xff] }
 0x37f   : > { %v1765_v29 = vpack.c.bf16 %v1740_v39, %v1739_v2  ;;  %4741 = vrsqrt.f32 %v1588_v26  ;;  %v1494_v51 = vsub.f32 %v1430_v20, %v7266_v62  ;;  %v13359_v32 = vsub.f32 %v13357_v19, %v13358_v61  ;;  %v13367_v2 = vld [vmem:[#allocation103_spill] sm:$0xff]  ;;  %v13369_v26 = vld [vmem:[#allocation68_spill] sm:$0xff]  ;;  %v13370_v20 = vld [vmem:[#allocation110_spill] sm:$0xff] }
 0x380   : > { %v1673_v13 = vmul.f32 %v7009_v59, %v1637_v56  ;;  %v1674_v50 = vmul.f32 %v7009_v59, %v1638_v14  ;;  %v1639_v8 = vmul.f32 %v7417_v12, %v13356_v22  ;;  %v1525_v18 = vmax.f32 %v1493_v45, 0.0  ;;  %v13366_v56 = vld [vmem:[#allocation66_spill] sm:$0xff] }
 0x381   : > { %v1640_v9 = vmul.f32 %v7425_v28, %v13359_v32  ;;  %4589 = vmatprep.mubr.bf16.mxu1 %v1765_v29  ;;  %v13362_v21 = vsub.f32 %v13360_v17, %v13361_v37  ;;  %v1526_v27 = vmax.f32 %v1494_v51, 0.0  ;;  %v13365_v5 = vsub.f32 %v13363_v34, %v13364_v38  ;;  %v13376_v51 = vld [vmem:[#allocation112_spill] sm:$0xff] }
 0x382   : > { %v1709_v47 = vadd.f32 %v7021_v6, %v1673_v13  ;;  %v1710_v48 = vadd.f32 %v7021_v6, %v1674_v50  ;;  %v1675_v3 = vmul.f32 %v7009_v59, %v1639_v8  ;;  %v4736_v7 = vpop.eup %4735  ;;  %v1589_v33 = vadd.f32 1e-05, %v1525_v18  ;;  %v13375_v8 = vld [vmem:[#allocation73_spill] sm:$0xff] }
 0x383   : > { %v1641_v12 = vmul.f32 %v7437_v58, %v13362_v21  ;;  %v1676_v10 = vmul.f32 %v7009_v59, %v1640_v9  ;;  %v1642_v28 = vmul.f32 %v7450_v16, %v13365_v5  ;;  %v4738_v11 = vpop.eup %4737  ;;  %v1590_v31 = vadd.f32 1e-05, %v1526_v27  ;;  %v13382_v27 = vld [vmem:[#allocation124_spill] sm:$0xff] }
 0x384   : > { %v1741_v62 = vmax.f32 %v1709_v47, 0.0  ;;  %v1742_v49 = vmax.f32 %v1710_v48, 0.0  ;;  %v1711_v44 = vadd.f32 %v7021_v6, %v1675_v3  ;;  %v13368_v39 = vsub.f32 %v13366_v56, %v13367_v2  ;;  %v13379_v48 = vld [vmem:[#allocation123_spill] sm:$0xff]  ;;  %v13387_v56 = vld [vmem:[#allocation18_spill] sm:$0xff]  ;;  %v13388_v2 = vld [vmem:[#allocation132_spill] sm:$0xff] }
 0x385   : > { %v1677_v36 = vmul.f32 %v7009_v59, %v1641_v12  ;;  %v1712_v58 = vadd.f32 %v7021_v6, %v1676_v10  ;;  %v1678_v60 = vmul.f32 %v7009_v59, %v1642_v28  ;;  %4743 = vrsqrt.f32 %v1589_v33  ;;  %v13381_v12 = vld [vmem:[#allocation10_spill] sm:$0xff]  ;;  %v13385_v33 = vld [vmem:[#allocation131_spill] sm:$0xff] }
 0x386   : > { %v1643_v55 = vmul.f32 %v7459_v54, %v13368_v39  ;;  %v1766_v16 = vpack.c.bf16 %v1742_v49, %v1741_v62  ;;  %v1743_v46 = vmax.f32 %v1711_v44, 0.0  ;;  %4745 = vrsqrt.f32 %v1590_v31  ;;  %v13373_v54 = vld [vmem:[#allocation87_spill] sm:$0xff]  ;;  %v4740_v61 = vpop.eup %4739  ;;  %v13384_v28 = vld [vmem:[#allocation14_spill] sm:$0xff] }
 0x387   : > { %v1713_v40 = vadd.f32 %v7021_v6, %v1677_v36  ;;  %v1744_v52 = vmax.f32 %v1712_v58, 0.0  ;;  %v1714_v14 = vadd.f32 %v7021_v6, %v1678_v60  ;;  %v13371_v13 = vsub.f32 %v13369_v26, %v13370_v20 }
 0x388   : > { %4590 = vmatmul.mubr.bf16.gmra.mrb[28].mxu1 %v1766_v16  ;;  %v1679_v50 = vmul.f32 %v7009_v59, %v1643_v55  ;;  %v13374_v4 = vsub.f32 %v13372_v24, %v13373_v54  ;;  %v13377_v47 = vsub.f32 %v13375_v8, %v13376_v51  ;;  %v13383_v62 = vsub.f32 %v13381_v12, %v13382_v27  ;;  %v13391_v24 = vld [vmem:[#allocation26_spill] sm:$0xff]  ;;  %v13392_v54 = vld [vmem:[#allocation95_spill] sm:$0xff] }
 0x389   : > { %v1644_v29 = vmul.f32 %v7472_v42, %v13371_v13  ;;  %v1745_v45 = vmax.f32 %v1713_v40, 0.0  ;;  %v1767_v32 = vpack.c.bf16 %v1744_v52, %v1743_v46  ;;  %v1746_v9 = vmax.f32 %v1714_v14, 0.0  ;;  %v13378_v42 = vld [vmem:[#allocation6_spill] sm:$0xff] }
 0x38a   : > { %v1645_v22 = vmul.f32 %v7485_v30, %v13374_v4  ;;  %v1646_v19 = vmul.f32 %v7501_v1, %v13377_v47  ;;  %v13380_v3 = vsub.f32 %v13378_v42, %v13379_v48  ;;  %v1715_v37 = vadd.f32 %v7021_v6, %v1679_v50  ;;  %v4742_v1 = vpop.eup %4741 }
 0x38b   : > { %v1680_v18 = vmul.f32 %v7009_v59, %v1644_v29  ;;  %v1648_v10 = vmul.f32 %v4734_v35, %v13383_v62  ;;  %4593 = vmatprep.mubr.bf16.mxu1 %v1767_v32  ;;  %v1768_v34 = vpack.c.bf16 %v1746_v9, %v1745_v45  ;;  %v13389_v39 = vsub.f32 %v13387_v56, %v13388_v2 }
 0x38c   : > { %v1647_v17 = vmul.f32 %v4732_v23, %v13380_v3  ;;  %v1681_v21 = vmul.f32 %v7009_v59, %v1645_v22  ;;  %v1682_v30 = vmul.f32 %v7009_v59, %v1646_v19  ;;  %v13386_v23 = vsub.f32 %v13384_v28, %v13385_v33 }
 0x38d   : > { %v1716_v38 = vadd.f32 %v7021_v6, %v1680_v18  ;;  %v1747_v44 = vmax.f32 %v1715_v37, 0.0  ;;  %v1684_v58 = vmul.f32 %v7009_v59, %v1648_v10  ;;  %v1650_v55 = vmul.f32 %v4738_v11, %v13389_v39 }
 0x38e   : > { %v1683_v5 = vmul.f32 %v7009_v59, %v1647_v17  ;;  %v1649_v49 = vmul.f32 %v4736_v7, %v13386_v23  ;;  %v1717_v36 = vadd.f32 %v7021_v6, %v1681_v21  ;;  %v1718_v31 = vadd.f32 %v7021_v6, %v1682_v30 }
 0x38f   : > { %v1748_v60 = vmax.f32 %v1716_v38, 0.0  ;;  %v1720_v7 = vadd.f32 %v7021_v6, %v1684_v58  ;;  %v13390_v52 = vsub.f32 %v13256_v53, %v7194_v15  ;;  %v1686_v13 = vmul.f32 %v7009_v59, %v1650_v55  ;;  %v4744_v45 = vpop.eup %4743 }
 0x390   : > { %v1719_v35 = vadd.f32 %v7021_v6, %v1683_v5  ;;  %v1685_v16 = vmul.f32 %v7009_v59, %v1649_v49  ;;  %v1749_v46 = vmax.f32 %v1717_v36, 0.0  ;;  %v1750_v40 = vmax.f32 %v1718_v31, 0.0  ;;  %4594 = vmatmul.mubr.bf16.gmra.mrb[32].mxu1 %v1768_v34  ;;  %v4746_v51 = vpop.eup %4745 }
 0x391   : > { %v1651_v14 = vmul.f32 %v4740_v61, %v13390_v52  ;;  %v1769_v26 = vpack.c.bf16 %v1748_v60, %v1747_v44  ;;  %v1752_v11 = vmax.f32 %v1720_v7, 0.0  ;;  %v13393_v4 = vsub.f32 %v13391_v24, %v13392_v54 }
 0x392   : > { %v1751_v20 = vmax.f32 %v1719_v35, 0.0  ;;  %v1721_v29 = vadd.f32 %v7021_v6, %v1685_v16  ;;  %v1770_v50 = vpack.c.bf16 %v1750_v40, %v1749_v46  ;;  %v1722_v15 = vadd.f32 %v7021_v6, %v1686_v13 }
 0x393   : > { %v1652_v22 = vmul.f32 %v4742_v1, %v13393_v4  ;;  %v1687_v8 = vmul.f32 %v7009_v59, %v1651_v14  ;;  %4597 = vmatprep.mubr.bf16.mxu1 %v1769_v26  ;;  %v13394_v53 = vsub.f32 %v13265_v43, %v7226_v41  ;;  %v1654_v9 = vmul.f32 %v4746_v51, %v1558_v0 }
 0x394   : > { %v1771_v19 = vpack.c.bf16 %v1752_v11, %v1751_v20  ;;  %v1753_v18 = vmax.f32 %v1721_v29, 0.0  ;;  %v1754_v42 = vmax.f32 %v1722_v15, 0.0 }
 0x395   : > { %v1653_v47 = vmul.f32 %v4744_v45, %v13394_v53  ;;  %v1688_v61 = vmul.f32 %v7009_v59, %v1652_v22  ;;  %v1723_v32 = vadd.f32 %v7021_v6, %v1687_v8  ;;  %v1690_v17 = vmul.f32 %v7009_v59, %v1654_v9 }
 0x396   : > { %v1772_v37 = vpack.c.bf16 %v1754_v42, %v1753_v18 }
 0x397   : > { %v1689_v48 = vmul.f32 %v7009_v59, %v1653_v47  ;;  %v1724_v3 = vadd.f32 %v7021_v6, %v1688_v61  ;;  %v1755_v43 = vmax.f32 %v1723_v32, 0.0  ;;  %v1726_v30 = vadd.f32 %v7021_v6, %v1690_v17 }
 0x398   : > { %4598 = vmatmul.mubr.bf16.gmra.mrb[36].mxu1 %v1770_v50 }
 0x399   : > { %v1725_v41 = vadd.f32 %v7021_v6, %v1689_v48  ;;  %v1756_v21 = vmax.f32 %v1724_v3, 0.0  ;;  %v1758_v25 = vmax.f32 %v1726_v30, 0.0  ;;  %4601 = vmatprep.mubr.bf16.mxu1 %v1771_v19 }
 0x39b   : > { %v1773_v12 = vpack.c.bf16 %v1756_v21, %v1755_v43  ;;  %v1757_v27 = vmax.f32 %v1725_v41, 0.0 }
 0x39d   : > { %v1774_v63 = vpack.c.bf16 %v1758_v25, %v1757_v27 }
 0x3a0   : > { %4602 = vmatmul.mubr.bf16.gmra.mrb[40].mxu1 %v1772_v37 }
 0x3a1   : > { %4605 = vmatprep.mubr.bf16.mxu1 %v1773_v12 }
 0x3a8   : > { %4606 = vmatmul.mubr.bf16.gmra.mrb[44].mxu1 %v1774_v63 }
 0x433   : > { %v7613_v0 = vpop.f32.mrb[16].mxu1 }
 0x434   : > { %13395 = vst [vmem:[#allocation143_spill] sm:$0xff] %v7613_v0  ;;  %2036 = vrot.lane.b32.xlu0 %v7613_v0, %s4942_s5  ;;  %v7617_v59 = vpop.f32.mrb[17].mxu1  ;;  %v7645_v38 = vmul.f32 %v7613_v0, %v7613_v0 }
 0x435   : > { %13396 = vst [vmem:[#allocation127_spill] sm:$0xff] %v7617_v59  ;;  %v7619_v62 = vpop.f32.mrb[18].mxu1  ;;  %v7663_v33 = vmul.f32 %v7617_v59, %v7617_v59 }
 0x436   : > { %13397 = vst [vmem:[#allocation117_spill] sm:$0xff] %v7619_v62  ;;  %2038 = vrot.lane.b32.xlu1 %v7619_v62, %s4942_s5  ;;  %v7623_v6 = vpop.f32.mrb[19].mxu1  ;;  %v7653_v28 = vmul.f32 %v7619_v62, %v7619_v62 }
 0x437   : > { %13398 = vst [vmem:[#allocation128_spill] sm:$0xff] %v7623_v6  ;;  %v7671_v49 = vmul.f32 %v7623_v6, %v7623_v6 }
 0x438   : > { %2164 = vrot.lane.b32.xlu0 %v7613_v0, %s4943_s6 }
 0x43a   : > { %2166 = vrot.lane.b32.xlu1 %v7619_v62, %s4943_s6 }
 0x43c   : > { %2032 = vrot.lane.b32.xlu0 %v7617_v59, %s4942_s5 }
 0x43e   : > { %2034 = vrot.lane.b32.xlu1 %v7623_v6, %s4942_s5 }
 0x440   : > { %2160 = vrot.lane.b32.xlu0 %v7617_v59, %s4943_s6 }
 0x442   : > { %v7633_v10 = vpop.f32.mrb[20].mxu1  ;;  %2162 = vrot.lane.b32.xlu1 %v7623_v6, %s4943_s6 }
 0x443   : > { %13399 = vst [vmem:[#allocation97_spill] sm:$0xff] %v7633_v10  ;;  %v7637_v1 = vpop.f32.mrb[21].mxu1  ;;  %v7719_v46 = vmul.f32 %v7633_v10, %v7633_v10 }
 0x444   : > { %13400 = vst [vmem:[#allocation79_spill] sm:$0xff] %v7637_v1  ;;  %v7639_v34 = vpop.f32.mrb[22].mxu1  ;;  %2100 = vrot.lane.b32.xlu0 %v7645_v38, %s4942_s5  ;;  %v7743_v20 = vmul.f32 %v7637_v1, %v7637_v1 }
 0x445   : > { %13401 = vst [vmem:[#allocation135_spill] sm:$0xff] %v7639_v34  ;;  %v7647_v5 = vpop.f32.mrb[23].mxu1  ;;  %v7725_v40 = vmul.f32 %v7639_v34, %v7639_v34 }
 0x446   : > { %13402 = vst [vmem:[#allocation144_spill] sm:$0xff] %v7647_v5  ;;  %2102 = vrot.lane.b32.xlu1 %v7653_v28, %s4942_s5  ;;  %v7749_v13 = vmul.f32 %v7647_v5, %v7647_v5 }
 0x448   : > { %2228 = vrot.lane.b32.xlu0 %v7645_v38, %s4943_s6  ;;  %13419 = vst [vmem:[#allocation100_spill] sm:$0xff] %v7749_v13 }
 0x44a   : > { %2230 = vrot.lane.b32.xlu1 %v7653_v28, %s4943_s6 }
 0x44c   : > { %2096 = vrot.lane.b32.xlu0 %v7663_v33, %s4942_s5 }
 0x44e   : > { %2098 = vrot.lane.b32.xlu1 %v7671_v49, %s4942_s5 }
 0x44f   : > { %v7665_v23 = vpop.f32.mrb[24].mxu1 }
 0x450   : > { %13403 = vst [vmem:[#allocation81_spill] sm:$0xff] %v7665_v23  ;;  %v7673_v44 = vpop.f32.mrb[25].mxu1  ;;  %2224 = vrot.lane.b32.xlu0 %v7663_v33, %s4943_s6  ;;  %v7791_v8 = vmul.f32 %v7665_v23, %v7665_v23 }
 0x451   : > { %13404 = vst [vmem:[#allocation136_spill] sm:$0xff] %v7673_v44  ;;  %v7675_v36 = vpop.f32.mrb[26].mxu1  ;;  %v7807_v15 = vmul.f32 %v7673_v44, %v7673_v44 }
 0x452   : > { %13405 = vst [vmem:[#allocation138_spill] sm:$0xff] %v7675_v36  ;;  %v7679_v31 = vpop.f32.mrb[27].mxu1  ;;  %2226 = vrot.lane.b32.xlu1 %v7671_v49, %s4943_s6  ;;  %13428 = vst [vmem:[#allocation109_spill] sm:$0xff] %v7791_v8  ;;  %v7797_v51 = vmul.f32 %v7675_v36, %v7675_v36 }
 0x453   : > { %13406 = vst [vmem:[#allocation22_spill] sm:$0xff] %v7679_v31  ;;  %13430 = vst [vmem:[#allocation116_spill] sm:$0xff] %v7807_v15  ;;  %v7813_v53 = vmul.f32 %v7679_v31, %v7679_v31 }
 0x454   : > { %2044 = vrot.lane.b32.xlu0 %v7633_v10, %s4942_s5  ;;  %13429 = vst [vmem:[#allocation155_spill] sm:$0xff] %v7797_v51 }
 0x455   : > { %13431 = vst [vmem:[#allocation156_spill] sm:$0xff] %v7813_v53 }
 0x456   : > { %2046 = vrot.lane.b32.xlu1 %v7639_v34, %s4942_s5 }
 0x458   : > { %2172 = vrot.lane.b32.xlu0 %v7633_v10, %s4943_s6 }
 0x45a   : > { %2174 = vrot.lane.b32.xlu1 %v7639_v34, %s4943_s6 }
 0x45b   : > { %v7689_v58 = vpop.f32.mrb[28].mxu1 }
 0x45c   : > { %13407 = vst [vmem:[#allocation94_spill] sm:$0xff] %v7689_v58  ;;  %v7691_v60 = vpop.f32.mrb[29].mxu1  ;;  %2040 = vrot.lane.b32.xlu0 %v7637_v1, %s4942_s5  ;;  %v7839_v47 = vmul.f32 %v7689_v58, %v7689_v58 }
 0x45d   : > { %13408 = vst [vmem:[#allocation96_spill] sm:$0xff] %v7691_v60  ;;  %v7695_v35 = vpop.f32.mrb[30].mxu1  ;;  %v7861_v18 = vmul.f32 %v7691_v60, %v7691_v60 }
 0x45e   : > { %13409 = vst [vmem:[#allocation139_spill] sm:$0xff] %v7695_v35  ;;  %v7697_v56 = vpop.f32.mrb[31].mxu1  ;;  %2042 = vrot.lane.b32.xlu1 %v7647_v5, %s4942_s5  ;;  %13432 = vst [vmem:[#allocation76_spill] sm:$0xff] %v7839_v47  ;;  %v7845_v19 = vmul.f32 %v7695_v35, %v7695_v35 }
 0x45f   : > { %13410 = vst [vmem:[#allocation90_spill] sm:$0xff] %v7697_v56  ;;  %13434 = vst [vmem:[#allocation118_spill] sm:$0xff] %v7861_v18  ;;  %v7869_v48 = vmul.f32 %v7697_v56, %v7697_v56 }
 0x460   : > { %2168 = vrot.lane.b32.xlu0 %v7637_v1, %s4943_s6  ;;  %13433 = vst [vmem:[#allocation157_spill] sm:$0xff] %v7845_v19 }
 0x461   : > { %13435 = vst [vmem:[#allocation115_spill] sm:$0xff] %v7869_v48 }
 0x462   : > { %2170 = vrot.lane.b32.xlu1 %v7647_v5, %s4943_s6 }
 0x463   : > { %v7705_v2 = vpop.f32.mrb[32].mxu1 }
 0x464   : > { %13411 = vst [vmem:[#allocation145_spill] sm:$0xff] %v7705_v2  ;;  %v7707_v39 = vpop.f32.mrb[33].mxu1  ;;  %2108 = vrot.lane.b32.xlu0 %v7719_v46, %s4942_s5  ;;  %v7917_v57 = vmul.f32 %v7705_v2, %v7705_v2 }
 0x465   : > { %13412 = vst [vmem:[#allocation64_spill] sm:$0xff] %v7707_v39  ;;  %v7711_v55 = vpop.f32.mrb[34].mxu1 }
 0x466   : > { %13413 = vst [vmem:[#allocation146_spill] sm:$0xff] %v7711_v55  ;;  %v7713_v16 = vpop.f32.mrb[35].mxu1  ;;  %2110 = vrot.lane.b32.xlu1 %v7725_v40, %s4942_s5  ;;  %13436 = vst [vmem:[#allocation122_spill] sm:$0xff] %v7917_v57 }
 0x467   : > { %13414 = vst [vmem:[#allocation104_spill] sm:$0xff] %v7713_v16 }
 0x468   : > { %2236 = vrot.lane.b32.xlu0 %v7719_v46, %s4943_s6 }
 0x46a   : > { %2238 = vrot.lane.b32.xlu1 %v7725_v40, %s4943_s6 }
 0x46b   : > { %v7729_v7 = vpop.f32.mrb[36].mxu1 }
 0x46c   : > { %13415 = vst [vmem:[#allocation30_spill] sm:$0xff] %v7729_v7  ;;  %v7731_v52 = vpop.f32.mrb[37].mxu1  ;;  %2104 = vrot.lane.b32.xlu0 %v7743_v20, %s4942_s5 }
 0x46d   : > { %13416 = vst [vmem:[#allocation149_spill] sm:$0xff] %v7731_v52  ;;  %v7735_v14 = vpop.f32.mrb[38].mxu1 }
 0x46e   : > { %13417 = vst [vmem:[#allocation105_spill] sm:$0xff] %v7735_v14  ;;  %v7737_v26 = vpop.f32.mrb[39].mxu1  ;;  %2106 = vrot.lane.b32.xlu1 %v7749_v13, %s4942_s5 }
 0x46f   : > { %13418 = vst [vmem:[#allocation150_spill] sm:$0xff] %v7737_v26 }
 0x470   : > { %2232 = vrot.lane.b32.xlu0 %v7743_v20, %s4943_s6 }
 0x472   : > { %2234 = vrot.lane.b32.xlu1 %v7749_v13, %s4943_s6  ;;  %v8021_v13 = vmul.f32 %v7731_v52, %v7731_v52 }
 0x473   : > { %v7753_v29 = vpop.f32.mrb[40].mxu1 }
 0x474   : > { %13420 = vst [vmem:[#allocation34_spill] sm:$0xff] %v7753_v29  ;;  %v7755_v45 = vpop.f32.mrb[41].mxu1  ;;  %2052 = vrot.lane.b32.xlu0 %v7665_v23, %s4942_s5  ;;  %13444 = vst [vmem:[#allocation5_spill] sm:$0xff] %v8021_v13 }
 0x475   : > { %13421 = vst [vmem:[#allocation151_spill] sm:$0xff] %v7755_v45  ;;  %v7759_v50 = vpop.f32.mrb[42].mxu1 }
 0x476   : > { %13422 = vst [vmem:[#allocation113_spill] sm:$0xff] %v7759_v50  ;;  %v7761_v11 = vpop.f32.mrb[43].mxu1  ;;  %2054 = vrot.lane.b32.xlu1 %v7675_v36, %s4942_s5 }
 0x477   : > { %13423 = vst [vmem:[#allocation152_spill] sm:$0xff] %v7761_v11 }
 0x478   : > { %2180 = vrot.lane.b32.xlu0 %v7665_v23, %s4943_s6 }
 0x47a   : > { %2182 = vrot.lane.b32.xlu1 %v7675_v36, %s4943_s6 }
 0x47b   : > { %v7769_v24 = vpop.f32.mrb[44].mxu1 }
 0x47c   : > { %13424 = vst [vmem:[#allocation107_spill] sm:$0xff] %v7769_v24  ;;  %v7771_v54 = vpop.f32.mrb[45].mxu1  ;;  %2048 = vrot.lane.b32.xlu0 %v7673_v44, %s4942_s5 }
 0x47d   : > { %13425 = vst [vmem:[#allocation153_spill] sm:$0xff] %v7771_v54  ;;  %v7775_v4 = vpop.f32.mrb[46].mxu1 }
 0x47e   : > { %13426 = vst [vmem:[#allocation72_spill] sm:$0xff] %v7775_v4  ;;  %v7777_v22 = vpop.f32.mrb[47].mxu1  ;;  %2050 = vrot.lane.b32.xlu1 %v7679_v31, %s4942_s5 }
 0x47f   : > { %13427 = vst [vmem:[#allocation154_spill] sm:$0xff] %v7777_v22 }
 0x480   : > { %2176 = vrot.lane.b32.xlu0 %v7673_v44, %s4943_s6  ;;  %v8005_v44 = vmul.f32 %v7735_v14, %v7735_v14 }
 0x482   : > { %2178 = vrot.lane.b32.xlu1 %v7679_v31, %s4943_s6  ;;  %13441 = vst [vmem:[#allocation9_spill] sm:$0xff] %v8005_v44 }
 0x484   : > { %2116 = vrot.lane.b32.xlu0 %v7791_v8, %s4942_s5 }
 0x486   : > { %2118 = vrot.lane.b32.xlu1 %v7797_v51, %s4942_s5 }
 0x488   : > { %2244 = vrot.lane.b32.xlu0 %v7791_v8, %s4943_s6  ;;  %v7997_v8 = vmul.f32 %v7729_v7, %v7729_v7 }
 0x48a   : > { %2246 = vrot.lane.b32.xlu1 %v7797_v51, %s4943_s6  ;;  %13440 = vst [vmem:[#allocation93_spill] sm:$0xff] %v7997_v8 }
 0x48c   : > { %2112 = vrot.lane.b32.xlu0 %v7807_v15, %s4942_s5 }
 0x48e   : > { %2114 = vrot.lane.b32.xlu1 %v7813_v53, %s4942_s5 }
 0x490   : > { %2240 = vrot.lane.b32.xlu0 %v7807_v15, %s4943_s6 }
 0x492   : > { %2242 = vrot.lane.b32.xlu1 %v7813_v53, %s4943_s6 }
 0x494   : > { %2060 = vrot.lane.b32.xlu0 %v7689_v58, %s4942_s5 }
 0x496   : > { %2062 = vrot.lane.b32.xlu1 %v7695_v35, %s4942_s5 }
 0x498   : > { %2188 = vrot.lane.b32.xlu0 %v7689_v58, %s4943_s6 }
 0x49a   : > { %2190 = vrot.lane.b32.xlu1 %v7695_v35, %s4943_s6 }
 0x49c   : > { %2056 = vrot.lane.b32.xlu0 %v7691_v60, %s4942_s5 }
 0x49e   : > { %2058 = vrot.lane.b32.xlu1 %v7697_v56, %s4942_s5 }
 0x4a0   : > { %2184 = vrot.lane.b32.xlu0 %v7691_v60, %s4943_s6  ;;  %v7949_v60 = vmul.f32 %v7713_v16, %v7713_v16 }
 0x4a2   : > { %2186 = vrot.lane.b32.xlu1 %v7697_v56, %s4943_s6  ;;  %v7941_v56 = vmul.f32 %v7707_v39, %v7707_v39  ;;  %13439 = vst [vmem:[#allocation133_spill] sm:$0xff] %v7949_v60 }
 0x4a4   : > { %2124 = vrot.lane.b32.xlu0 %v7839_v47, %s4942_s5  ;;  %13438 = vst [vmem:[#allocation80_spill] sm:$0xff] %v7941_v56 }
 0x4a6   : > { %v7847_v61 = vpop.permute.xlu0 %2036  ;;  %2126 = vrot.lane.b32.xlu1 %v7845_v19, %s4942_s5 }
 0x4a8   : > { %2252 = vrot.lane.b32.xlu0 %v7839_v47, %s4943_s6  ;;  %v7853_v32 = vpop.permute.xlu1 %2038 }
 0x4aa   : > { %v7855_v9 = vpop.permute.xlu0 %2164  ;;  %2254 = vrot.lane.b32.xlu1 %v7845_v19, %s4943_s6 }
 0x4ac   : > { %2120 = vrot.lane.b32.xlu0 %v7861_v18, %s4942_s5  ;;  %v7865_v42 = vpop.permute.xlu1 %2166 }
 0x4ae   : > { %v7871_v3 = vpop.permute.xlu0 %2032  ;;  %2122 = vrot.lane.b32.xlu1 %v7869_v48, %s4942_s5 }
 0x4b0   : > { %2248 = vrot.lane.b32.xlu0 %v7861_v18, %s4943_s6  ;;  %v7877_v17 = vpop.permute.xlu1 %2034  ;;  %v7925_v18 = vmul.f32 %v7711_v55, %v7711_v55 }
 0x4b2   : > { %v7879_v37 = vpop.permute.xlu0 %2160  ;;  %2250 = vrot.lane.b32.xlu1 %v7869_v48, %s4943_s6  ;;  %13437 = vst [vmem:[#allocation78_spill] sm:$0xff] %v7925_v18 }
 0x4b4   : > { %2068 = vrot.lane.b32.xlu0 %v7705_v2, %s4942_s5  ;;  %v7885_v41 = vpop.permute.xlu1 %2162 }
 0x4b6   : > { %v7887_v43 = vpop.permute.xlu0 %2100  ;;  %2070 = vrot.lane.b32.xlu1 %v7711_v55, %s4942_s5 }
 0x4b8   : > { %2196 = vrot.lane.b32.xlu0 %v7705_v2, %s4943_s6  ;;  %v7893_v21 = vpop.permute.xlu1 %2102 }
 0x4ba   : > { %v7895_v30 = vpop.permute.xlu0 %2228  ;;  %2198 = vrot.lane.b32.xlu1 %v7711_v55, %s4943_s6 }
 0x4bc   : > { %2064 = vrot.lane.b32.xlu0 %v7707_v39, %s4942_s5  ;;  %v7901_v12 = vpop.permute.xlu1 %2230 }
 0x4be   : > { %v7903_v27 = vpop.permute.xlu0 %2096  ;;  %2066 = vrot.lane.b32.xlu1 %v7713_v16, %s4942_s5 }
 0x4c0   : > { %2192 = vrot.lane.b32.xlu0 %v7707_v39, %s4943_s6  ;;  %v7909_v25 = vpop.permute.xlu1 %2098 }
 0x4c2   : > { %v7911_v63 = vpop.permute.xlu0 %2224  ;;  %2194 = vrot.lane.b32.xlu1 %v7713_v16, %s4943_s6 }
 0x4c4   : > { %2132 = vrot.lane.b32.xlu0 %v7917_v57, %s4942_s5  ;;  %v7921_v48 = vpop.permute.xlu1 %2226 }
 0x4c6   : > { %v7927_v19 = vpop.permute.xlu0 %2044  ;;  %2134 = vrot.lane.b32.xlu1 %v7925_v18, %s4942_s5 }
 0x4c8   : > { %2260 = vrot.lane.b32.xlu0 %v7917_v57, %s4943_s6  ;;  %v7933_v47 = vpop.permute.xlu1 %2046 }
 0x4ca   : > { %v7935_v2 = vpop.permute.xlu0 %2172  ;;  %2262 = vrot.lane.b32.xlu1 %v7925_v18, %s4943_s6 }
 0x4cc   : > { %2128 = vrot.lane.b32.xlu0 %v7941_v56, %s4942_s5  ;;  %v7945_v55 = vpop.permute.xlu1 %2174 }
 0x4ce   : > { %v7951_v57 = vpop.permute.xlu0 %2040  ;;  %2130 = vrot.lane.b32.xlu1 %v7949_v60, %s4942_s5 }
 0x4d0   : > { %2256 = vrot.lane.b32.xlu0 %v7941_v56, %s4943_s6  ;;  %v7957_v18 = vpop.permute.xlu1 %2042 }
 0x4d2   : > { %v7959_v39 = vpop.permute.xlu0 %2168  ;;  %2258 = vrot.lane.b32.xlu1 %v7949_v60, %s4943_s6 }
 0x4d4   : > { %2076 = vrot.lane.b32.xlu0 %v7729_v7, %s4942_s5  ;;  %v7965_v16 = vpop.permute.xlu1 %2170 }
 0x4d6   : > { %v7967_v35 = vpop.permute.xlu0 %2108  ;;  %2078 = vrot.lane.b32.xlu1 %v7735_v14, %s4942_s5 }
 0x4d8   : > { %2204 = vrot.lane.b32.xlu0 %v7729_v7, %s4943_s6  ;;  %v7973_v56 = vpop.permute.xlu1 %2110 }
 0x4da   : > { %v7975_v58 = vpop.permute.xlu0 %2236  ;;  %2206 = vrot.lane.b32.xlu1 %v7735_v14, %s4943_s6 }
 0x4dc   : > { %2072 = vrot.lane.b32.xlu0 %v7731_v52, %s4942_s5  ;;  %v7981_v60 = vpop.permute.xlu1 %2238 }
 0x4de   : > { %v7983_v53 = vpop.permute.xlu0 %2104  ;;  %2074 = vrot.lane.b32.xlu1 %v7737_v26, %s4942_s5 }
 0x4e0   : > { %2200 = vrot.lane.b32.xlu0 %v7731_v52, %s4943_s6  ;;  %v7989_v15 = vpop.permute.xlu1 %2106 }
 0x4e2   : > { %v7991_v51 = vpop.permute.xlu0 %2232  ;;  %2202 = vrot.lane.b32.xlu1 %v7737_v26, %s4943_s6 }
 0x4e4   : > { %2140 = vrot.lane.b32.xlu0 %v7997_v8, %s4942_s5  ;;  %v8001_v31 = vpop.permute.xlu1 %2234 }
 0x4e6   : > { %v8007_v36 = vpop.permute.xlu0 %2052  ;;  %2142 = vrot.lane.b32.xlu1 %v8005_v44, %s4942_s5 }
 0x4e7   : > { %13442 = vst [vmem:[#allocation101_spill] sm:$0xff] %v8007_v36  ;;  %v8029_v36 = vmul.f32 %v7737_v26, %v7737_v26 }
 0x4e8   : > { %2268 = vrot.lane.b32.xlu0 %v7997_v8, %s4943_s6  ;;  %v8013_v23 = vpop.permute.xlu1 %2054 }
 0x4e9   : > { %13443 = vst [vmem:[#allocation21_spill] sm:$0xff] %v8013_v23  ;;  %13445 = vst [vmem:[#allocation25_spill] sm:$0xff] %v8029_v36 }
 0x4ea   : > { %v8015_v7 = vpop.permute.xlu0 %2180  ;;  %2270 = vrot.lane.b32.xlu1 %v8005_v44, %s4943_s6 }
 0x4ec   : > { %2136 = vrot.lane.b32.xlu0 %v8021_v13, %s4942_s5  ;;  %v8025_v14 = vpop.permute.xlu1 %2182 }
 0x4ee   : > { %v8031_v8 = vpop.permute.xlu0 %2048  ;;  %2138 = vrot.lane.b32.xlu1 %v8029_v36, %s4942_s5 }
 0x4ef   : > { %13446 = vst [vmem:[#allocation134_spill] sm:$0xff] %v8031_v8 }
 0x4f0   : > { %2264 = vrot.lane.b32.xlu0 %v8021_v13, %s4943_s6  ;;  %v8037_v44 = vpop.permute.xlu1 %2050 }
 0x4f1   : > { %13447 = vst [vmem:[#allocation119_spill] sm:$0xff] %v8037_v44 }
 0x4f2   : > { %v8039_v52 = vpop.permute.xlu0 %2176  ;;  %2266 = vrot.lane.b32.xlu1 %v8029_v36, %s4943_s6 }
 0x4f4   : > { %2084 = vrot.lane.b32.xlu0 %v7753_v29, %s4942_s5  ;;  %v8045_v26 = vpop.permute.xlu1 %2178 }
 0x4f5   : > { %13448 = vst [vmem:[#allocation29_spill] sm:$0xff] %v8045_v26 }
 0x4f6   : > { %v8047_v23 = vpop.permute.xlu0 %2116  ;;  %2086 = vrot.lane.b32.xlu1 %v7759_v50, %s4942_s5 }
 0x4f7   : > { %13449 = vst [vmem:[#allocation13_spill] sm:$0xff] %v8047_v23 }
 0x4f8   : > { %2212 = vrot.lane.b32.xlu0 %v7753_v29, %s4943_s6  ;;  %v8053_v13 = vpop.permute.xlu1 %2118 }
 0x4f9   : > { %13450 = vst [vmem:[#allocation142_spill] sm:$0xff] %v8053_v13 }
 0x4fa   : > { %v8055_v44 = vpop.permute.xlu0 %2244  ;;  %2214 = vrot.lane.b32.xlu1 %v7759_v50, %s4943_s6 }
 0x4fb   : > { %13451 = vst [vmem:[#allocation77_spill] sm:$0xff] %v8055_v44  ;;  %v8077_v44 = vmul.f32 %v7753_v29, %v7753_v29 }
 0x4fc   : > { %2080 = vrot.lane.b32.xlu0 %v7755_v45, %s4942_s5  ;;  %v8061_v36 = vpop.permute.xlu1 %2246 }
 0x4fd   : > { %13452 = vst [vmem:[#allocation129_spill] sm:$0xff] %v8061_v36  ;;  %13455 = vst [vmem:[#allocation130_spill] sm:$0xff] %v8077_v44  ;;  %v8085_v36 = vmul.f32 %v7759_v50, %v7759_v50 }
 0x4fe   : > { %v8063_v26 = vpop.permute.xlu0 %2112  ;;  %2082 = vrot.lane.b32.xlu1 %v7761_v11, %s4942_s5 }
 0x4ff   : > { %13453 = vst [vmem:[#allocation121_spill] sm:$0xff] %v8063_v26  ;;  %13457 = vst [vmem:[#allocation17_spill] sm:$0xff] %v8085_v36 }
 0x500   : > { %2208 = vrot.lane.b32.xlu0 %v7755_v45, %s4943_s6  ;;  %v8069_v23 = vpop.permute.xlu1 %2114 }
 0x501   : > { %13454 = vst [vmem:[#allocation63_spill] sm:$0xff] %v8069_v23 }
 0x502   : > { %v8071_v13 = vpop.permute.xlu0 %2240  ;;  %2210 = vrot.lane.b32.xlu1 %v7761_v11, %s4943_s6 }
 0x504   : > { %2148 = vrot.lane.b32.xlu0 %v8077_v44, %s4942_s5  ;;  %v8081_v26 = vpop.permute.xlu1 %2242 }
 0x505   : > { %13456 = vst [vmem:[#allocation39_spill] sm:$0xff] %v8081_v26  ;;  %v8101_v26 = vmul.f32 %v7755_v45, %v7755_v45 }
 0x506   : > { %v8087_v8 = vpop.permute.xlu0 %2060  ;;  %2150 = vrot.lane.b32.xlu1 %v8085_v36, %s4942_s5 }
 0x507   : > { %13458 = vst [vmem:[#allocation125_spill] sm:$0xff] %v8087_v8  ;;  %13460 = vst [vmem:[#allocation126_spill] sm:$0xff] %v8101_v26  ;;  %v8109_v8 = vmul.f32 %v7761_v11, %v7761_v11 }
 0x508   : > { %2276 = vrot.lane.b32.xlu0 %v8077_v44, %s4943_s6  ;;  %v8093_v23 = vpop.permute.xlu1 %2062 }
 0x509   : > { %13459 = vst [vmem:[#allocation83_spill] sm:$0xff] %v8093_v23  ;;  %13461 = vst [vmem:[#allocation137_spill] sm:$0xff] %v8109_v8 }
 0x50a   : > { %v8095_v29 = vpop.permute.xlu0 %2188  ;;  %2278 = vrot.lane.b32.xlu1 %v8085_v36, %s4943_s6 }
 0x50c   : > { %2144 = vrot.lane.b32.xlu0 %v8101_v26, %s4942_s5  ;;  %v8105_v50 = vpop.permute.xlu1 %2190 }
 0x50e   : > { %v8111_v44 = vpop.permute.xlu0 %2056  ;;  %2146 = vrot.lane.b32.xlu1 %v8109_v8, %s4942_s5 }
 0x50f   : > { %13462 = vst [vmem:[#allocation88_spill] sm:$0xff] %v8111_v44 }
 0x510   : > { %2272 = vrot.lane.b32.xlu0 %v8101_v26, %s4943_s6  ;;  %v8117_v36 = vpop.permute.xlu1 %2058 }
 0x511   : > { %13463 = vst [vmem:[#allocation49_spill] sm:$0xff] %v8117_v36 }
 0x512   : > { %v8119_v45 = vpop.permute.xlu0 %2184  ;;  %2274 = vrot.lane.b32.xlu1 %v8109_v8, %s4943_s6 }
 0x514   : > { %2092 = vrot.lane.b32.xlu0 %v7769_v24, %s4942_s5  ;;  %v8125_v11 = vpop.permute.xlu1 %2186 }
 0x515   : > { %13464 = vst [vmem:[#allocation41_spill] sm:$0xff] %v8125_v11 }
 0x516   : > { %v8127_v23 = vpop.permute.xlu0 %2124  ;;  %2094 = vrot.lane.b32.xlu1 %v7775_v4, %s4942_s5 }
 0x517   : > { %13465 = vst [vmem:[#allocation99_spill] sm:$0xff] %v8127_v23 }
 0x518   : > { %2220 = vrot.lane.b32.xlu0 %v7769_v24, %s4943_s6  ;;  %v8133_v26 = vpop.permute.xlu1 %2126 }
 0x519   : > { %13466 = vst [vmem:[#allocation43_spill] sm:$0xff] %v8133_v26 }
 0x51a   : > { %v8135_v36 = vpop.permute.xlu0 %2252  ;;  %2222 = vrot.lane.b32.xlu1 %v7775_v4, %s4943_s6 }
 0x51b   : > { %13467 = vst [vmem:[#allocation106_spill] sm:$0xff] %v8135_v36  ;;  %v8157_v36 = vmul.f32 %v7769_v24, %v7769_v24 }
 0x51c   : > { %2088 = vrot.lane.b32.xlu0 %v7771_v54, %s4942_s5  ;;  %v8141_v8 = vpop.permute.xlu1 %2254 }
 0x51d   : > { %13468 = vst [vmem:[#allocation140_spill] sm:$0xff] %v8141_v8  ;;  %13471 = vst [vmem:[#allocation91_spill] sm:$0xff] %v8157_v36  ;;  %v8165_v8 = vmul.f32 %v7775_v4, %v7775_v4  ;;  %v8185_v4 = vmul.f32 %v7777_v22, %v7777_v22 }
 0x51e   : > { %v8143_v11 = vpop.permute.xlu0 %2120  ;;  %2090 = vrot.lane.b32.xlu1 %v7777_v22, %s4942_s5 }
 0x51f   : > { %13469 = vst [vmem:[#allocation85_spill] sm:$0xff] %v8143_v11  ;;  %13473 = vst [vmem:[#allocation60_spill] sm:$0xff] %v8165_v8 }
 0x520   : > { %2216 = vrot.lane.b32.xlu0 %v7771_v54, %s4943_s6  ;;  %v8149_v23 = vpop.permute.xlu1 %2122 }
 0x521   : > { %13470 = vst [vmem:[#allocation92_spill] sm:$0xff] %v8149_v23 }
 0x522   : > { %v8151_v26 = vpop.permute.xlu0 %2248  ;;  %2218 = vrot.lane.b32.xlu1 %v7777_v22, %s4943_s6 }
 0x524   : > { %2156 = vrot.lane.b32.xlu0 %v8157_v36, %s4942_s5  ;;  %v8161_v11 = vpop.permute.xlu1 %2250 }
 0x525   : > { %13472 = vst [vmem:[#allocation141_spill] sm:$0xff] %v8161_v11  ;;  %v8181_v11 = vmul.f32 %v7771_v54, %v7771_v54  ;;  %v2290_v54 = vsel %vm5754_vm1, %v7847_v61, %v7855_v9 }
 0x526   : > { %v8167_v44 = vpop.permute.xlu0 %2068  ;;  %2158 = vrot.lane.b32.xlu1 %v8165_v8, %s4942_s5 }
 0x527   : > { %13474 = vst [vmem:[#allocation45_spill] sm:$0xff] %v8167_v44  ;;  %13476 = vst [vmem:[#allocation47_spill] sm:$0xff] %v8181_v11 }
 0x528   : > { %2284 = vrot.lane.b32.xlu0 %v8157_v36, %s4943_s6  ;;  %v8173_v23 = vpop.permute.xlu1 %2070 }
 0x529   : > { %13475 = vst [vmem:[#allocation102_spill] sm:$0xff] %v8173_v23  ;;  %v2291_v23 = vsel %vm5754_vm1, %v7853_v32, %v7865_v42  ;;  %v2289_v32 = vsel %vm5754_vm1, %v7877_v17, %v7885_v41  ;;  %v2322_v17 = vsel %vm5754_vm1, %v7887_v43, %v7895_v30  ;;  %v2320_v43 = vsel %vm5754_vm1, %v7903_v27, %v7911_v63 }
 0x52a   : > { %v8175_v24 = vpop.permute.xlu0 %2196  ;;  %2286 = vrot.lane.b32.xlu1 %v8165_v8, %s4943_s6  ;;  %v8215_v61 = vadd.f32 %v7619_v62, %v2291_v23 }
 0x52c   : > { %2152 = vrot.lane.b32.xlu0 %v8181_v11, %s4942_s5  ;;  %v8189_v44 = vpop.permute.xlu1 %2198  ;;  %13481 = vst [vmem:[#allocation89_spill] sm:$0xff] %v8215_v61 }
 0x52d   : > { %13477 = vst [vmem:[#allocation33_spill] sm:$0xff] %v8189_v44 }
 0x52e   : > { %v8191_v36 = vpop.permute.xlu0 %2064  ;;  %2154 = vrot.lane.b32.xlu1 %v8185_v4, %s4942_s5 }
 0x52f   : > { %13478 = vst [vmem:[#allocation111_spill] sm:$0xff] %v8191_v36  ;;  %v8208_v36 = vadd.f32 %v7613_v0, %v2290_v54  ;;  %v2288_v54 = vsel %vm5754_vm1, %v7871_v3, %v7879_v37  ;;  %v8245_v3 = vadd.f32 %v2289_v32, %v7623_v6  ;;  %v8268_v32 = vadd.f32 %v2322_v17, %v7645_v38 }
 0x530   : > { %2280 = vrot.lane.b32.xlu0 %v8181_v11, %s4943_s6  ;;  %v8201_v22 = vpop.permute.xlu1 %2066  ;;  %v8238_v42 = vadd.f32 %v2288_v54, %v7617_v59  ;;  %v2323_v54 = vsel %vm5754_vm1, %v7893_v21, %v7901_v12  ;;  %v2321_v38 = vsel %vm5754_vm1, %v7909_v25, %v7921_v48  ;;  %v8290_v12 = vadd.f32 %v2320_v43, %v7663_v33 }
 0x531   : > { %13480 = vst [vmem:[#allocation147_spill] sm:$0xff] %v8208_v36  ;;  %13483 = vst [vmem:[#allocation148_spill] sm:$0xff] %v8245_v3  ;;  %v8279_v30 = vadd.f32 %v2323_v54, %v7653_v28  ;;  %v2294_v28 = vsel %vm5754_vm1, %v7927_v19, %v7935_v2  ;;  %v8301_v27 = vadd.f32 %v2321_v38, %v7671_v49 }
 0x532   : > { %v8210_v44 = vpop.permute.xlu0 %2192  ;;  %2282 = vrot.lane.b32.xlu1 %v8185_v4, %s4943_s6  ;;  %13482 = vst [vmem:[#allocation98_spill] sm:$0xff] %v8238_v42  ;;  %13484 = vst [vmem:[#allocation65_spill] sm:$0xff] %v8268_v32  ;;  %v2295_v33 = vsel %vm5754_vm1, %v7933_v47, %v7945_v55  ;;  %v8312_v25 = vadd.f32 %v7633_v10, %v2294_v28  ;;  %v2292_v55 = vsel %vm5754_vm1, %v7951_v57, %v7959_v39 }
 0x533   : > { %13485 = vst [vmem:[#allocation50_spill] sm:$0xff] %v8279_v30  ;;  %13486 = vst [vmem:[#allocation114_spill] sm:$0xff] %v8290_v12  ;;  %v8319_v49 = vadd.f32 %v7639_v34, %v2295_v33  ;;  %v2293_v54 = vsel %vm5754_vm1, %v7957_v18, %v7965_v16  ;;  %v8342_v43 = vadd.f32 %v2292_v55, %v7637_v1  ;;  %v13506_v34 = vld [vmem:[#allocation136_spill] sm:$0xff] }
 0x534   : > { %2420 = vrot.lane.b32.xlu0 %v8208_v36, %s4944_s7  ;;  %v8219_v9 = vpop.permute.xlu1 %2194  ;;  %13487 = vst [vmem:[#allocation52_spill] sm:$0xff] %v8301_v27  ;;  %13488 = vst [vmem:[#allocation108_spill] sm:$0xff] %v8312_v25  ;;  %v8349_v57 = vadd.f32 %v2293_v54, %v7647_v5  ;;  %v2326_v16 = vsel %vm5754_vm1, %v7967_v35, %v7975_v58  ;;  %v2327_v33 = vsel %vm5754_vm1, %v7973_v56, %v7981_v60 }
 0x535   : > { %13489 = vst [vmem:[#allocation54_spill] sm:$0xff] %v8319_v49  ;;  %13490 = vst [vmem:[#allocation37_spill] sm:$0xff] %v8342_v43  ;;  %v8372_v55 = vadd.f32 %v2326_v16, %v7719_v46  ;;  %v2324_v58 = vsel %vm5754_vm1, %v7983_v53, %v7991_v51  ;;  %v8383_v35 = vadd.f32 %v2327_v33, %v7725_v40  ;;  %v13495_v40 = vld [vmem:[#allocation101_spill] sm:$0xff]  ;;  %v13496_v53 = vld [vmem:[#allocation100_spill] sm:$0xff] }
 0x536   : > { %v8221_v11 = vpop.permute.xlu0 %2132  ;;  %2422 = vrot.lane.b32.xlu1 %v8215_v61, %s4944_s7  ;;  %13491 = vst [vmem:[#allocation56_spill] sm:$0xff] %v8349_v57  ;;  %v2325_v56 = vsel %vm5754_vm1, %v7989_v15, %v8001_v31  ;;  %v8394_v46 = vadd.f32 %v2324_v58, %v7743_v20  ;;  %v2298_v51 = vsel %vm5754_vm1, %v13495_v40, %v8015_v7  ;;  %v13498_v20 = vld [vmem:[#allocation21_spill] sm:$0xff]  ;;  %v13501_v7 = vld [vmem:[#allocation138_spill] sm:$0xff] }
 0x537   : > { %13492 = vst [vmem:[#allocation75_spill] sm:$0xff] %v8372_v55  ;;  %13493 = vst [vmem:[#allocation58_spill] sm:$0xff] %v8383_v35  ;;  %v8405_v33 = vadd.f32 %v2325_v56, %v13496_v53  ;;  %v2299_v15 = vsel %vm5754_vm1, %v13498_v20, %v8025_v14  ;;  %v13499_v58 = vld [vmem:[#allocation81_spill] sm:$0xff]  ;;  %v13503_v14 = vld [vmem:[#allocation134_spill] sm:$0xff] }
 0x538   : > { %2548 = vrot.lane.b32.xlu0 %v8208_v36, %s4945_s8  ;;  %v8231_v23 = vpop.permute.xlu1 %2134  ;;  %13494 = vst [vmem:[#allocation82_spill] sm:$0xff] %v8394_v46  ;;  %v8416_v5 = vadd.f32 %v13499_v58, %v2298_v51  ;;  %v8423_v56 = vadd.f32 %v13501_v7, %v2299_v15  ;;  %v2296_v51 = vsel %vm5754_vm1, %v13503_v14, %v8039_v52  ;;  %v13504_v15 = vld [vmem:[#allocation29_spill] sm:$0xff]  ;;  %v13505_v7 = vld [vmem:[#allocation119_spill] sm:$0xff] }
 0x539   : > { %13497 = vst [vmem:[#allocation61_spill] sm:$0xff] %v8405_v33  ;;  %v2297_v58 = vsel %vm5754_vm1, %v13505_v7, %v13504_v15  ;;  %v8446_v10 = vadd.f32 %v2296_v51, %v13506_v34  ;;  %v13510_v7 = vld [vmem:[#allocation77_spill] sm:$0xff]  ;;  %v13513_v34 = vld [vmem:[#allocation142_spill] sm:$0xff] }
 0x53a   : > { %v8240_v62 = vpop.permute.xlu0 %2260  ;;  %2550 = vrot.lane.b32.xlu1 %v8215_v61, %s4945_s8  ;;  %13500 = vst [vmem:[#allocation86_spill] sm:$0xff] %v8416_v5  ;;  %13502 = vst [vmem:[#allocation66_spill] sm:$0xff] %v8423_v56  ;;  %v13511_v51 = vld [vmem:[#allocation13_spill] sm:$0xff] }
 0x53b   : > { %13507 = vst [vmem:[#allocation103_spill] sm:$0xff] %v8446_v10  ;;  %v2330_v15 = vsel %vm5754_vm1, %v13511_v51, %v13510_v7  ;;  %v13516_v7 = vld [vmem:[#allocation121_spill] sm:$0xff] }
 0x53c   : > { %2416 = vrot.lane.b32.xlu0 %v8238_v42, %s4944_s7  ;;  %v8249_v37 = vpop.permute.xlu1 %2262  ;;  %v2328_v51 = vsel %vm5754_vm1, %v13516_v7, %v8071_v13 }
 0x53e   : > { %v8251_v0 = vpop.permute.xlu0 %2128  ;;  %2418 = vrot.lane.b32.xlu1 %v8245_v3, %s4944_s7 }
 0x540   : > { %2544 = vrot.lane.b32.xlu0 %v8238_v42, %s4945_s8  ;;  %v8261_v41 = vpop.permute.xlu1 %2130  ;;  %v13521_v42 = vld [vmem:[#allocation116_spill] sm:$0xff] }
 0x542   : > { %v8270_v6 = vpop.permute.xlu0 %2256  ;;  %2546 = vrot.lane.b32.xlu1 %v8245_v3, %s4945_s8 }
 0x544   : > { %2484 = vrot.lane.b32.xlu0 %v8268_v32, %s4944_s7  ;;  %v8283_v21 = vpop.permute.xlu1 %2258  ;;  %v13549_v32 = vld [vmem:[#allocation118_spill] sm:$0xff] }
 0x546   : > { %v8292_v17 = vpop.permute.xlu0 %2076  ;;  %2486 = vrot.lane.b32.xlu1 %v8279_v30, %s4944_s7 }
 0x548   : > { %2480 = vrot.lane.b32.xlu0 %v8290_v12, %s4944_s7  ;;  %v8305_v48 = vpop.permute.xlu1 %2078 }
 0x54a   : > { %v8314_v63 = vpop.permute.xlu0 %2204  ;;  %2482 = vrot.lane.b32.xlu1 %v8301_v27, %s4944_s7 }
 0x54c   : > { %2428 = vrot.lane.b32.xlu0 %v8312_v25, %s4944_s7  ;;  %v8323_v2 = vpop.permute.xlu1 %2206 }
 0x54e   : > { %v8325_v19 = vpop.permute.xlu0 %2072  ;;  %2430 = vrot.lane.b32.xlu1 %v8319_v49, %s4944_s7 }
 0x550   : > { %2556 = vrot.lane.b32.xlu0 %v8312_v25, %s4945_s8  ;;  %v8335_v47 = vpop.permute.xlu1 %2074 }
 0x552   : > { %v8344_v38 = vpop.permute.xlu0 %2200  ;;  %2558 = vrot.lane.b32.xlu1 %v8319_v49, %s4945_s8 }
 0x554   : > { %2424 = vrot.lane.b32.xlu0 %v8342_v43, %s4944_s7  ;;  %v8353_v39 = vpop.permute.xlu1 %2202 }
 0x556   : > { %v8355_v28 = vpop.permute.xlu0 %2140  ;;  %2426 = vrot.lane.b32.xlu1 %v8349_v57, %s4944_s7 }
 0x558   : > { %2552 = vrot.lane.b32.xlu0 %v8342_v43, %s4945_s8  ;;  %v8365_v18 = vpop.permute.xlu1 %2142  ;;  %v13514_v43 = vld [vmem:[#allocation109_spill] sm:$0xff] }
 0x559   : > { %v8476_v49 = vadd.f32 %v2330_v15, %v13514_v43  ;;  %v13519_v43 = vld [vmem:[#allocation39_spill] sm:$0xff] }
 0x55a   : > { %v8374_v54 = vpop.permute.xlu0 %2268  ;;  %2554 = vrot.lane.b32.xlu1 %v8349_v57, %s4945_s8  ;;  %v13508_v57 = vld [vmem:[#allocation22_spill] sm:$0xff] }
 0x55b   : > { %v8453_v52 = vadd.f32 %v2297_v58, %v13508_v57  ;;  %v13512_v57 = vld [vmem:[#allocation129_spill] sm:$0xff]  ;;  %13515 = vst [vmem:[#allocation110_spill] sm:$0xff] %v8476_v49 }
 0x55c   : > { %2492 = vrot.lane.b32.xlu0 %v8372_v55, %s4944_s7  ;;  %v8387_v60 = vpop.permute.xlu1 %2270  ;;  %v13542_v55 = vld [vmem:[#allocation76_spill] sm:$0xff] }
 0x55d   : > { %13509 = vst [vmem:[#allocation68_spill] sm:$0xff] %v8453_v52 }
 0x55e   : > { %v8396_v16 = vpop.permute.xlu0 %2136  ;;  %2494 = vrot.lane.b32.xlu1 %v8383_v35, %s4944_s7  ;;  %v13536_v35 = vld [vmem:[#allocation90_spill] sm:$0xff] }
 0x560   : > { %2488 = vrot.lane.b32.xlu0 %v8394_v46, %s4944_s7  ;;  %v8409_v31 = vpop.permute.xlu1 %2138 }
 0x562   : > { %v8418_v1 = vpop.permute.xlu0 %2264  ;;  %2490 = vrot.lane.b32.xlu1 %v8405_v33, %s4944_s7 }
 0x564   : > { %2436 = vrot.lane.b32.xlu0 %v8416_v5, %s4944_s7  ;;  %v8427_v40 = vpop.permute.xlu1 %2266 }
 0x566   : > { %v8429_v53 = vpop.permute.xlu0 %2084  ;;  %2438 = vrot.lane.b32.xlu1 %v8423_v56, %s4944_s7 }
 0x568   : > { %2564 = vrot.lane.b32.xlu0 %v8416_v5, %s4945_s8  ;;  %v8439_v20 = vpop.permute.xlu1 %2086 }
 0x56a   : > { %v8448_v59 = vpop.permute.xlu0 %2212  ;;  %2566 = vrot.lane.b32.xlu1 %v8423_v56, %s4945_s8  ;;  %v2331_v56 = vsel %vm5754_vm1, %v13513_v34, %v13512_v57  ;;  %v13520_v57 = vld [vmem:[#allocation63_spill] sm:$0xff] }
 0x56b   : > { %v2329_v15 = vsel %vm5754_vm1, %v13520_v57, %v13519_v43  ;;  %v13527_v57 = vld [vmem:[#allocation94_spill] sm:$0xff] }
 0x56c   : > { %2432 = vrot.lane.b32.xlu0 %v8446_v10, %s4944_s7  ;;  %v8457_v14 = vpop.permute.xlu1 %2214 }
 0x56e   : > { %v8459_v5 = vpop.permute.xlu0 %2080  ;;  %2434 = vrot.lane.b32.xlu1 %v8453_v52, %s4944_s7 }
 0x570   : > { %2560 = vrot.lane.b32.xlu0 %v8446_v10, %s4945_s8  ;;  %v8469_v58 = vpop.permute.xlu1 %2082  ;;  %v13517_v10 = vld [vmem:[#allocation155_spill] sm:$0xff] }
 0x571   : > { %v8487_v3 = vadd.f32 %v2331_v56, %v13517_v10  ;;  %v13523_v10 = vld [vmem:[#allocation125_spill] sm:$0xff]  ;;  %v13524_v56 = vld [vmem:[#allocation156_spill] sm:$0xff] }
 0x572   : > { %v8478_v25 = vpop.permute.xlu0 %2208  ;;  %2562 = vrot.lane.b32.xlu1 %v8453_v52, %s4945_s8  ;;  %v8498_v52 = vadd.f32 %v2328_v51, %v13521_v42  ;;  %v2302_v13 = vsel %vm5754_vm1, %v13523_v10, %v8095_v29  ;;  %v8509_v7 = vadd.f32 %v2329_v15, %v13524_v56  ;;  %v13526_v42 = vld [vmem:[#allocation83_spill] sm:$0xff] }
 0x573   : > { %13518 = vst [vmem:[#allocation70_spill] sm:$0xff] %v8487_v3  ;;  %v2303_v51 = vsel %vm5754_vm1, %v13526_v42, %v8105_v50  ;;  %v8520_v36 = vadd.f32 %v13527_v57, %v2302_v13  ;;  %v13529_v29 = vld [vmem:[#allocation139_spill] sm:$0xff]  ;;  %v13531_v50 = vld [vmem:[#allocation88_spill] sm:$0xff] }
 0x574   : > { %2500 = vrot.lane.b32.xlu0 %v8476_v49, %s4944_s7  ;;  %v8491_v34 = vpop.permute.xlu1 %2210  ;;  %13522 = vst [vmem:[#allocation87_spill] sm:$0xff] %v8498_v52  ;;  %13525 = vst [vmem:[#allocation73_spill] sm:$0xff] %v8509_v7  ;;  %v8527_v15 = vadd.f32 %v13529_v29, %v2303_v51  ;;  %v2300_v13 = vsel %vm5754_vm1, %v13531_v50, %v8119_v45  ;;  %v13532_v51 = vld [vmem:[#allocation41_spill] sm:$0xff]  ;;  %v13534_v49 = vld [vmem:[#allocation96_spill] sm:$0xff] }
 0x575   : > { %13528 = vst [vmem:[#allocation112_spill] sm:$0xff] %v8520_v36  ;;  %v13533_v29 = vld [vmem:[#allocation49_spill] sm:$0xff] }
 0x576   : > { %v8500_v61 = vpop.permute.xlu0 %2148  ;;  %2502 = vrot.lane.b32.xlu1 %v8487_v3, %s4944_s7  ;;  %13530 = vst [vmem:[#allocation6_spill] sm:$0xff] %v8527_v15  ;;  %v2301_v57 = vsel %vm5754_vm1, %v13533_v29, %v13532_v51  ;;  %v13538_v29 = vld [vmem:[#allocation106_spill] sm:$0xff] }
 0x577   : > { %v8557_v45 = vadd.f32 %v2301_v57, %v13536_v35  ;;  %v13540_v35 = vld [vmem:[#allocation140_spill] sm:$0xff] }
 0x578   : > { %2496 = vrot.lane.b32.xlu0 %v8498_v52, %s4944_s7  ;;  %v8513_v43 = vpop.permute.xlu1 %2150 }
 0x579   : > { %13537 = vst [vmem:[#allocation10_spill] sm:$0xff] %v8557_v45 }
 0x57a   : > { %v8522_v3 = vpop.permute.xlu0 %2276  ;;  %2498 = vrot.lane.b32.xlu1 %v8509_v7, %s4944_s7  ;;  %v8550_v7 = vadd.f32 %v2300_v13, %v13534_v49  ;;  %v13539_v13 = vld [vmem:[#allocation99_spill] sm:$0xff] }
 0x57b   : > { %v2334_v51 = vsel %vm5754_vm1, %v13539_v13, %v13538_v29  ;;  %v13541_v49 = vld [vmem:[#allocation43_spill] sm:$0xff]  ;;  %v13544_v29 = vld [vmem:[#allocation85_spill] sm:$0xff] }
 0x57c   : > { %2444 = vrot.lane.b32.xlu0 %v8520_v36, %s4944_s7  ;;  %v8531_v10 = vpop.permute.xlu1 %2278  ;;  %13535 = vst [vmem:[#allocation123_spill] sm:$0xff] %v8550_v7  ;;  %v8580_v33 = vadd.f32 %v2334_v51, %v13542_v55  ;;  %v2332_v13 = vsel %vm5754_vm1, %v13544_v29, %v8151_v26  ;;  %v13547_v55 = vld [vmem:[#allocation141_spill] sm:$0xff] }
 0x57d   : > { %v13551_v26 = vld [vmem:[#allocation45_spill] sm:$0xff] }
 0x57e   : > { %v8533_v56 = vpop.permute.xlu0 %2144  ;;  %2446 = vrot.lane.b32.xlu1 %v8527_v15, %s4944_s7  ;;  %13543 = vst [vmem:[#allocation124_spill] sm:$0xff] %v8580_v33 }
 0x580   : > { %2572 = vrot.lane.b32.xlu0 %v8520_v36, %s4945_s8  ;;  %v8543_v42 = vpop.permute.xlu1 %2146 }
 0x582   : > { %v8552_v52 = vpop.permute.xlu0 %2272  ;;  %2574 = vrot.lane.b32.xlu1 %v8527_v15, %s4945_s8  ;;  %v2335_v15 = vsel %vm5754_vm1, %v13541_v49, %v13540_v35  ;;  %v13548_v35 = vld [vmem:[#allocation92_spill] sm:$0xff] }
 0x583   : > { %v2333_v51 = vsel %vm5754_vm1, %v13548_v35, %v13547_v55 }
 0x584   : > { %2440 = vrot.lane.b32.xlu0 %v8550_v7, %s4944_s7  ;;  %v8561_v50 = vpop.permute.xlu1 %2274 }
 0x586   : > { %v8563_v36 = vpop.permute.xlu0 %2092  ;;  %2442 = vrot.lane.b32.xlu1 %v8557_v45, %s4944_s7 }
 0x588   : > { %2568 = vrot.lane.b32.xlu0 %v8550_v7, %s4945_s8  ;;  %v8573_v57 = vpop.permute.xlu1 %2094  ;;  %v13545_v7 = vld [vmem:[#allocation157_spill] sm:$0xff] }
 0x589   : > { %v8591_v30 = vadd.f32 %v2335_v15, %v13545_v7  ;;  %v2306_v7 = vsel %vm5754_vm1, %v13551_v26, %v8175_v24  ;;  %v13552_v15 = vld [vmem:[#allocation115_spill] sm:$0xff]  ;;  %v13558_v24 = vld [vmem:[#allocation146_spill] sm:$0xff] }
 0x58a   : > { %v8582_v46 = vpop.permute.xlu0 %2220  ;;  %2570 = vrot.lane.b32.xlu1 %v8557_v45, %s4945_s8  ;;  %v8602_v45 = vadd.f32 %v2332_v13, %v13549_v32  ;;  %v8613_v29 = vadd.f32 %v2333_v51, %v13552_v15  ;;  %v13554_v32 = vld [vmem:[#allocation33_spill] sm:$0xff]  ;;  %v13555_v13 = vld [vmem:[#allocation102_spill] sm:$0xff] }
 0x58b   : > { %13546 = vst [vmem:[#allocation14_spill] sm:$0xff] %v8591_v30  ;;  %v2307_v35 = vsel %vm5754_vm1, %v13555_v13, %v13554_v32 }
 0x58c   : > { %2508 = vrot.lane.b32.xlu0 %v8580_v33, %s4944_s7  ;;  %v8595_v49 = vpop.permute.xlu1 %2222  ;;  %13550 = vst [vmem:[#allocation131_spill] sm:$0xff] %v8602_v45  ;;  %13553 = vst [vmem:[#allocation18_spill] sm:$0xff] %v8613_v29  ;;  %v13556_v33 = vld [vmem:[#allocation145_spill] sm:$0xff]  ;;  %v8631_v51 = vadd.f32 %v13558_v24, %v2307_v35  ;;  %v2305_v35 = vsel %vm5754_vm1, %v8201_v22, %v8219_v9  ;;  %v13561_v24 = vld [vmem:[#allocation64_spill] sm:$0xff]  ;;  %v2338_v22 = vsel %vm5754_vm1, %v8221_v11, %v8240_v62 }
 0x58d   : > { %v2336_v62 = vsel %vm5754_vm1, %v8251_v0, %v8270_v6  ;;  %v13567_v11 = vld [vmem:[#allocation78_spill] sm:$0xff]  ;;  %v2310_v0 = vsel %vm5754_vm1, %v8292_v17, %v8314_v63  ;;  %v13572_v6 = vld [vmem:[#allocation133_spill] sm:$0xff]  ;;  %v2308_v17 = vsel %vm5754_vm1, %v8325_v19, %v8344_v38 }
 0x58e   : > { %v8604_v27 = vpop.permute.xlu0 %2088  ;;  %2510 = vrot.lane.b32.xlu1 %v8591_v30, %s4944_s7  ;;  %v8624_v30 = vadd.f32 %v13556_v33, %v2306_v7  ;;  %13559 = vst [vmem:[#allocation26_spill] sm:$0xff] %v8631_v51  ;;  %v13560_v7 = vld [vmem:[#allocation111_spill] sm:$0xff]  ;;  %v13578_v63 = vld [vmem:[#allocation105_spill] sm:$0xff]  ;;  %v13584_v19 = vld [vmem:[#allocation150_spill] sm:$0xff] }
 0x58f   : > { %v2304_v32 = vsel %vm5754_vm1, %v13560_v7, %v8210_v44 }
 0x590   : > { %2504 = vrot.lane.b32.xlu0 %v8602_v45, %s4944_s7  ;;  %v8617_v55 = vpop.permute.xlu1 %2090  ;;  %13557 = vst [vmem:[#allocation132_spill] sm:$0xff] %v8624_v30  ;;  %v8654_v33 = vadd.f32 %v2304_v32, %v13561_v24  ;;  %v13563_v45 = vld [vmem:[#allocation104_spill] sm:$0xff]  ;;  %v2339_v32 = vsel %vm5754_vm1, %v8231_v23, %v8249_v37  ;;  %v2337_v37 = vsel %vm5754_vm1, %v8261_v41, %v8283_v21 }
 0x591   : > { %v8661_v44 = vadd.f32 %v2305_v35, %v13563_v45  ;;  %v13565_v35 = vld [vmem:[#allocation122_spill] sm:$0xff]  ;;  %v2311_v21 = vsel %vm5754_vm1, %v8305_v48, %v8323_v2  ;;  %v2309_v2 = vsel %vm5754_vm1, %v8335_v47, %v8353_v39  ;;  %v2342_v47 = vsel %vm5754_vm1, %v8355_v28, %v8374_v54  ;;  %v13592_v54 = vld [vmem:[#allocation9_spill] sm:$0xff] }
 0x592   : > { %v8626_v12 = vpop.permute.xlu0 %2216  ;;  %2506 = vrot.lane.b32.xlu1 %v8613_v29, %s4944_s7  ;;  %13562 = vst [vmem:[#allocation95_spill] sm:$0xff] %v8654_v33  ;;  %v8684_v45 = vadd.f32 %v2338_v22, %v13565_v35  ;;  %v13569_v22 = vld [vmem:[#allocation80_spill] sm:$0xff]  ;;  %v8757_v38 = vadd.f32 %v2309_v2, %v13584_v19  ;;  %v13589_v2 = vld [vmem:[#allocation93_spill] sm:$0xff]  ;;  %v2340_v28 = vsel %vm5754_vm1, %v8396_v16, %v8418_v1 }
 0x593   : > { %13564 = vst [vmem:[#allocation101_spill] sm:$0xff] %v8661_v44  ;;  %v8706_v35 = vadd.f32 %v2336_v62, %v13569_v22  ;;  %v13575_v62 = vld [vmem:[#allocation30_spill] sm:$0xff]  ;;  %v8780_v19 = vadd.f32 %v2342_v47, %v13589_v2  ;;  %v13595_v47 = vld [vmem:[#allocation5_spill] sm:$0xff]  ;;  %v2314_v1 = vsel %vm5754_vm1, %v8429_v53, %v8448_v59  ;;  %v2312_v59 = vsel %vm5754_vm1, %v8459_v5, %v8478_v25  ;;  %v13610_v25 = vld [vmem:[#allocation152_spill] sm:$0xff] }
 0x594   : > { %2452 = vrot.lane.b32.xlu0 %v8624_v30, %s4944_s7  ;;  %v8635_v26 = vpop.permute.xlu1 %2218  ;;  %13566 = vst [vmem:[#allocation100_spill] sm:$0xff] %v8684_v45  ;;  %13585 = vst [vmem:[#allocation39_spill] sm:$0xff] %v8757_v38  ;;  %v8802_v2 = vadd.f32 %v2340_v28, %v13595_v47  ;;  %v13598_v16 = vld [vmem:[#allocation25_spill] sm:$0xff]  ;;  %v13601_v28 = vld [vmem:[#allocation34_spill] sm:$0xff]  ;;  %v2346_v5 = vsel %vm5754_vm1, %v8500_v61, %v8522_v3  ;;  %v2344_v61 = vsel %vm5754_vm1, %v8533_v56, %v8552_v52 }
 0x595   : > { %13570 = vst [vmem:[#allocation134_spill] sm:$0xff] %v8706_v35  ;;  %13590 = vst [vmem:[#allocation156_spill] sm:$0xff] %v8780_v19  ;;  %v13604_v53 = vld [vmem:[#allocation113_spill] sm:$0xff]  ;;  %v2318_v52 = vsel %vm5754_vm1, %v8563_v36, %v8582_v46  ;;  %v2316_v36 = vsel %vm5754_vm1, %v8604_v27, %v8626_v12  ;;  %v13628_v46 = vld [vmem:[#allocation72_spill] sm:$0xff] }
 0x596   : > { %v8637_v15 = vpop.permute.xlu0 %2156  ;;  %2454 = vrot.lane.b32.xlu1 %v8631_v51, %s4944_s7  ;;  %13596 = vst [vmem:[#allocation49_spill] sm:$0xff] %v8802_v2  ;;  %v13616_v3 = vld [vmem:[#allocation17_spill] sm:$0xff]  ;;  %v13634_v27 = vld [vmem:[#allocation154_spill] sm:$0xff] }
 0x597   : > { %v13622_v56 = vld [vmem:[#allocation137_spill] sm:$0xff] }
 0x598   : > { %2580 = vrot.lane.b32.xlu0 %v8624_v30, %s4945_s8  ;;  %v8647_v13 = vpop.permute.xlu1 %2158 }
 0x59a   : > { %v8656_v29 = vpop.permute.xlu0 %2284  ;;  %2582 = vrot.lane.b32.xlu1 %v8631_v51, %s4945_s8  ;;  %v13747_v51 = vld [vmem:[#allocation67_spill] sm:$0xff] }
 0x59b   : > { %v2350_v12 = vsel %vm5754_vm1, %v8637_v15, %v8656_v29  ;;  %v13640_v15 = vld [vmem:[#allocation60_spill] sm:$0xff] }
 0x59c   : > { %2448 = vrot.lane.b32.xlu0 %v8654_v33, %s4944_s7  ;;  %v8665_v7 = vpop.permute.xlu1 %2286 }
 0x59e   : > { %v8667_v30 = vpop.permute.xlu0 %2152  ;;  %2450 = vrot.lane.b32.xlu1 %v8661_v44, %s4944_s7 }
 0x5a0   : > { %2576 = vrot.lane.b32.xlu0 %v8654_v33, %s4945_s8  ;;  %v8677_v9 = vpop.permute.xlu1 %2154  ;;  %v8695_v33 = vadd.f32 %v2339_v32, %v13567_v11  ;;  %v8717_v32 = vadd.f32 %v2337_v37, %v13572_v6  ;;  %v8728_v11 = vadd.f32 %v13575_v62, %v2310_v0  ;;  %v8739_v37 = vadd.f32 %v13578_v63, %v2311_v21  ;;  %v13581_v0 = vld [vmem:[#allocation149_spill] sm:$0xff] }
 0x5a1   : > { %v8750_v6 = vadd.f32 %v2308_v17, %v13581_v0  ;;  %v2343_v17 = vsel %vm5754_vm1, %v8365_v18, %v8387_v60  ;;  %v2341_v60 = vsel %vm5754_vm1, %v8409_v31, %v8427_v40  ;;  %v2315_v40 = vsel %vm5754_vm1, %v8439_v20, %v8457_v14 }
 0x5a2   : > { %v8686_v24 = vpop.permute.xlu0 %2280  ;;  %2578 = vrot.lane.b32.xlu1 %v8661_v44, %s4945_s8  ;;  %13568 = vst [vmem:[#allocation21_spill] sm:$0xff] %v8695_v33  ;;  %13573 = vst [vmem:[#allocation119_spill] sm:$0xff] %v8717_v32  ;;  %v2313_v14 = vsel %vm5754_vm1, %v8469_v58, %v8491_v34  ;;  %v2347_v34 = vsel %vm5754_vm1, %v8513_v43, %v8531_v10  ;;  %v2345_v10 = vsel %vm5754_vm1, %v8543_v42, %v8561_v50 }
 0x5a3   : > { %13576 = vst [vmem:[#allocation13_spill] sm:$0xff] %v8728_v11  ;;  %13579 = vst [vmem:[#allocation142_spill] sm:$0xff] %v8739_v37  ;;  %v2319_v50 = vsel %vm5754_vm1, %v8573_v57, %v8595_v49  ;;  %v2317_v49 = vsel %vm5754_vm1, %v8617_v55, %v8635_v26  ;;  %v2351_v26 = vsel %vm5754_vm1, %v8647_v13, %v8665_v7 }
 0x5a4   : > { %2516 = vrot.lane.b32.xlu0 %v8684_v45, %s4944_s7  ;;  %v8699_v23 = vpop.permute.xlu1 %2282  ;;  %13582 = vst [vmem:[#allocation121_spill] sm:$0xff] %v8750_v6  ;;  %v2348_v29 = vsel %vm5754_vm1, %v8667_v30, %v8686_v24 }
 0x5a5   : > { %v2349_v7 = vsel %vm5754_vm1, %v8677_v9, %v8699_v23 }
 0x5a6   : > { %v8708_v44 = vpop.permute.xlu0 %2420  ;;  %2518 = vrot.lane.b32.xlu1 %v8695_v33, %s4944_s7  ;;  %v8985_v30 = vadd.f32 %v2349_v7, %v8185_v4 }
 0x5a7   : > { %13571 = vst [vmem:[#allocation29_spill] sm:$0xff] %v8708_v44 }
 0x5a8   : > { %2512 = vrot.lane.b32.xlu0 %v8706_v35, %s4944_s7  ;;  %v8721_v41 = vpop.permute.xlu1 %2422  ;;  %13646 = vst [vmem:[#allocation162_spill] sm:$0xff] %v8985_v30 }
 0x5a9   : > { %13574 = vst [vmem:[#allocation77_spill] sm:$0xff] %v8721_v41 }
 0x5aa   : > { %v8730_v22 = vpop.permute.xlu0 %2548  ;;  %2514 = vrot.lane.b32.xlu1 %v8717_v32, %s4944_s7 }
 0x5ab   : > { %13577 = vst [vmem:[#allocation129_spill] sm:$0xff] %v8730_v22 }
 0x5ac   : > { %2460 = vrot.lane.b32.xlu0 %v8728_v11, %s4944_s7  ;;  %v8743_v48 = vpop.permute.xlu1 %2550 }
 0x5ad   : > { %13580 = vst [vmem:[#allocation109_spill] sm:$0xff] %v8743_v48 }
 0x5ae   : > { %v8752_v62 = vpop.permute.xlu0 %2416  ;;  %2462 = vrot.lane.b32.xlu1 %v8739_v37, %s4944_s7 }
 0x5af   : > { %13583 = vst [vmem:[#allocation155_spill] sm:$0xff] %v8752_v62 }
 0x5b0   : > { %2456 = vrot.lane.b32.xlu0 %v8750_v6, %s4944_s7  ;;  %v8761_v21 = vpop.permute.xlu1 %2418 }
 0x5b1   : > { %13586 = vst [vmem:[#allocation63_spill] sm:$0xff] %v8761_v21 }
 0x5b2   : > { %v8763_v63 = vpop.permute.xlu0 %2544  ;;  %2458 = vrot.lane.b32.xlu1 %v8757_v38, %s4944_s7 }
 0x5b3   : > { %13587 = vst [vmem:[#allocation116_spill] sm:$0xff] %v8763_v63 }
 0x5b4   : > { %2584 = vrot.lane.b32.xlu0 %v8750_v6, %s4945_s8  ;;  %v8773_v39 = vpop.permute.xlu1 %2546  ;;  %v8791_v6 = vadd.f32 %v2343_v17, %v13592_v54  ;;  %v8813_v17 = vadd.f32 %v2341_v60, %v13598_v16  ;;  %v8824_v54 = vadd.f32 %v13601_v28, %v2314_v1  ;;  %v8835_v60 = vadd.f32 %v13604_v53, %v2315_v40  ;;  %v13607_v1 = vld [vmem:[#allocation151_spill] sm:$0xff] }
 0x5b5   : > { %13588 = vst [vmem:[#allocation125_spill] sm:$0xff] %v8773_v39  ;;  %v8846_v16 = vadd.f32 %v2312_v59, %v13607_v1  ;;  %v8857_v40 = vadd.f32 %v2313_v14, %v13610_v25  ;;  %v13613_v59 = vld [vmem:[#allocation130_spill] sm:$0xff]  ;;  %v8879_v14 = vadd.f32 %v2347_v34, %v13616_v3  ;;  %v8901_v34 = vadd.f32 %v2345_v10, %v13622_v56 }
 0x5b6   : > { %v8782_v0 = vpop.permute.xlu0 %2484  ;;  %2586 = vrot.lane.b32.xlu1 %v8757_v38, %s4945_s8  ;;  %13593 = vst [vmem:[#allocation88_spill] sm:$0xff] %v8791_v6  ;;  %13599 = vst [vmem:[#allocation99_spill] sm:$0xff] %v8813_v17  ;;  %v8868_v53 = vadd.f32 %v2346_v5, %v13613_v59  ;;  %v13619_v5 = vld [vmem:[#allocation126_spill] sm:$0xff]  ;;  %v8923_v10 = vadd.f32 %v13628_v46, %v2319_v50  ;;  %v8945_v50 = vadd.f32 %v2317_v49, %v13634_v27 }
 0x5b7   : > { %13591 = vst [vmem:[#allocation83_spill] sm:$0xff] %v8782_v0  ;;  %13602 = vst [vmem:[#allocation43_spill] sm:$0xff] %v8824_v54  ;;  %v8890_v59 = vadd.f32 %v2344_v61, %v13619_v5  ;;  %v13625_v61 = vld [vmem:[#allocation107_spill] sm:$0xff]  ;;  %v8967_v49 = vadd.f32 %v2351_v26, %v13640_v15  ;;  %v13690_v38 = vld [vmem:[#allocation14_spill] sm:$0xff] }
 0x5b8   : > { %2524 = vrot.lane.b32.xlu0 %v8780_v19, %s4944_s7  ;;  %v8795_v18 = vpop.permute.xlu1 %2486  ;;  %13605 = vst [vmem:[#allocation85_spill] sm:$0xff] %v8835_v60  ;;  %13608 = vst [vmem:[#allocation141_spill] sm:$0xff] %v8846_v16  ;;  %v8912_v3 = vadd.f32 %v13625_v61, %v2318_v52  ;;  %v13631_v52 = vld [vmem:[#allocation153_spill] sm:$0xff] }
 0x5b9   : > { %13594 = vst [vmem:[#allocation41_spill] sm:$0xff] %v8795_v18  ;;  %13611 = vst [vmem:[#allocation118_spill] sm:$0xff] %v8857_v40  ;;  %v8934_v56 = vadd.f32 %v2316_v36, %v13631_v52  ;;  %v13637_v36 = vld [vmem:[#allocation91_spill] sm:$0xff]  ;;  %v13670_v18 = vld [vmem:[#allocation61_spill] sm:$0xff] }
 0x5ba   : > { %v8804_v0 = vpop.permute.xlu0 %2480  ;;  %2526 = vrot.lane.b32.xlu1 %v8791_v6, %s4944_s7  ;;  %13614 = vst [vmem:[#allocation115_spill] sm:$0xff] %v8868_v53  ;;  %13617 = vst [vmem:[#allocation102_spill] sm:$0xff] %v8879_v14  ;;  %v8956_v46 = vadd.f32 %v2350_v12, %v13637_v36  ;;  %v13643_v12 = vld [vmem:[#allocation47_spill] sm:$0xff] }
 0x5bb   : > { %13597 = vst [vmem:[#allocation106_spill] sm:$0xff] %v8804_v0  ;;  %13620 = vst [vmem:[#allocation122_spill] sm:$0xff] %v8890_v59  ;;  %v8978_v36 = vadd.f32 %v2348_v29, %v13643_v12 }
 0x5bc   : > { %2520 = vrot.lane.b32.xlu0 %v8802_v2, %s4944_s7  ;;  %v8817_v31 = vpop.permute.xlu1 %2482  ;;  %13623 = vst [vmem:[#allocation80_spill] sm:$0xff] %v8901_v34  ;;  %13626 = vst [vmem:[#allocation93_spill] sm:$0xff] %v8912_v3 }
 0x5bd   : > { %13600 = vst [vmem:[#allocation140_spill] sm:$0xff] %v8817_v31  ;;  %13629 = vst [vmem:[#allocation5_spill] sm:$0xff] %v8923_v10 }
 0x5be   : > { %v8826_v47 = vpop.permute.xlu0 %2428  ;;  %2522 = vrot.lane.b32.xlu1 %v8813_v17, %s4944_s7  ;;  %13632 = vst [vmem:[#allocation130_spill] sm:$0xff] %v8934_v56  ;;  %13635 = vst [vmem:[#allocation126_spill] sm:$0xff] %v8945_v50 }
 0x5bf   : > { %13603 = vst [vmem:[#allocation76_spill] sm:$0xff] %v8826_v47  ;;  %13638 = vst [vmem:[#allocation91_spill] sm:$0xff] %v8956_v46 }
 0x5c0   : > { %2468 = vrot.lane.b32.xlu0 %v8824_v54, %s4944_s7  ;;  %v8839_v20 = vpop.permute.xlu1 %2430  ;;  %13641 = vst [vmem:[#allocation60_spill] sm:$0xff] %v8967_v49  ;;  %13644 = vst [vmem:[#allocation47_spill] sm:$0xff] %v8978_v36 }
 0x5c1   : > { %13606 = vst [vmem:[#allocation157_spill] sm:$0xff] %v8839_v20 }
 0x5c2   : > { %v8848_v28 = vpop.permute.xlu0 %2556  ;;  %2470 = vrot.lane.b32.xlu1 %v8835_v60, %s4944_s7 }
 0x5c3   : > { %13609 = vst [vmem:[#allocation92_spill] sm:$0xff] %v8848_v28 }
 0x5c4   : > { %2464 = vrot.lane.b32.xlu0 %v8846_v16, %s4944_s7  ;;  %v8861_v58 = vpop.permute.xlu1 %2558 }
 0x5c5   : > { %13612 = vst [vmem:[#allocation45_spill] sm:$0xff] %v8861_v58 }
 0x5c6   : > { %v8870_v1 = vpop.permute.xlu0 %2424  ;;  %2466 = vrot.lane.b32.xlu1 %v8857_v40, %s4944_s7 }
 0x5c7   : > { %13615 = vst [vmem:[#allocation33_spill] sm:$0xff] %v8870_v1 }
 0x5c8   : > { %2532 = vrot.lane.b32.xlu0 %v8868_v53, %s4944_s7  ;;  %v8883_v43 = vpop.permute.xlu1 %2426 }
 0x5c9   : > { %13618 = vst [vmem:[#allocation111_spill] sm:$0xff] %v8883_v43 }
 0x5ca   : > { %v8892_v25 = vpop.permute.xlu0 %2552  ;;  %2534 = vrot.lane.b32.xlu1 %v8879_v14, %s4944_s7 }
 0x5cb   : > { %13621 = vst [vmem:[#allocation78_spill] sm:$0xff] %v8892_v25 }
 0x5cc   : > { %2528 = vrot.lane.b32.xlu0 %v8890_v59, %s4944_s7  ;;  %v8905_v42 = vpop.permute.xlu1 %2554 }
 0x5cd   : > { %13624 = vst [vmem:[#allocation133_spill] sm:$0xff] %v8905_v42 }
 0x5ce   : > { %v8914_v5 = vpop.permute.xlu0 %2492  ;;  %2530 = vrot.lane.b32.xlu1 %v8901_v34, %s4944_s7 }
 0x5cf   : > { %13627 = vst [vmem:[#allocation9_spill] sm:$0xff] %v8914_v5  ;;  %v13666_v5 = vld [vmem:[#allocation50_spill] sm:$0xff] }
 0x5d0   : > { %2476 = vrot.lane.b32.xlu0 %v8912_v3, %s4944_s7  ;;  %v8927_v57 = vpop.permute.xlu1 %2494 }
 0x5d1   : > { %13630 = vst [vmem:[#allocation25_spill] sm:$0xff] %v8927_v57 }
 0x5d2   : > { %v8936_v61 = vpop.permute.xlu0 %2488  ;;  %2478 = vrot.lane.b32.xlu1 %v8923_v10, %s4944_s7 }
 0x5d3   : > { %13633 = vst [vmem:[#allocation17_spill] sm:$0xff] %v8936_v61 }
 0x5d4   : > { %2472 = vrot.lane.b32.xlu0 %v8934_v56, %s4944_s7  ;;  %v8949_v55 = vpop.permute.xlu1 %2490 }
 0x5d5   : > { %13636 = vst [vmem:[#allocation137_spill] sm:$0xff] %v8949_v55 }
 0x5d6   : > { %v8958_v52 = vpop.permute.xlu0 %2436  ;;  %2474 = vrot.lane.b32.xlu1 %v8945_v50, %s4944_s7 }
 0x5d7   : > { %13639 = vst [vmem:[#allocation159_spill] sm:$0xff] %v8958_v52 }
 0x5d8   : > { %2540 = vrot.lane.b32.xlu0 %v8956_v46, %s4944_s7  ;;  %v8971_v13 = vpop.permute.xlu1 %2438 }
 0x5d9   : > { %13642 = vst [vmem:[#allocation160_spill] sm:$0xff] %v8971_v13 }
 0x5da   : > { %v8980_v27 = vpop.permute.xlu0 %2564  ;;  %2542 = vrot.lane.b32.xlu1 %v8967_v49, %s4944_s7 }
 0x5db   : > { %13645 = vst [vmem:[#allocation161_spill] sm:$0xff] %v8980_v27 }
 0x5dc   : > { %2536 = vrot.lane.b32.xlu0 %v8978_v36, %s4944_s7  ;;  %v8989_v24 = vpop.permute.xlu1 %2566 }
 0x5dd   : > { %13647 = vst [vmem:[#allocation163_spill] sm:$0xff] %v8989_v24 }
 0x5de   : > { %v8991_v26 = vpop.permute.xlu0 %2432  ;;  %2538 = vrot.lane.b32.xlu1 %v8985_v30, %s4944_s7 }
 0x5df   : > { %13648 = vst [vmem:[#allocation164_spill] sm:$0xff] %v8991_v26 }
 0x5e0   : > { %2588 = vrot.lane.b32.xlu0 %v8728_v11, %s4945_s8  ;;  %v8997_v9 = vpop.permute.xlu1 %2434  ;;  %v13686_v11 = vld [vmem:[#allocation18_spill] sm:$0xff] }
 0x5e1   : > { %13649 = vst [vmem:[#allocation165_spill] sm:$0xff] %v8997_v9 }
 0x5e2   : > { %v8999_v23 = vpop.permute.xlu0 %2560  ;;  %2590 = vrot.lane.b32.xlu1 %v8739_v37, %s4945_s8 }
 0x5e3   : > { %13650 = vst [vmem:[#allocation166_spill] sm:$0xff] %v8999_v23 }
 0x5e4   : > { %2592 = vrot.lane.b32.xlu0 %v8846_v16, %s4945_s8  ;;  %v9005_v4 = vpop.permute.xlu1 %2562 }
 0x5e5   : > { %13651 = vst [vmem:[#allocation167_spill] sm:$0xff] %v9005_v4 }
 0x5e6   : > { %v9007_v29 = vpop.permute.xlu0 %2500  ;;  %2594 = vrot.lane.b32.xlu1 %v8857_v40, %s4945_s8  ;;  %v13671_v40 = vld [vmem:[#allocation75_spill] sm:$0xff] }
 0x5e7   : > { %13652 = vst [vmem:[#allocation168_spill] sm:$0xff] %v9007_v29 }
 0x5e8   : > { %2596 = vrot.lane.b32.xlu0 %v8824_v54, %s4945_s8  ;;  %v9013_v15 = vpop.permute.xlu1 %2502 }
 0x5e9   : > { %13653 = vst [vmem:[#allocation169_spill] sm:$0xff] %v9013_v15 }
 0x5ea   : > { %v9015_v7 = vpop.permute.xlu0 %2496  ;;  %2598 = vrot.lane.b32.xlu1 %v8835_v60, %s4945_s8  ;;  %v13662_v60 = vld [vmem:[#allocation52_spill] sm:$0xff] }
 0x5eb   : > { %13654 = vst [vmem:[#allocation170_spill] sm:$0xff] %v9015_v7  ;;  %v13659_v7 = vld [vmem:[#allocation114_spill] sm:$0xff] }
 0x5ec   : > { %2600 = vrot.lane.b32.xlu0 %v8934_v56, %s4945_s8  ;;  %v9021_v12 = vpop.permute.xlu1 %2498 }
 0x5ed   : > { %13655 = vst [vmem:[#allocation171_spill] sm:$0xff] %v9021_v12 }
 0x5ee   : > { %v9023_v57 = vpop.permute.xlu0 %2444  ;;  %2602 = vrot.lane.b32.xlu1 %v8945_v50, %s4945_s8  ;;  %v13663_v50 = vld [vmem:[#allocation65_spill] sm:$0xff] }
 0x5ef   : > { %13656 = vst [vmem:[#allocation172_spill] sm:$0xff] %v9023_v57 }
 0x5f0   : > { %2604 = vrot.lane.b32.xlu0 %v8912_v3, %s4945_s8  ;;  %v9029_v29 = vpop.permute.xlu1 %2446 }
 0x5f1   : > { %13657 = vst [vmem:[#allocation173_spill] sm:$0xff] %v9029_v29 }
 0x5f2   : > { %v9031_v15 = vpop.permute.xlu0 %2572  ;;  %2606 = vrot.lane.b32.xlu1 %v8923_v10, %s4945_s8  ;;  %v13667_v10 = vld [vmem:[#allocation82_spill] sm:$0xff] }
 0x5f3   : > { %13658 = vst [vmem:[#allocation174_spill] sm:$0xff] %v9031_v15 }
 0x5f4   : > { %2608 = vrot.lane.b32.xlu0 %v13659_v7, %s4945_s8  ;;  %v9037_v56 = vpop.permute.xlu1 %2574  ;;  %v13731_v7 = vld [vmem:[#allocation46_spill] sm:$0xff] }
 0x5f5   : > { %13660 = vst [vmem:[#allocation175_spill] sm:$0xff] %v9037_v56 }
 0x5f6   : > { %v9039_v12 = vpop.permute.xlu0 %2440  ;;  %2610 = vrot.lane.b32.xlu1 %v13662_v60, %s4945_s8  ;;  %v13674_v60 = vld [vmem:[#allocation58_spill] sm:$0xff] }
 0x5f7   : > { %13661 = vst [vmem:[#allocation176_spill] sm:$0xff] %v9039_v12 }
 0x5f8   : > { %2612 = vrot.lane.b32.xlu0 %v13663_v50, %s4945_s8  ;;  %v9045_v3 = vpop.permute.xlu1 %2442 }
 0x5f9   : > { %13664 = vst [vmem:[#allocation177_spill] sm:$0xff] %v9045_v3 }
 0x5fa   : > { %v9047_v54 = vpop.permute.xlu0 %2568  ;;  %2614 = vrot.lane.b32.xlu1 %v13666_v5, %s4945_s8  ;;  %v13675_v5 = vld [vmem:[#allocation87_spill] sm:$0xff] }
 0x5fb   : > { %13665 = vst [vmem:[#allocation178_spill] sm:$0xff] %v9047_v54  ;;  %v13767_v54 = vld [vmem:[#allocation32_spill] sm:$0xff] }
 0x5fc   : > { %2616 = vrot.lane.b32.xlu0 %v13667_v10, %s4945_s8  ;;  %v9053_v55 = vpop.permute.xlu1 %2570 }
 0x5fd   : > { %13668 = vst [vmem:[#allocation179_spill] sm:$0xff] %v9053_v55  ;;  %v13763_v55 = vld [vmem:[#allocation24_spill] sm:$0xff] }
 0x5fe   : > { %v9055_v61 = vpop.permute.xlu0 %2508  ;;  %2618 = vrot.lane.b32.xlu1 %v13670_v18, %s4945_s8  ;;  %v13679_v18 = vld [vmem:[#allocation110_spill] sm:$0xff]  ;;  %v9517_v8 = vmul.f32 %v13763_v55, %v13763_v55 }
 0x5ff   : > { %13669 = vst [vmem:[#allocation180_spill] sm:$0xff] %v9055_v61  ;;  %v13678_v61 = vld [vmem:[#allocation73_spill] sm:$0xff] }
 0x600   : > { %2620 = vrot.lane.b32.xlu0 %v13671_v40, %s4945_s8  ;;  %v9061_v50 = vpop.permute.xlu1 %2510  ;;  %13812 = vst [vmem:[#allocation280_spill] sm:$0xff] %v9517_v8 }
 0x601   : > { %13672 = vst [vmem:[#allocation181_spill] sm:$0xff] %v9061_v50 }
 0x602   : > { %v9063_v16 = vpop.permute.xlu0 %2504  ;;  %2622 = vrot.lane.b32.xlu1 %v13674_v60, %s4945_s8  ;;  %v13683_v60 = vld [vmem:[#allocation131_spill] sm:$0xff] }
 0x603   : > { %13673 = vst [vmem:[#allocation182_spill] sm:$0xff] %v9063_v16  ;;  %v13682_v16 = vld [vmem:[#allocation70_spill] sm:$0xff] }
 0x604   : > { %2624 = vrot.lane.b32.xlu0 %v13675_v5, %s4945_s8  ;;  %v9069_v10 = vpop.permute.xlu1 %2506 }
 0x605   : > { %13676 = vst [vmem:[#allocation183_spill] sm:$0xff] %v9069_v10 }
 0x606   : > { %v9071_v37 = vpop.permute.xlu0 %2452  ;;  %2626 = vrot.lane.b32.xlu1 %v13678_v61, %s4945_s8  ;;  %v13687_v61 = vld [vmem:[#allocation124_spill] sm:$0xff] }
 0x607   : > { %13677 = vst [vmem:[#allocation184_spill] sm:$0xff] %v9071_v37 }
 0x608   : > { %2628 = vrot.lane.b32.xlu0 %v13679_v18, %s4945_s8  ;;  %v9077_v40 = vpop.permute.xlu1 %2454 }
 0x609   : > { %13680 = vst [vmem:[#allocation185_spill] sm:$0xff] %v9077_v40 }
 0x60a   : > { %v9079_v50 = vpop.permute.xlu0 %2580  ;;  %2630 = vrot.lane.b32.xlu1 %v13682_v16, %s4945_s8 }
 0x60b   : > { %13681 = vst [vmem:[#allocation186_spill] sm:$0xff] %v9079_v50  ;;  %v13759_v50 = vld [vmem:[#allocation16_spill] sm:$0xff] }
 0x60c   : > { %2632 = vrot.lane.b32.xlu0 %v13683_v60, %s4945_s8  ;;  %v9085_v5 = vpop.permute.xlu1 %2582 }
 0x60d   : > { %13684 = vst [vmem:[#allocation187_spill] sm:$0xff] %v9085_v5  ;;  %v13755_v5 = vld [vmem:[#allocation7_spill] sm:$0xff] }
 0x60e   : > { %v9087_v10 = vpop.permute.xlu0 %2448  ;;  %2634 = vrot.lane.b32.xlu1 %v13686_v11, %s4945_s8 }
 0x60f   : > { %13685 = vst [vmem:[#allocation188_spill] sm:$0xff] %v9087_v10 }
 0x610   : > { %2636 = vrot.lane.b32.xlu0 %v13687_v61, %s4945_s8  ;;  %v9093_v18 = vpop.permute.xlu1 %2450 }
 0x611   : > { %13688 = vst [vmem:[#allocation189_spill] sm:$0xff] %v9093_v18  ;;  %v13743_v18 = vld [vmem:[#allocation59_spill] sm:$0xff] }
 0x612   : > { %v9095_v31 = vpop.permute.xlu0 %2576  ;;  %2638 = vrot.lane.b32.xlu1 %v13690_v38, %s4945_s8 }
 0x613   : > { %13689 = vst [vmem:[#allocation190_spill] sm:$0xff] %v9095_v31  ;;  %v13751_v31 = vld [vmem:[#allocation71_spill] sm:$0xff] }
 0x614   : > { %2640 = vrot.lane.b32.xlu0 %v8706_v35, %s4945_s8  ;;  %v9101_v60 = vpop.permute.xlu1 %2578 }
 0x615   : > { %13691 = vst [vmem:[#allocation191_spill] sm:$0xff] %v9101_v60 }
 0x616   : > { %v9103_v16 = vpop.permute.xlu0 %2516  ;;  %2642 = vrot.lane.b32.xlu1 %v8717_v32, %s4945_s8 }
 0x617   : > { %13692 = vst [vmem:[#allocation192_spill] sm:$0xff] %v9103_v16 }
 0x618   : > { %2644 = vrot.lane.b32.xlu0 %v8684_v45, %s4945_s8  ;;  %v9109_v61 = vpop.permute.xlu1 %2518 }
 0x619   : > { %13693 = vst [vmem:[#allocation193_spill] sm:$0xff] %v9109_v61 }
 0x61a   : > { %v9111_v11 = vpop.permute.xlu0 %2512  ;;  %2646 = vrot.lane.b32.xlu1 %v8695_v33, %s4945_s8 }
 0x61b   : > { %13694 = vst [vmem:[#allocation194_spill] sm:$0xff] %v9111_v11  ;;  %v13719_v11 = vld [vmem:[#allocation31_spill] sm:$0xff] }
 0x61c   : > { %2648 = vrot.lane.b32.xlu0 %v8802_v2, %s4945_s8  ;;  %v9117_v35 = vpop.permute.xlu1 %2514 }
 0x61d   : > { %13695 = vst [vmem:[#allocation195_spill] sm:$0xff] %v9117_v35  ;;  %v13718_v35 = vld [vmem:[#allocation27_spill] sm:$0xff] }
 0x61e   : > { %v9119_v38 = vpop.permute.xlu0 %2460  ;;  %2650 = vrot.lane.b32.xlu1 %v8813_v17, %s4945_s8 }
 0x61f   : > { %13696 = vst [vmem:[#allocation196_spill] sm:$0xff] %v9119_v38 }
 0x620   : > { %2652 = vrot.lane.b32.xlu0 %v8780_v19, %s4945_s8  ;;  %v9125_v45 = vpop.permute.xlu1 %2462 }
 0x621   : > { %13697 = vst [vmem:[#allocation197_spill] sm:$0xff] %v9125_v45  ;;  %v13727_v45 = vld [vmem:[#allocation42_spill] sm:$0xff] }
 0x622   : > { %v9127_v61 = vpop.permute.xlu0 %2456  ;;  %2654 = vrot.lane.b32.xlu1 %v8791_v6, %s4945_s8 }
 0x623   : > { %13698 = vst [vmem:[#allocation198_spill] sm:$0xff] %v9127_v61  ;;  %v13739_v61 = vld [vmem:[#allocation55_spill] sm:$0xff] }
 0x624   : > { %2656 = vrot.lane.b32.xlu0 %v8890_v59, %s4945_s8  ;;  %v9133_v2 = vpop.permute.xlu1 %2458 }
 0x625   : > { %13699 = vst [vmem:[#allocation199_spill] sm:$0xff] %v9133_v2 }
 0x626   : > { %v9135_v33 = vpop.permute.xlu0 %2584  ;;  %2658 = vrot.lane.b32.xlu1 %v8901_v34, %s4945_s8 }
 0x627   : > { %13700 = vst [vmem:[#allocation200_spill] sm:$0xff] %v9135_v33 }
 0x628   : > { %2660 = vrot.lane.b32.xlu0 %v8868_v53, %s4945_s8  ;;  %v9141_v19 = vpop.permute.xlu1 %2586 }
 0x629   : > { %13701 = vst [vmem:[#allocation201_spill] sm:$0xff] %v9141_v19  ;;  %v13735_v19 = vld [vmem:[#allocation51_spill] sm:$0xff] }
 0x62a   : > { %v9143_v17 = vpop.permute.xlu0 %2524  ;;  %2662 = vrot.lane.b32.xlu1 %v8879_v14, %s4945_s8  ;;  %v13707_v14 = vld [vmem:[#allocation8_spill] sm:$0xff] }
 0x62b   : > { %13702 = vst [vmem:[#allocation202_spill] sm:$0xff] %v9143_v17  ;;  %v13710_v17 = vld [vmem:[#allocation11_spill] sm:$0xff]  ;;  %v9293_v56 = vmul.f32 %v13707_v14, %v13707_v14 }
 0x62c   : > { %2664 = vrot.lane.b32.xlu0 %v8978_v36, %s4945_s8  ;;  %v9149_v59 = vpop.permute.xlu1 %2526 }
 0x62d   : > { %13703 = vst [vmem:[#allocation203_spill] sm:$0xff] %v9149_v59 }
 0x62e   : > { %v9151_v6 = vpop.permute.xlu0 %2520  ;;  %2666 = vrot.lane.b32.xlu1 %v8985_v30, %s4945_s8  ;;  %v13711_v30 = vld [vmem:[#allocation15_spill] sm:$0xff] }
 0x62f   : > { %13704 = vst [vmem:[#allocation204_spill] sm:$0xff] %v9151_v6  ;;  %v13714_v6 = vld [vmem:[#allocation19_spill] sm:$0xff] }
 0x630   : > { %2668 = vrot.lane.b32.xlu0 %v8956_v46, %s4945_s8  ;;  %v9157_v53 = vpop.permute.xlu1 %2522 }
 0x631   : > { %13705 = vst [vmem:[#allocation205_spill] sm:$0xff] %v9157_v53 }
 0x632   : > { %v9159_v34 = vpop.permute.xlu0 %2468  ;;  %2670 = vrot.lane.b32.xlu1 %v8967_v49, %s4945_s8  ;;  %v13715_v49 = vld [vmem:[#allocation23_spill] sm:$0xff] }
 0x633   : > { %13706 = vst [vmem:[#allocation206_spill] sm:$0xff] %v9159_v34 }
 0x634   : > { %3192 = vrot.lane.b32.xlu0 %v13707_v14, %s4942_s5  ;;  %v9165_v36 = vpop.permute.xlu1 %2470 }
 0x635   : > { %13708 = vst [vmem:[#allocation207_spill] sm:$0xff] %v9165_v36 }
 0x636   : > { %v9167_v59 = vpop.permute.xlu0 %2464  ;;  %3194 = vrot.lane.b32.xlu1 %v13710_v17, %s4942_s5 }
 0x637   : > { %13709 = vst [vmem:[#allocation208_spill] sm:$0xff] %v9167_v59 }
 0x638   : > { %3196 = vrot.lane.b32.xlu0 %v13711_v30, %s4942_s5  ;;  %v9173_v46 = vpop.permute.xlu1 %2466 }
 0x639   : > { %13712 = vst [vmem:[#allocation209_spill] sm:$0xff] %v9173_v46  ;;  %v13723_v46 = vld [vmem:[#allocation38_spill] sm:$0xff] }
 0x63a   : > { %v9175_v53 = vpop.permute.xlu0 %2532  ;;  %3198 = vrot.lane.b32.xlu1 %v13714_v6, %s4942_s5 }
 0x63b   : > { %13713 = vst [vmem:[#allocation210_spill] sm:$0xff] %v9175_v53  ;;  %v13722_v53 = vld [vmem:[#allocation35_spill] sm:$0xff] }
 0x63c   : > { %3200 = vrot.lane.b32.xlu0 %v13715_v49, %s4942_s5  ;;  %v9181_v32 = vpop.permute.xlu1 %2534 }
 0x63d   : > { %13716 = vst [vmem:[#allocation211_spill] sm:$0xff] %v9181_v32 }
 0x63e   : > { %v9183_v16 = vpop.permute.xlu0 %2528  ;;  %3202 = vrot.lane.b32.xlu1 %v13718_v35, %s4942_s5 }
 0x63f   : > { %13717 = vst [vmem:[#allocation212_spill] sm:$0xff] %v9183_v16  ;;  %v13726_v16 = vld [vmem:[#allocation40_spill] sm:$0xff] }
 0x640   : > { %3204 = vrot.lane.b32.xlu0 %v13719_v11, %s4942_s5  ;;  %v9189_v36 = vpop.permute.xlu1 %2530 }
 0x641   : > { %13720 = vst [vmem:[#allocation213_spill] sm:$0xff] %v9189_v36 }
 0x642   : > { %v9191_v34 = vpop.permute.xlu0 %2476  ;;  %3206 = vrot.lane.b32.xlu1 %v13722_v53, %s4942_s5 }
 0x643   : > { %13721 = vst [vmem:[#allocation214_spill] sm:$0xff] %v9191_v34  ;;  %v13730_v34 = vld [vmem:[#allocation44_spill] sm:$0xff] }
 0x644   : > { %3208 = vrot.lane.b32.xlu0 %v13723_v46, %s4942_s5  ;;  %v9197_v59 = vpop.permute.xlu1 %2478 }
 0x645   : > { %13724 = vst [vmem:[#allocation215_spill] sm:$0xff] %v9197_v59 }
 0x646   : > { %v9199_v32 = vpop.permute.xlu0 %2472  ;;  %3210 = vrot.lane.b32.xlu1 %v13726_v16, %s4942_s5 }
 0x647   : > { %13725 = vst [vmem:[#allocation216_spill] sm:$0xff] %v9199_v32  ;;  %v13734_v32 = vld [vmem:[#allocation48_spill] sm:$0xff] }
 0x648   : > { %3212 = vrot.lane.b32.xlu0 %v13727_v45, %s4942_s5  ;;  %v9205_v38 = vpop.permute.xlu1 %2474 }
 0x649   : > { %13728 = vst [vmem:[#allocation217_spill] sm:$0xff] %v9205_v38 }
 0x64a   : > { %v9207_v36 = vpop.permute.xlu0 %2540  ;;  %3214 = vrot.lane.b32.xlu1 %v13730_v34, %s4942_s5 }
 0x64b   : > { %13729 = vst [vmem:[#allocation218_spill] sm:$0xff] %v9207_v36  ;;  %v13738_v36 = vld [vmem:[#allocation53_spill] sm:$0xff] }
 0x64c   : > { %3216 = vrot.lane.b32.xlu0 %v13731_v7, %s4942_s5  ;;  %v9213_v2 = vpop.permute.xlu1 %2542 }
 0x64d   : > { %13732 = vst [vmem:[#allocation219_spill] sm:$0xff] %v9213_v2 }
 0x64e   : > { %v9215_v59 = vpop.permute.xlu0 %2536  ;;  %3218 = vrot.lane.b32.xlu1 %v13734_v32, %s4942_s5 }
 0x64f   : > { %13733 = vst [vmem:[#allocation220_spill] sm:$0xff] %v9215_v59  ;;  %v13742_v59 = vld [vmem:[#allocation57_spill] sm:$0xff] }
 0x650   : > { %3220 = vrot.lane.b32.xlu0 %v13735_v19, %s4942_s5  ;;  %v9221_v0 = vpop.permute.xlu1 %2538 }
 0x651   : > { %13736 = vst [vmem:[#allocation221_spill] sm:$0xff] %v9221_v0 }
 0x652   : > { %v9223_v38 = vpop.permute.xlu0 %2588  ;;  %3222 = vrot.lane.b32.xlu1 %v13738_v36, %s4942_s5 }
 0x653   : > { %13737 = vst [vmem:[#allocation222_spill] sm:$0xff] %v9223_v38  ;;  %v13746_v38 = vld [vmem:[#allocation62_spill] sm:$0xff] }
 0x654   : > { %3224 = vrot.lane.b32.xlu0 %v13739_v61, %s4942_s5  ;;  %v9229_v33 = vpop.permute.xlu1 %2590 }
 0x655   : > { %13740 = vst [vmem:[#allocation223_spill] sm:$0xff] %v9229_v33 }
 0x656   : > { %v9231_v2 = vpop.permute.xlu0 %2592  ;;  %3226 = vrot.lane.b32.xlu1 %v13742_v59, %s4942_s5 }
 0x657   : > { %13741 = vst [vmem:[#allocation224_spill] sm:$0xff] %v9231_v2  ;;  %v13750_v2 = vld [vmem:[#allocation69_spill] sm:$0xff] }
 0x658   : > { %3228 = vrot.lane.b32.xlu0 %v13743_v18, %s4942_s5  ;;  %v9237_v60 = vpop.permute.xlu1 %2594 }
 0x659   : > { %13744 = vst [vmem:[#allocation225_spill] sm:$0xff] %v9237_v60 }
 0x65a   : > { %v9239_v0 = vpop.permute.xlu0 %2596  ;;  %3230 = vrot.lane.b32.xlu1 %v13746_v38, %s4942_s5 }
 0x65b   : > { %13745 = vst [vmem:[#allocation226_spill] sm:$0xff] %v9239_v0  ;;  %v13754_v0 = vld [vmem:[#allocation74_spill] sm:$0xff] }
 0x65c   : > { %3232 = vrot.lane.b32.xlu0 %v13747_v51, %s4942_s5  ;;  %v9245_v10 = vpop.permute.xlu1 %2598  ;;  %v9473_v62 = vmul.f32 %v13754_v0, %v13754_v0 }
 0x65d   : > { %13748 = vst [vmem:[#allocation227_spill] sm:$0xff] %v9245_v10 }
 0x65e   : > { %v9247_v33 = vpop.permute.xlu0 %2600  ;;  %3234 = vrot.lane.b32.xlu1 %v13750_v2, %s4942_s5  ;;  %13801 = vst [vmem:[#allocation269_spill] sm:$0xff] %v9473_v62 }
 0x65f   : > { %13749 = vst [vmem:[#allocation228_spill] sm:$0xff] %v9247_v33  ;;  %v13758_v33 = vld [vmem:[#allocation12_spill] sm:$0xff] }
 0x660   : > { %3236 = vrot.lane.b32.xlu0 %v13751_v31, %s4942_s5  ;;  %v9253_v40 = vpop.permute.xlu1 %2602  ;;  %v9493_v48 = vmul.f32 %v13758_v33, %v13758_v33 }
 0x661   : > { %13752 = vst [vmem:[#allocation229_spill] sm:$0xff] %v9253_v40 }
 0x662   : > { %v9255_v60 = vpop.permute.xlu0 %2604  ;;  %3238 = vrot.lane.b32.xlu1 %v13754_v0, %s4942_s5  ;;  %13806 = vst [vmem:[#allocation274_spill] sm:$0xff] %v9493_v48 }
 0x663   : > { %13753 = vst [vmem:[#allocation230_spill] sm:$0xff] %v9255_v60  ;;  %v13762_v60 = vld [vmem:[#allocation20_spill] sm:$0xff] }
 0x664   : > { %3240 = vrot.lane.b32.xlu0 %v13755_v5, %s4942_s5  ;;  %v9261_v37 = vpop.permute.xlu1 %2606 }
 0x665   : > { %13756 = vst [vmem:[#allocation231_spill] sm:$0xff] %v9261_v37 }
 0x666   : > { %v9263_v10 = vpop.permute.xlu0 %2608  ;;  %3242 = vrot.lane.b32.xlu1 %v13758_v33, %s4942_s5 }
 0x667   : > { %13757 = vst [vmem:[#allocation232_spill] sm:$0xff] %v9263_v10  ;;  %v13766_v10 = vld [vmem:[#allocation28_spill] sm:$0xff] }
 0x668   : > { %3244 = vrot.lane.b32.xlu0 %v13759_v50, %s4942_s5  ;;  %v9269_v3 = vpop.permute.xlu1 %2610 }
 0x669   : > { %13760 = vst [vmem:[#allocation233_spill] sm:$0xff] %v9269_v3 }
 0x66a   : > { %v9271_v40 = vpop.permute.xlu0 %2612  ;;  %3246 = vrot.lane.b32.xlu1 %v13762_v60, %s4942_s5 }
 0x66b   : > { %13761 = vst [vmem:[#allocation234_spill] sm:$0xff] %v9271_v40  ;;  %v13770_v40 = vld [vmem:[#allocation36_spill] sm:$0xff] }
 0x66c   : > { %3248 = vrot.lane.b32.xlu0 %v13763_v55, %s4942_s5  ;;  %v9277_v12 = vpop.permute.xlu1 %2614 }
 0x66d   : > { %13764 = vst [vmem:[#allocation235_spill] sm:$0xff] %v9277_v12  ;;  %v9301_v12 = vmul.f32 %v13710_v17, %v13710_v17 }
 0x66e   : > { %v9279_v37 = vpop.permute.xlu0 %2616  ;;  %3250 = vrot.lane.b32.xlu1 %v13766_v10, %s4942_s5 }
 0x66f   : > { %13765 = vst [vmem:[#allocation236_spill] sm:$0xff] %v9279_v37 }
 0x670   : > { %3252 = vrot.lane.b32.xlu0 %v13767_v54, %s4942_s5  ;;  %v9285_v29 = vpop.permute.xlu1 %2618 }
 0x671   : > { %13768 = vst [vmem:[#allocation237_spill] sm:$0xff] %v9285_v29 }
 0x672   : > { %v9287_v3 = vpop.permute.xlu0 %2620  ;;  %3254 = vrot.lane.b32.xlu1 %v13770_v40, %s4942_s5 }
 0x673   : > { %13769 = vst [vmem:[#allocation238_spill] sm:$0xff] %v9287_v3  ;;  %v9309_v3 = vmul.f32 %v13711_v30, %v13711_v30 }
 0x674   : > { %3256 = vrot.lane.b32.xlu0 %v9293_v56, %s4942_s5  ;;  %v9297_v37 = vpop.permute.xlu1 %2622 }
 0x675   : > { %13771 = vst [vmem:[#allocation239_spill] sm:$0xff] %v9297_v37  ;;  %v9317_v37 = vmul.f32 %v13714_v6, %v13714_v6 }
 0x676   : > { %v9303_v57 = vpop.permute.xlu0 %2624  ;;  %3258 = vrot.lane.b32.xlu1 %v9301_v12, %s4942_s5 }
 0x677   : > { %13772 = vst [vmem:[#allocation240_spill] sm:$0xff] %v9303_v57  ;;  %v9325_v57 = vmul.f32 %v13715_v49, %v13715_v49 }
 0x678   : > { %3260 = vrot.lane.b32.xlu0 %v9309_v3, %s4942_s5  ;;  %v9313_v29 = vpop.permute.xlu1 %2626 }
 0x679   : > { %13773 = vst [vmem:[#allocation241_spill] sm:$0xff] %v9313_v29  ;;  %v9333_v29 = vmul.f32 %v13718_v35, %v13718_v35 }
 0x67a   : > { %v9319_v15 = vpop.permute.xlu0 %2628  ;;  %3262 = vrot.lane.b32.xlu1 %v9317_v37, %s4942_s5 }
 0x67b   : > { %13774 = vst [vmem:[#allocation242_spill] sm:$0xff] %v9319_v15  ;;  %v9341_v15 = vmul.f32 %v13719_v11, %v13719_v11 }
 0x67c   : > { %3264 = vrot.lane.b32.xlu0 %v9325_v57, %s4942_s5  ;;  %v9329_v9 = vpop.permute.xlu1 %2630 }
 0x67d   : > { %13775 = vst [vmem:[#allocation243_spill] sm:$0xff] %v9329_v9  ;;  %v9349_v9 = vmul.f32 %v13722_v53, %v13722_v53 }
 0x67e   : > { %v9335_v4 = vpop.permute.xlu0 %2632  ;;  %3266 = vrot.lane.b32.xlu1 %v9333_v29, %s4942_s5 }
 0x67f   : > { %13776 = vst [vmem:[#allocation244_spill] sm:$0xff] %v9335_v4  ;;  %v9357_v4 = vmul.f32 %v13723_v46, %v13723_v46 }
 0x680   : > { %3268 = vrot.lane.b32.xlu0 %v9341_v15, %s4942_s5  ;;  %v9345_v26 = vpop.permute.xlu1 %2634 }
 0x681   : > { %13777 = vst [vmem:[#allocation245_spill] sm:$0xff] %v9345_v26  ;;  %v9365_v26 = vmul.f32 %v13726_v16, %v13726_v16 }
 0x682   : > { %v9351_v23 = vpop.permute.xlu0 %2636  ;;  %3270 = vrot.lane.b32.xlu1 %v9349_v9, %s4942_s5 }
 0x683   : > { %13778 = vst [vmem:[#allocation246_spill] sm:$0xff] %v9351_v23  ;;  %v9373_v23 = vmul.f32 %v13727_v45, %v13727_v45 }
 0x684   : > { %3272 = vrot.lane.b32.xlu0 %v9357_v4, %s4942_s5  ;;  %v9361_v13 = vpop.permute.xlu1 %2638 }
 0x685   : > { %13779 = vst [vmem:[#allocation247_spill] sm:$0xff] %v9361_v13  ;;  %v9381_v13 = vmul.f32 %v13730_v34, %v13730_v34 }
 0x686   : > { %v9367_v24 = vpop.permute.xlu0 %2640  ;;  %3274 = vrot.lane.b32.xlu1 %v9365_v26, %s4942_s5 }
 0x687   : > { %13780 = vst [vmem:[#allocation248_spill] sm:$0xff] %v9367_v24  ;;  %v9389_v24 = vmul.f32 %v13731_v7, %v13731_v7 }
 0x688   : > { %3276 = vrot.lane.b32.xlu0 %v9373_v23, %s4942_s5  ;;  %v9377_v52 = vpop.permute.xlu1 %2642 }
 0x689   : > { %13781 = vst [vmem:[#allocation249_spill] sm:$0xff] %v9377_v52  ;;  %v9397_v52 = vmul.f32 %v13734_v32, %v13734_v32 }
 0x68a   : > { %v9383_v27 = vpop.permute.xlu0 %2644  ;;  %3278 = vrot.lane.b32.xlu1 %v9381_v13, %s4942_s5 }
 0x68b   : > { %13782 = vst [vmem:[#allocation250_spill] sm:$0xff] %v9383_v27  ;;  %v9405_v27 = vmul.f32 %v13735_v19, %v13735_v19 }
 0x68c   : > { %3280 = vrot.lane.b32.xlu0 %v9389_v24, %s4942_s5  ;;  %v9393_v43 = vpop.permute.xlu1 %2646 }
 0x68d   : > { %13783 = vst [vmem:[#allocation251_spill] sm:$0xff] %v9393_v43  ;;  %v9413_v43 = vmul.f32 %v13738_v36, %v13738_v36 }
 0x68e   : > { %v9399_v42 = vpop.permute.xlu0 %2648  ;;  %3282 = vrot.lane.b32.xlu1 %v9397_v52, %s4942_s5 }
 0x68f   : > { %13784 = vst [vmem:[#allocation252_spill] sm:$0xff] %v9399_v42  ;;  %13786 = vst [vmem:[#allocation254_spill] sm:$0xff] %v9413_v43  ;;  %v9421_v42 = vmul.f32 %v13739_v61, %v13739_v61 }
 0x690   : > { %3284 = vrot.lane.b32.xlu0 %v9405_v27, %s4942_s5  ;;  %v9409_v1 = vpop.permute.xlu1 %2650 }
 0x691   : > { %13785 = vst [vmem:[#allocation253_spill] sm:$0xff] %v9409_v1  ;;  %13788 = vst [vmem:[#allocation256_spill] sm:$0xff] %v9421_v42  ;;  %v9429_v1 = vmul.f32 %v13742_v59, %v13742_v59 }
 0x692   : > { %v9415_v25 = vpop.permute.xlu0 %2652  ;;  %3286 = vrot.lane.b32.xlu1 %v9413_v43, %s4942_s5 }
 0x693   : > { %13787 = vst [vmem:[#allocation255_spill] sm:$0xff] %v9415_v25  ;;  %13790 = vst [vmem:[#allocation258_spill] sm:$0xff] %v9429_v1  ;;  %v9437_v25 = vmul.f32 %v13743_v18, %v13743_v18 }
 0x694   : > { %3288 = vrot.lane.b32.xlu0 %v9421_v42, %s4942_s5  ;;  %v9425_v20 = vpop.permute.xlu1 %2654 }
 0x695   : > { %13789 = vst [vmem:[#allocation257_spill] sm:$0xff] %v9425_v20  ;;  %13792 = vst [vmem:[#allocation260_spill] sm:$0xff] %v9437_v25  ;;  %v9445_v20 = vmul.f32 %v13746_v38, %v13746_v38 }
 0x696   : > { %v9431_v58 = vpop.permute.xlu0 %2656  ;;  %3290 = vrot.lane.b32.xlu1 %v9429_v1, %s4942_s5 }
 0x697   : > { %13791 = vst [vmem:[#allocation259_spill] sm:$0xff] %v9431_v58  ;;  %13794 = vst [vmem:[#allocation262_spill] sm:$0xff] %v9445_v20  ;;  %v9453_v58 = vmul.f32 %v13747_v51, %v13747_v51 }
 0x698   : > { %3292 = vrot.lane.b32.xlu0 %v9437_v25, %s4942_s5  ;;  %v9441_v47 = vpop.permute.xlu1 %2658 }
 0x699   : > { %13793 = vst [vmem:[#allocation261_spill] sm:$0xff] %v9441_v47  ;;  %13796 = vst [vmem:[#allocation264_spill] sm:$0xff] %v9453_v58  ;;  %v9461_v47 = vmul.f32 %v13750_v2, %v13750_v2 }
 0x69a   : > { %v9447_v28 = vpop.permute.xlu0 %2660  ;;  %3294 = vrot.lane.b32.xlu1 %v9445_v20, %s4942_s5 }
 0x69b   : > { %13795 = vst [vmem:[#allocation263_spill] sm:$0xff] %v9447_v28  ;;  %13798 = vst [vmem:[#allocation266_spill] sm:$0xff] %v9461_v47  ;;  %v9469_v28 = vmul.f32 %v13751_v31, %v13751_v31 }
 0x69c   : > { %3296 = vrot.lane.b32.xlu0 %v9453_v58, %s4942_s5  ;;  %v9457_v21 = vpop.permute.xlu1 %2662 }
 0x69d   : > { %13797 = vst [vmem:[#allocation265_spill] sm:$0xff] %v9457_v21  ;;  %13800 = vst [vmem:[#allocation268_spill] sm:$0xff] %v9469_v28 }
 0x69e   : > { %v9463_v39 = vpop.permute.xlu0 %2664  ;;  %3298 = vrot.lane.b32.xlu1 %v9461_v47, %s4942_s5 }
 0x69f   : > { %13799 = vst [vmem:[#allocation267_spill] sm:$0xff] %v9463_v39  ;;  %v9485_v39 = vmul.f32 %v13755_v5, %v13755_v5 }
 0x6a0   : > { %3300 = vrot.lane.b32.xlu0 %v9469_v28, %s4942_s5  ;;  %v9477_v21 = vpop.permute.xlu1 %2666 }
 0x6a1   : > { %13802 = vst [vmem:[#allocation270_spill] sm:$0xff] %v9477_v21  ;;  %13804 = vst [vmem:[#allocation272_spill] sm:$0xff] %v9485_v39 }
 0x6a2   : > { %v9479_v63 = vpop.permute.xlu0 %2668  ;;  %3302 = vrot.lane.b32.xlu1 %v9473_v62, %s4942_s5 }
 0x6a3   : > { %13803 = vst [vmem:[#allocation271_spill] sm:$0xff] %v9479_v63  ;;  %v9501_v63 = vmul.f32 %v13759_v50, %v13759_v50 }
 0x6a4   : > { %3304 = vrot.lane.b32.xlu0 %v9485_v39, %s4942_s5  ;;  %v9489_v41 = vpop.permute.xlu1 %2670 }
 0x6a5   : > { %13805 = vst [vmem:[#allocation273_spill] sm:$0xff] %v9489_v41  ;;  %13808 = vst [vmem:[#allocation276_spill] sm:$0xff] %v9501_v63  ;;  %v9509_v41 = vmul.f32 %v13762_v60, %v13762_v60 }
 0x6a6   : > { %v9495_v44 = vpop.permute.xlu0 %3192  ;;  %3306 = vrot.lane.b32.xlu1 %v9493_v48, %s4942_s5 }
 0x6a7   : > { %13807 = vst [vmem:[#allocation275_spill] sm:$0xff] %v9495_v44  ;;  %13810 = vst [vmem:[#allocation278_spill] sm:$0xff] %v9509_v41 }
 0x6a8   : > { %3308 = vrot.lane.b32.xlu0 %v9501_v63, %s4942_s5  ;;  %v9505_v21 = vpop.permute.xlu1 %3194 }
 0x6a9   : > { %13809 = vst [vmem:[#allocation277_spill] sm:$0xff] %v9505_v21  ;;  %v9525_v21 = vmul.f32 %v13766_v10, %v13766_v10 }
 0x6aa   : > { %v9511_v22 = vpop.permute.xlu0 %3196  ;;  %3310 = vrot.lane.b32.xlu1 %v9509_v41, %s4942_s5 }
 0x6ab   : > { %13811 = vst [vmem:[#allocation279_spill] sm:$0xff] %v9511_v22  ;;  %13814 = vst [vmem:[#allocation282_spill] sm:$0xff] %v9525_v21  ;;  %v9533_v22 = vmul.f32 %v13767_v54, %v13767_v54 }
 0x6ac   : > { %3312 = vrot.lane.b32.xlu0 %v9517_v8, %s4942_s5  ;;  %v9521_v44 = vpop.permute.xlu1 %3198 }
 0x6ad   : > { %13813 = vst [vmem:[#allocation281_spill] sm:$0xff] %v9521_v44  ;;  %13816 = vst [vmem:[#allocation284_spill] sm:$0xff] %v9533_v22  ;;  %v9541_v44 = vmul.f32 %v13770_v40, %v13770_v40 }
 0x6ae   : > { %v9527_v63 = vpop.permute.xlu0 %3200  ;;  %3314 = vrot.lane.b32.xlu1 %v9525_v21, %s4942_s5 }
 0x6af   : > { %13815 = vst [vmem:[#allocation283_spill] sm:$0xff] %v9527_v63 }
 0x6b0   : > { %3316 = vrot.lane.b32.xlu0 %v9533_v22, %s4942_s5  ;;  %v9537_v41 = vpop.permute.xlu1 %3202 }
 0x6b1   : > { %13817 = vst [vmem:[#allocation285_spill] sm:$0xff] %v9537_v41 }
 0x6b2   : > { %v9543_v8 = vpop.permute.xlu0 %3204  ;;  %3318 = vrot.lane.b32.xlu1 %v9541_v44, %s4942_s5 }
 0x6b3   : > { %13818 = vst [vmem:[#allocation286_spill] sm:$0xff] %v9543_v8 }
 0x6b4   : > { %3320 = vrot.lane.b32.xlu0 %v13707_v14, %s4943_s6  ;;  %v9549_v63 = vpop.permute.xlu1 %3206 }
 0x6b5   : > { %13819 = vst [vmem:[#allocation287_spill] sm:$0xff] %v9549_v63 }
 0x6b6   : > { %v9551_v21 = vpop.permute.xlu0 %3208  ;;  %3322 = vrot.lane.b32.xlu1 %v13710_v17, %s4943_s6 }
 0x6b7   : > { %13820 = vst [vmem:[#allocation288_spill] sm:$0xff] %v9551_v21 }
 0x6b8   : > { %3324 = vrot.lane.b32.xlu0 %v13711_v30, %s4943_s6  ;;  %v9557_v41 = vpop.permute.xlu1 %3210 }
 0x6b9   : > { %13821 = vst [vmem:[#allocation289_spill] sm:$0xff] %v9557_v41 }
 0x6ba   : > { %v9559_v22 = vpop.permute.xlu0 %3212  ;;  %3326 = vrot.lane.b32.xlu1 %v13714_v6, %s4943_s6 }
 0x6bb   : > { %13822 = vst [vmem:[#allocation290_spill] sm:$0xff] %v9559_v22 }
 0x6bc   : > { %3328 = vrot.lane.b32.xlu0 %v13715_v49, %s4943_s6  ;;  %v9565_v8 = vpop.permute.xlu1 %3214 }
 0x6bd   : > { %13823 = vst [vmem:[#allocation291_spill] sm:$0xff] %v9565_v8 }
 0x6be   : > { %v9567_v63 = vpop.permute.xlu0 %3216  ;;  %3330 = vrot.lane.b32.xlu1 %v13718_v35, %s4943_s6 }
 0x6bf   : > { %13824 = vst [vmem:[#allocation292_spill] sm:$0xff] %v9567_v63 }
 0x6c0   : > { %3332 = vrot.lane.b32.xlu0 %v13719_v11, %s4943_s6  ;;  %v9573_v21 = vpop.permute.xlu1 %3218 }
 0x6c1   : > { %13825 = vst [vmem:[#allocation293_spill] sm:$0xff] %v9573_v21 }
 0x6c2   : > { %v9575_v41 = vpop.permute.xlu0 %3220  ;;  %3334 = vrot.lane.b32.xlu1 %v13722_v53, %s4943_s6 }
 0x6c3   : > { %13826 = vst [vmem:[#allocation294_spill] sm:$0xff] %v9575_v41 }
 0x6c4   : > { %3336 = vrot.lane.b32.xlu0 %v13723_v46, %s4943_s6  ;;  %v9581_v22 = vpop.permute.xlu1 %3222 }
 0x6c5   : > { %13827 = vst [vmem:[#allocation295_spill] sm:$0xff] %v9581_v22 }
 0x6c6   : > { %v9583_v8 = vpop.permute.xlu0 %3224  ;;  %3338 = vrot.lane.b32.xlu1 %v13726_v16, %s4943_s6 }
 0x6c7   : > { %13828 = vst [vmem:[#allocation296_spill] sm:$0xff] %v9583_v8 }
 0x6c8   : > { %3340 = vrot.lane.b32.xlu0 %v13727_v45, %s4943_s6  ;;  %v9589_v63 = vpop.permute.xlu1 %3226 }
 0x6c9   : > { %13829 = vst [vmem:[#allocation297_spill] sm:$0xff] %v9589_v63 }
 0x6ca   : > { %v9591_v21 = vpop.permute.xlu0 %3228  ;;  %3342 = vrot.lane.b32.xlu1 %v13730_v34, %s4943_s6 }
 0x6cb   : > { %13830 = vst [vmem:[#allocation298_spill] sm:$0xff] %v9591_v21 }
 0x6cc   : > { %3344 = vrot.lane.b32.xlu0 %v13731_v7, %s4943_s6  ;;  %v9597_v41 = vpop.permute.xlu1 %3230 }
 0x6cd   : > { %13831 = vst [vmem:[#allocation299_spill] sm:$0xff] %v9597_v41 }
 0x6ce   : > { %v9599_v22 = vpop.permute.xlu0 %3232  ;;  %3346 = vrot.lane.b32.xlu1 %v13734_v32, %s4943_s6 }
 0x6cf   : > { %13832 = vst [vmem:[#allocation300_spill] sm:$0xff] %v9599_v22 }
 0x6d0   : > { %3348 = vrot.lane.b32.xlu0 %v13735_v19, %s4943_s6  ;;  %v9605_v8 = vpop.permute.xlu1 %3234 }
 0x6d1   : > { %13833 = vst [vmem:[#allocation301_spill] sm:$0xff] %v9605_v8 }
 0x6d2   : > { %v9607_v63 = vpop.permute.xlu0 %3236  ;;  %3350 = vrot.lane.b32.xlu1 %v13738_v36, %s4943_s6 }
 0x6d3   : > { %13834 = vst [vmem:[#allocation302_spill] sm:$0xff] %v9607_v63 }
 0x6d4   : > { %3352 = vrot.lane.b32.xlu0 %v13739_v61, %s4943_s6  ;;  %v9613_v21 = vpop.permute.xlu1 %3238 }
 0x6d5   : > { %13835 = vst [vmem:[#allocation303_spill] sm:$0xff] %v9613_v21 }
 0x6d6   : > { %v9615_v41 = vpop.permute.xlu0 %3240  ;;  %3354 = vrot.lane.b32.xlu1 %v13742_v59, %s4943_s6 }
 0x6d7   : > { %13836 = vst [vmem:[#allocation304_spill] sm:$0xff] %v9615_v41 }
 0x6d8   : > { %3356 = vrot.lane.b32.xlu0 %v13743_v18, %s4943_s6  ;;  %v9621_v22 = vpop.permute.xlu1 %3242 }
 0x6d9   : > { %13837 = vst [vmem:[#allocation305_spill] sm:$0xff] %v9621_v22 }
 0x6da   : > { %v9623_v8 = vpop.permute.xlu0 %3244  ;;  %3358 = vrot.lane.b32.xlu1 %v13746_v38, %s4943_s6 }
 0x6db   : > { %13838 = vst [vmem:[#allocation306_spill] sm:$0xff] %v9623_v8 }
 0x6dc   : > { %3360 = vrot.lane.b32.xlu0 %v13747_v51, %s4943_s6  ;;  %v9629_v63 = vpop.permute.xlu1 %3246 }
 0x6dd   : > { %13839 = vst [vmem:[#allocation307_spill] sm:$0xff] %v9629_v63 }
 0x6de   : > { %v9631_v21 = vpop.permute.xlu0 %3248  ;;  %3362 = vrot.lane.b32.xlu1 %v13750_v2, %s4943_s6 }
 0x6df   : > { %13840 = vst [vmem:[#allocation308_spill] sm:$0xff] %v9631_v21 }
 0x6e0   : > { %3364 = vrot.lane.b32.xlu0 %v13751_v31, %s4943_s6  ;;  %v9637_v41 = vpop.permute.xlu1 %3250 }
 0x6e1   : > { %13841 = vst [vmem:[#allocation309_spill] sm:$0xff] %v9637_v41 }
 0x6e2   : > { %v9639_v22 = vpop.permute.xlu0 %3252  ;;  %3366 = vrot.lane.b32.xlu1 %v13754_v0, %s4943_s6 }
 0x6e3   : > { %13842 = vst [vmem:[#allocation310_spill] sm:$0xff] %v9639_v22 }
 0x6e4   : > { %3368 = vrot.lane.b32.xlu0 %v13755_v5, %s4943_s6  ;;  %v9645_v8 = vpop.permute.xlu1 %3254 }
 0x6e5   : > { %13843 = vst [vmem:[#allocation311_spill] sm:$0xff] %v9645_v8 }
 0x6e6   : > { %v9647_v63 = vpop.permute.xlu0 %3256  ;;  %3370 = vrot.lane.b32.xlu1 %v13758_v33, %s4943_s6 }
 0x6e7   : > { %13844 = vst [vmem:[#allocation312_spill] sm:$0xff] %v9647_v63 }
 0x6e8   : > { %3372 = vrot.lane.b32.xlu0 %v13759_v50, %s4943_s6  ;;  %v9653_v21 = vpop.permute.xlu1 %3258 }
 0x6e9   : > { %13845 = vst [vmem:[#allocation313_spill] sm:$0xff] %v9653_v21 }
 0x6ea   : > { %v9655_v41 = vpop.permute.xlu0 %3260  ;;  %3374 = vrot.lane.b32.xlu1 %v13762_v60, %s4943_s6 }
 0x6eb   : > { %13846 = vst [vmem:[#allocation314_spill] sm:$0xff] %v9655_v41 }
 0x6ec   : > { %3376 = vrot.lane.b32.xlu0 %v13763_v55, %s4943_s6  ;;  %v9661_v22 = vpop.permute.xlu1 %3262 }
 0x6ed   : > { %13847 = vst [vmem:[#allocation315_spill] sm:$0xff] %v9661_v22 }
 0x6ee   : > { %v9663_v8 = vpop.permute.xlu0 %3264  ;;  %3378 = vrot.lane.b32.xlu1 %v13766_v10, %s4943_s6 }
 0x6ef   : > { %13848 = vst [vmem:[#allocation316_spill] sm:$0xff] %v9663_v8 }
 0x6f0   : > { %3380 = vrot.lane.b32.xlu0 %v13767_v54, %s4943_s6  ;;  %v9669_v63 = vpop.permute.xlu1 %3266 }
 0x6f1   : > { %13849 = vst [vmem:[#allocation317_spill] sm:$0xff] %v9669_v63 }
 0x6f2   : > { %v9671_v21 = vpop.permute.xlu0 %3268  ;;  %3382 = vrot.lane.b32.xlu1 %v13770_v40, %s4943_s6 }
 0x6f3   : > { %13850 = vst [vmem:[#allocation318_spill] sm:$0xff] %v9671_v21 }
 0x6f4   : > { %3384 = vrot.lane.b32.xlu0 %v9293_v56, %s4943_s6  ;;  %v9677_v41 = vpop.permute.xlu1 %3270 }
 0x6f5   : > { %13851 = vst [vmem:[#allocation319_spill] sm:$0xff] %v9677_v41 }
 0x6f6   : > { %v9679_v22 = vpop.permute.xlu0 %3272  ;;  %3386 = vrot.lane.b32.xlu1 %v9301_v12, %s4943_s6 }
 0x6f7   : > { %13852 = vst [vmem:[#allocation320_spill] sm:$0xff] %v9679_v22 }
 0x6f8   : > { %3388 = vrot.lane.b32.xlu0 %v9309_v3, %s4943_s6  ;;  %v9685_v8 = vpop.permute.xlu1 %3274 }
 0x6f9   : > { %13853 = vst [vmem:[#allocation321_spill] sm:$0xff] %v9685_v8 }
 0x6fa   : > { %v9687_v63 = vpop.permute.xlu0 %3276  ;;  %3390 = vrot.lane.b32.xlu1 %v9317_v37, %s4943_s6 }
 0x6fb   : > { %13854 = vst [vmem:[#allocation322_spill] sm:$0xff] %v9687_v63 }
 0x6fc   : > { %3392 = vrot.lane.b32.xlu0 %v9325_v57, %s4943_s6  ;;  %v9693_v21 = vpop.permute.xlu1 %3278 }
 0x6fd   : > { %13855 = vst [vmem:[#allocation323_spill] sm:$0xff] %v9693_v21 }
 0x6fe   : > { %v9695_v41 = vpop.permute.xlu0 %3280  ;;  %3394 = vrot.lane.b32.xlu1 %v9333_v29, %s4943_s6 }
 0x6ff   : > { %13856 = vst [vmem:[#allocation324_spill] sm:$0xff] %v9695_v41 }
 0x700   : > { %3396 = vrot.lane.b32.xlu0 %v9341_v15, %s4943_s6  ;;  %v9701_v22 = vpop.permute.xlu1 %3282 }
 0x701   : > { %13857 = vst [vmem:[#allocation325_spill] sm:$0xff] %v9701_v22 }
 0x702   : > { %v9703_v8 = vpop.permute.xlu0 %3284  ;;  %3398 = vrot.lane.b32.xlu1 %v9349_v9, %s4943_s6 }
 0x703   : > { %13858 = vst [vmem:[#allocation326_spill] sm:$0xff] %v9703_v8 }
 0x704   : > { %3400 = vrot.lane.b32.xlu0 %v9357_v4, %s4943_s6  ;;  %v9709_v63 = vpop.permute.xlu1 %3286 }
 0x705   : > { %13859 = vst [vmem:[#allocation327_spill] sm:$0xff] %v9709_v63 }
 0x706   : > { %v9711_v21 = vpop.permute.xlu0 %3288  ;;  %3402 = vrot.lane.b32.xlu1 %v9365_v26, %s4943_s6 }
 0x707   : > { %13860 = vst [vmem:[#allocation328_spill] sm:$0xff] %v9711_v21 }
 0x708   : > { %3404 = vrot.lane.b32.xlu0 %v9373_v23, %s4943_s6  ;;  %v9717_v41 = vpop.permute.xlu1 %3290 }
 0x709   : > { %13861 = vst [vmem:[#allocation329_spill] sm:$0xff] %v9717_v41 }
 0x70a   : > { %v9719_v22 = vpop.permute.xlu0 %3292  ;;  %3406 = vrot.lane.b32.xlu1 %v9381_v13, %s4943_s6 }
 0x70b   : > { %13862 = vst [vmem:[#allocation330_spill] sm:$0xff] %v9719_v22 }
 0x70c   : > { %3408 = vrot.lane.b32.xlu0 %v9389_v24, %s4943_s6  ;;  %v9725_v8 = vpop.permute.xlu1 %3294 }
 0x70d   : > { %13863 = vst [vmem:[#allocation331_spill] sm:$0xff] %v9725_v8 }
 0x70e   : > { %v9727_v63 = vpop.permute.xlu0 %3296  ;;  %3410 = vrot.lane.b32.xlu1 %v9397_v52, %s4943_s6 }
 0x70f   : > { %13864 = vst [vmem:[#allocation332_spill] sm:$0xff] %v9727_v63 }
 0x710   : > { %3412 = vrot.lane.b32.xlu0 %v9405_v27, %s4943_s6  ;;  %v9733_v21 = vpop.permute.xlu1 %3298 }
 0x711   : > { %13865 = vst [vmem:[#allocation333_spill] sm:$0xff] %v9733_v21 }
 0x712   : > { %v9735_v41 = vpop.permute.xlu0 %3300  ;;  %3414 = vrot.lane.b32.xlu1 %v9413_v43, %s4943_s6 }
 0x713   : > { %13866 = vst [vmem:[#allocation334_spill] sm:$0xff] %v9735_v41 }
 0x714   : > { %3416 = vrot.lane.b32.xlu0 %v9421_v42, %s4943_s6  ;;  %v9741_v22 = vpop.permute.xlu1 %3302 }
 0x715   : > { %13867 = vst [vmem:[#allocation335_spill] sm:$0xff] %v9741_v22 }
 0x716   : > { %v9743_v8 = vpop.permute.xlu0 %3304  ;;  %3418 = vrot.lane.b32.xlu1 %v9429_v1, %s4943_s6  ;;  %v13883_v1 = vld [vmem:[#allocation277_spill] sm:$0xff] }
 0x717   : > { %13868 = vst [vmem:[#allocation336_spill] sm:$0xff] %v9743_v8 }
 0x718   : > { %3420 = vrot.lane.b32.xlu0 %v9437_v25, %s4943_s6  ;;  %v9749_v63 = vpop.permute.xlu1 %3306  ;;  %v13882_v25 = vld [vmem:[#allocation284_spill] sm:$0xff] }
 0x719   : > { %13869 = vst [vmem:[#allocation337_spill] sm:$0xff] %v9749_v63 }
 0x71a   : > { %v9751_v21 = vpop.permute.xlu0 %3308  ;;  %3422 = vrot.lane.b32.xlu1 %v9445_v20, %s4943_s6 }
 0x71b   : > { %13870 = vst [vmem:[#allocation338_spill] sm:$0xff] %v9751_v21 }
 0x71c   : > { %3424 = vrot.lane.b32.xlu0 %v9453_v58, %s4943_s6  ;;  %v9757_v41 = vpop.permute.xlu1 %3310 }
 0x71d   : > { %13871 = vst [vmem:[#allocation339_spill] sm:$0xff] %v9757_v41 }
 0x71e   : > { %v9759_v22 = vpop.permute.xlu0 %3312  ;;  %3426 = vrot.lane.b32.xlu1 %v9461_v47, %s4943_s6 }
 0x71f   : > { %13872 = vst [vmem:[#allocation340_spill] sm:$0xff] %v9759_v22  ;;  %v13876_v22 = vld [vmem:[#allocation276_spill] sm:$0xff] }
 0x720   : > { %3428 = vrot.lane.b32.xlu0 %v9469_v28, %s4943_s6  ;;  %v9765_v8 = vpop.permute.xlu1 %3314 }
 0x721   : > { %13873 = vst [vmem:[#allocation341_spill] sm:$0xff] %v9765_v8  ;;  %v13877_v8 = vld [vmem:[#allocation278_spill] sm:$0xff] }
 0x722   : > { %v9767_v63 = vpop.permute.xlu0 %3316  ;;  %3430 = vrot.lane.b32.xlu1 %v9473_v62, %s4943_s6 }
 0x723   : > { %13874 = vst [vmem:[#allocation342_spill] sm:$0xff] %v9767_v63  ;;  %v13878_v63 = vld [vmem:[#allocation280_spill] sm:$0xff] }
 0x724   : > { %3432 = vrot.lane.b32.xlu0 %v9485_v39, %s4943_s6  ;;  %v9773_v21 = vpop.permute.xlu1 %3318  ;;  %v13879_v39 = vld [vmem:[#allocation282_spill] sm:$0xff] }
 0x725   : > { %13875 = vst [vmem:[#allocation343_spill] sm:$0xff] %v9773_v21  ;;  %v13880_v21 = vld [vmem:[#allocation275_spill] sm:$0xff] }
 0x726   : > { %v3321_v41 = vpop.permute.xlu0 %3320  ;;  %3434 = vrot.lane.b32.xlu1 %v9493_v48, %s4943_s6 }
 0x727   : > { %v3448_v48 = vsel %vm5754_vm1, %v13880_v21, %v3321_v41 }
 0x728   : > { %3436 = vrot.lane.b32.xlu0 %v13876_v22, %s4943_s6  ;;  %v3323_v28 = vpop.permute.xlu1 %3322  ;;  %v9794_v42 = vadd.f32 %v3448_v48, %v13707_v14  ;;  %v13889_v14 = vld [vmem:[#allocation283_spill] sm:$0xff] }
 0x72a   : > { %v3325_v47 = vpop.permute.xlu0 %3324  ;;  %3438 = vrot.lane.b32.xlu1 %v13877_v8, %s4943_s6  ;;  %v3449_v8 = vsel %vm5754_vm1, %v13883_v1, %v3323_v28  ;;  %13884 = vst [vmem:[#allocation275_spill] sm:$0xff] %v9794_v42 }
 0x72b   : > { %v9802_v41 = vadd.f32 %v3449_v8, %v13710_v17  ;;  %v13891_v17 = vld [vmem:[#allocation285_spill] sm:$0xff] }
 0x72c   : > { %3440 = vrot.lane.b32.xlu0 %v13878_v63, %s4943_s6  ;;  %v3327_v62 = vpop.permute.xlu1 %3326 }
 0x72d   : > { %13886 = vst [vmem:[#allocation120_spill] sm:$0xff] %v9802_v41 }
 0x72e   : > { %v3329_v58 = vpop.permute.xlu0 %3328  ;;  %3442 = vrot.lane.b32.xlu1 %v13879_v39, %s4943_s6  ;;  %v13885_v39 = vld [vmem:[#allocation279_spill] sm:$0xff] }
 0x72f   : > { %v3450_v43 = vsel %vm5754_vm1, %v13885_v39, %v3325_v47  ;;  %v3452_v8 = vsel %vm5754_vm1, %v13889_v14, %v3329_v58 }
 0x730   : > { %3444 = vrot.lane.b32.xlu0 %v13882_v25, %s4943_s6  ;;  %v3331_v22 = vpop.permute.xlu1 %3330  ;;  %v13887_v25 = vld [vmem:[#allocation281_spill] sm:$0xff]  ;;  %v9810_v28 = vadd.f32 %v3450_v43, %v13711_v30  ;;  %v13893_v30 = vld [vmem:[#allocation286_spill] sm:$0xff] }
 0x731   : > { %v3451_v48 = vsel %vm5754_vm1, %v13887_v25, %v3327_v62  ;;  %v3453_v62 = vsel %vm5754_vm1, %v13891_v17, %v3331_v22  ;;  %v9826_v25 = vadd.f32 %v3452_v8, %v13715_v49  ;;  %v13897_v49 = vld [vmem:[#allocation288_spill] sm:$0xff] }
 0x732   : > { %v3333_v63 = vpop.permute.xlu0 %3332  ;;  %3446 = vrot.lane.b32.xlu1 %v9541_v44, %s4943_s6  ;;  %13888 = vst [vmem:[#allocation277_spill] sm:$0xff] %v9810_v28  ;;  %v9818_v39 = vadd.f32 %v3451_v48, %v13714_v6  ;;  %v9834_v14 = vadd.f32 %v3453_v62, %v13718_v35  ;;  %v13895_v6 = vld [vmem:[#allocation287_spill] sm:$0xff]  ;;  %v13899_v35 = vld [vmem:[#allocation289_spill] sm:$0xff] }
 0x733   : > { %13892 = vst [vmem:[#allocation281_spill] sm:$0xff] %v9826_v25  ;;  %v3454_v58 = vsel %vm5754_vm1, %v13893_v30, %v3333_v63 }
 0x734   : > { %3576 = vrot.lane.b32.xlu0 %v9794_v42, %s4944_s7  ;;  %v3335_v21 = vpop.permute.xlu1 %3334  ;;  %13890 = vst [vmem:[#allocation279_spill] sm:$0xff] %v9818_v39  ;;  %13894 = vst [vmem:[#allocation283_spill] sm:$0xff] %v9834_v14  ;;  %v9842_v17 = vadd.f32 %v3454_v58, %v13719_v11  ;;  %v13901_v11 = vld [vmem:[#allocation290_spill] sm:$0xff] }
 0x735   : > { %v3455_v22 = vsel %vm5754_vm1, %v13895_v6, %v3335_v21 }
 0x736   : > { %v3337_v1 = vpop.permute.xlu0 %3336  ;;  %3578 = vrot.lane.b32.xlu1 %v9802_v41, %s4944_s7  ;;  %13896 = vst [vmem:[#allocation285_spill] sm:$0xff] %v9842_v17  ;;  %v9850_v30 = vadd.f32 %v3455_v22, %v13722_v53  ;;  %v13903_v53 = vld [vmem:[#allocation291_spill] sm:$0xff] }
 0x737   : > { %v3456_v63 = vsel %vm5754_vm1, %v13897_v49, %v3337_v1 }
 0x738   : > { %3580 = vrot.lane.b32.xlu0 %v9810_v28, %s4944_s7  ;;  %v3339_v47 = vpop.permute.xlu1 %3338  ;;  %13898 = vst [vmem:[#allocation286_spill] sm:$0xff] %v9850_v30  ;;  %v9858_v21 = vadd.f32 %v3456_v63, %v13723_v46  ;;  %v13905_v46 = vld [vmem:[#allocation292_spill] sm:$0xff] }
 0x739   : > { %v3457_v6 = vsel %vm5754_vm1, %v13899_v35, %v3339_v47 }
 0x73a   : > { %v3341_v43 = vpop.permute.xlu0 %3340  ;;  %3582 = vrot.lane.b32.xlu1 %v9818_v39, %s4944_s7  ;;  %13900 = vst [vmem:[#allocation287_spill] sm:$0xff] %v9858_v21  ;;  %v9866_v1 = vadd.f32 %v3457_v6, %v13726_v16  ;;  %v13907_v16 = vld [vmem:[#allocation293_spill] sm:$0xff] }
 0x73b   : > { %v3458_v49 = vsel %vm5754_vm1, %v13901_v11, %v3341_v43 }
 0x73c   : > { %3584 = vrot.lane.b32.xlu0 %v9826_v25, %s4944_s7  ;;  %v3343_v48 = vpop.permute.xlu1 %3342  ;;  %13902 = vst [vmem:[#allocation288_spill] sm:$0xff] %v9866_v1  ;;  %v9874_v47 = vadd.f32 %v3458_v49, %v13727_v45  ;;  %v13909_v45 = vld [vmem:[#allocation294_spill] sm:$0xff] }
 0x73d   : > { %v3459_v35 = vsel %vm5754_vm1, %v13903_v53, %v3343_v48 }
 0x73e   : > { %v3345_v8 = vpop.permute.xlu0 %3344  ;;  %3586 = vrot.lane.b32.xlu1 %v9834_v14, %s4944_s7  ;;  %13904 = vst [vmem:[#allocation289_spill] sm:$0xff] %v9874_v47  ;;  %v9882_v43 = vadd.f32 %v3459_v35, %v13730_v34  ;;  %v13911_v34 = vld [vmem:[#allocation295_spill] sm:$0xff] }
 0x73f   : > { %v3460_v11 = vsel %vm5754_vm1, %v13905_v46, %v3345_v8 }
 0x740   : > { %3588 = vrot.lane.b32.xlu0 %v9842_v17, %s4944_s7  ;;  %v3347_v62 = vpop.permute.xlu1 %3346  ;;  %13906 = vst [vmem:[#allocation290_spill] sm:$0xff] %v9882_v43  ;;  %v9890_v48 = vadd.f32 %v3460_v11, %v13731_v7  ;;  %v13913_v7 = vld [vmem:[#allocation296_spill] sm:$0xff] }
 0x741   : > { %v3461_v53 = vsel %vm5754_vm1, %v13907_v16, %v3347_v62 }
 0x742   : > { %v3349_v58 = vpop.permute.xlu0 %3348  ;;  %3590 = vrot.lane.b32.xlu1 %v9850_v30, %s4944_s7  ;;  %13908 = vst [vmem:[#allocation291_spill] sm:$0xff] %v9890_v48  ;;  %v9898_v8 = vadd.f32 %v3461_v53, %v13734_v32  ;;  %v13915_v32 = vld [vmem:[#allocation297_spill] sm:$0xff] }
 0x743   : > { %v3462_v46 = vsel %vm5754_vm1, %v13909_v45, %v3349_v58 }
 0x744   : > { %3592 = vrot.lane.b32.xlu0 %v9858_v21, %s4944_s7  ;;  %v3351_v22 = vpop.permute.xlu1 %3350  ;;  %13910 = vst [vmem:[#allocation292_spill] sm:$0xff] %v9898_v8  ;;  %v9906_v62 = vadd.f32 %v3462_v46, %v13735_v19  ;;  %v13917_v19 = vld [vmem:[#allocation298_spill] sm:$0xff] }
 0x745   : > { %v3463_v16 = vsel %vm5754_vm1, %v13911_v34, %v3351_v22 }
 0x746   : > { %v3353_v63 = vpop.permute.xlu0 %3352  ;;  %3594 = vrot.lane.b32.xlu1 %v9866_v1, %s4944_s7  ;;  %13912 = vst [vmem:[#allocation293_spill] sm:$0xff] %v9906_v62  ;;  %v9914_v58 = vadd.f32 %v3463_v16, %v13738_v36  ;;  %v13919_v36 = vld [vmem:[#allocation299_spill] sm:$0xff] }
 0x747   : > { %v3464_v45 = vsel %vm5754_vm1, %v13913_v7, %v3353_v63 }
 0x748   : > { %3596 = vrot.lane.b32.xlu0 %v9874_v47, %s4944_s7  ;;  %v3355_v6 = vpop.permute.xlu1 %3354  ;;  %13914 = vst [vmem:[#allocation294_spill] sm:$0xff] %v9914_v58  ;;  %v9922_v22 = vadd.f32 %v3464_v45, %v13739_v61  ;;  %v13921_v61 = vld [vmem:[#allocation300_spill] sm:$0xff] }
 0x749   : > { %v3465_v34 = vsel %vm5754_vm1, %v13915_v32, %v3355_v6 }
 0x74a   : > { %v3357_v49 = vpop.permute.xlu0 %3356  ;;  %3598 = vrot.lane.b32.xlu1 %v9882_v43, %s4944_s7  ;;  %13916 = vst [vmem:[#allocation295_spill] sm:$0xff] %v9922_v22  ;;  %v9930_v63 = vadd.f32 %v3465_v34, %v13742_v59  ;;  %v13923_v59 = vld [vmem:[#allocation301_spill] sm:$0xff] }
 0x74b   : > { %v3466_v7 = vsel %vm5754_vm1, %v13917_v19, %v3357_v49 }
 0x74c   : > { %3600 = vrot.lane.b32.xlu0 %v9890_v48, %s4944_s7  ;;  %v3359_v35 = vpop.permute.xlu1 %3358  ;;  %13918 = vst [vmem:[#allocation296_spill] sm:$0xff] %v9930_v63  ;;  %v9938_v6 = vadd.f32 %v3466_v7, %v13743_v18  ;;  %v13925_v18 = vld [vmem:[#allocation302_spill] sm:$0xff] }
 0x74d   : > { %v3467_v32 = vsel %vm5754_vm1, %v13919_v36, %v3359_v35 }
 0x74e   : > { %v3361_v11 = vpop.permute.xlu0 %3360  ;;  %3602 = vrot.lane.b32.xlu1 %v9898_v8, %s4944_s7  ;;  %13920 = vst [vmem:[#allocation297_spill] sm:$0xff] %v9938_v6  ;;  %v9946_v49 = vadd.f32 %v3467_v32, %v13746_v38  ;;  %v13927_v38 = vld [vmem:[#allocation303_spill] sm:$0xff] }
 0x74f   : > { %v3468_v19 = vsel %vm5754_vm1, %v13921_v61, %v3361_v11 }
 0x750   : > { %3604 = vrot.lane.b32.xlu0 %v9906_v62, %s4944_s7  ;;  %v3363_v53 = vpop.permute.xlu1 %3362  ;;  %13922 = vst [vmem:[#allocation298_spill] sm:$0xff] %v9946_v49  ;;  %v9954_v35 = vadd.f32 %v3468_v19, %v13747_v51  ;;  %v13929_v51 = vld [vmem:[#allocation304_spill] sm:$0xff] }
 0x751   : > { %v3469_v36 = vsel %vm5754_vm1, %v13923_v59, %v3363_v53 }
 0x752   : > { %v3365_v46 = vpop.permute.xlu0 %3364  ;;  %3606 = vrot.lane.b32.xlu1 %v9914_v58, %s4944_s7  ;;  %13924 = vst [vmem:[#allocation299_spill] sm:$0xff] %v9954_v35  ;;  %v9962_v11 = vadd.f32 %v3469_v36, %v13750_v2  ;;  %v13931_v2 = vld [vmem:[#allocation305_spill] sm:$0xff] }
 0x753   : > { %v3470_v61 = vsel %vm5754_vm1, %v13925_v18, %v3365_v46 }
 0x754   : > { %3608 = vrot.lane.b32.xlu0 %v9922_v22, %s4944_s7  ;;  %v3367_v16 = vpop.permute.xlu1 %3366  ;;  %13926 = vst [vmem:[#allocation300_spill] sm:$0xff] %v9962_v11  ;;  %v9970_v53 = vadd.f32 %v3470_v61, %v13751_v31  ;;  %v13933_v31 = vld [vmem:[#allocation306_spill] sm:$0xff] }
 0x755   : > { %v3471_v59 = vsel %vm5754_vm1, %v13927_v38, %v3367_v16 }
 0x756   : > { %v3369_v45 = vpop.permute.xlu0 %3368  ;;  %3610 = vrot.lane.b32.xlu1 %v9930_v63, %s4944_s7  ;;  %13928 = vst [vmem:[#allocation301_spill] sm:$0xff] %v9970_v53  ;;  %v9978_v46 = vadd.f32 %v3471_v59, %v13754_v0  ;;  %v13935_v0 = vld [vmem:[#allocation307_spill] sm:$0xff] }
 0x757   : > { %v3472_v18 = vsel %vm5754_vm1, %v13929_v51, %v3369_v45 }
 0x758   : > { %3612 = vrot.lane.b32.xlu0 %v9938_v6, %s4944_s7  ;;  %v3371_v34 = vpop.permute.xlu1 %3370  ;;  %13930 = vst [vmem:[#allocation302_spill] sm:$0xff] %v9978_v46  ;;  %v9986_v16 = vadd.f32 %v3472_v18, %v13755_v5  ;;  %v13937_v5 = vld [vmem:[#allocation308_spill] sm:$0xff] }
 0x759   : > { %v3473_v38 = vsel %vm5754_vm1, %v13931_v2, %v3371_v34 }
 0x75a   : > { %v3373_v7 = vpop.permute.xlu0 %3372  ;;  %3614 = vrot.lane.b32.xlu1 %v9946_v49, %s4944_s7  ;;  %13932 = vst [vmem:[#allocation303_spill] sm:$0xff] %v9986_v16  ;;  %v9994_v45 = vadd.f32 %v3473_v38, %v13758_v33  ;;  %v13939_v33 = vld [vmem:[#allocation309_spill] sm:$0xff] }
 0x75b   : > { %v3474_v51 = vsel %vm5754_vm1, %v13933_v31, %v3373_v7 }
 0x75c   : > { %3616 = vrot.lane.b32.xlu0 %v9954_v35, %s4944_s7  ;;  %v3375_v32 = vpop.permute.xlu1 %3374  ;;  %13934 = vst [vmem:[#allocation304_spill] sm:$0xff] %v9994_v45  ;;  %v10002_v34 = vadd.f32 %v3474_v51, %v13759_v50  ;;  %v13941_v50 = vld [vmem:[#allocation310_spill] sm:$0xff] }
 0x75d   : > { %v3475_v2 = vsel %vm5754_vm1, %v13935_v0, %v3375_v32 }
 0x75e   : > { %v3377_v19 = vpop.permute.xlu0 %3376  ;;  %3618 = vrot.lane.b32.xlu1 %v9962_v11, %s4944_s7  ;;  %13936 = vst [vmem:[#allocation305_spill] sm:$0xff] %v10002_v34  ;;  %v10010_v7 = vadd.f32 %v3475_v2, %v13762_v60  ;;  %v13943_v60 = vld [vmem:[#allocation311_spill] sm:$0xff] }
 0x75f   : > { %v3476_v31 = vsel %vm5754_vm1, %v13937_v5, %v3377_v19 }
 0x760   : > { %3620 = vrot.lane.b32.xlu0 %v9970_v53, %s4944_s7  ;;  %v3379_v36 = vpop.permute.xlu1 %3378  ;;  %13938 = vst [vmem:[#allocation306_spill] sm:$0xff] %v10010_v7  ;;  %v10018_v32 = vadd.f32 %v3476_v31, %v13763_v55  ;;  %v13945_v55 = vld [vmem:[#allocation312_spill] sm:$0xff] }
 0x761   : > { %v3477_v0 = vsel %vm5754_vm1, %v13939_v33, %v3379_v36 }
 0x762   : > { %v3381_v61 = vpop.permute.xlu0 %3380  ;;  %3622 = vrot.lane.b32.xlu1 %v9978_v46, %s4944_s7  ;;  %13940 = vst [vmem:[#allocation307_spill] sm:$0xff] %v10018_v32  ;;  %v10026_v19 = vadd.f32 %v3477_v0, %v13766_v10  ;;  %v13947_v10 = vld [vmem:[#allocation313_spill] sm:$0xff] }
 0x763   : > { %v3478_v5 = vsel %vm5754_vm1, %v13941_v50, %v3381_v61 }
 0x764   : > { %3624 = vrot.lane.b32.xlu0 %v9986_v16, %s4944_s7  ;;  %v3383_v59 = vpop.permute.xlu1 %3382  ;;  %13942 = vst [vmem:[#allocation308_spill] sm:$0xff] %v10026_v19  ;;  %v10034_v36 = vadd.f32 %v3478_v5, %v13767_v54  ;;  %v13949_v54 = vld [vmem:[#allocation314_spill] sm:$0xff] }
 0x765   : > { %v3479_v33 = vsel %vm5754_vm1, %v13943_v60, %v3383_v59 }
 0x766   : > { %v3385_v18 = vpop.permute.xlu0 %3384  ;;  %3626 = vrot.lane.b32.xlu1 %v9994_v45, %s4944_s7  ;;  %13944 = vst [vmem:[#allocation309_spill] sm:$0xff] %v10034_v36  ;;  %v10042_v61 = vadd.f32 %v3479_v33, %v13770_v40  ;;  %v13951_v40 = vld [vmem:[#allocation315_spill] sm:$0xff] }
 0x767   : > { %v3480_v50 = vsel %vm5754_vm1, %v13945_v55, %v3385_v18 }
 0x768   : > { %3628 = vrot.lane.b32.xlu0 %v10002_v34, %s4944_s7  ;;  %v3387_v38 = vpop.permute.xlu1 %3386  ;;  %13946 = vst [vmem:[#allocation310_spill] sm:$0xff] %v10042_v61  ;;  %v10050_v59 = vadd.f32 %v3480_v50, %v9293_v56  ;;  %v13953_v50 = vld [vmem:[#allocation316_spill] sm:$0xff] }
 0x769   : > { %v3481_v60 = vsel %vm5754_vm1, %v13947_v10, %v3387_v38 }
 0x76a   : > { %v3389_v51 = vpop.permute.xlu0 %3388  ;;  %3630 = vrot.lane.b32.xlu1 %v10010_v7, %s4944_s7  ;;  %13948 = vst [vmem:[#allocation311_spill] sm:$0xff] %v10050_v59  ;;  %v10058_v18 = vadd.f32 %v3481_v60, %v9301_v12  ;;  %v13955_v60 = vld [vmem:[#allocation317_spill] sm:$0xff] }
 0x76b   : > { %v3482_v55 = vsel %vm5754_vm1, %v13949_v54, %v3389_v51 }
 0x76c   : > { %3632 = vrot.lane.b32.xlu0 %v10018_v32, %s4944_s7  ;;  %v3391_v2 = vpop.permute.xlu1 %3390  ;;  %13950 = vst [vmem:[#allocation312_spill] sm:$0xff] %v10058_v18  ;;  %v10066_v56 = vadd.f32 %v3482_v55, %v9309_v3  ;;  %v13957_v55 = vld [vmem:[#allocation318_spill] sm:$0xff] }
 0x76d   : > { %v3483_v10 = vsel %vm5754_vm1, %v13951_v40, %v3391_v2 }
 0x76e   : > { %v3393_v31 = vpop.permute.xlu0 %3392  ;;  %3634 = vrot.lane.b32.xlu1 %v10026_v19, %s4944_s7  ;;  %13952 = vst [vmem:[#allocation313_spill] sm:$0xff] %v10066_v56  ;;  %v10074_v12 = vadd.f32 %v3483_v10, %v9317_v37 }
 0x76f   : > { %v3484_v54 = vsel %vm5754_vm1, %v13953_v50, %v3393_v31  ;;  %v13959_v50 = vld [vmem:[#allocation319_spill] sm:$0xff] }
 0x770   : > { %3636 = vrot.lane.b32.xlu0 %v10034_v36, %s4944_s7  ;;  %v3395_v0 = vpop.permute.xlu1 %3394  ;;  %13954 = vst [vmem:[#allocation314_spill] sm:$0xff] %v10074_v12  ;;  %v10082_v3 = vadd.f32 %v3484_v54, %v9325_v57 }
 0x771   : > { %v3485_v40 = vsel %vm5754_vm1, %v13955_v60, %v3395_v0  ;;  %v13961_v60 = vld [vmem:[#allocation320_spill] sm:$0xff] }
 0x772   : > { %v3397_v5 = vpop.permute.xlu0 %3396  ;;  %3638 = vrot.lane.b32.xlu1 %v10042_v61, %s4944_s7  ;;  %13956 = vst [vmem:[#allocation315_spill] sm:$0xff] %v10082_v3  ;;  %v10090_v31 = vadd.f32 %v3485_v40, %v9333_v29 }
 0x773   : > { %v3486_v37 = vsel %vm5754_vm1, %v13957_v55, %v3397_v5  ;;  %v13962_v55 = vld [vmem:[#allocation321_spill] sm:$0xff] }
 0x774   : > { %3640 = vrot.lane.b32.xlu0 %v10050_v59, %s4944_s7  ;;  %v3399_v33 = vpop.permute.xlu1 %3398  ;;  %13958 = vst [vmem:[#allocation316_spill] sm:$0xff] %v10090_v31  ;;  %v10098_v0 = vadd.f32 %v3486_v37, %v9341_v15 }
 0x775   : > { %v3487_v57 = vsel %vm5754_vm1, %v13959_v50, %v3399_v33  ;;  %v13963_v50 = vld [vmem:[#allocation322_spill] sm:$0xff] }
 0x776   : > { %v3401_v38 = vpop.permute.xlu0 %3400  ;;  %3642 = vrot.lane.b32.xlu1 %v10058_v18, %s4944_s7  ;;  %13960 = vst [vmem:[#allocation317_spill] sm:$0xff] %v10098_v0  ;;  %v10106_v5 = vadd.f32 %v3487_v57, %v9349_v9 }
 0x777   : > { %v3488_v29 = vsel %vm5754_vm1, %v13961_v60, %v3401_v38  ;;  %v13964_v60 = vld [vmem:[#allocation323_spill] sm:$0xff] }
 0x778   : > { %3644 = vrot.lane.b32.xlu0 %v10066_v56, %s4944_s7  ;;  %v3403_v51 = vpop.permute.xlu1 %3402  ;;  %v10114_v33 = vadd.f32 %v3488_v29, %v9357_v4 }
 0x779   : > { %v3489_v15 = vsel %vm5754_vm1, %v13962_v55, %v3403_v51  ;;  %v13965_v55 = vld [vmem:[#allocation324_spill] sm:$0xff] }
 0x77a   : > { %v3405_v2 = vpop.permute.xlu0 %3404  ;;  %3646 = vrot.lane.b32.xlu1 %v10074_v12, %s4944_s7  ;;  %v10122_v38 = vadd.f32 %v3489_v15, %v9365_v26 }
 0x77b   : > { %v3490_v9 = vsel %vm5754_vm1, %v13963_v50, %v3405_v2  ;;  %v13966_v50 = vld [vmem:[#allocation325_spill] sm:$0xff] }
 0x77c   : > { %3648 = vrot.lane.b32.xlu0 %v10082_v3, %s4944_s7  ;;  %v3407_v10 = vpop.permute.xlu1 %3406  ;;  %v10130_v51 = vadd.f32 %v3490_v9, %v9373_v23 }
 0x77d   : > { %v3491_v4 = vsel %vm5754_vm1, %v13964_v60, %v3407_v10  ;;  %v13968_v60 = vld [vmem:[#allocation326_spill] sm:$0xff] }
 0x77e   : > { %v3409_v54 = vpop.permute.xlu0 %3408  ;;  %3650 = vrot.lane.b32.xlu1 %v10090_v31, %s4944_s7  ;;  %v10138_v2 = vadd.f32 %v3491_v4, %v9381_v13 }
 0x77f   : > { %v3492_v26 = vsel %vm5754_vm1, %v13965_v55, %v3409_v54  ;;  %v13970_v55 = vld [vmem:[#allocation327_spill] sm:$0xff] }
 0x780   : > { %3652 = vrot.lane.b32.xlu0 %v10098_v0, %s4944_s7  ;;  %v3411_v40 = vpop.permute.xlu1 %3410  ;;  %v10146_v10 = vadd.f32 %v3492_v26, %v9389_v24 }
 0x781   : > { %v3493_v23 = vsel %vm5754_vm1, %v13966_v50, %v3411_v40  ;;  %v13972_v50 = vld [vmem:[#allocation328_spill] sm:$0xff] }
 0x782   : > { %v3413_v37 = vpop.permute.xlu0 %3412  ;;  %3654 = vrot.lane.b32.xlu1 %v10106_v5, %s4944_s7  ;;  %13967 = vst [vmem:[#allocation318_spill] sm:$0xff] %v10146_v10  ;;  %v10154_v54 = vadd.f32 %v3493_v23, %v9397_v52 }
 0x783   : > { %v3494_v13 = vsel %vm5754_vm1, %v13968_v60, %v3413_v37  ;;  %v13973_v37 = vld [vmem:[#allocation254_spill] sm:$0xff] }
 0x784   : > { %3656 = vrot.lane.b32.xlu0 %v10114_v33, %s4944_s7  ;;  %v3415_v57 = vpop.permute.xlu1 %3414  ;;  %13969 = vst [vmem:[#allocation319_spill] sm:$0xff] %v10154_v54  ;;  %v10162_v40 = vadd.f32 %v3494_v13, %v9405_v27 }
 0x785   : > { %v3495_v24 = vsel %vm5754_vm1, %v13970_v55, %v3415_v57  ;;  %v13976_v57 = vld [vmem:[#allocation256_spill] sm:$0xff] }
 0x786   : > { %v3417_v29 = vpop.permute.xlu0 %3416  ;;  %3658 = vrot.lane.b32.xlu1 %v10122_v38, %s4944_s7  ;;  %13971 = vst [vmem:[#allocation320_spill] sm:$0xff] %v10162_v40  ;;  %v10170_v23 = vadd.f32 %v3495_v24, %v13973_v37  ;;  %v13979_v24 = vld [vmem:[#allocation258_spill] sm:$0xff] }
 0x787   : > { %v3496_v52 = vsel %vm5754_vm1, %v13972_v50, %v3417_v29 }
 0x788   : > { %3660 = vrot.lane.b32.xlu0 %v10130_v51, %s4944_s7  ;;  %v3419_v15 = vpop.permute.xlu1 %3418  ;;  %13974 = vst [vmem:[#allocation321_spill] sm:$0xff] %v10170_v23  ;;  %v10178_v13 = vadd.f32 %v3496_v52, %v13976_v57 }
 0x78a   : > { %v3421_v9 = vpop.permute.xlu0 %3420  ;;  %3662 = vrot.lane.b32.xlu1 %v10138_v2, %s4944_s7  ;;  %13977 = vst [vmem:[#allocation322_spill] sm:$0xff] %v10178_v13 }
 0x78c   : > { %3664 = vrot.lane.b32.xlu0 %v10146_v10, %s4944_s7  ;;  %v3423_v4 = vpop.permute.xlu1 %3422  ;;  %v13975_v10 = vld [vmem:[#allocation329_spill] sm:$0xff] }
 0x78d   : > { %v3497_v27 = vsel %vm5754_vm1, %v13975_v10, %v3419_v15  ;;  %v13982_v10 = vld [vmem:[#allocation260_spill] sm:$0xff] }
 0x78e   : > { %v3425_v26 = vpop.permute.xlu0 %3424  ;;  %3666 = vrot.lane.b32.xlu1 %v10154_v54, %s4944_s7  ;;  %v13978_v54 = vld [vmem:[#allocation330_spill] sm:$0xff]  ;;  %v10186_v50 = vadd.f32 %v3497_v27, %v13979_v24 }
 0x78f   : > { %v3498_v29 = vsel %vm5754_vm1, %v13978_v54, %v3421_v9  ;;  %v13985_v54 = vld [vmem:[#allocation262_spill] sm:$0xff] }
 0x790   : > { %3668 = vrot.lane.b32.xlu0 %v10162_v40, %s4944_s7  ;;  %v3427_v60 = vpop.permute.xlu1 %3426  ;;  %13980 = vst [vmem:[#allocation323_spill] sm:$0xff] %v10186_v50  ;;  %v13981_v40 = vld [vmem:[#allocation331_spill] sm:$0xff]  ;;  %v10194_v52 = vadd.f32 %v3498_v29, %v13982_v10 }
 0x791   : > { %v3499_v15 = vsel %vm5754_vm1, %v13981_v40, %v3423_v4  ;;  %v13988_v40 = vld [vmem:[#allocation264_spill] sm:$0xff] }
 0x792   : > { %v3429_v55 = vpop.permute.xlu0 %3428  ;;  %3670 = vrot.lane.b32.xlu1 %v10170_v23, %s4944_s7  ;;  %13983 = vst [vmem:[#allocation324_spill] sm:$0xff] %v10194_v52  ;;  %v13984_v23 = vld [vmem:[#allocation332_spill] sm:$0xff]  ;;  %v10202_v27 = vadd.f32 %v3499_v15, %v13985_v54 }
 0x793   : > { %v3500_v9 = vsel %vm5754_vm1, %v13984_v23, %v3425_v26  ;;  %v13991_v23 = vld [vmem:[#allocation266_spill] sm:$0xff] }
 0x794   : > { %3672 = vrot.lane.b32.xlu0 %v10178_v13, %s4944_s7  ;;  %v3431_v37 = vpop.permute.xlu1 %3430  ;;  %13986 = vst [vmem:[#allocation325_spill] sm:$0xff] %v10202_v27  ;;  %v13987_v13 = vld [vmem:[#allocation333_spill] sm:$0xff]  ;;  %v10210_v29 = vadd.f32 %v3500_v9, %v13988_v40 }
 0x795   : > { %v3501_v4 = vsel %vm5754_vm1, %v13987_v13, %v3427_v60  ;;  %v13994_v13 = vld [vmem:[#allocation268_spill] sm:$0xff] }
 0x796   : > { %v3433_v57 = vpop.permute.xlu0 %3432  ;;  %3674 = vrot.lane.b32.xlu1 %v10186_v50, %s4944_s7  ;;  %13989 = vst [vmem:[#allocation326_spill] sm:$0xff] %v10210_v29  ;;  %v13990_v50 = vld [vmem:[#allocation334_spill] sm:$0xff]  ;;  %v10218_v15 = vadd.f32 %v3501_v4, %v13991_v23 }
 0x797   : > { %v3502_v26 = vsel %vm5754_vm1, %v13990_v50, %v3429_v55  ;;  %v13997_v50 = vld [vmem:[#allocation269_spill] sm:$0xff] }
 0x798   : > { %3676 = vrot.lane.b32.xlu0 %v10194_v52, %s4944_s7  ;;  %v3435_v24 = vpop.permute.xlu1 %3434  ;;  %13992 = vst [vmem:[#allocation327_spill] sm:$0xff] %v10218_v15  ;;  %v13993_v52 = vld [vmem:[#allocation335_spill] sm:$0xff]  ;;  %v10226_v9 = vadd.f32 %v3502_v26, %v13994_v13 }
 0x799   : > { %v3503_v60 = vsel %vm5754_vm1, %v13993_v52, %v3431_v37  ;;  %v14000_v52 = vld [vmem:[#allocation272_spill] sm:$0xff] }
 0x79a   : > { %v3437_v10 = vpop.permute.xlu0 %3436  ;;  %3678 = vrot.lane.b32.xlu1 %v10202_v27, %s4944_s7  ;;  %13995 = vst [vmem:[#allocation328_spill] sm:$0xff] %v10226_v9  ;;  %v13996_v27 = vld [vmem:[#allocation336_spill] sm:$0xff]  ;;  %v10234_v4 = vadd.f32 %v3503_v60, %v13997_v50 }
 0x79b   : > { %v3504_v55 = vsel %vm5754_vm1, %v13996_v27, %v3433_v57  ;;  %v14003_v27 = vld [vmem:[#allocation274_spill] sm:$0xff] }
 0x79c   : > { %3680 = vrot.lane.b32.xlu0 %v10210_v29, %s4944_s7  ;;  %v3439_v54 = vpop.permute.xlu1 %3438  ;;  %13998 = vst [vmem:[#allocation254_spill] sm:$0xff] %v10234_v4  ;;  %v13999_v29 = vld [vmem:[#allocation337_spill] sm:$0xff]  ;;  %v10242_v26 = vadd.f32 %v3504_v55, %v14000_v52 }
 0x79d   : > { %v3505_v37 = vsel %vm5754_vm1, %v13999_v29, %v3435_v24  ;;  %v14006_v29 = vld [vmem:[#allocation276_spill] sm:$0xff] }
 0x79e   : > { %v3441_v40 = vpop.permute.xlu0 %3440  ;;  %3682 = vrot.lane.b32.xlu1 %v10218_v15, %s4944_s7  ;;  %14001 = vst [vmem:[#allocation329_spill] sm:$0xff] %v10242_v26  ;;  %v14002_v15 = vld [vmem:[#allocation338_spill] sm:$0xff]  ;;  %v10250_v60 = vadd.f32 %v3505_v37, %v14003_v27 }
 0x79f   : > { %v3506_v57 = vsel %vm5754_vm1, %v14002_v15, %v3437_v10  ;;  %v14009_v10 = vld [vmem:[#allocation340_spill] sm:$0xff]  ;;  %v14010_v37 = vld [vmem:[#allocation278_spill] sm:$0xff] }
 0x7a0   : > { %3684 = vrot.lane.b32.xlu0 %v10226_v9, %s4944_s7  ;;  %v3443_v23 = vpop.permute.xlu1 %3442  ;;  %14004 = vst [vmem:[#allocation256_spill] sm:$0xff] %v10250_v60  ;;  %v14005_v9 = vld [vmem:[#allocation339_spill] sm:$0xff]  ;;  %v10258_v55 = vadd.f32 %v3506_v57, %v14006_v29  ;;  %v3508_v15 = vsel %vm5754_vm1, %v14009_v10, %v3441_v40  ;;  %v14014_v57 = vld [vmem:[#allocation280_spill] sm:$0xff]  ;;  %v14017_v40 = vld [vmem:[#allocation342_spill] sm:$0xff] }
 0x7a1   : > { %v3507_v24 = vsel %vm5754_vm1, %v14005_v9, %v3439_v54  ;;  %v14013_v54 = vld [vmem:[#allocation341_spill] sm:$0xff]  ;;  %v10278_v29 = vadd.f32 %v3508_v15, %v14014_v57  ;;  %v14018_v10 = vld [vmem:[#allocation282_spill] sm:$0xff] }
 0x7a2   : > { %v3445_v13 = vpop.permute.xlu0 %3444  ;;  %3686 = vrot.lane.b32.xlu1 %v10234_v4, %s4944_s7  ;;  %14007 = vst [vmem:[#allocation330_spill] sm:$0xff] %v10258_v55  ;;  %v10268_v27 = vadd.f32 %v3507_v24, %v14010_v37  ;;  %v3509_v9 = vsel %vm5754_vm1, %v14013_v54, %v3443_v23  ;;  %v14021_v23 = vld [vmem:[#allocation343_spill] sm:$0xff]  ;;  %v14022_v54 = vld [vmem:[#allocation284_spill] sm:$0xff] }
 0x7a3   : > { %14015 = vst [vmem:[#allocation332_spill] sm:$0xff] %v10278_v29  ;;  %v3510_v24 = vsel %vm5754_vm1, %v14017_v40, %v3445_v13  ;;  %v10288_v37 = vadd.f32 %v3509_v9, %v14018_v10 }
 0x7a4   : > { %3688 = vrot.lane.b32.xlu0 %v10242_v26, %s4944_s7  ;;  %v3447_v50 = vpop.permute.xlu1 %3446  ;;  %14011 = vst [vmem:[#allocation331_spill] sm:$0xff] %v10268_v27  ;;  %v10298_v57 = vadd.f32 %v3510_v24, %v14022_v54 }
 0x7a5   : > { %14019 = vst [vmem:[#allocation333_spill] sm:$0xff] %v10288_v37  ;;  %v3511_v15 = vsel %vm5754_vm1, %v14021_v23, %v3447_v50 }
 0x7a6   : > { %v10260_v52 = vpop.permute.xlu0 %3576  ;;  %3690 = vrot.lane.b32.xlu1 %v10250_v60, %s4944_s7  ;;  %14023 = vst [vmem:[#allocation334_spill] sm:$0xff] %v10298_v57  ;;  %v10305_v13 = vadd.f32 %v3511_v15, %v9541_v44  ;;  %v14110_v60 = vld [vmem:[#allocation179_spill] sm:$0xff] }
 0x7a7   : > { %14008 = vst [vmem:[#allocation258_spill] sm:$0xff] %v10260_v52 }
 0x7a8   : > { %3692 = vrot.lane.b32.xlu0 %v10258_v55, %s4944_s7  ;;  %v10272_v26 = vpop.permute.xlu1 %3578  ;;  %14025 = vst [vmem:[#allocation335_spill] sm:$0xff] %v10305_v13 }
 0x7a9   : > { %14012 = vst [vmem:[#allocation260_spill] sm:$0xff] %v10272_v26 }
 0x7aa   : > { %v10280_v52 = vpop.permute.xlu0 %3580  ;;  %3694 = vrot.lane.b32.xlu1 %v10268_v27, %s4944_s7  ;;  %v14109_v27 = vld [vmem:[#allocation112_spill] sm:$0xff] }
 0x7ab   : > { %14016 = vst [vmem:[#allocation262_spill] sm:$0xff] %v10280_v52 }
 0x7ac   : > { %3696 = vrot.lane.b32.xlu0 %v10278_v29, %s4944_s7  ;;  %v10292_v26 = vpop.permute.xlu1 %3582 }
 0x7ad   : > { %14020 = vst [vmem:[#allocation264_spill] sm:$0xff] %v10292_v26  ;;  %v14047_v26 = vld [vmem:[#allocation147_spill] sm:$0xff] }
 0x7ae   : > { %v10300_v52 = vpop.permute.xlu0 %3584  ;;  %3698 = vrot.lane.b32.xlu1 %v10288_v37, %s4944_s7  ;;  %v14105_v37 = vld [vmem:[#allocation176_spill] sm:$0xff] }
 0x7af   : > { %14024 = vst [vmem:[#allocation266_spill] sm:$0xff] %v10300_v52 }
 0x7b0   : > { %3700 = vrot.lane.b32.xlu0 %v10298_v57, %s4944_s7  ;;  %v10309_v9 = vpop.permute.xlu1 %3586 }
 0x7b1   : > { %14026 = vst [vmem:[#allocation268_spill] sm:$0xff] %v10309_v9  ;;  %v14045_v9 = vld [vmem:[#allocation77_spill] sm:$0xff] }
 0x7b2   : > { %v10311_v40 = vpop.permute.xlu0 %3588  ;;  %3702 = vrot.lane.b32.xlu1 %v10305_v13, %s4944_s7 }
 0x7b3   : > { %14027 = vst [vmem:[#allocation336_spill] sm:$0xff] %v10311_v40 }
 0x7b4   : > { %3704 = vrot.lane.b32.xlu0 %v9794_v42, %s4945_s8  ;;  %v10317_v20 = vpop.permute.xlu1 %3590  ;;  %v14049_v42 = vld [vmem:[#allocation155_spill] sm:$0xff] }
 0x7b5   : > { %14028 = vst [vmem:[#allocation269_spill] sm:$0xff] %v10317_v20  ;;  %v14041_v20 = vld [vmem:[#allocation29_spill] sm:$0xff] }
 0x7b6   : > { %v10319_v50 = vpop.permute.xlu0 %3592  ;;  %3706 = vrot.lane.b32.xlu1 %v9802_v41, %s4945_s8  ;;  %v14048_v41 = vld [vmem:[#allocation116_spill] sm:$0xff] }
 0x7b7   : > { %14029 = vst [vmem:[#allocation337_spill] sm:$0xff] %v10319_v50 }
 0x7b8   : > { %3708 = vrot.lane.b32.xlu0 %v9810_v28, %s4945_s8  ;;  %v10325_v44 = vpop.permute.xlu1 %3594 }
 0x7b9   : > { %14030 = vst [vmem:[#allocation272_spill] sm:$0xff] %v10325_v44 }
 0x7ba   : > { %v10327_v24 = vpop.permute.xlu0 %3596  ;;  %3710 = vrot.lane.b32.xlu1 %v9818_v39, %s4945_s8 }
 0x7bb   : > { %14031 = vst [vmem:[#allocation338_spill] sm:$0xff] %v10327_v24  ;;  %v14096_v24 = vld [vmem:[#allocation172_spill] sm:$0xff] }
 0x7bc   : > { %3712 = vrot.lane.b32.xlu0 %v9826_v25, %s4945_s8  ;;  %v10333_v10 = vpop.permute.xlu1 %3598 }
 0x7bd   : > { %14032 = vst [vmem:[#allocation274_spill] sm:$0xff] %v10333_v10  ;;  %v14092_v10 = vld [vmem:[#allocation103_spill] sm:$0xff] }
 0x7be   : > { %v10335_v23 = vpop.permute.xlu0 %3600  ;;  %3714 = vrot.lane.b32.xlu1 %v9834_v14, %s4945_s8 }
 0x7bf   : > { %14033 = vst [vmem:[#allocation339_spill] sm:$0xff] %v10335_v23  ;;  %v14088_v23 = vld [vmem:[#allocation66_spill] sm:$0xff] }
 0x7c0   : > { %3716 = vrot.lane.b32.xlu0 %v9842_v17, %s4945_s8  ;;  %v10341_v15 = vpop.permute.xlu1 %3602 }
 0x7c1   : > { %14034 = vst [vmem:[#allocation276_spill] sm:$0xff] %v10341_v15  ;;  %v14072_v15 = vld [vmem:[#allocation159_spill] sm:$0xff] }
 0x7c2   : > { %v10343_v54 = vpop.permute.xlu0 %3604  ;;  %3718 = vrot.lane.b32.xlu1 %v9850_v30, %s4945_s8  ;;  %v14040_v30 = vld [vmem:[#allocation129_spill] sm:$0xff] }
 0x7c3   : > { %14035 = vst [vmem:[#allocation340_spill] sm:$0xff] %v10343_v54  ;;  %v2674_v40 = vsel %vm6771_vm2, %v14041_v20, %v14040_v30  ;;  %v2672_v30 = vsel %vm6771_vm2, %v14049_v42, %v14048_v41  ;;  %v14050_v20 = vld [vmem:[#allocation125_spill] sm:$0xff] }
 0x7c4   : > { %3720 = vrot.lane.b32.xlu0 %v9858_v21, %s4945_s8  ;;  %v10349_v44 = vpop.permute.xlu1 %3606  ;;  %v2738_v28 = vadd.f32 %v2674_v40, %v14047_v26  ;;  %v14056_v40 = vld [vmem:[#allocation98_spill] sm:$0xff]  ;;  %v14057_v42 = vld [vmem:[#allocation45_spill] sm:$0xff] }
 0x7c5   : > { %14036 = vst [vmem:[#allocation278_spill] sm:$0xff] %v10349_v44  ;;  %v2736_v44 = vadd.f32 %v2672_v30, %v14056_v40  ;;  %v14058_v41 = vld [vmem:[#allocation157_spill] sm:$0xff]  ;;  %v14064_v40 = vld [vmem:[#allocation108_spill] sm:$0xff] }
 0x7c6   : > { %v10351_v50 = vpop.permute.xlu0 %3608  ;;  %3722 = vrot.lane.b32.xlu1 %v9866_v1, %s4945_s8  ;;  %v14044_v1 = vld [vmem:[#allocation109_spill] sm:$0xff]  ;;  %v2679_v54 = vsel %vm6771_vm2, %v14058_v41, %v14057_v42 }
 0x7c7   : > { %14037 = vst [vmem:[#allocation341_spill] sm:$0xff] %v10351_v50  ;;  %v2675_v52 = vsel %vm6771_vm2, %v14045_v9, %v14044_v1  ;;  %v14053_v9 = vld [vmem:[#allocation89_spill] sm:$0xff]  ;;  %v14055_v50 = vld [vmem:[#allocation76_spill] sm:$0xff]  ;;  %v10428_v30 = vmul.f32 0.25, %v2736_v44 }
 0x7c8   : > { %3724 = vrot.lane.b32.xlu0 %v9874_v47, %s4945_s8  ;;  %v10357_v17 = vpop.permute.xlu1 %3610  ;;  %v14095_v47 = vld [vmem:[#allocation174_spill] sm:$0xff] }
 0x7c9   : > { %14038 = vst [vmem:[#allocation280_spill] sm:$0xff] %v10357_v17  ;;  %v14054_v17 = vld [vmem:[#allocation92_spill] sm:$0xff] }
 0x7ca   : > { %v10359_v14 = vpop.permute.xlu0 %3612  ;;  %3726 = vrot.lane.b32.xlu1 %v9882_v43, %s4945_s8  ;;  %v2678_v26 = vsel %vm6771_vm2, %v14055_v50, %v14054_v17  ;;  %v14063_v50 = vld [vmem:[#allocation84_spill] sm:$0xff] }
 0x7cb   : > { %14039 = vst [vmem:[#allocation342_spill] sm:$0xff] %v10359_v14  ;;  %v14051_v14 = vld [vmem:[#allocation63_spill] sm:$0xff] }
 0x7cc   : > { %3728 = vrot.lane.b32.xlu0 %v9890_v48, %s4945_s8  ;;  %v10369_v25 = vpop.permute.xlu1 %3614  ;;  %v14084_v48 = vld [vmem:[#allocation167_spill] sm:$0xff] }
 0x7cd   : > { %14043 = vst [vmem:[#allocation282_spill] sm:$0xff] %v10369_v25  ;;  %v2673_v25 = vsel %vm6771_vm2, %v14051_v14, %v14050_v20  ;;  %v10406_v20 = vmul.f32 0.25, %v2738_v28 }
 0x7ce   : > { %v10375_v39 = vpop.permute.xlu0 %3616  ;;  %3730 = vrot.lane.b32.xlu1 %v9898_v8, %s4945_s8  ;;  %v2742_v8 = vadd.f32 %v2678_v26, %v14064_v40  ;;  %v14070_v26 = vld [vmem:[#allocation37_spill] sm:$0xff] }
 0x7cf   : > { %14046 = vst [vmem:[#allocation343_spill] sm:$0xff] %v10375_v39  ;;  %v2739_v39 = vadd.f32 %v2675_v52, %v14053_v9  ;;  %v14060_v52 = vld [vmem:[#allocation148_spill] sm:$0xff] }
 0x7d0   : > { %3732 = vrot.lane.b32.xlu0 %v9906_v62, %s4945_s8  ;;  %v10390_v1 = vpop.permute.xlu1 %3618  ;;  %v2737_v9 = vadd.f32 %v2673_v25, %v14060_v52  ;;  %v14062_v62 = vld [vmem:[#allocation33_spill] sm:$0xff] }
 0x7d1   : > { %14052 = vst [vmem:[#allocation284_spill] sm:$0xff] %v10390_v1  ;;  %v14061_v1 = vld [vmem:[#allocation78_spill] sm:$0xff]  ;;  %v10420_v28 = vmul.f32 0.25, %v2739_v39  ;;  %v14068_v52 = vld [vmem:[#allocation133_spill] sm:$0xff] }
 0x7d2   : > { %v10402_v14 = vpop.permute.xlu0 %3620  ;;  %3734 = vrot.lane.b32.xlu1 %v9914_v58, %s4945_s8  ;;  %v2676_v17 = vsel %vm6771_vm2, %v14062_v62, %v14061_v1  ;;  %v14069_v58 = vld [vmem:[#allocation111_spill] sm:$0xff]  ;;  %v10444_v44 = vmul.f32 0.25, %v2737_v9  ;;  %v14078_v1 = vld [vmem:[#allocation56_spill] sm:$0xff] }
 0x7d3   : > { %14059 = vst [vmem:[#allocation129_spill] sm:$0xff] %v10402_v14  ;;  %14066 = vst [vmem:[#allocation158_spill] sm:$0xff] %v10420_v28  ;;  %v14067_v14 = vld [vmem:[#allocation54_spill] sm:$0xff]  ;;  %v2677_v62 = vsel %vm6771_vm2, %v14069_v58, %v14068_v52  ;;  %v2740_v40 = vadd.f32 %v2676_v17, %v14070_v26  ;;  %v10442_v58 = vmul.f32 %v10406_v20, %v10406_v20  ;;  %v14075_v17 = vld [vmem:[#allocation160_spill] sm:$0xff]  ;;  %v10452_v26 = vmul.f32 0.25, %v2742_v8 }
 0x7d4   : > { %3736 = vrot.lane.b32.xlu0 %v9922_v22, %s4945_s8  ;;  %v10417_v42 = vpop.permute.xlu1 %3622  ;;  %v2743_v25 = vadd.f32 %v2679_v54, %v14067_v14  ;;  %v14071_v22 = vld [vmem:[#allocation161_spill] sm:$0xff]  ;;  %v14074_v14 = vld [vmem:[#allocation163_spill] sm:$0xff]  ;;  %v14080_v54 = vld [vmem:[#allocation164_spill] sm:$0xff] }
 0x7d5   : > { %14065 = vst [vmem:[#allocation29_spill] sm:$0xff] %v10417_v42  ;;  %v2682_v41 = vsel %vm6771_vm2, %v14072_v15, %v14071_v22  ;;  %v2683_v52 = vsel %vm6771_vm2, %v14075_v17, %v14074_v14  ;;  %v14076_v22 = vld [vmem:[#allocation143_spill] sm:$0xff]  ;;  %14077 = vst [vmem:[#allocation77_spill] sm:$0xff] %v10452_v26  ;;  %v14079_v42 = vld [vmem:[#allocation166_spill] sm:$0xff]  ;;  %v10465_v14 = vmul.f32 %v10420_v28, %v10420_v28 }
 0x7d6   : > { %v10435_v39 = vpop.permute.xlu0 %3624  ;;  %3738 = vrot.lane.b32.xlu1 %v9930_v63, %s4945_s8  ;;  %v2680_v63 = vsel %vm6771_vm2, %v14080_v54, %v14079_v42  ;;  %v10467_v17 = vmul.f32 0.25, %v2743_v25  ;;  %v14083_v8 = vld [vmem:[#allocation86_spill] sm:$0xff]  ;;  %v2747_v43 = vadd.f32 %v2683_v52, %v14088_v23  ;;  %v10498_v23 = vmul.f32 %v10452_v26, %v10452_v26  ;;  %v14115_v26 = vld [vmem:[#allocation184_spill] sm:$0xff] }
 0x7d7   : > { %14073 = vst [vmem:[#allocation109_spill] sm:$0xff] %v10435_v39  ;;  %v2741_v39 = vadd.f32 %v2677_v62, %v14078_v1  ;;  %v2746_v15 = vadd.f32 %v2682_v41, %v14083_v8  ;;  %v14085_v62 = vld [vmem:[#allocation165_spill] sm:$0xff]  ;;  %v14090_v41 = vld [vmem:[#allocation127_spill] sm:$0xff]  ;;  %v2686_v8 = vsel %vm6771_vm2, %v14096_v24, %v14095_v47  ;;  %v14114_v47 = vld [vmem:[#allocation186_spill] sm:$0xff] }
 0x7d8   : > { %3740 = vrot.lane.b32.xlu0 %v9938_v6, %s4945_s8  ;;  %v10461_v9 = vpop.permute.xlu1 %3626  ;;  %14082 = vst [vmem:[#allocation116_spill] sm:$0xff] %v10467_v17  ;;  %v2681_v1 = vsel %vm6771_vm2, %v14085_v62, %v14084_v48  ;;  %v10478_v6 = vmul.f32 %v10428_v30, %v10428_v30  ;;  %v10491_v48 = vmul.f32 %v10444_v44, %v10444_v44  ;;  %v14091_v62 = vld [vmem:[#allocation128_spill] sm:$0xff] }
 0x7d9   : > { %14081 = vst [vmem:[#allocation147_spill] sm:$0xff] %v10461_v9  ;;  %v10480_v9 = vmul.f32 0.25, %v2740_v40  ;;  %v2744_v40 = vadd.f32 %v2680_v63, %v14092_v10  ;;  %v10500_v52 = vmul.f32 0.25, %v2741_v39  ;;  %v10515_v54 = vmul.f32 %v10467_v17, %v10467_v17  ;;  %v14104_v10 = vld [vmem:[#allocation178_spill] sm:$0xff] }
 0x7da   : > { %v10483_v25 = vpop.permute.xlu0 %3628  ;;  %3742 = vrot.lane.b32.xlu1 %v9946_v49, %s4945_s8  ;;  %v10517_v39 = vmul.f32 0.25, %v2746_v15  ;;  %v2684_v15 = vsel %vm6771_vm2, %v14105_v37, %v14104_v10  ;;  %v2750_v55 = vadd.f32 %v2686_v8, %v14109_v27 }
 0x7db   : > { %14087 = vst [vmem:[#allocation155_spill] sm:$0xff] %v10480_v9  ;;  %14089 = vst [vmem:[#allocation125_spill] sm:$0xff] %v10483_v25  ;;  %v14094_v25 = vld [vmem:[#allocation68_spill] sm:$0xff]  ;;  %v10541_v24 = vmul.f32 0.25, %v2744_v40  ;;  %v10550_v37 = vmul.f32 %v10500_v52, %v10500_v52  ;;  %v2690_v40 = vsel %vm6771_vm2, %v14115_v26, %v14114_v47  ;;  %v14127_v47 = vld [vmem:[#allocation190_spill] sm:$0xff] }
 0x7dc   : > { %14093 = vst [vmem:[#allocation63_spill] sm:$0xff] %v10500_v52  ;;  %v2745_v49 = vadd.f32 %v2681_v1, %v14094_v25  ;;  %3744 = vrot.lane.b32.xlu0 %v9954_v35, %s4945_s8  ;;  %v10509_v13 = vpop.permute.xlu1 %3630  ;;  %14099 = vst [vmem:[#allocation92_spill] sm:$0xff] %v10517_v39  ;;  %v14100_v1 = vld [vmem:[#allocation175_spill] sm:$0xff]  ;;  %v14101_v25 = vld [vmem:[#allocation173_spill] sm:$0xff]  ;;  %v10529_v35 = vmul.f32 0.25, %v2747_v43 }
 0x7dd   : > { %14097 = vst [vmem:[#allocation89_spill] sm:$0xff] %v10509_v13  ;;  %v2687_v57 = vsel %vm6771_vm2, %v14101_v25, %v14100_v1  ;;  %v10527_v13 = vmul.f32 %v10480_v9, %v10480_v9  ;;  %14108 = vst [vmem:[#allocation45_spill] sm:$0xff] %v10541_v24  ;;  %v14111_v43 = vld [vmem:[#allocation177_spill] sm:$0xff]  ;;  %v14123_v52 = vld [vmem:[#allocation10_spill] sm:$0xff] }
 0x7de   : > { %14103 = vst [vmem:[#allocation76_spill] sm:$0xff] %v10529_v35  ;;  %v10535_v29 = vpop.permute.xlu0 %3632  ;;  %3746 = vrot.lane.b32.xlu1 %v9962_v11, %s4945_s8  ;;  %v2685_v17 = vsel %vm6771_vm2, %v14111_v43, %v14110_v60  ;;  %v10552_v10 = vmul.f32 0.25, %v2745_v49  ;;  %v10567_v43 = vmul.f32 %v10517_v39, %v10517_v39  ;;  %v14118_v49 = vld [vmem:[#allocation123_spill] sm:$0xff]  ;;  %v14128_v39 = vld [vmem:[#allocation188_spill] sm:$0xff] }
 0x7df   : > { %14106 = vst [vmem:[#allocation98_spill] sm:$0xff] %v10535_v29  ;;  %v14113_v29 = vld [vmem:[#allocation6_spill] sm:$0xff]  ;;  %v2748_v25 = vadd.f32 %v2684_v15, %v14118_v49  ;;  %v2749_v60 = vadd.f32 %v2685_v17, %v14123_v52  ;;  %v10589_v15 = vmul.f32 %v10541_v24, %v10541_v24  ;;  %v10591_v49 = vmul.f32 0.25, %v2750_v55  ;;  %v14136_v52 = vld [vmem:[#allocation189_spill] sm:$0xff] }
 0x7e0   : > { %14112 = vst [vmem:[#allocation157_spill] sm:$0xff] %v10552_v10  ;;  %v2751_v11 = vadd.f32 %v2687_v57, %v14113_v29  ;;  %3748 = vrot.lane.b32.xlu0 %v9970_v53, %s4945_s8  ;;  %v10561_v27 = vpop.permute.xlu1 %3634  ;;  %v14119_v29 = vld [vmem:[#allocation187_spill] sm:$0xff]  ;;  %v14120_v57 = vld [vmem:[#allocation185_spill] sm:$0xff]  ;;  %v2688_v53 = vsel %vm6771_vm2, %v14128_v39, %v14127_v47  ;;  %v14144_v17 = vld [vmem:[#allocation106_spill] sm:$0xff] }
 0x7e1   : > { %14116 = vst [vmem:[#allocation148_spill] sm:$0xff] %v10561_v27  ;;  %v2691_v63 = vsel %vm6771_vm2, %v14120_v57, %v14119_v29  ;;  %v10578_v27 = vmul.f32 %v10529_v35, %v10529_v35  ;;  %14125 = vst [vmem:[#allocation33_spill] sm:$0xff] %v10591_v49  ;;  %v14126_v29 = vld [vmem:[#allocation132_spill] sm:$0xff]  ;;  %v14131_v35 = vld [vmem:[#allocation26_spill] sm:$0xff]  ;;  %v10613_v39 = vmul.f32 0.25, %v2748_v25 }
 0x7e2   : > { %v10583_v4 = vpop.permute.xlu0 %3636  ;;  %3750 = vrot.lane.b32.xlu1 %v9978_v46, %s4945_s8  ;;  %v2754_v57 = vadd.f32 %v2690_v40, %v14126_v29  ;;  %v10604_v46 = vmul.f32 0.25, %v2751_v11  ;;  %v2755_v8 = vadd.f32 %v2691_v63, %v14131_v35  ;;  %v14135_v47 = vld [vmem:[#allocation191_spill] sm:$0xff]  ;;  %v4875_v11 = vld [vmem:[%s12264_s3] sm:$0xff]  ;;  %v14137_v35 = vsub.s32 2, %v14063_v50  ;;  %v14141_v29 = vld [vmem:[#allocation200_spill] sm:$0xff] }
 0x7e3   : > { %14124 = vst [vmem:[#allocation78_spill] sm:$0xff] %v10583_v4  ;;  %v10602_v4 = vmul.f32 %v10552_v10, %v10552_v10  ;;  %14134 = vst [vmem:[#allocation133_spill] sm:$0xff] %v10613_v39  ;;  %v2689_v26 = vsel %vm6771_vm2, %v14136_v52, %v14135_v47  ;;  %v14142_v25 = vld [vmem:[#allocation198_spill] sm:$0xff]  ;;  %v14143_v40 = vld [vmem:[#allocation232_spill] sm:$0xff] }
 0x7e4   : > { %14130 = vst [vmem:[#allocation108_spill] sm:$0xff] %v10604_v46  ;;  %3752 = vrot.lane.b32.xlu0 %v9986_v16, %s4945_s8  ;;  %v10609_v55 = vpop.permute.xlu1 %3638  ;;  %v10624_v63 = vrot.slane %v4875_v11, %v14137_v35  ;;  %v10626_v16 = vmul.f32 0.25, %v2749_v60  ;;  %v2692_v10 = vsel %vm6771_vm2, %v14142_v25, %v14141_v29  ;;  %v2704_v52 = vsel %vm6771_vm2, %v14144_v17, %v14143_v40  ;;  %v14148_v35 = vld [vmem:[#allocation199_spill] sm:$0xff] }
 0x7e5   : > { %14132 = vst [vmem:[#allocation54_spill] sm:$0xff] %v10609_v55  ;;  %v14140_v55 = vld [vmem:[#allocation95_spill] sm:$0xff]  ;;  %v10643_v60 = vmul.f32 %v10591_v49, %v10591_v49  ;;  %v14149_v25 = vsub.s32 3, %v14063_v50  ;;  %v14157_v50 = vld [vmem:[#allocation114_spill] sm:$0xff] }
 0x7e6   : > { %14138 = vst [vmem:[#allocation111_spill] sm:$0xff] %v10624_v63  ;;  %14139 = vst [vmem:[#allocation37_spill] sm:$0xff] %v10626_v16  ;;  %v2752_v24 = vadd.f32 %v2688_v53, %v14140_v55  ;;  %v10637_v47 = vpop.permute.xlu0 %3640  ;;  %3754 = vrot.lane.b32.xlu1 %v9994_v45, %s4945_s8  ;;  %v10645_v53 = vmul.f32 0.25, %v2754_v57  ;;  %v14147_v55 = vld [vmem:[#allocation201_spill] sm:$0xff]  ;;  %v10661_v45 = vmul.f32 0.25, %v2755_v8  ;;  %v2768_v49 = vadd.f32 %v2704_v52, %v14157_v50 }
 0x7e7   : > { %14145 = vst [vmem:[#allocation161_spill] sm:$0xff] %v10637_v47  ;;  %v2693_v29 = vsel %vm6771_vm2, %v14148_v35, %v14147_v55  ;;  %v10653_v9 = vrot.slane %v4875_v11, %v14149_v25  ;;  %v10659_v47 = vmul.f32 %v10604_v46, %v10604_v46  ;;  %v14153_v57 = vld [vmem:[#allocation101_spill] sm:$0xff]  ;;  %v10672_v35 = vmul.f32 %v10613_v39, %v10613_v39  ;;  %v14165_v46 = vld [vmem:[#allocation222_spill] sm:$0xff] }
 0x7e8   : > { %14146 = vst [vmem:[#allocation159_spill] sm:$0xff] %v10645_v53  ;;  %14152 = vst [vmem:[#allocation160_spill] sm:$0xff] %v10661_v45  ;;  %v2753_v1 = vadd.f32 %v2689_v26, %v14153_v57  ;;  %3756 = vrot.lane.b32.xlu0 %v10002_v34, %s4945_s8  ;;  %v10666_v28 = vpop.permute.xlu1 %3642  ;;  %v14156_v25 = vld [vmem:[#allocation121_spill] sm:$0xff]  ;;  %v10680_v26 = vmul.f32 %v10626_v16, %v10626_v16  ;;  %v10682_v57 = vmul.f32 0.25, %v2752_v24  ;;  %v14166_v24 = vld [vmem:[#allocation196_spill] sm:$0xff] }
 0x7e9   : > { %14150 = vst [vmem:[#allocation163_spill] sm:$0xff] %v10653_v9  ;;  %14154 = vst [vmem:[#allocation143_spill] sm:$0xff] %v10666_v28  ;;  %v2756_v40 = vadd.f32 %v2692_v10, %v14156_v25  ;;  %v14160_v28 = vld [vmem:[#allocation39_spill] sm:$0xff]  ;;  %v10693_v50 = vmul.f32 %v10645_v53, %v10645_v53  ;;  %v14170_v25 = vld [vmem:[#allocation197_spill] sm:$0xff] }
 0x7ea   : > { %14159 = vst [vmem:[#allocation56_spill] sm:$0xff] %v10682_v57  ;;  %v2757_v34 = vadd.f32 %v2693_v29, %v14160_v28  ;;  %v10685_v11 = vpop.permute.xlu0 %3644  ;;  %3758 = vrot.lane.b32.xlu1 %v10010_v7, %s4945_s8  ;;  %v2694_v28 = vsel %vm6771_vm2, %v14166_v24, %v14165_v46  ;;  %v10703_v29 = vmul.f32 %v10661_v45, %v10661_v45  ;;  %v14169_v7 = vld [vmem:[#allocation223_spill] sm:$0xff]  ;;  %v14171_v16 = vld [vmem:[#allocation233_spill] sm:$0xff]  ;;  %v14172_v10 = vld [vmem:[#allocation140_spill] sm:$0xff] }
 0x7eb   : > { %14161 = vst [vmem:[#allocation166_spill] sm:$0xff] %v10685_v11  ;;  %14163 = vst [vmem:[#allocation164_spill] sm:$0xff] %v10693_v50  ;;  %v10705_v11 = vmul.f32 0.25, %v2753_v1  ;;  %v2695_v55 = vsel %vm6771_vm2, %v14170_v25, %v14169_v7  ;;  %v2705_v17 = vsel %vm6771_vm2, %v14172_v10, %v14171_v16  ;;  %v10719_v24 = vmul.f32 0.25, %v2756_v40  ;;  %v14175_v53 = vld [vmem:[#allocation224_spill] sm:$0xff]  ;;  %v14177_v39 = vld [vmem:[#allocation225_spill] sm:$0xff] }
 0x7ec   : > { %14167 = vst [vmem:[#allocation86_spill] sm:$0xff] %v10703_v29  ;;  %3760 = vrot.lane.b32.xlu0 %v10018_v32, %s4945_s8  ;;  %v10717_v46 = vpop.permute.xlu1 %3646  ;;  %v14176_v1 = vld [vmem:[#allocation208_spill] sm:$0xff]  ;;  %v14178_v8 = vld [vmem:[#allocation209_spill] sm:$0xff]  ;;  %v2832_v25 = vmul.f32 0.25, %v2768_v49  ;;  %v10733_v32 = vmul.f32 %v10682_v57, %v10682_v57  ;;  %v10735_v40 = vmul.f32 0.25, %v2757_v34  ;;  %v14185_v49 = vld [vmem:[#allocation142_spill] sm:$0xff] }
 0x7ed   : > { %14168 = vst [vmem:[#allocation167_spill] sm:$0xff] %v10705_v11  ;;  %14173 = vst [vmem:[#allocation165_spill] sm:$0xff] %v10717_v46  ;;  %v2696_v52 = vsel %vm6771_vm2, %v14176_v1, %v14175_v53  ;;  %v2697_v7 = vsel %vm6771_vm2, %v14178_v8, %v14177_v39  ;;  %v14182_v46 = vld [vmem:[#allocation13_spill] sm:$0xff]  ;;  %v2759_v8 = vadd.f32 %v2695_v55, %v14185_v49  ;;  %v14186_v1 = vld [vmem:[#allocation52_spill] sm:$0xff] }
 0x7ee   : > { %14174 = vst [vmem:[#allocation66_spill] sm:$0xff] %v10719_v24  ;;  %14180 = vst [vmem:[#allocation127_spill] sm:$0xff] %v10733_v32  ;;  %v2758_v29 = vadd.f32 %v2694_v28, %v14182_v46  ;;  %v10738_v50 = vpop.permute.xlu0 %3648  ;;  %3762 = vrot.lane.b32.xlu1 %v10026_v19, %s4945_s8  ;;  %v2769_v10 = vadd.f32 %v2705_v17, %v14186_v1  ;;  %v14187_v45 = vld [vmem:[#allocation234_spill] sm:$0xff]  ;;  %v14188_v16 = vld [vmem:[#allocation83_spill] sm:$0xff]  ;;  %v10752_v28 = vmul.f32 %v10705_v11, %v10705_v11 }
 0x7ef   : > { %14181 = vst [vmem:[#allocation128_spill] sm:$0xff] %v10735_v40  ;;  %14183 = vst [vmem:[#allocation103_spill] sm:$0xff] %v10738_v50  ;;  %v2706_v34 = vsel %vm6771_vm2, %v14188_v16, %v14187_v45  ;;  %v14190_v19 = vld [vmem:[#allocation141_spill] sm:$0xff]  ;;  %v14191_v32 = vld [vmem:[#allocation118_spill] sm:$0xff]  ;;  %v10764_v55 = vmul.f32 %v10719_v24, %v10719_v24  ;;  %v2896_v49 = vsub.f32 %v2832_v25, %v10478_v6  ;;  %v10790_v25 = vmul.f32 0.25, %v2759_v8 }
 0x7f0   : > { %v2760_v42 = vadd.f32 %v2696_v52, %v14190_v19  ;;  %v2761_v39 = vadd.f32 %v2697_v7, %v14191_v32  ;;  %3764 = vrot.lane.b32.xlu0 %v10034_v36, %s4945_s8  ;;  %v10760_v17 = vpop.permute.xlu1 %3650  ;;  %v14194_v1 = vld [vmem:[#allocation235_spill] sm:$0xff]  ;;  %v14195_v50 = vld [vmem:[#allocation41_spill] sm:$0xff]  ;;  %v10775_v32 = vmul.f32 %v10735_v40, %v10735_v40  ;;  %v10777_v52 = vmul.f32 0.25, %v2758_v29  ;;  %v14198_v36 = vld [vmem:[#allocation236_spill] sm:$0xff] }
 0x7f1   : > { %14192 = vst [vmem:[#allocation68_spill] sm:$0xff] %v10760_v17  ;;  %v2707_v19 = vsel %vm6771_vm2, %v14195_v50, %v14194_v1  ;;  %v14197_v7 = vld [vmem:[#allocation65_spill] sm:$0xff]  ;;  %14202 = vst [vmem:[#allocation175_spill] sm:$0xff] %v10790_v25  ;;  %v14203_v1 = vld [vmem:[#allocation226_spill] sm:$0xff] }
 0x7f2   : > { %14196 = vst [vmem:[#allocation174_spill] sm:$0xff] %v10775_v32  ;;  %v2770_v17 = vadd.f32 %v2706_v34, %v14197_v7  ;;  %v14199_v11 = vld [vmem:[#allocation17_spill] sm:$0xff]  ;;  %v10784_v24 = vpop.permute.xlu0 %3652  ;;  %3766 = vrot.lane.b32.xlu1 %v10042_v61, %s4945_s8  ;;  %v14204_v29 = vld [vmem:[#allocation206_spill] sm:$0xff]  ;;  %v2833_v7 = vmul.f32 0.25, %v2769_v10  ;;  %v10796_v45 = vmul.f32 0.25, %v2760_v42  ;;  %v10798_v46 = vmul.f32 0.25, %v2761_v39 }
 0x7f3   : > { %v2708_v16 = vsel %vm6771_vm2, %v14199_v11, %v14198_v36  ;;  %14200 = vst [vmem:[#allocation172_spill] sm:$0xff] %v10784_v24  ;;  %v2698_v34 = vsel %vm6771_vm2, %v14204_v29, %v14203_v1  ;;  %v14207_v36 = vld [vmem:[#allocation50_spill] sm:$0xff]  ;;  %v14208_v24 = vld [vmem:[#allocation237_spill] sm:$0xff]  ;;  %v14211_v50 = vld [vmem:[#allocation227_spill] sm:$0xff]  ;;  %v2928_v10 = vmax.f32 %v2896_v49, 0.0 }
 0x7f4   : > { %14205 = vst [vmem:[#allocation173_spill] sm:$0xff] %v10796_v45  ;;  %14206 = vst [vmem:[#allocation178_spill] sm:$0xff] %v10798_v46  ;;  %v2771_v11 = vadd.f32 %v2707_v19, %v14207_v36  ;;  %v14209_v57 = vld [vmem:[#allocation137_spill] sm:$0xff]  ;;  %3768 = vrot.lane.b32.xlu0 %v10050_v59, %s4945_s8  ;;  %v10807_v8 = vpop.permute.xlu1 %3654  ;;  %v14212_v40 = vld [vmem:[#allocation207_spill] sm:$0xff]  ;;  %v2834_v53 = vmul.f32 0.25, %v2770_v17 }
 0x7f5   : > { %v2709_v61 = vsel %vm6771_vm2, %v14209_v57, %v14208_v24  ;;  %14210 = vst [vmem:[#allocation176_spill] sm:$0xff] %v10807_v8  ;;  %v2699_v42 = vsel %vm6771_vm2, %v14212_v40, %v14211_v50  ;;  %v14213_v39 = vld [vmem:[#allocation82_spill] sm:$0xff]  ;;  %v14215_v19 = vld [vmem:[#allocation9_spill] sm:$0xff]  ;;  %v10820_v57 = vmul.f32 %v10777_v52, %v10777_v52  ;;  %v14217_v59 = vld [vmem:[#allocation43_spill] sm:$0xff]  ;;  %v10831_v40 = vmul.f32 %v10790_v25, %v10790_v25 }
 0x7f6   : > { %v2772_v1 = vadd.f32 %v2708_v16, %v14213_v39  ;;  %v14214_v29 = vld [vmem:[#allocation238_spill] sm:$0xff]  ;;  %v2762_v6 = vadd.f32 %v2698_v34, %v14217_v59  ;;  %v10825_v32 = vpop.permute.xlu0 %3656  ;;  %3770 = vrot.lane.b32.xlu1 %v10058_v18, %s4945_s8  ;;  %v2897_v50 = vsub.f32 %v2833_v7, %v10491_v48  ;;  %v14220_v39 = vld [vmem:[#allocation61_spill] sm:$0xff]  ;;  %v10839_v59 = vmul.f32 %v10796_v45, %v10796_v45  ;;  %v14222_v8 = vld [vmem:[#allocation75_spill] sm:$0xff] }
 0x7f7   : > { %v2710_v36 = vsel %vm6771_vm2, %v14215_v19, %v14214_v29  ;;  %v14216_v24 = vld [vmem:[#allocation30_spill] sm:$0xff]  ;;  %14218 = vst [vmem:[#allocation112_spill] sm:$0xff] %v10825_v32  ;;  %v2773_v29 = vadd.f32 %v2709_v61, %v14220_v39  ;;  %v14221_v17 = vld [vmem:[#allocation85_spill] sm:$0xff]  ;;  %v2835_v19 = vmul.f32 0.25, %v2771_v11  ;;  %v10851_v61 = vmul.f32 %v10798_v46, %v10798_v46  ;;  %v14226_v11 = vld [vmem:[#allocation216_spill] sm:$0xff] }
 0x7f8   : > { %v2763_v34 = vadd.f32 %v2699_v42, %v14221_v17  ;;  %v2774_v32 = vadd.f32 %v2710_v36, %v14222_v8  ;;  %3772 = vrot.lane.b32.xlu0 %v10066_v56, %s4945_s8  ;;  %v10845_v18 = vpop.permute.xlu1 %3658  ;;  %v2992_v48 = vadd.f32 1e-05, %v2928_v10  ;;  %v2836_v7 = vmul.f32 0.25, %v2772_v1  ;;  %v14225_v42 = vld [vmem:[#allocation228_spill] sm:$0xff]  ;;  %v14227_v17 = vld [vmem:[#allocation239_spill] sm:$0xff]  ;;  %v14231_v1 = vld [vmem:[#allocation229_spill] sm:$0xff] }
 0x7f9   : > { %14223 = vst [vmem:[#allocation179_spill] sm:$0xff] %v10845_v18  ;;  %v10853_v39 = vmul.f32 0.25, %v2762_v6  ;;  %v2700_v8 = vsel %vm6771_vm2, %v14226_v11, %v14225_v42  ;;  %v2898_v36 = vsub.f32 %v2834_v53, %v10442_v58  ;;  %v14228_v18 = vld [vmem:[#allocation25_spill] sm:$0xff]  ;;  %v14230_v6 = vld [vmem:[#allocation152_spill] sm:$0xff]  ;;  %v2929_v11 = vmax.f32 %v2897_v50, 0.0  ;;  %v14234_v49 = vld [vmem:[#allocation230_spill] sm:$0xff] }
 0x7fa   : > { %v2711_v25 = vsel %vm6771_vm2, %v14228_v18, %v14227_v17  ;;  %v10864_v56 = vpop.permute.xlu0 %3660  ;;  %3774 = vrot.lane.b32.xlu1 %v10074_v12, %s4945_s8  ;;  %v14232_v45 = vld [vmem:[#allocation217_spill] sm:$0xff]  ;;  %v2837_v58 = vmul.f32 0.25, %v2773_v29  ;;  %v10874_v53 = vmul.f32 0.25, %v2763_v34  ;;  %v14235_v16 = vld [vmem:[#allocation214_spill] sm:$0xff]  ;;  %v2899_v17 = vsub.f32 %v2835_v19, %v10465_v14 }
 0x7fb   : > { %14229 = vst [vmem:[#allocation177_spill] sm:$0xff] %v10864_v56  ;;  %v2701_v42 = vsel %vm6771_vm2, %v14232_v45, %v14231_v1  ;;  %v2702_v18 = vsel %vm6771_vm2, %v14235_v16, %v14234_v49  ;;  %v2838_v56 = vmul.f32 0.25, %v2774_v32  ;;  %v14237_v12 = vld [vmem:[#allocation130_spill] sm:$0xff]  ;;  %4747 = vrsqrt.f32 %v2992_v48 }
 0x7fc   : > { %14233 = vst [vmem:[#allocation6_spill] sm:$0xff] %v10874_v53  ;;  %3776 = vrot.lane.b32.xlu0 %v10082_v3, %s4945_s8  ;;  %v10883_v10 = vpop.permute.xlu1 %3662  ;;  %v2764_v46 = vadd.f32 %v2700_v8, %v14237_v12  ;;  %v2900_v45 = vsub.f32 %v2836_v7, %v10527_v13  ;;  %v14238_v50 = vld [vmem:[#allocation58_spill] sm:$0xff]  ;;  %v10890_v34 = vmul.f32 %v10853_v39, %v10853_v39  ;;  %v2930_v19 = vmax.f32 %v2898_v36, 0.0  ;;  %v14242_v12 = vld [vmem:[#allocation93_spill] sm:$0xff]  ;;  %v14243_v7 = vld [vmem:[#allocation240_spill] sm:$0xff] }
 0x7fd   : > { %14236 = vst [vmem:[#allocation186_spill] sm:$0xff] %v10883_v10  ;;  %v2775_v29 = vadd.f32 %v2711_v25, %v14238_v50  ;;  %v14239_v16 = vld [vmem:[#allocation34_spill] sm:$0xff]  ;;  %v2766_v48 = vadd.f32 %v2702_v18, %v14242_v12  ;;  %v2993_v13 = vadd.f32 1e-05, %v2929_v11  ;;  %v2901_v25 = vsub.f32 %v2837_v58, %v10550_v37  ;;  %v14249_v58 = vld [vmem:[#allocation231_spill] sm:$0xff]  ;;  %v14260_v3 = vld [vmem:[#allocation169_spill] sm:$0xff] }
 0x7fe   : > { %v14240_v32 = vld [vmem:[#allocation126_spill] sm:$0xff]  ;;  %v10895_v1 = vpop.permute.xlu0 %3664  ;;  %3778 = vrot.lane.b32.xlu1 %v10090_v31, %s4945_s8  ;;  %v10907_v14 = vmul.f32 %v10874_v53, %v10874_v53  ;;  %v2931_v36 = vmax.f32 %v2899_v17, 0.0  ;;  %v10918_v11 = vmul.f32 0.25, %v2764_v46  ;;  %v14250_v12 = vld [vmem:[#allocation215_spill] sm:$0xff]  ;;  %v2932_v17 = vmax.f32 %v2900_v45, 0.0 }
 0x7ff   : > { %v2765_v49 = vadd.f32 %v2701_v42, %v14240_v32  ;;  %14241 = vst [vmem:[#allocation184_spill] sm:$0xff] %v10895_v1  ;;  %v14244_v8 = vld [vmem:[#allocation170_spill] sm:$0xff]  ;;  %v2902_v42 = vsub.f32 %v2838_v56, %v10498_v23  ;;  %v14245_v32 = vld [vmem:[#allocation241_spill] sm:$0xff]  ;;  %v14246_v1 = vld [vmem:[#allocation171_spill] sm:$0xff]  ;;  %v2994_v23 = vadd.f32 1e-05, %v2930_v19  ;;  %4749 = vrsqrt.f32 %v2993_v13 }
 0x800   : > { %v2712_v50 = vsel %vm6771_vm2, %v14244_v8, %v14243_v7  ;;  %v2713_v18 = vsel %vm6771_vm2, %v14246_v1, %v14245_v32  ;;  %3780 = vrot.lane.b32.xlu0 %v10098_v0, %s4945_s8  ;;  %v10916_v37 = vpop.permute.xlu1 %3666  ;;  %14248 = vst [vmem:[#allocation187_spill] sm:$0xff] %v10918_v11  ;;  %v2703_v7 = vsel %vm6771_vm2, %v14250_v12, %v14249_v58  ;;  %v2839_v8 = vmul.f32 0.25, %v2775_v29  ;;  %v14252_v10 = vld [vmem:[#allocation87_spill] sm:$0xff]  ;;  %v14253_v1 = vld [vmem:[#allocation242_spill] sm:$0xff]  ;;  %v14254_v32 = vld [vmem:[#allocation168_spill] sm:$0xff] }
 0x801   : > { %14247 = vst [vmem:[#allocation123_spill] sm:$0xff] %v10916_v37  ;;  %v10924_v56 = vmul.f32 0.25, %v2765_v49  ;;  %v2776_v31 = vadd.f32 %v2712_v50, %v14252_v10  ;;  %v2714_v0 = vsel %vm6771_vm2, %v14254_v32, %v14253_v1  ;;  %v10935_v46 = vmul.f32 0.25, %v2766_v48  ;;  %v14257_v29 = vld [vmem:[#allocation73_spill] sm:$0xff]  ;;  %v14259_v50 = vld [vmem:[#allocation243_spill] sm:$0xff]  ;;  %v14267_v13 = vld [vmem:[#allocation182_spill] sm:$0xff] }
 0x802   : > { %v10931_v37 = vpop.permute.xlu0 %3668  ;;  %3782 = vrot.lane.b32.xlu1 %v10106_v5, %s4945_s8  ;;  %v2933_v45 = vmax.f32 %v2901_v25, 0.0  ;;  %v2777_v49 = vadd.f32 %v2713_v18, %v14257_v29  ;;  %v14258_v58 = vld [vmem:[#allocation5_spill] sm:$0xff]  ;;  %v2995_v12 = vadd.f32 1e-05, %v2931_v36  ;;  %v2934_v10 = vmax.f32 %v2902_v42, 0.0  ;;  %v14263_v29 = vld [vmem:[#allocation110_spill] sm:$0xff] }
 0x803   : > { %14251 = vst [vmem:[#allocation185_spill] sm:$0xff] %v10924_v56  ;;  %14255 = vst [vmem:[#allocation10_spill] sm:$0xff] %v10931_v37  ;;  %v2767_v19 = vadd.f32 %v2703_v7, %v14258_v58  ;;  %v2715_v1 = vsel %vm6771_vm2, %v14260_v3, %v14259_v50  ;;  %v2996_v25 = vadd.f32 1e-05, %v2932_v17  ;;  %v2903_v18 = vsub.f32 %v2839_v8, %v10515_v54  ;;  %v14265_v8 = vld [vmem:[#allocation70_spill] sm:$0xff]  ;;  %v14271_v53 = vld [vmem:[#allocation183_spill] sm:$0xff] }
 0x804   : > { %14256 = vst [vmem:[#allocation132_spill] sm:$0xff] %v10935_v46  ;;  %3784 = vrot.lane.b32.xlu0 %v10114_v33, %s4945_s8  ;;  %v10945_v32 = vpop.permute.xlu1 %3670  ;;  %v2778_v7 = vadd.f32 %v2714_v0, %v14263_v29  ;;  %v10953_v36 = vmul.f32 %v10918_v11, %v10918_v11  ;;  %v10957_v3 = vmul.f32 %v10924_v56, %v10924_v56  ;;  %4751 = vrsqrt.f32 %v2994_v23  ;;  %v14266_v29 = vld [vmem:[#allocation244_spill] sm:$0xff]  ;;  %v14274_v48 = vld [vmem:[#allocation246_spill] sm:$0xff]  ;;  %v14296_v37 = vld [vmem:[#allocation193_spill] sm:$0xff] }
 0x805   : > { %14261 = vst [vmem:[#allocation190_spill] sm:$0xff] %v10945_v32  ;;  %v2840_v42 = vmul.f32 0.25, %v2776_v31  ;;  %v4748_v17 = vpop.eup %4747  ;;  %v2997_v50 = vadd.f32 1e-05, %v2933_v45  ;;  %v2841_v54 = vmul.f32 0.25, %v2777_v49  ;;  %v2779_v0 = vadd.f32 %v2715_v1, %v14265_v8  ;;  %v14270_v8 = vld [vmem:[#allocation245_spill] sm:$0xff] }
 0x806   : > { %v10959_v58 = vpop.permute.xlu0 %3672  ;;  %3786 = vrot.lane.b32.xlu1 %v10122_v38, %s4945_s8  ;;  %v2716_v11 = vsel %vm6771_vm2, %v14267_v13, %v14266_v29  ;;  %v10970_v56 = vmul.f32 %v10935_v46, %v10935_v46  ;;  %v10972_v31 = vmul.f32 0.25, %v2767_v19  ;;  %4753 = vrsqrt.f32 %v2995_v12  ;;  %v14292_v32 = vld [vmem:[#allocation192_spill] sm:$0xff] }
 0x807   : > { %14264 = vst [vmem:[#allocation188_spill] sm:$0xff] %v10959_v58  ;;  %v2998_v23 = vadd.f32 1e-05, %v2934_v10  ;;  %4755 = vrsqrt.f32 %v2996_v25  ;;  %v2935_v49 = vmax.f32 %v2903_v18, 0.0  ;;  %v2842_v1 = vmul.f32 0.25, %v2778_v7  ;;  %v14273_v10 = vld [vmem:[#allocation131_spill] sm:$0xff] }
 0x808   : > { %14268 = vst [vmem:[#allocation26_spill] sm:$0xff] %v10972_v31  ;;  %3788 = vrot.lane.b32.xlu0 %v10130_v51, %s4945_s8  ;;  %v10976_v45 = vpop.permute.xlu1 %3674  ;;  %v2717_v13 = vsel %vm6771_vm2, %v14271_v53, %v14270_v8  ;;  %v14272_v29 = vsub.f32 %v14090_v41, %v10428_v30  ;;  %v2904_v12 = vsub.f32 %v2840_v42, %v10589_v15  ;;  %v14275_v58 = vld [vmem:[#allocation180_spill] sm:$0xff]  ;;  %4757 = vrsqrt.f32 %v2997_v50  ;;  %v14277_v30 = vld [vmem:[#allocation247_spill] sm:$0xff]  ;;  %v14278_v41 = vld [vmem:[#allocation181_spill] sm:$0xff] }
 0x809   : > { %14269 = vst [vmem:[#allocation191_spill] sm:$0xff] %v10976_v45  ;;  %v2780_v46 = vadd.f32 %v2716_v11, %v14273_v10  ;;  %v2718_v25 = vsel %vm6771_vm2, %v14275_v58, %v14274_v48  ;;  %v2905_v53 = vsub.f32 %v2841_v54, %v10602_v4  ;;  %v2843_v7 = vmul.f32 0.25, %v2779_v0  ;;  %v14279_v48 = vld [vmem:[#allocation18_spill] sm:$0xff]  ;;  %v14280_v58 = vld [vmem:[#allocation248_spill] sm:$0xff]  ;;  %v4750_v0 = vpop.eup %4749 }
 0x80a   : > { %v3056_v19 = vmul.f32 %v4748_v17, %v14272_v29  ;;  %v10991_v18 = vpop.permute.xlu0 %3676  ;;  %3790 = vrot.lane.b32.xlu1 %v10138_v2, %s4945_s8  ;;  %v2719_v15 = vsel %vm6771_vm2, %v14278_v41, %v14277_v30  ;;  %v11002_v11 = vmul.f32 %v10972_v31, %v10972_v31  ;;  %4759 = vrsqrt.f32 %v2998_v23  ;;  %v14281_v17 = vld [vmem:[#allocation194_spill] sm:$0xff]  ;;  %v14284_v10 = vld [vmem:[#allocation124_spill] sm:$0xff]  ;;  %v14285_v41 = vld [vmem:[#allocation249_spill] sm:$0xff] }
 0x80b   : > { %14276 = vst [vmem:[#allocation189_spill] sm:$0xff] %v10991_v18  ;;  %v2781_v42 = vadd.f32 %v2717_v13, %v14279_v48  ;;  %v2720_v50 = vsel %vm6771_vm2, %v14281_v17, %v14280_v58  ;;  %v14282_v4 = vld [vmem:[#allocation318_spill] sm:$0xff]  ;;  %v2999_v8 = vadd.f32 1e-05, %v2935_v49  ;;  %v2906_v29 = vsub.f32 %v2842_v1, %v10567_v43  ;;  %v14286_v23 = vld [vmem:[#allocation195_spill] sm:$0xff] }
 0x80c   : > { %3792 = vrot.lane.b32.xlu0 %v14282_v4, %s4945_s8  ;;  %v11011_v54 = vpop.permute.xlu1 %3678  ;;  %v2782_v30 = vadd.f32 %v2718_v25, %v14284_v10  ;;  %v2721_v13 = vsel %vm6771_vm2, %v14286_v23, %v14285_v41  ;;  %v3092_v48 = vmul.f32 %v10624_v63, %v3056_v19  ;;  %v2936_v31 = vmax.f32 %v2904_v12, 0.0  ;;  %v14287_v17 = vld [vmem:[#allocation14_spill] sm:$0xff]  ;;  %v14294_v23 = vld [vmem:[#allocation119_spill] sm:$0xff] }
 0x80d   : > { %14283 = vst [vmem:[#allocation95_spill] sm:$0xff] %v11011_v54  ;;  %v2844_v58 = vmul.f32 0.25, %v2780_v46  ;;  %v2783_v18 = vadd.f32 %v2719_v15, %v14287_v17  ;;  %v14289_v54 = vld [vmem:[#allocation319_spill] sm:$0xff]  ;;  %v2937_v49 = vmax.f32 %v2905_v53, 0.0  ;;  %v2907_v43 = vsub.f32 %v2843_v7, %v10578_v27  ;;  %v14290_v1 = vld [vmem:[#allocation134_spill] sm:$0xff]  ;;  %v14297_v53 = vld [vmem:[#allocation320_spill] sm:$0xff] }
 0x80e   : > { %v11021_v45 = vpop.permute.xlu0 %3680  ;;  %3794 = vrot.lane.b32.xlu1 %v14289_v54, %s4945_s8  ;;  %v2784_v25 = vadd.f32 %v2720_v50, %v14290_v1  ;;  %v14291_v10 = vld [vmem:[#allocation250_spill] sm:$0xff]  ;;  %v4752_v19 = vpop.eup %4751  ;;  %v14293_v46 = vsub.f32 %v14091_v62, %v10444_v44  ;;  %v2845_v15 = vmul.f32 0.25, %v2781_v42  ;;  %v2785_v17 = vadd.f32 %v2721_v13, %v14294_v23  ;;  %v14299_v1 = vld [vmem:[#allocation252_spill] sm:$0xff]  ;;  %v14303_v23 = vld [vmem:[#allocation321_spill] sm:$0xff] }
 0x80f   : > { %14288 = vst [vmem:[#allocation200_spill] sm:$0xff] %v11021_v45  ;;  %v2722_v41 = vsel %vm6771_vm2, %v14292_v32, %v14291_v10  ;;  %v14295_v45 = vld [vmem:[#allocation251_spill] sm:$0xff]  ;;  %4761 = vrsqrt.f32 %v2999_v8  ;;  %v2938_v32 = vmax.f32 %v2906_v29, 0.0  ;;  %v2846_v50 = vmul.f32 0.25, %v2782_v30  ;;  %v14300_v10 = vld [vmem:[#allocation204_spill] sm:$0xff] }
 0x810   : > { %v3057_v12 = vmul.f32 %v4750_v0, %v14293_v46  ;;  %v2723_v27 = vsel %vm6771_vm2, %v14296_v37, %v14295_v45  ;;  %3796 = vrot.lane.b32.xlu0 %v14297_v53, %s4945_s8  ;;  %v11041_v7 = vpop.permute.xlu1 %3682  ;;  %v2724_v44 = vsel %vm6771_vm2, %v14300_v10, %v14299_v1  ;;  %v4754_v62 = vpop.eup %4753  ;;  %v3000_v42 = vadd.f32 1e-05, %v2936_v31  ;;  %v14301_v46 = vld [vmem:[#allocation100_spill] sm:$0xff]  ;;  %v14304_v53 = vld [vmem:[#allocation21_spill] sm:$0xff] }
 0x811   : > { %14298 = vst [vmem:[#allocation198_spill] sm:$0xff] %v11041_v7  ;;  %v2908_v0 = vsub.f32 %v2844_v58, %v10672_v35  ;;  %v2847_v13 = vmul.f32 0.25, %v2783_v18  ;;  %v2786_v37 = vadd.f32 %v2722_v41, %v14301_v46  ;;  %v4756_v8 = vpop.eup %4755  ;;  %v3001_v29 = vadd.f32 1e-05, %v2937_v49  ;;  %v14305_v31 = vld [vmem:[#allocation49_spill] sm:$0xff]  ;;  %v14308_v41 = vld [vmem:[#allocation322_spill] sm:$0xff] }
 0x812   : > { %v11049_v45 = vpop.permute.xlu0 %3684  ;;  %3798 = vrot.lane.b32.xlu1 %v14303_v23, %s4945_s8  ;;  %v2939_v30 = vmax.f32 %v2907_v43, 0.0  ;;  %v2848_v7 = vmul.f32 0.25, %v2784_v25  ;;  %v2787_v54 = vadd.f32 %v2723_v27, %v14304_v53  ;;  %v2909_v1 = vsub.f32 %v2845_v15, %v10680_v26  ;;  %v14306_v35 = vld [vmem:[#allocation253_spill] sm:$0xff]  ;;  %v11064_v49 = vpop.eup %4757  ;;  %v14412_v23 = vld [vmem:[#allocation267_spill] sm:$0xff] }
 0x813   : > { %14302 = vst [vmem:[#allocation232_spill] sm:$0xff] %v11049_v45  ;;  %v2849_v10 = vmul.f32 0.25, %v2785_v17  ;;  %v2788_v4 = vadd.f32 %v2724_v44, %v14305_v31  ;;  %v14307_v18 = vld [vmem:[#allocation205_spill] sm:$0xff]  ;;  %v11067_v43 = vadd.f32 %v10653_v9, %v3092_v48  ;;  %v14310_v26 = vsub.f32 %v14076_v22, %v10406_v20  ;;  %v14314_v22 = vld [vmem:[#allocation99_spill] sm:$0xff] }
 0x814   : > { %v2725_v58 = vsel %vm6771_vm2, %v14307_v18, %v14306_v35  ;;  %3800 = vrot.lane.b32.xlu0 %v14308_v41, %s4945_s8  ;;  %v11062_v46 = vpop.permute.xlu1 %3686  ;;  %v3002_v15 = vadd.f32 1e-05, %v2938_v32  ;;  %v2910_v17 = vsub.f32 %v2846_v50, %v10643_v60  ;;  %v11073_v27 = vpop.eup %4759  ;;  %4763 = vrsqrt.f32 %v3000_v42  ;;  %v14312_v18 = vld [vmem:[#allocation323_spill] sm:$0xff]  ;;  %v14315_v42 = vld [vmem:[#allocation324_spill] sm:$0xff]  ;;  %v14398_v41 = vld [vmem:[#allocation102_spill] sm:$0xff] }
 0x815   : > { %14309 = vst [vmem:[#allocation106_spill] sm:$0xff] %v11062_v46  ;;  %v3058_v25 = vmul.f32 %v4752_v19, %v14310_v26  ;;  %v2940_v53 = vmax.f32 %v2908_v0, 0.0  ;;  %v2911_v44 = vsub.f32 %v2847_v13, %v10659_v47  ;;  %v2850_v31 = vmul.f32 0.25, %v2786_v37  ;;  %v14313_v46 = vld [vmem:[#allocation127_spill] sm:$0xff]  ;;  %v14317_v13 = vld [vmem:[#allocation117_spill] sm:$0xff]  ;;  %v14318_v37 = vld [vmem:[#allocation158_spill] sm:$0xff] }
 0x816   : > { %v11076_v35 = vpop.permute.xlu0 %3688  ;;  %3802 = vrot.lane.b32.xlu1 %v14312_v18, %s4945_s8  ;;  %v3003_v48 = vadd.f32 1e-05, %v2939_v30  ;;  %v2912_v45 = vsub.f32 %v2848_v7, %v14313_v46  ;;  %v2851_v20 = vmul.f32 0.25, %v2787_v54  ;;  %v2789_v19 = vadd.f32 %v2725_v58, %v14314_v22  ;;  %v14321_v46 = vld [vmem:[#allocation255_spill] sm:$0xff]  ;;  %v14324_v22 = vld [vmem:[#allocation325_spill] sm:$0xff] }
 0x817   : > { %14311 = vst [vmem:[#allocation201_spill] sm:$0xff] %v11076_v35  ;;  %4765 = vrsqrt.f32 %v3001_v29  ;;  %v2941_v60 = vmax.f32 %v2909_v1, 0.0  ;;  %v2913_v32 = vsub.f32 %v2849_v10, %v10752_v28  ;;  %v2852_v50 = vmul.f32 0.25, %v2788_v4  ;;  %v14320_v29 = vld [vmem:[#allocation164_spill] sm:$0xff]  ;;  %v14322_v28 = vld [vmem:[#allocation202_spill] sm:$0xff]  ;;  %v14337_v35 = vld [vmem:[#allocation259_spill] sm:$0xff] }
 0x818   : > { %3804 = vrot.lane.b32.xlu0 %v14315_v42, %s4945_s8  ;;  %v11085_v47 = vpop.permute.xlu1 %3690  ;;  %v3093_v0 = vmul.f32 %v10624_v63, %v3057_v12  ;;  %v14319_v30 = vsub.f32 %v14317_v13, %v14318_v37  ;;  %4767 = vrsqrt.f32 %v3002_v15  ;;  %v2942_v54 = vmax.f32 %v2910_v17, 0.0 }
 0x819   : > { %14316 = vst [vmem:[#allocation199_spill] sm:$0xff] %v11085_v47  ;;  %v3004_v7 = vadd.f32 1e-05, %v2940_v53  ;;  %v2943_v58 = vmax.f32 %v2911_v44, 0.0  ;;  %v2914_v1 = vsub.f32 %v2850_v31, %v14320_v29  ;;  %v2726_v4 = vsel %vm6771_vm2, %v14322_v28, %v14321_v46  ;;  %v4762_v12 = vpop.eup %4761  ;;  %v14330_v47 = vld [vmem:[#allocation203_spill] sm:$0xff] }
 0x81a   : > { %v3059_v26 = vmul.f32 %v4754_v62, %v14319_v30  ;;  %v11096_v10 = vpop.permute.xlu0 %3692  ;;  %3806 = vrot.lane.b32.xlu1 %v14324_v22, %s4945_s8  ;;  %4769 = vrsqrt.f32 %v3003_v48  ;;  %v2944_v13 = vmax.f32 %v2912_v45, 0.0  ;;  %v14325_v62 = vld [vmem:[#allocation86_spill] sm:$0xff]  ;;  %v2853_v17 = vmul.f32 0.25, %v2789_v19  ;;  %v14329_v45 = vld [vmem:[#allocation257_spill] sm:$0xff]  ;;  %v14332_v19 = vld [vmem:[#allocation155_spill] sm:$0xff] }
 0x81b   : > { %14323 = vst [vmem:[#allocation101_spill] sm:$0xff] %v11096_v10  ;;  %v2915_v15 = vsub.f32 %v2851_v20, %v14325_v62  ;;  %v3094_v53 = vmul.f32 %v10624_v63, %v3058_v25  ;;  %v3005_v44 = vadd.f32 1e-05, %v2941_v60  ;;  %v2945_v31 = vmax.f32 %v2913_v32, 0.0  ;;  %v14326_v30 = vld [vmem:[#allocation326_spill] sm:$0xff]  ;;  %v14328_v10 = vld [vmem:[#allocation156_spill] sm:$0xff] }
 0x81c   : > { %v2916_v37 = vsub.f32 %v2852_v50, %v10764_v55  ;;  %3808 = vrot.lane.b32.xlu0 %v14326_v30, %s4945_s8  ;;  %v11105_v29 = vpop.permute.xlu1 %3694  ;;  %v3095_v46 = vmul.f32 %v10624_v63, %v3059_v26  ;;  %v3006_v28 = vadd.f32 1e-05, %v2942_v54  ;;  %v2790_v48 = vadd.f32 %v2726_v4, %v14328_v10  ;;  %v14331_v25 = vld [vmem:[#allocation79_spill] sm:$0xff]  ;;  %v14336_v4 = vld [vmem:[#allocation174_spill] sm:$0xff]  ;;  %v14338_v30 = vld [vmem:[#allocation212_spill] sm:$0xff] }
 0x81d   : > { %14327 = vst [vmem:[#allocation121_spill] sm:$0xff] %v11105_v29  ;;  %v2727_v20 = vsel %vm6771_vm2, %v14330_v47, %v14329_v45  ;;  %v14333_v60 = vsub.f32 %v14331_v25, %v14332_v19  ;;  %4771 = vrsqrt.f32 %v3004_v7  ;;  %v3007_v55 = vadd.f32 1e-05, %v2943_v58  ;;  %v14335_v29 = vld [vmem:[#allocation327_spill] sm:$0xff]  ;;  %v14339_v58 = vld [vmem:[#allocation88_spill] sm:$0xff] }
 0x81e   : > { %v2946_v50 = vmax.f32 %v2914_v1, 0.0  ;;  %v11116_v62 = vpop.permute.xlu0 %3696  ;;  %3810 = vrot.lane.b32.xlu1 %v14335_v29, %s4945_s8  ;;  %v3008_v26 = vadd.f32 1e-05, %v2944_v13  ;;  %v2947_v54 = vmax.f32 %v2915_v15, 0.0  ;;  %v2917_v10 = vsub.f32 %v2853_v17, %v14336_v4  ;;  %v4764_v45 = vpop.eup %4763  ;;  %v14340_v25 = vld [vmem:[#allocation328_spill] sm:$0xff]  ;;  %v14362_v29 = vld [vmem:[#allocation45_spill] sm:$0xff] }
 0x81f   : > { %v3060_v32 = vmul.f32 %v4756_v8, %v14333_v60  ;;  %14334 = vst [vmem:[#allocation114_spill] sm:$0xff] %v11116_v62  ;;  %v2728_v47 = vsel %vm6771_vm2, %v14338_v30, %v14337_v35  ;;  %4773 = vrsqrt.f32 %v3005_v44  ;;  %v3009_v8 = vadd.f32 1e-05, %v2945_v31  ;;  %v14347_v60 = vld [vmem:[#allocation254_spill] sm:$0xff]  ;;  %v14355_v62 = vld [vmem:[#allocation97_spill] sm:$0xff] }
 0x820   : > { %v2948_v7 = vmax.f32 %v2916_v37, 0.0  ;;  %v2791_v1 = vadd.f32 %v2727_v20, %v14339_v58  ;;  %3812 = vrot.lane.b32.xlu0 %v14340_v25, %s4945_s8  ;;  %v11128_v19 = vpop.permute.xlu1 %3698  ;;  %v11131_v13 = vadd.f32 %v10653_v9, %v3093_v0  ;;  %v11134_v15 = vadd.f32 %v10653_v9, %v3094_v53  ;;  %v14345_v37 = vld [vmem:[#allocation122_spill] sm:$0xff]  ;;  %v14348_v58 = vld [vmem:[#allocation261_spill] sm:$0xff] }
 0x821   : > { %14341 = vst [vmem:[#allocation39_spill] sm:$0xff] %v11128_v19  ;;  %4775 = vrsqrt.f32 %v3006_v28  ;;  %v2854_v17 = vmul.f32 0.25, %v2790_v48  ;;  %v4766_v35 = vpop.eup %4765  ;;  %v11137_v44 = vadd.f32 %v10653_v9, %v3095_v46  ;;  %v3010_v31 = vadd.f32 1e-05, %v2946_v50  ;;  %v14349_v28 = vld [vmem:[#allocation213_spill] sm:$0xff]  ;;  %v14352_v19 = vld [vmem:[#allocation144_spill] sm:$0xff] }
 0x822   : > { %14342 = vst [vmem:[#allocation222_spill] sm:$0xff] %v11131_v13  ;;  %14343 = vst [vmem:[#allocation196_spill] sm:$0xff] %v11134_v15  ;;  %4777 = vrsqrt.f32 %v3007_v55  ;;  %v2792_v30 = vadd.f32 %v2728_v47, %v14345_v37  ;;  %v11140_v20 = vpop.permute.xlu0 %3700  ;;  %3814 = vrot.lane.b32.xlu1 %v14347_v60, %s4945_s8  ;;  %v4768_v0 = vpop.eup %4767  ;;  %v3011_v4 = vadd.f32 1e-05, %v2947_v54  ;;  %v2949_v53 = vmax.f32 %v2917_v10, 0.0  ;;  %v14350_v47 = vld [vmem:[#allocation329_spill] sm:$0xff] }
 0x823   : > { %14344 = vst [vmem:[#allocation223_spill] sm:$0xff] %v11137_v44  ;;  %14346 = vst [vmem:[#allocation197_spill] sm:$0xff] %v11140_v20  ;;  %4779 = vrsqrt.f32 %v3008_v26  ;;  %v2729_v48 = vsel %vm6771_vm2, %v14349_v28, %v14348_v58  ;;  %v3096_v46 = vmul.f32 %v10624_v63, %v3060_v32  ;;  %v3012_v55 = vadd.f32 1e-05, %v2948_v7  ;;  %v14353_v26 = vld [vmem:[#allocation63_spill] sm:$0xff]  ;;  %v14356_v60 = vld [vmem:[#allocation77_spill] sm:$0xff] }
 0x824   : > { %4781 = vrsqrt.f32 %v3009_v8  ;;  %v2855_v50 = vmul.f32 0.25, %v2791_v1  ;;  %3816 = vrot.lane.b32.xlu0 %v14350_v47, %s4945_s8  ;;  %v11151_v37 = vpop.permute.xlu1 %3702  ;;  %v4770_v20 = vpop.eup %4769  ;;  %v14354_v54 = vsub.f32 %v14352_v19, %v14353_v26  ;;  %v14357_v25 = vsub.f32 %v14355_v62, %v14356_v60  ;;  %v14358_v32 = vld [vmem:[#allocation135_spill] sm:$0xff]  ;;  %v14359_v8 = vld [vmem:[#allocation116_spill] sm:$0xff] }
 0x825   : > { %14351 = vst [vmem:[#allocation233_spill] sm:$0xff] %v11151_v37  ;;  %v14360_v7 = vsub.f32 %v14358_v32, %v14359_v8  ;;  %v2918_v28 = vsub.f32 %v2854_v17, %v10820_v57  ;;  %v14361_v47 = vld [vmem:[#allocation136_spill] sm:$0xff]  ;;  %4783 = vrsqrt.f32 %v3010_v31  ;;  %v2856_v42 = vmul.f32 0.25, %v2792_v30  ;;  %v14369_v57 = vld [vmem:[#allocation263_spill] sm:$0xff]  ;;  %v14370_v17 = vld [vmem:[#allocation210_spill] sm:$0xff] }
 0x826   : > { %v3061_v10 = vmul.f32 %v11064_v49, %v14354_v54  ;;  %v3062_v58 = vmul.f32 %v11073_v27, %v14357_v25  ;;  %v14363_v37 = vsub.f32 %v14361_v47, %v14362_v29  ;;  %v14364_v19 = vld [vmem:[#allocation80_spill] sm:$0xff]  ;;  %v11169_v49 = vpop.permute.xlu0 %3704  ;;  %v14366_v27 = vld [vmem:[#allocation22_spill] sm:$0xff]  ;;  %v14367_v25 = vld [vmem:[#allocation157_spill] sm:$0xff]  ;;  %4785 = vrsqrt.f32 %v3011_v4 }
 0x827   : > { %v3063_v1 = vmul.f32 %v4762_v12, %v14360_v7  ;;  %v2793_v26 = vadd.f32 %v2729_v48, %v14364_v19  ;;  %v14365_v62 = vld [vmem:[#allocation256_spill] sm:$0xff]  ;;  %v14368_v60 = vsub.f32 %v14366_v27, %v14367_v25  ;;  %v3013_v12 = vadd.f32 1e-05, %v2949_v53  ;;  %v14371_v31 = vld [vmem:[#allocation81_spill] sm:$0xff] }
 0x828   : > { %v3064_v22 = vmul.f32 %v4764_v45, %v14363_v37  ;;  %3818 = vrot.lane.b32.xlu1 %v14365_v62, %s4945_s8  ;;  %v2730_v29 = vsel %vm6771_vm2, %v14370_v17, %v14369_v57  ;;  %v4772_v45 = vpop.eup %4771  ;;  %v14372_v30 = vld [vmem:[#allocation92_spill] sm:$0xff]  ;;  %v14374_v37 = vld [vmem:[#allocation138_spill] sm:$0xff]  ;;  %4787 = vrsqrt.f32 %v3012_v55  ;;  %v2919_v19 = vsub.f32 %v2855_v50, %v10831_v40  ;;  %v11189_v4 = vpop.permute.xlu1 %3706  ;;  %v14378_v17 = vld [vmem:[#allocation115_spill] sm:$0xff] }
 0x829   : > { %v3065_v54 = vmul.f32 %v4766_v35, %v14368_v60  ;;  %v14373_v48 = vsub.f32 %v14371_v31, %v14372_v30  ;;  %v14375_v32 = vld [vmem:[#allocation76_spill] sm:$0xff]  ;;  %v14377_v35 = vld [vmem:[#allocation330_spill] sm:$0xff]  ;;  %v3097_v53 = vmul.f32 %v10624_v63, %v3061_v10  ;;  %v3098_v27 = vmul.f32 %v10624_v63, %v3062_v58  ;;  %v14379_v31 = vld [vmem:[#allocation331_spill] sm:$0xff] }
 0x82a   : > { %v14376_v8 = vsub.f32 %v14374_v37, %v14375_v32  ;;  %3820 = vrot.lane.b32.xlu0 %v14377_v35, %s4945_s8  ;;  %v3099_v25 = vmul.f32 %v10624_v63, %v3063_v1  ;;  %v2950_v60 = vmax.f32 %v2918_v28, 0.0  ;;  %v3100_v57 = vmul.f32 %v10624_v63, %v3064_v22  ;;  %v11197_v50 = vpop.permute.xlu0 %3708  ;;  %v14381_v1 = vld [vmem:[#allocation96_spill] sm:$0xff]  ;;  %v14382_v28 = vld [vmem:[#allocation133_spill] sm:$0xff]  ;;  %v14385_v32 = vld [vmem:[#allocation211_spill] sm:$0xff] }
 0x82b   : > { %v3066_v47 = vmul.f32 %v4768_v0, %v14373_v48  ;;  %v4774_v0 = vpop.eup %4773  ;;  %v2857_v55 = vmul.f32 0.25, %v2793_v26  ;;  %v2794_v40 = vadd.f32 %v2730_v29, %v14378_v17  ;;  %v11202_v10 = vadd.f32 %v10653_v9, %v3096_v46  ;;  %v14384_v37 = vld [vmem:[#allocation265_spill] sm:$0xff]  ;;  %v14386_v46 = vld [vmem:[#allocation332_spill] sm:$0xff] }
 0x82c   : > { %v3067_v7 = vmul.f32 %v4770_v20, %v14376_v8  ;;  %v2920_v20 = vsub.f32 %v2856_v42, %v10839_v59  ;;  %3822 = vrot.lane.b32.xlu1 %v14379_v31, %s4945_s8  ;;  %v4776_v30 = vpop.eup %4775  ;;  %v3101_v58 = vmul.f32 %v10624_v63, %v3065_v54  ;;  %v14383_v48 = vsub.f32 %v14381_v1, %v14382_v28  ;;  %v11216_v54 = vpop.permute.xlu1 %3710  ;;  %v14393_v31 = vld [vmem:[#allocation37_spill] sm:$0xff] }
 0x82d   : > { %14380 = vst [vmem:[#allocation140_spill] sm:$0xff] %v11202_v10  ;;  %4789 = vrsqrt.f32 %v3013_v12  ;;  %v4778_v59 = vpop.eup %4777  ;;  %v3102_v42 = vmul.f32 %v10624_v63, %v3066_v47  ;;  %v2951_v29 = vmax.f32 %v2919_v19, 0.0  ;;  %v2731_v8 = vsel %vm6771_vm2, %v14385_v32, %v14384_v37  ;;  %v14396_v62 = vld [vmem:[#allocation33_spill] sm:$0xff] }
 0x82e   : > { %v3068_v22 = vmul.f32 %v4772_v45, %v14383_v48  ;;  %v3103_v26 = vmul.f32 %v10624_v63, %v3067_v7  ;;  %3824 = vrot.lane.b32.xlu0 %v14386_v46, %s4945_s8  ;;  %v4780_v17 = vpop.eup %4779  ;;  %v11219_v45 = vadd.f32 %v10653_v9, %v3097_v53  ;;  %v11222_v12 = vadd.f32 %v10653_v9, %v3098_v27  ;;  %v11231_v32 = vpop.permute.xlu0 %3712  ;;  %v14391_v53 = vld [vmem:[#allocation333_spill] sm:$0xff]  ;;  %v14392_v46 = vld [vmem:[#allocation90_spill] sm:$0xff] }
 0x82f   : > { %v11225_v47 = vadd.f32 %v10653_v9, %v3099_v25  ;;  %v3014_v7 = vadd.f32 1e-05, %v2950_v60  ;;  %v4782_v19 = vpop.eup %4781  ;;  %v11228_v1 = vadd.f32 %v10653_v9, %v3100_v57  ;;  %v2952_v28 = vmax.f32 %v2920_v20, 0.0  ;;  %v14395_v60 = vld [vmem:[#allocation94_spill] sm:$0xff] }
 0x830   : > { %14387 = vst [vmem:[#allocation224_spill] sm:$0xff] %v11219_v45  ;;  %14388 = vst [vmem:[#allocation208_spill] sm:$0xff] %v11222_v12  ;;  %v2921_v48 = vsub.f32 %v2857_v55, %v10851_v61  ;;  %v2858_v37 = vmul.f32 0.25, %v2794_v40  ;;  %3826 = vrot.lane.b32.xlu1 %v14391_v53, %s4945_s8  ;;  %v3104_v27 = vmul.f32 %v10624_v63, %v3068_v22  ;;  %v3015_v22 = vadd.f32 1e-05, %v2951_v29  ;;  %v14410_v53 = vld [vmem:[#allocation167_spill] sm:$0xff] }
 0x831   : > { %14389 = vst [vmem:[#allocation225_spill] sm:$0xff] %v11225_v47  ;;  %14390 = vst [vmem:[#allocation209_spill] sm:$0xff] %v11228_v1  ;;  %v14394_v25 = vsub.f32 %v14392_v46, %v14393_v31  ;;  %v14397_v18 = vsub.f32 %v14395_v60, %v14396_v62  ;;  %v2795_v20 = vadd.f32 %v2731_v8, %v14398_v41  ;;  %v4784_v1 = vpop.eup %4783  ;;  %v14402_v31 = vld [vmem:[#allocation334_spill] sm:$0xff]  ;;  %v14406_v46 = vld [vmem:[#allocation64_spill] sm:$0xff]  ;;  %4791 = vrsqrt.f32 %v3014_v7 }
 0x832   : > { %v11244_v61 = vadd.f32 %v10653_v9, %v3101_v58  ;;  %v11247_v55 = vadd.f32 %v10653_v9, %v3102_v42  ;;  %v11250_v40 = vadd.f32 %v10653_v9, %v3103_v26  ;;  %3828 = vrot.lane.b32.xlu0 %v14402_v31, %s4945_s8  ;;  %v4786_v62 = vpop.eup %4785  ;;  %v14407_v58 = vld [vmem:[#allocation56_spill] sm:$0xff]  ;;  %v2922_v31 = vsub.f32 %v2858_v37, %v10890_v34  ;;  %v14417_v34 = vld [vmem:[#allocation159_spill] sm:$0xff] }
 0x833   : > { %v3069_v35 = vmul.f32 %v4774_v0, %v14394_v25  ;;  %v3070_v57 = vmul.f32 %v4776_v30, %v14397_v18  ;;  %v11254_v0 = vpop.permute.xlu1 %3714  ;;  %v14403_v18 = vld [vmem:[#allocation139_spill] sm:$0xff]  ;;  %v14404_v30 = vld [vmem:[#allocation108_spill] sm:$0xff]  ;;  %v14408_v25 = vsub.f32 %v14406_v46, %v14407_v58  ;;  %v4788_v29 = vpop.eup %4787  ;;  %4793 = vrsqrt.f32 %v3015_v22  ;;  %v14422_v46 = vld [vmem:[#allocation270_spill] sm:$0xff] }
 0x834   : > { %14399 = vst [vmem:[#allocation13_spill] sm:$0xff] %v11244_v61  ;;  %14400 = vst [vmem:[#allocation142_spill] sm:$0xff] %v11247_v55  ;;  %v14405_v41 = vsub.f32 %v14403_v18, %v14404_v30  ;;  %v14409_v42 = vld [vmem:[#allocation104_spill] sm:$0xff]  ;;  %v2953_v61 = vmax.f32 %v2921_v48, 0.0  ;;  %v14414_v30 = vld [vmem:[#allocation335_spill] sm:$0xff] }
 0x835   : > { %14401 = vst [vmem:[#allocation52_spill] sm:$0xff] %v11250_v40  ;;  %v3072_v60 = vmul.f32 %v4780_v17, %v14408_v25  ;;  %v14411_v55 = vsub.f32 %v14409_v42, %v14410_v53  ;;  %v3016_v40 = vadd.f32 1e-05, %v2952_v28  ;;  %v14413_v47 = vld [vmem:[#allocation220_spill] sm:$0xff]  ;;  %3830 = vrot.lane.b32.xlu1 %v14414_v30, %s4945_s8  ;;  %v11275_v17 = vadd.f32 %v10653_v9, %v3104_v27  ;;  %v14416_v48 = vld [vmem:[#allocation145_spill] sm:$0xff]  ;;  %v14442_v30 = vld [vmem:[#allocation338_spill] sm:$0xff] }
 0x836   : > { %v3071_v8 = vmul.f32 %v4778_v59, %v14405_v41  ;;  %v2732_v18 = vsel %vm6771_vm2, %v14413_v47, %v14412_v23  ;;  %v11270_v59 = vpop.permute.xlu0 %3716  ;;  %v3105_v7 = vmul.f32 %v10624_v63, %v3069_v35  ;;  %v2859_v28 = vmul.f32 0.25, %v2795_v20  ;;  %v14420_v41 = vld [vmem:[#allocation160_spill] sm:$0xff]  ;;  %v14423_v58 = vld [vmem:[#allocation221_spill] sm:$0xff] }
 0x837   : > { %v3073_v26 = vmul.f32 %v4782_v19, %v14411_v55  ;;  %14415 = vst [vmem:[#allocation234_spill] sm:$0xff] %v11275_v17  ;;  %v3106_v19 = vmul.f32 %v10624_v63, %v3070_v57  ;;  %v14418_v37 = vsub.f32 %v14416_v48, %v14417_v34  ;;  %v14419_v55 = vld [vmem:[#allocation146_spill] sm:$0xff]  ;;  %v2733_v27 = vsel %vm6771_vm2, %v14423_v58, %v14422_v46  ;;  %v11289_v25 = vpop.permute.xlu1 %3718  ;;  %v4790_v35 = vpop.eup %4789  ;;  %v14424_v42 = vld [vmem:[#allocation149_spill] sm:$0xff] }
 0x838   : > { %v14421_v23 = vsub.f32 %v14419_v55, %v14420_v41  ;;  %v3107_v57 = vmul.f32 %v10624_v63, %v3071_v8  ;;  %v3108_v20 = vmul.f32 %v10624_v63, %v3072_v60  ;;  %v14425_v48 = vld [vmem:[#allocation66_spill] sm:$0xff]  ;;  %4795 = vrsqrt.f32 %v3016_v40  ;;  %v14432_v40 = vld [vmem:[#allocation128_spill] sm:$0xff] }
 0x839   : > { %v3074_v53 = vmul.f32 %v4784_v1, %v14418_v37  ;;  %v14426_v1 = vsub.f32 %v14424_v42, %v14425_v48  ;;  %v14427_v37 = vld [vmem:[#allocation47_spill] sm:$0xff]  ;;  %v3109_v22 = vmul.f32 %v10624_v63, %v3073_v26  ;;  %v2954_v41 = vmax.f32 %v2922_v31, 0.0  ;;  %v14430_v58 = vld [vmem:[#allocation162_spill] sm:$0xff] }
 0x83a   : > { %v3075_v47 = vmul.f32 %v4786_v62, %v14421_v23  ;;  %v2796_v55 = vadd.f32 %v2732_v18, %v14427_v37  ;;  %v3017_v62 = vadd.f32 1e-05, %v2953_v61  ;;  %v11298_v23 = vpop.permute.xlu0 %3720  ;;  %v11301_v46 = vadd.f32 %v10653_v9, %v3105_v7  ;;  %v14431_v26 = vld [vmem:[#allocation150_spill] sm:$0xff]  ;;  %v14434_v48 = vld [vmem:[#allocation271_spill] sm:$0xff] }
 0x83b   : > { %v3076_v34 = vmul.f32 %v4788_v29, %v14426_v1  ;;  %v11304_v8 = vadd.f32 %v10653_v9, %v3106_v19  ;;  %v2923_v60 = vsub.f32 %v2859_v28, %v10907_v14  ;;  %v2797_v42 = vadd.f32 %v2733_v27, %v14430_v58  ;;  %v14435_v1 = vld [vmem:[#allocation218_spill] sm:$0xff]  ;;  %v11317_v37 = vpop.permute.xlu1 %3722  ;;  %v14440_v58 = vld [vmem:[#allocation219_spill] sm:$0xff] }
 0x83c   : > { %14428 = vst [vmem:[#allocation83_spill] sm:$0xff] %v11301_v46  ;;  %v3110_v29 = vmul.f32 %v10624_v63, %v3074_v53  ;;  %v3111_v18 = vmul.f32 %v10624_v63, %v3075_v47  ;;  %v14433_v61 = vsub.f32 %v14431_v26, %v14432_v40  ;;  %v2734_v7 = vsel %vm6771_vm2, %v14435_v1, %v14434_v48  ;;  %v14441_v1 = vld [vmem:[#allocation91_spill] sm:$0xff]  ;;  %v14537_v46 = vld [vmem:[#allocation281_spill] sm:$0xff] }
 0x83d   : > { %14429 = vst [vmem:[#allocation141_spill] sm:$0xff] %v11304_v8  ;;  %v11320_v19 = vadd.f32 %v10653_v9, %v3107_v57  ;;  %v11323_v14 = vadd.f32 %v10653_v9, %v3108_v20  ;;  %v3112_v28 = vmul.f32 %v10624_v63, %v3076_v34  ;;  %v2860_v53 = vmul.f32 0.25, %v2796_v55 }
 0x83e   : > { %v3077_v31 = vmul.f32 %v4790_v35, %v14433_v61  ;;  %v11327_v47 = vadd.f32 %v10653_v9, %v3109_v22  ;;  %4797 = vrsqrt.f32 %v3017_v62  ;;  %v3018_v27 = vadd.f32 1e-05, %v2954_v41  ;;  %v14439_v35 = vld [vmem:[#allocation273_spill] sm:$0xff]  ;;  %v3725_v40 = vpop.permute.xlu0 %3724  ;;  %v4792_v61 = vpop.eup %4791 }
 0x83f   : > { %14436 = vst [vmem:[#allocation118_spill] sm:$0xff] %v11320_v19  ;;  %14437 = vst [vmem:[#allocation235_spill] sm:$0xff] %v11323_v14  ;;  %v2735_v26 = vsel %vm6771_vm2, %v14440_v58, %v14439_v35  ;;  %v2955_v57 = vmax.f32 %v2923_v60, 0.0  ;;  %v2861_v48 = vmul.f32 0.25, %v2797_v42  ;;  %v2798_v20 = vadd.f32 %v2734_v7, %v14441_v1  ;;  %v14445_v41 = vld [vmem:[#allocation289_spill] sm:$0xff]  ;;  %v3727_v58 = vpop.permute.xlu1 %3726  ;;  %v14447_v7 = vld [vmem:[#allocation60_spill] sm:$0xff] }
 0x840   : > { %14438 = vst [vmem:[#allocation41_spill] sm:$0xff] %v11327_v47  ;;  %v3842_v34 = vsel %vm6771_vm2, %v14442_v30, %v3725_v40  ;;  %v11338_v55 = vadd.f32 %v10653_v9, %v3110_v29  ;;  %v11341_v22 = vadd.f32 %v10653_v9, %v3111_v18  ;;  %v3113_v62 = vmul.f32 %v10624_v63, %v3077_v31  ;;  %v14448_v47 = vld [vmem:[#allocation274_spill] sm:$0xff]  ;;  %v4794_v29 = vpop.eup %4793  ;;  %v14465_v14 = vld [vmem:[#allocation173_spill] sm:$0xff] }
 0x841   : > { %v3906_v35 = vadd.f32 %v3842_v34, %v14445_v41  ;;  %v11346_v60 = vadd.f32 %v10653_v9, %v3112_v28  ;;  %v2924_v42 = vsub.f32 %v2860_v53, %v10953_v36  ;;  %v2799_v1 = vadd.f32 %v2735_v26, %v14447_v7  ;;  %v14451_v34 = vld [vmem:[#allocation290_spill] sm:$0xff]  ;;  %v14452_v26 = vld [vmem:[#allocation339_spill] sm:$0xff] }
 0x842   : > { %14443 = vst [vmem:[#allocation65_spill] sm:$0xff] %v11338_v55  ;;  %14444 = vst [vmem:[#allocation236_spill] sm:$0xff] %v11341_v22  ;;  %v3843_v30 = vsel %vm6771_vm2, %v14448_v47, %v3727_v58  ;;  %v14449_v18 = vsub.f32 %v14216_v24, %v10777_v52  ;;  %4799 = vrsqrt.f32 %v3018_v27  ;;  %v3729_v28 = vpop.permute.xlu0 %3728  ;;  %v2925_v36 = vsub.f32 %v2861_v48, %v10957_v3  ;;  %v4796_v47 = vpop.eup %4795  ;;  %v14460_v22 = vld [vmem:[#allocation276_spill] sm:$0xff]  ;;  %v14464_v55 = vld [vmem:[#allocation151_spill] sm:$0xff] }
 0x843   : > { %14446 = vst [vmem:[#allocation17_spill] sm:$0xff] %v11346_v60  ;;  %v11356_v31 = vmul.f32 0.25, %v3906_v35  ;;  %v3907_v41 = vadd.f32 %v3843_v30, %v14451_v34  ;;  %v3019_v60 = vadd.f32 1e-05, %v2955_v57  ;;  %v2862_v53 = vmul.f32 0.25, %v2798_v20  ;;  %v3731_v30 = vpop.permute.xlu1 %3730  ;;  %v14457_v57 = vld [vmem:[#allocation105_spill] sm:$0xff] }
 0x844   : > { %v3078_v40 = vmul.f32 %v4792_v61, %v14449_v18  ;;  %v3844_v7 = vsel %vm6771_vm2, %v14452_v26, %v3729_v28  ;;  %v11364_v58 = vadd.f32 %v10653_v9, %v3113_v62  ;;  %v14456_v61 = vld [vmem:[#allocation291_spill] sm:$0xff]  ;;  %v2956_v20 = vmax.f32 %v2924_v42, 0.0  ;;  %v14563_v52 = vld [vmem:[#allocation98_spill] sm:$0xff] }
 0x845   : > { %14450 = vst [vmem:[#allocation226_spill] sm:$0xff] %v11356_v31  ;;  %v11368_v27 = vmul.f32 0.25, %v3907_v41  ;;  %v3908_v35 = vadd.f32 %v3844_v7, %v14456_v61  ;;  %v14458_v18 = vld [vmem:[#allocation175_spill] sm:$0xff]  ;;  %v2863_v34 = vmul.f32 0.25, %v2799_v1  ;;  %v3845_v28 = vsel %vm6771_vm2, %v14460_v22, %v3731_v30  ;;  %v14556_v30 = vld [vmem:[#allocation286_spill] sm:$0xff] }
 0x846   : > { %14453 = vst [vmem:[#allocation206_spill] sm:$0xff] %v11364_v58  ;;  %v14459_v3 = vsub.f32 %v14457_v57, %v14458_v18  ;;  %v3114_v62 = vmul.f32 %v10624_v63, %v3078_v40  ;;  %v14463_v58 = vld [vmem:[#allocation292_spill] sm:$0xff]  ;;  %v3733_v61 = vpop.permute.xlu0 %3732  ;;  %v14466_v57 = vsub.f32 %v14464_v55, %v14465_v14  ;;  %v2957_v42 = vmax.f32 %v2925_v36, 0.0 }
 0x847   : > { %14455 = vst [vmem:[#allocation50_spill] sm:$0xff] %v11368_v27  ;;  %v11380_v41 = vmul.f32 0.25, %v3908_v35  ;;  %v3909_v7 = vadd.f32 %v3845_v28, %v14463_v58  ;;  %v2926_v1 = vsub.f32 %v2862_v53, %v10970_v56  ;;  %v14467_v18 = vld [vmem:[#allocation340_spill] sm:$0xff]  ;;  %4801 = vrsqrt.f32 %v3019_v60  ;;  %v14470_v58 = vld [vmem:[#allocation293_spill] sm:$0xff]  ;;  %v3735_v24 = vpop.permute.xlu1 %3734  ;;  %v14471_v56 = vld [vmem:[#allocation278_spill] sm:$0xff] }
 0x848   : > { %v3079_v48 = vmul.f32 %v4794_v29, %v14459_v3  ;;  %v3080_v29 = vmul.f32 %v4796_v47, %v14466_v57  ;;  %v3846_v22 = vsel %vm6771_vm2, %v14467_v18, %v3733_v61  ;;  %v4798_v40 = vpop.eup %4797  ;;  %v3020_v55 = vadd.f32 1e-05, %v2956_v20  ;;  %v14475_v57 = vld [vmem:[#allocation294_spill] sm:$0xff]  ;;  %v14548_v60 = vld [vmem:[#allocation337_spill] sm:$0xff] }
 0x849   : > { %14462 = vst [vmem:[#allocation237_spill] sm:$0xff] %v11380_v41  ;;  %v11392_v3 = vmul.f32 0.25, %v3909_v7  ;;  %v3910_v28 = vadd.f32 %v3846_v22, %v14470_v58  ;;  %v2927_v36 = vsub.f32 %v2863_v34, %v11002_v11  ;;  %v3847_v53 = vsel %vm6771_vm2, %v14471_v56, %v3735_v24  ;;  %v14476_v11 = vld [vmem:[#allocation341_spill] sm:$0xff] }
 0x84a   : > { %v3115_v14 = vmul.f32 %v10624_v63, %v3079_v48  ;;  %v11401_v47 = vadd.f32 %v10653_v9, %v3114_v62  ;;  %v3911_v18 = vadd.f32 %v3847_v53, %v14475_v57  ;;  %v3737_v22 = vpop.permute.xlu0 %3736  ;;  %v3116_v48 = vmul.f32 %v10624_v63, %v3080_v29  ;;  %v14477_v62 = vld [vmem:[#allocation178_spill] sm:$0xff]  ;;  %v14481_v53 = vld [vmem:[#allocation295_spill] sm:$0xff] }
 0x84b   : > { %14469 = vst [vmem:[#allocation137_spill] sm:$0xff] %v11392_v3  ;;  %v11405_v7 = vmul.f32 0.25, %v3910_v28  ;;  %v3021_v20 = vadd.f32 1e-05, %v2957_v42  ;;  %v2958_v58 = vmax.f32 %v2926_v1, 0.0  ;;  %v3848_v34 = vsel %vm6771_vm2, %v14476_v11, %v3737_v22  ;;  %v3739_v19 = vpop.permute.xlu1 %3738  ;;  %v14483_v1 = vld [vmem:[#allocation280_spill] sm:$0xff] }
 0x84c   : > { %14472 = vst [vmem:[#allocation227_spill] sm:$0xff] %v11401_v47  ;;  %v4800_v24 = vpop.eup %4799  ;;  %v14478_v56 = vsub.f32 %v14230_v6, %v14477_v62  ;;  %v11417_v47 = vmul.f32 0.25, %v3911_v18  ;;  %v3912_v57 = vadd.f32 %v3848_v34, %v14481_v53  ;;  %v11421_v29 = vadd.f32 %v10653_v9, %v3115_v14  ;;  %v14484_v6 = vld [vmem:[#allocation258_spill] sm:$0xff]  ;;  %v14487_v34 = vld [vmem:[#allocation296_spill] sm:$0xff] }
 0x84d   : > { %14474 = vst [vmem:[#allocation207_spill] sm:$0xff] %v11405_v7  ;;  %4803 = vrsqrt.f32 %v3020_v55  ;;  %v2959_v42 = vmax.f32 %v2927_v36, 0.0  ;;  %v3849_v22 = vsel %vm6771_vm2, %v14483_v1, %v3739_v19  ;;  %v11436_v55 = vadd.f32 %v10653_v9, %v3116_v48  ;;  %v14489_v53 = vld [vmem:[#allocation260_spill] sm:$0xff]  ;;  %v14490_v1 = vld [vmem:[#allocation342_spill] sm:$0xff]  ;;  %v14496_v9 = vld [vmem:[#allocation275_spill] sm:$0xff] }
 0x84e   : > { %v3081_v35 = vmul.f32 %v4798_v40, %v14478_v56  ;;  %14480 = vst [vmem:[#allocation82_spill] sm:$0xff] %v11417_v47  ;;  %14482 = vst [vmem:[#allocation238_spill] sm:$0xff] %v11421_v29  ;;  %v3832_v40 = vsel %vm6771_vm2, %v14484_v6, %v11169_v49  ;;  %v11432_v62 = vmul.f32 0.25, %v3912_v57  ;;  %v3913_v56 = vadd.f32 %v3849_v22, %v14487_v34  ;;  %v3741_v14 = vpop.permute.xlu0 %3740  ;;  %v14491_v6 = vld [vmem:[#allocation262_spill] sm:$0xff] }
 0x84f   : > { %14488 = vst [vmem:[#allocation30_spill] sm:$0xff] %v11436_v55  ;;  %v3022_v36 = vadd.f32 1e-05, %v2958_v58  ;;  %v3833_v19 = vsel %vm6771_vm2, %v14489_v53, %v11189_v4  ;;  %v3850_v49 = vsel %vm6771_vm2, %v14490_v1, %v3741_v14  ;;  %v3834_v57 = vsel %vm6771_vm2, %v14491_v6, %v11197_v50  ;;  %v14494_v58 = vld [vmem:[#allocation297_spill] sm:$0xff]  ;;  %v3743_v28 = vpop.permute.xlu1 %3742  ;;  %v14497_v1 = vld [vmem:[#allocation282_spill] sm:$0xff] }
 0x850   : > { %14486 = vst [vmem:[#allocation9_spill] sm:$0xff] %v11432_v62  ;;  %v11451_v48 = vmul.f32 0.25, %v3913_v56  ;;  %v3914_v11 = vadd.f32 %v3850_v49, %v14494_v58  ;;  %v14495_v4 = vsub.f32 %v14239_v16, %v10853_v39  ;;  %v3023_v55 = vadd.f32 1e-05, %v2959_v42  ;;  %v14502_v34 = vld [vmem:[#allocation298_spill] sm:$0xff]  ;;  %v14504_v42 = vld [vmem:[#allocation277_spill] sm:$0xff] }
 0x851   : > { %v3896_v14 = vadd.f32 %v3832_v40, %v14496_v9  ;;  %v3851_v29 = vsel %vm6771_vm2, %v14497_v1, %v3743_v28  ;;  %v11461_v50 = vpop.eup %4801  ;;  %v11464_v6 = vmul.f32 %v10624_v63, %v3081_v35  ;;  %4805 = vrsqrt.f32 %v3021_v20  ;;  %v14525_v35 = vld [vmem:[#allocation29_spill] sm:$0xff] }
 0x852   : > { %14493 = vst [vmem:[#allocation43_spill] sm:$0xff] %v11451_v48  ;;  %v3082_v53 = vmul.f32 %v4800_v24, %v14495_v4  ;;  %14498 = vst [vmem:[#allocation61_spill] sm:$0xff] %v11461_v50  ;;  %v11468_v58 = vmul.f32 0.25, %v3914_v11  ;;  %v3915_v39 = vadd.f32 %v3851_v29, %v14502_v34  ;;  %v3745_v16 = vpop.permute.xlu0 %3744  ;;  %v14503_v24 = vld [vmem:[#allocation120_spill] sm:$0xff]  ;;  %v3898_v40 = vadd.f32 %v3834_v57, %v14504_v42  ;;  %v14505_v4 = vld [vmem:[#allocation343_spill] sm:$0xff] }
 0x853   : > { %14499 = vst [vmem:[#allocation85_spill] sm:$0xff] %v11464_v6  ;;  %v3897_v9 = vadd.f32 %v3833_v19, %v14503_v24  ;;  %v3852_v28 = vsel %vm6771_vm2, %v14505_v4, %v3745_v16  ;;  %4807 = vrsqrt.f32 %v3022_v36  ;;  %v14508_v11 = vld [vmem:[#allocation299_spill] sm:$0xff]  ;;  %v3747_v6 = vpop.permute.xlu1 %3746  ;;  %v11484_v20 = vmul.f32 0.25, %v3896_v14  ;;  %v14510_v19 = vld [vmem:[#allocation284_spill] sm:$0xff] }
 0x854   : > { %14501 = vst [vmem:[#allocation75_spill] sm:$0xff] %v11468_v58  ;;  %v11478_v50 = vmul.f32 0.25, %v3915_v39  ;;  %v3916_v49 = vadd.f32 %v3852_v28, %v14508_v11  ;;  %v11482_v29 = vmul.f32 %v10624_v63, %v3082_v53  ;;  %4809 = vrsqrt.f32 %v3023_v55  ;;  %v14511_v36 = vld [vmem:[#allocation264_spill] sm:$0xff] }
 0x855   : > { %v3853_v57 = vsel %vm6771_vm2, %v14510_v19, %v3747_v6  ;;  %v3835_v34 = vsel %vm6771_vm2, %v14511_v36, %v11216_v54  ;;  %v14514_v42 = vld [vmem:[#allocation300_spill] sm:$0xff]  ;;  %v11500_v14 = vmul.f32 0.25, %v3897_v9  ;;  %v11502_v28 = vmul.f32 0.25, %v3898_v40  ;;  %v14516_v6 = vld [vmem:[#allocation129_spill] sm:$0xff] }
 0x856   : > { %14507 = vst [vmem:[#allocation228_spill] sm:$0xff] %v11478_v50  ;;  %14509 = vst [vmem:[#allocation216_spill] sm:$0xff] %v11482_v29  ;;  %v11495_v24 = vmul.f32 0.25, %v3916_v49  ;;  %v3917_v53 = vadd.f32 %v3853_v57, %v14514_v42  ;;  %v3749_v4 = vpop.permute.xlu0 %3748  ;;  %v4876_v54 = vld [vmem:[%s12264_s3] sm:$0xff]  ;;  %v14517_v19 = vld [vmem:[#allocation84_spill] sm:$0xff] }
 0x857   : > { %v11498_v55 = vpop.eup %4803  ;;  %v3854_v11 = vsel %vm6771_vm2, %v14516_v6, %v3749_v4  ;;  %v14518_v49 = vsub.s32 4, %v14517_v19  ;;  %v14521_v9 = vld [vmem:[#allocation301_spill] sm:$0xff]  ;;  %v3751_v1 = vpop.permute.xlu1 %3750  ;;  %v14522_v63 = vsub.s32 5, %v14517_v19  ;;  %v11525_v4 = vmul.f32 %v11484_v20, %v11484_v20  ;;  %v14523_v6 = vld [vmem:[#allocation8_spill] sm:$0xff]  ;;  %v14524_v29 = vld [vmem:[#allocation279_spill] sm:$0xff] }
 0x858   : > { %14513 = vst [vmem:[#allocation239_spill] sm:$0xff] %v11495_v24  ;;  %14515 = vst [vmem:[#allocation25_spill] sm:$0xff] %v11498_v55  ;;  %v11516_v16 = vmul.f32 0.25, %v3917_v53  ;;  %v3918_v40 = vadd.f32 %v3854_v11, %v14521_v9  ;;  %v3899_v39 = vadd.f32 %v3835_v34, %v14524_v29  ;;  %v3855_v53 = vsel %vm6771_vm2, %v14525_v35, %v3751_v1  ;;  %v14526_v11 = vld [vmem:[#allocation266_spill] sm:$0xff]  ;;  %v14530_v34 = vld [vmem:[#allocation11_spill] sm:$0xff] }
 0x859   : > { %v11512_v36 = vrot.slane %v4876_v54, %v14518_v49  ;;  %v11521_v55 = vrot.slane %v4876_v54, %v14522_v63  ;;  %v3836_v19 = vsel %vm6771_vm2, %v14526_v11, %v11231_v32  ;;  %v14529_v42 = vld [vmem:[#allocation302_spill] sm:$0xff]  ;;  %v11544_v29 = vmul.f32 %v11500_v14, %v11500_v14  ;;  %v14531_v32 = vld [vmem:[#allocation109_spill] sm:$0xff]  ;;  %v14535_v63 = vld [vmem:[#allocation303_spill] sm:$0xff] }
 0x85a   : > { %14520 = vst [vmem:[#allocation152_spill] sm:$0xff] %v11516_v16  ;;  %v11539_v9 = vmul.f32 0.25, %v3918_v40  ;;  %v3919_v57 = vadd.f32 %v3855_v53, %v14529_v42  ;;  %v3753_v56 = vpop.permute.xlu0 %3752  ;;  %v11550_v1 = vmul.f32 %v11502_v28, %v11502_v28  ;;  %v14532_v40 = vld [vmem:[#allocation268_spill] sm:$0xff]  ;;  %v11566_v18 = vmul.f32 0.25, %v3899_v39 }
 0x85b   : > { %v3856_v11 = vsel %vm6771_vm2, %v14531_v32, %v3753_v56  ;;  %v3837_v42 = vsel %vm6771_vm2, %v14532_v40, %v11254_v0  ;;  %v3755_v22 = vpop.permute.xlu1 %3754  ;;  %v11564_v8 = vpop.eup %4805  ;;  %v3900_v61 = vadd.f32 %v3836_v19, %v14537_v46  ;;  %v14538_v56 = vld [vmem:[#allocation336_spill] sm:$0xff]  ;;  %v14539_v0 = vld [vmem:[#allocation147_spill] sm:$0xff] }
 0x85c   : > { %14528 = vst [vmem:[#allocation229_spill] sm:$0xff] %v11539_v9  ;;  %v11561_v49 = vmul.f32 0.25, %v3919_v57  ;;  %v3920_v35 = vadd.f32 %v3856_v11, %v14535_v63  ;;  %14536 = vst [vmem:[#allocation230_spill] sm:$0xff] %v11564_v8  ;;  %v3838_v32 = vsel %vm6771_vm2, %v14538_v56, %v11270_v59  ;;  %v3857_v40 = vsel %vm6771_vm2, %v14539_v0, %v3755_v22  ;;  %v14541_v63 = vld [vmem:[#allocation269_spill] sm:$0xff]  ;;  %v14544_v19 = vld [vmem:[#allocation304_spill] sm:$0xff] }
 0x85d   : > { %v11576_v57 = vpop.eup %4807  ;;  %v3839_v11 = vsel %vm6771_vm2, %v14541_v63, %v11289_v25  ;;  %v3921_v8 = vadd.f32 %v3857_v40, %v14544_v19  ;;  %v14546_v56 = vld [vmem:[#allocation15_spill] sm:$0xff]  ;;  %v3840_v25 = vsel %vm6771_vm2, %v14548_v60, %v11298_v23  ;;  %v14549_v63 = vld [vmem:[#allocation125_spill] sm:$0xff]  ;;  %v14550_v54 = vld [vmem:[#allocation272_spill] sm:$0xff]  ;;  %v11608_v17 = vmul.f32 0.25, %v3900_v61 }
 0x85e   : > { %14534 = vst [vmem:[#allocation217_spill] sm:$0xff] %v11561_v49  ;;  %14540 = vst [vmem:[#allocation214_spill] sm:$0xff] %v11576_v57  ;;  %v11584_v46 = vmul.f32 0.25, %v3920_v35  ;;  %v3757_v53 = vpop.permute.xlu0 %3756  ;;  %v11587_v59 = vpop.eup %4809  ;;  %v14547_v0 = vld [vmem:[#allocation283_spill] sm:$0xff]  ;;  %v3841_v40 = vsel %vm6771_vm2, %v14550_v54, %v11317_v37  ;;  %v14555_v23 = vld [vmem:[#allocation285_spill] sm:$0xff]  ;;  %v3903_v26 = vadd.f32 %v3839_v11, %v14556_v30  ;;  %v11617_v37 = vmul.f32 %v11566_v18, %v11566_v18 }
 0x85f   : > { %14545 = vst [vmem:[#allocation58_spill] sm:$0xff] %v11587_v59  ;;  %v3901_v57 = vadd.f32 %v3837_v42, %v14547_v0  ;;  %v3858_v35 = vsel %vm6771_vm2, %v14549_v63, %v3757_v53  ;;  %v11605_v22 = vmul.f32 0.25, %v3921_v8  ;;  %v14553_v42 = vld [vmem:[#allocation305_spill] sm:$0xff]  ;;  %v3759_v39 = vpop.permute.xlu1 %3758  ;;  %14554 = vst [vmem:[#allocation126_spill] sm:$0xff] %v11608_v17  ;;  %v3902_v60 = vadd.f32 %v3838_v32, %v14555_v23  ;;  %v14561_v32 = vld [vmem:[#allocation287_spill] sm:$0xff] }
 0x860   : > { %14543 = vst [vmem:[#allocation130_spill] sm:$0xff] %v11584_v46  ;;  %v3922_v0 = vadd.f32 %v3858_v35, %v14553_v42  ;;  %v14557_v53 = vld [vmem:[#allocation89_spill] sm:$0xff]  ;;  %v14559_v35 = vld [vmem:[#allocation306_spill] sm:$0xff]  ;;  %v3904_v30 = vadd.f32 %v3840_v25, %v14561_v32  ;;  %v14562_v11 = vld [vmem:[#allocation288_spill] sm:$0xff]  ;;  %v11640_v25 = vmul.f32 %v11608_v17, %v11608_v17  ;;  %v11644_v32 = vmul.f32 0.25, %v3903_v26 }
 0x861   : > { %14552 = vst [vmem:[#allocation34_spill] sm:$0xff] %v11605_v22  ;;  %v3859_v63 = vsel %vm6771_vm2, %v14557_v53, %v3759_v39  ;;  %v11624_v19 = vmul.f32 0.25, %v3901_v57  ;;  %v3905_v23 = vadd.f32 %v3841_v40, %v14562_v11  ;;  %v14564_v53 = vld [vmem:[#allocation19_spill] sm:$0xff]  ;;  %v11642_v40 = vmul.f32 0.25, %v3902_v60 }
 0x862   : > { %v11621_v59 = vmul.f32 0.25, %v3922_v0  ;;  %v3923_v61 = vadd.f32 %v3859_v63, %v14559_v35  ;;  %v3761_v42 = vpop.permute.xlu0 %3760  ;;  %v14566_v63 = vld [vmem:[#allocation307_spill] sm:$0xff]  ;;  %14568 = vst [vmem:[#allocation170_spill] sm:$0xff] %v11644_v32  ;;  %v11660_v26 = vmul.f32 0.25, %v3904_v30 }
 0x863   : > { %14560 = vst [vmem:[#allocation93_spill] sm:$0xff] %v11624_v19  ;;  %v3860_v39 = vsel %vm6771_vm2, %v14563_v52, %v3761_v42  ;;  %v3763_v57 = vpop.permute.xlu1 %3762  ;;  %14567 = vst [vmem:[#allocation240_spill] sm:$0xff] %v11642_v40  ;;  %v14569_v52 = vld [vmem:[#allocation148_spill] sm:$0xff]  ;;  %v11658_v60 = vmul.f32 %v11624_v19, %v11624_v19  ;;  %v11662_v10 = vmul.f32 0.25, %v3905_v23  ;;  %v11676_v30 = vmul.f32 %v11642_v40, %v11642_v40  ;;  %v14583_v19 = vld [vmem:[#allocation310_spill] sm:$0xff] }
 0x864   : > { %v11635_v8 = vmul.f32 0.25, %v3923_v61  ;;  %v3924_v35 = vadd.f32 %v3860_v39, %v14566_v63  ;;  %v3861_v42 = vsel %vm6771_vm2, %v14569_v52, %v3763_v57  ;;  %v14572_v63 = vld [vmem:[#allocation308_spill] sm:$0xff]  ;;  %14573 = vst [vmem:[#allocation241_spill] sm:$0xff] %v11660_v26  ;;  %v14575_v57 = vld [vmem:[#allocation78_spill] sm:$0xff]  ;;  %v11696_v17 = vmul.f32 %v11660_v26, %v11660_v26 }
 0x865   : > { %v3925_v54 = vadd.f32 %v3861_v42, %v14572_v63  ;;  %14574 = vst [vmem:[#allocation171_spill] sm:$0xff] %v11662_v10  ;;  %v14578_v63 = vld [vmem:[#allocation309_spill] sm:$0xff]  ;;  %v14584_v40 = vld [vmem:[#allocation38_spill] sm:$0xff]  ;;  %v11716_v23 = vmul.f32 %v11356_v31, %v11356_v31  ;;  %v11720_v26 = vmul.f32 %v11368_v27, %v11368_v27 }
 0x866   : > { %v11653_v39 = vmul.f32 0.25, %v3924_v35  ;;  %v3765_v45 = vpop.permute.xlu0 %3764 }
 0x867   : > { %v3862_v52 = vsel %vm6771_vm2, %v14575_v57, %v3765_v45  ;;  %v11671_v42 = vmul.f32 0.25, %v3925_v54  ;;  %v3767_v15 = vpop.permute.xlu1 %3766  ;;  %v11682_v45 = vmul.f32 %v11644_v32, %v11644_v32  ;;  %v14580_v57 = vld [vmem:[#allocation54_spill] sm:$0xff]  ;;  %v14589_v32 = vld [vmem:[#allocation311_spill] sm:$0xff] }
 0x868   : > { %v3926_v44 = vadd.f32 %v3862_v52, %v14578_v63  ;;  %v3863_v61 = vsel %vm6771_vm2, %v14580_v57, %v3767_v15  ;;  %v11702_v15 = vmul.f32 %v11662_v10, %v11662_v10  ;;  %v14585_v57 = vld [vmem:[#allocation161_spill] sm:$0xff]  ;;  %v11738_v10 = vmul.f32 %v11405_v7, %v11405_v7 }
 0x869   : > { %v3927_v0 = vadd.f32 %v3863_v61, %v14583_v19  ;;  %v14592_v19 = vld [vmem:[#allocation312_spill] sm:$0xff] }
 0x86a   : > { %v11691_v35 = vmul.f32 0.25, %v3926_v44  ;;  %v3769_v11 = vpop.permute.xlu0 %3768  ;;  %v14586_v44 = vld [vmem:[#allocation40_spill] sm:$0xff] }
 0x86b   : > { %v3864_v63 = vsel %vm6771_vm2, %v14585_v57, %v3769_v11  ;;  %v11711_v52 = vmul.f32 0.25, %v3927_v0  ;;  %v3771_v13 = vpop.permute.xlu1 %3770  ;;  %v11724_v11 = vmul.f32 %v11380_v41, %v11380_v41  ;;  %v14590_v57 = vld [vmem:[#allocation143_spill] sm:$0xff]  ;;  %v11742_v41 = vmul.f32 %v11417_v47, %v11417_v47 }
 0x86c   : > { %v3928_v54 = vadd.f32 %v3864_v63, %v14589_v32  ;;  %v3865_v0 = vsel %vm6771_vm2, %v14590_v57, %v3771_v13  ;;  %v11731_v32 = vmul.f32 %v11392_v3, %v11392_v3  ;;  %v11746_v13 = vmul.f32 %v11432_v62, %v11432_v62  ;;  %v14593_v57 = vld [vmem:[#allocation166_spill] sm:$0xff]  ;;  %v14594_v63 = vld [vmem:[#allocation313_spill] sm:$0xff] }
 0x86d   : > { %14588 = vst [vmem:[#allocation231_spill] sm:$0xff] %v11711_v52  ;;  %v3929_v31 = vadd.f32 %v3865_v0, %v14592_v19  ;;  %v11759_v47 = vmul.f32 %v11468_v58, %v11468_v58  ;;  %v11763_v62 = vmul.f32 %v11478_v50, %v11478_v50  ;;  %v11776_v3 = vmul.f32 %v11516_v16, %v11516_v16 }
 0x86e   : > { %v3992_v12 = vmul.f32 0.25, %v3928_v54  ;;  %v3773_v27 = vpop.permute.xlu0 %3772  ;;  %v11753_v54 = vmul.f32 %v11451_v48, %v11451_v48  ;;  %v11780_v50 = vmul.f32 %v11539_v9, %v11539_v9  ;;  %v11796_v9 = vmul.f32 %v11605_v22, %v11605_v22 }
 0x86f   : > { %v3866_v61 = vsel %vm6771_vm2, %v14593_v57, %v3773_v27  ;;  %v3993_v0 = vmul.f32 0.25, %v3929_v31  ;;  %v3775_v7 = vpop.permute.xlu1 %3774  ;;  %v11767_v27 = vmul.f32 %v11495_v24, %v11495_v24  ;;  %v14595_v57 = vld [vmem:[#allocation165_spill] sm:$0xff]  ;;  %v11784_v24 = vmul.f32 %v11561_v49, %v11561_v49  ;;  %v14600_v49 = vld [vmem:[#allocation315_spill] sm:$0xff] }
 0x870   : > { %v4056_v19 = vsub.f32 %v3992_v12, %v11525_v4  ;;  %v3930_v52 = vadd.f32 %v3866_v61, %v14594_v63  ;;  %v3867_v12 = vsel %vm6771_vm2, %v14595_v57, %v3775_v7  ;;  %v14596_v63 = vld [vmem:[#allocation314_spill] sm:$0xff]  ;;  %v14598_v7 = vld [vmem:[#allocation103_spill] sm:$0xff]  ;;  %14599 = vst [vmem:[#allocation87_spill] sm:$0xff] %v11796_v9  ;;  %v14603_v9 = vld [vmem:[#allocation172_spill] sm:$0xff] }
 0x871   : > { %v4057_v4 = vsub.f32 %v3993_v0, %v11544_v29  ;;  %v3931_v48 = vadd.f32 %v3867_v12, %v14596_v63  ;;  %14597 = vst [vmem:[#allocation215_spill] sm:$0xff] %v11784_v24  ;;  %v11792_v63 = vmul.f32 %v11584_v46, %v11584_v46  ;;  %v14601_v24 = vld [vmem:[#allocation68_spill] sm:$0xff] }
 0x872   : > { %v4088_v31 = vmax.f32 %v4056_v19, 0.0  ;;  %v3994_v61 = vmul.f32 0.25, %v3930_v52  ;;  %v3777_v58 = vpop.permute.xlu0 %3776  ;;  %v14602_v46 = vld [vmem:[#allocation316_spill] sm:$0xff] }
 0x873   : > { %v3868_v29 = vsel %vm6771_vm2, %v14598_v7, %v3777_v58  ;;  %v4089_v19 = vmax.f32 %v4057_v4, 0.0  ;;  %v3995_v57 = vmul.f32 0.25, %v3931_v48  ;;  %v3779_v12 = vpop.permute.xlu1 %3778 }
 0x874   : > { %v4152_v52 = vadd.f32 1e-05, %v4088_v31  ;;  %v4058_v0 = vsub.f32 %v3994_v61, %v11550_v1  ;;  %v3932_v16 = vadd.f32 %v3868_v29, %v14600_v49  ;;  %v3869_v58 = vsel %vm6771_vm2, %v14601_v24, %v3779_v12 }
 0x875   : > { %v4153_v31 = vadd.f32 1e-05, %v4089_v19  ;;  %v4059_v48 = vsub.f32 %v3995_v57, %v11617_v37  ;;  %v11805_v61 = vmul.f32 %v11621_v59, %v11621_v59  ;;  %v3933_v22 = vadd.f32 %v3869_v58, %v14602_v46 }
 0x876   : > { %4811 = vrsqrt.f32 %v4152_v52  ;;  %v4090_v4 = vmax.f32 %v4058_v0, 0.0  ;;  %v3781_v1 = vpop.permute.xlu0 %3780  ;;  %v3996_v7 = vmul.f32 0.25, %v3932_v16  ;;  %v14604_v52 = vld [vmem:[#allocation317_spill] sm:$0xff]  ;;  %v11814_v37 = vmul.f32 %v11635_v8, %v11635_v8  ;;  %v14605_v16 = vld [vmem:[#allocation176_spill] sm:$0xff] }
 0x877   : > { %v3870_v49 = vsel %vm6771_vm2, %v14603_v9, %v3781_v1  ;;  %4813 = vrsqrt.f32 %v4153_v31  ;;  %v4091_v24 = vmax.f32 %v4059_v48, 0.0  ;;  %v3783_v0 = vpop.permute.xlu1 %3782  ;;  %v3997_v12 = vmul.f32 0.25, %v3933_v22 }
 0x878   : > { %v4154_v29 = vadd.f32 1e-05, %v4090_v4  ;;  %v3934_v19 = vadd.f32 %v3870_v49, %v14604_v52  ;;  %v4060_v57 = vsub.f32 %v3996_v7, %v11640_v25  ;;  %v3871_v46 = vsel %vm6771_vm2, %v14605_v16, %v3783_v0  ;;  %v14606_v52 = vld [vmem:[#allocation112_spill] sm:$0xff] }
 0x879   : > { %v4155_v58 = vadd.f32 1e-05, %v4091_v24  ;;  %v3935_v31 = vadd.f32 %v3871_v46, %v10106_v5  ;;  %v11823_v48 = vmul.f32 %v11653_v39, %v11653_v39  ;;  %v4061_v49 = vsub.f32 %v3997_v12, %v11658_v60 }
 0x87a   : > { %4815 = vrsqrt.f32 %v4154_v29  ;;  %v3998_v9 = vmul.f32 0.25, %v3934_v19  ;;  %v3785_v4 = vpop.permute.xlu0 %3784  ;;  %v4092_v1 = vmax.f32 %v4060_v57, 0.0  ;;  %v11833_v5 = vmul.f32 %v11671_v42, %v11671_v42  ;;  %v14607_v57 = vld [vmem:[#allocation179_spill] sm:$0xff] }
 0x87b   : > { %v3872_v22 = vsel %vm6771_vm2, %v14606_v52, %v3785_v4  ;;  %4817 = vrsqrt.f32 %v4155_v58  ;;  %v3999_v7 = vmul.f32 0.25, %v3935_v31  ;;  %v3787_v24 = vpop.permute.xlu1 %3786  ;;  %v4093_v0 = vmax.f32 %v4061_v49, 0.0  ;;  %v14608_v31 = vld [vmem:[#allocation177_spill] sm:$0xff] }
 0x87c   : > { %v4062_v25 = vsub.f32 %v3998_v9, %v11676_v30  ;;  %v3936_v29 = vadd.f32 %v3872_v22, %v10114_v33  ;;  %v4156_v19 = vadd.f32 1e-05, %v4092_v1  ;;  %v3873_v60 = vsel %vm6771_vm2, %v14607_v57, %v3787_v24  ;;  %v14610_v24 = vld [vmem:[#allocation186_spill] sm:$0xff] }
 0x87d   : > { %v4063_v16 = vsub.f32 %v3999_v7, %v11682_v45  ;;  %v3937_v30 = vadd.f32 %v3873_v60, %v10122_v38  ;;  %v11842_v33 = vmul.f32 %v11691_v35, %v11691_v35  ;;  %v4157_v9 = vadd.f32 1e-05, %v4093_v0 }
 0x87e   : > { %v4094_v12 = vmax.f32 %v4062_v25, 0.0  ;;  %v4000_v46 = vmul.f32 0.25, %v3936_v29  ;;  %v3789_v58 = vpop.permute.xlu0 %3788  ;;  %4819 = vrsqrt.f32 %v4156_v19  ;;  %v14609_v38 = vsub.f32 %v14523_v6, %v11484_v20 }
 0x87f   : > { %v3874_v4 = vsel %vm6771_vm2, %v14608_v31, %v3789_v58  ;;  %v4095_v52 = vmax.f32 %v4063_v16, 0.0  ;;  %v4001_v22 = vmul.f32 0.25, %v3937_v30  ;;  %v3791_v25 = vpop.permute.xlu1 %3790  ;;  %4821 = vrsqrt.f32 %v4157_v9  ;;  %v14612_v31 = vld [vmem:[#allocation184_spill] sm:$0xff] }
 0x880   : > { %v4812_v1 = vpop.eup %4811  ;;  %v4158_v49 = vadd.f32 1e-05, %v4094_v12  ;;  %v4064_v45 = vsub.f32 %v4000_v46, %v11696_v17  ;;  %v3938_v29 = vadd.f32 %v3874_v4, %v10130_v51  ;;  %v3875_v19 = vsel %vm6771_vm2, %v14610_v24, %v3791_v25 }
 0x881   : > { %v4216_v7 = vmul.f32 %v4812_v1, %v14609_v38  ;;  %v4814_v0 = vpop.eup %4813  ;;  %v4159_v57 = vadd.f32 1e-05, %v4095_v52  ;;  %v4065_v17 = vsub.f32 %v4001_v22, %v11702_v15  ;;  %v14611_v20 = vsub.f32 %v14530_v34, %v11500_v14  ;;  %v14614_v22 = vld [vmem:[#allocation318_spill] sm:$0xff] }
 0x882   : > { %4823 = vrsqrt.f32 %v4158_v49  ;;  %v4096_v60 = vmax.f32 %v4064_v45, 0.0  ;;  %v3793_v12 = vpop.permute.xlu0 %3792  ;;  %v4002_v51 = vmul.f32 0.25, %v3938_v29  ;;  %v3939_v46 = vadd.f32 %v3875_v19, %v10138_v2 }
 0x883   : > { %v4252_v16 = vmul.f32 %v11512_v36, %v4216_v7  ;;  %v4217_v6 = vmul.f32 %v4814_v0, %v14611_v20  ;;  %4825 = vrsqrt.f32 %v4159_v57  ;;  %v4097_v9 = vmax.f32 %v4065_v17, 0.0  ;;  %v3795_v38 = vpop.permute.xlu1 %3794  ;;  %v14616_v17 = vld [vmem:[#allocation222_spill] sm:$0xff] }
 0x884   : > { %v4816_v30 = vpop.eup %4815  ;;  %v4160_v58 = vadd.f32 1e-05, %v4096_v60  ;;  %v3876_v4 = vsel %vm6771_vm2, %v14612_v31, %v3793_v12  ;;  %v14613_v14 = vsub.f32 %v14546_v56, %v11502_v28  ;;  %v4066_v2 = vsub.f32 %v4002_v51, %v11716_v23  ;;  %v14618_v51 = vld [vmem:[#allocation126_spill] sm:$0xff]  ;;  %v14620_v31 = vld [vmem:[#allocation196_spill] sm:$0xff] }
 0x885   : > { %v4288_v15 = vadd.f32 %v11521_v55, %v4252_v16  ;;  %v4253_v1 = vmul.f32 %v11512_v36, %v4217_v6  ;;  %v4818_v49 = vpop.eup %4817  ;;  %v4161_v52 = vadd.f32 1e-05, %v4097_v9  ;;  %v4003_v45 = vmul.f32 0.25, %v3939_v46  ;;  %v14617_v6 = vld [vmem:[#allocation23_spill] sm:$0xff] }
 0x886   : > { %v4218_v34 = vmul.f32 %v4816_v30, %v14613_v14  ;;  %4827 = vrsqrt.f32 %v4160_v58  ;;  %v3940_v25 = vadd.f32 %v3876_v4, %v14614_v22  ;;  %v14615_v19 = vsub.f32 %v14564_v53, %v11566_v18  ;;  %v3797_v20 = vpop.permute.xlu0 %3796 }
 0x887   : > { %v4320_v7 = vadd.f32 %v4288_v15, %v11067_v43  ;;  %v4289_v29 = vadd.f32 %v11521_v55, %v4253_v1  ;;  %4829 = vrsqrt.f32 %v4161_v52  ;;  %v4098_v56 = vmax.f32 %v4066_v2, 0.0  ;;  %v14621_v1 = vld [vmem:[#allocation123_spill] sm:$0xff] }
 0x888   : > { %v4254_v24 = vmul.f32 %v11512_v36, %v4218_v34  ;;  %v4219_v28 = vmul.f32 %v4818_v49, %v14615_v19  ;;  %v4067_v23 = vsub.f32 %v4003_v45, %v11720_v26  ;;  %v4004_v0 = vmul.f32 0.25, %v3940_v25  ;;  %v4820_v57 = vpop.eup %4819  ;;  %v14623_v49 = vld [vmem:[#allocation93_spill] sm:$0xff]  ;;  %v3799_v25 = vpop.permute.xlu1 %3798  ;;  %v14626_v19 = vld [vmem:[#allocation31_spill] sm:$0xff] }
 0x889   : > { %v4352_v60 = vmax.f32 %v4320_v7, 0.0  ;;  %v4321_v12 = vadd.f32 %v4289_v29, %v14616_v17  ;;  %v14619_v46 = vsub.f32 %v14617_v6, %v14618_v51  ;;  %v4162_v18 = vadd.f32 1e-05, %v4098_v56  ;;  %v4822_v9 = vpop.eup %4821  ;;  %v14625_v29 = vld [vmem:[#allocation223_spill] sm:$0xff]  ;;  %v14631_v51 = vld [vmem:[#allocation170_spill] sm:$0xff] }
 0x88a   : > { %v4290_v16 = vadd.f32 %v11521_v55, %v4254_v24  ;;  %v4255_v43 = vmul.f32 %v11512_v36, %v4219_v28  ;;  %v4099_v53 = vmax.f32 %v4067_v23, 0.0  ;;  %v4068_v58 = vsub.f32 %v4004_v0, %v11724_v11  ;;  %v14622_v11 = vld [vmem:[#allocation27_spill] sm:$0xff]  ;;  %v14627_v28 = vld [vmem:[#allocation240_spill] sm:$0xff] }
 0x88b   : > { %v4220_v30 = vmul.f32 %v4820_v57, %v14619_v46  ;;  %4384 = vst [vmem:[%s11888_s22] sm:$0xff] %v4352_v60  ;;  %v4353_v26 = vmax.f32 %v4321_v12, 0.0  ;;  %v3877_v14 = vsel %vm6771_vm2, %v14621_v1, %v3795_v38  ;;  %v14624_v52 = vsub.f32 %v14622_v11, %v14623_v49  ;;  %v14629_v17 = vld [vmem:[#allocation319_spill] sm:$0xff] }
 0x88c   : > { %v4322_v4 = vadd.f32 %v4290_v16, %v14620_v31  ;;  %v4291_v15 = vadd.f32 %v11521_v55, %v4255_v43  ;;  %v4824_v34 = vpop.eup %4823  ;;  %4831 = vrsqrt.f32 %v4162_v18  ;;  %v4163_v22 = vadd.f32 1e-05, %v4099_v53  ;;  %v14630_v6 = vld [vmem:[#allocation35_spill] sm:$0xff]  ;;  %v3801_v53 = vpop.permute.xlu0 %3800 }
 0x88d   : > { %v4256_v2 = vmul.f32 %v11512_v36, %v4220_v30  ;;  %v4221_v45 = vmul.f32 %v4822_v9, %v14624_v52  ;;  %4385 = vst [vmem:[%s11888_s22 + $0x8] sm:$0xff] %v4353_v26  ;;  %v14628_v56 = vsub.f32 %v14626_v19, %v14627_v28  ;;  %v4100_v38 = vmax.f32 %v4068_v58, 0.0  ;;  %v4826_v0 = vpop.eup %4825  ;;  %v14633_v9 = vld [vmem:[#allocation140_spill] sm:$0xff] }
 0x88e   : > { %v4354_v7 = vmax.f32 %v4322_v4, 0.0  ;;  %v4323_v24 = vadd.f32 %v4291_v15, %v14625_v29  ;;  %4833 = vrsqrt.f32 %v4163_v22  ;;  %v3941_v12 = vadd.f32 %v3877_v14, %v14629_v17  ;;  %v14634_v15 = vld [vmem:[#allocation10_spill] sm:$0xff]  ;;  %v14637_v22 = vld [vmem:[#allocation224_spill] sm:$0xff] }
 0x88f   : > { %v4222_v23 = vmul.f32 %v4824_v34, %v14628_v56  ;;  %v4292_v57 = vadd.f32 %v11521_v55, %v4256_v2  ;;  %v4257_v60 = vmul.f32 %v11512_v36, %v4221_v45  ;;  %v14632_v46 = vsub.f32 %v14630_v6, %v14631_v51  ;;  %v14635_v2 = vld [vmem:[#allocation241_spill] sm:$0xff]  ;;  %v14639_v28 = vld [vmem:[#allocation208_spill] sm:$0xff] }
 0x890   : > { %4386 = vst [vmem:[%s11888_s22 + $0x10] sm:$0xff] %v4354_v7  ;;  %v4355_v16 = vmax.f32 %v4323_v24, 0.0  ;;  %v4164_v18 = vadd.f32 1e-05, %v4100_v38  ;;  %v4828_v58 = vpop.eup %4827  ;;  %v4005_v4 = vmul.f32 0.25, %v3941_v12  ;;  %v3878_v1 = vsel %vm6771_vm2, %v14634_v15, %v3797_v20  ;;  %v14638_v24 = vld [vmem:[#allocation320_spill] sm:$0xff]  ;;  %v3803_v20 = vpop.permute.xlu1 %3802 }
 0x891   : > { %v4258_v43 = vmul.f32 %v11512_v36, %v4222_v23  ;;  %v4223_v30 = vmul.f32 %v4826_v0, %v14632_v46  ;;  %v4324_v26 = vadd.f32 %v4292_v57, %v14633_v9  ;;  %v4293_v31 = vadd.f32 %v11521_v55, %v4257_v60  ;;  %v4830_v52 = vpop.eup %4829  ;;  %v14643_v6 = vld [vmem:[#allocation225_spill] sm:$0xff] }
 0x892   : > { %4387 = vst [vmem:[%s11888_s22 + $0x18] sm:$0xff] %v4355_v16  ;;  %v14636_v11 = vsub.f32 %v14584_v40, %v14635_v2  ;;  %4835 = vrsqrt.f32 %v4164_v18  ;;  %v4069_v29 = vsub.f32 %v4005_v4, %v11731_v32  ;;  %v3942_v19 = vadd.f32 %v3878_v1, %v14638_v24  ;;  %v14640_v40 = vld [vmem:[#allocation171_spill] sm:$0xff]  ;;  %v14642_v32 = vld [vmem:[#allocation190_spill] sm:$0xff]  ;;  %v3805_v18 = vpop.permute.xlu0 %3804  ;;  %v14645_v4 = vld [vmem:[#allocation188_spill] sm:$0xff] }
 0x893   : > { %v4294_v14 = vadd.f32 %v11521_v55, %v4258_v43  ;;  %v4259_v34 = vmul.f32 %v11512_v36, %v4223_v30  ;;  %v4356_v45 = vmax.f32 %v4324_v26, 0.0  ;;  %v4325_v7 = vadd.f32 %v4293_v31, %v14637_v22  ;;  %v14644_v26 = vld [vmem:[#allocation321_spill] sm:$0xff]  ;;  %v14647_v2 = vld [vmem:[#allocation42_spill] sm:$0xff] }
 0x894   : > { %v4224_v49 = vmul.f32 %v4828_v58, %v14636_v11  ;;  %v14641_v0 = vsub.f32 %v14586_v44, %v14640_v40  ;;  %v4101_v17 = vmax.f32 %v4069_v29, 0.0  ;;  %v4006_v12 = vmul.f32 0.25, %v3942_v19  ;;  %v14646_v1 = vld [vmem:[#allocation209_spill] sm:$0xff]  ;;  %v14648_v11 = vld [vmem:[#allocation226_spill] sm:$0xff]  ;;  %v3807_v24 = vpop.permute.xlu1 %3806 }
 0x895   : > { %v4326_v56 = vadd.f32 %v4294_v14, %v14639_v28  ;;  %v4295_v23 = vadd.f32 %v11521_v55, %v4259_v34  ;;  %4388 = vst [vmem:[%s11888_s22 + $0x20] sm:$0xff] %v4356_v45  ;;  %v4357_v60 = vmax.f32 %v4325_v7, 0.0  ;;  %v3879_v16 = vsel %vm6771_vm2, %v14642_v32, %v3799_v25  ;;  %v14650_v7 = vld [vmem:[#allocation322_spill] sm:$0xff]  ;;  %v14651_v19 = vld [vmem:[#allocation13_spill] sm:$0xff] }
 0x896   : > { %v4260_v38 = vmul.f32 %v11512_v36, %v4224_v49  ;;  %v4225_v57 = vmul.f32 %v4830_v52, %v14641_v0  ;;  %v4832_v58 = vpop.eup %4831  ;;  %v4165_v44 = vadd.f32 1e-05, %v4101_v17  ;;  %v4070_v9 = vsub.f32 %v4006_v12, %v11738_v10  ;;  %v14655_v12 = vld [vmem:[#allocation191_spill] sm:$0xff] }
 0x897   : > { %v4358_v43 = vmax.f32 %v4326_v56, 0.0  ;;  %v4327_v51 = vadd.f32 %v4295_v23, %v14643_v6  ;;  %4389 = vst [vmem:[%s11888_s22 + $0x28] sm:$0xff] %v4357_v60  ;;  %v3943_v31 = vadd.f32 %v3879_v16, %v14644_v26  ;;  %v3880_v25 = vsel %vm6771_vm2, %v14645_v4, %v3801_v53  ;;  %v14652_v23 = vld [vmem:[#allocation44_spill] sm:$0xff] }
 0x898   : > { %v4296_v46 = vadd.f32 %v11521_v55, %v4260_v38  ;;  %v4261_v30 = vmul.f32 %v11512_v36, %v4225_v57  ;;  %v14649_v49 = vsub.f32 %v14647_v2, %v14648_v11  ;;  %v4834_v45 = vpop.eup %4833  ;;  %4837 = vrsqrt.f32 %v4165_v44  ;;  %v14653_v38 = vld [vmem:[#allocation50_spill] sm:$0xff] }
 0x899   : > { %4390 = vst [vmem:[%s11888_s22 + $0x30] sm:$0xff] %v4358_v43  ;;  %v4359_v15 = vmax.f32 %v4327_v51, 0.0  ;;  %v4102_v10 = vmax.f32 %v4070_v9, 0.0  ;;  %v4007_v22 = vmul.f32 0.25, %v3943_v31  ;;  %v3944_v29 = vadd.f32 %v3880_v25, %v14650_v7  ;;  %v14657_v44 = vld [vmem:[#allocation46_spill] sm:$0xff]  ;;  %v14658_v9 = vld [vmem:[#allocation237_spill] sm:$0xff] }
 0x89a   : > { %v4328_v14 = vadd.f32 %v4296_v46, %v14646_v1  ;;  %v4297_v34 = vadd.f32 %v11521_v55, %v4261_v30  ;;  %v4226_v52 = vmul.f32 %v4832_v58, %v14649_v49  ;;  %v14654_v40 = vsub.f32 %v14652_v23, %v14653_v38  ;;  %v14656_v46 = vld [vmem:[#allocation323_spill] sm:$0xff]  ;;  %v3809_v58 = vpop.permute.xlu0 %3808 }
 0x89b   : > { %4391 = vst [vmem:[%s11888_s22 + $0x38] sm:$0xff] %v4359_v15  ;;  %v4166_v57 = vadd.f32 1e-05, %v4102_v10  ;;  %v4071_v60 = vsub.f32 %v4007_v22, %v11742_v41  ;;  %v4008_v17 = vmul.f32 0.25, %v3944_v29  ;;  %v3881_v32 = vsel %vm6771_vm2, %v14655_v12, %v3803_v20  ;;  %v14660_v20 = vld [vmem:[#allocation142_spill] sm:$0xff]  ;;  %v3811_v10 = vpop.permute.xlu1 %3810 }
 0x89c   : > { %v4360_v53 = vmax.f32 %v4328_v14, 0.0  ;;  %v4329_v28 = vadd.f32 %v4297_v34, %v14651_v19  ;;  %v4262_v56 = vmul.f32 %v11512_v36, %v4226_v52  ;;  %v4227_v0 = vmul.f32 %v4834_v45, %v14654_v40  ;;  %v4836_v16 = vpop.eup %4835  ;;  %v14661_v14 = vld [vmem:[#allocation189_spill] sm:$0xff]  ;;  %v14662_v52 = vld [vmem:[#allocation324_spill] sm:$0xff]  ;;  %v14667_v12 = vld [vmem:[#allocation234_spill] sm:$0xff] }
 0x89d   : > { %v3945_v30 = vadd.f32 %v3881_v32, %v14656_v46  ;;  %v14659_v26 = vsub.f32 %v14657_v44, %v14658_v9  ;;  %4839 = vrsqrt.f32 %v4166_v57  ;;  %v4103_v41 = vmax.f32 %v4071_v60, 0.0  ;;  %v14665_v40 = vld [vmem:[#allocation325_spill] sm:$0xff]  ;;  %v14666_v57 = vld [vmem:[#allocation200_spill] sm:$0xff] }
 0x89e   : > { %4392 = vst [vmem:[%s11888_s22 + $0x40] sm:$0xff] %v4360_v53  ;;  %v4361_v43 = vmax.f32 %v4329_v28, 0.0  ;;  %v4298_v6 = vadd.f32 %v11521_v55, %v4262_v56  ;;  %v4263_v51 = vmul.f32 %v11512_v36, %v4227_v0  ;;  %v4072_v4 = vsub.f32 %v4008_v17, %v11746_v13  ;;  %v14663_v13 = vld [vmem:[#allocation52_spill] sm:$0xff]  ;;  %v14664_v53 = vld [vmem:[#allocation95_spill] sm:$0xff] }
 0x89f   : > { %v4228_v31 = vmul.f32 %v4836_v16, %v14659_v26  ;;  %v4009_v1 = vmul.f32 0.25, %v3945_v30  ;;  %v3882_v34 = vsel %vm6771_vm2, %v14661_v14, %v3805_v18  ;;  %v4167_v11 = vadd.f32 1e-05, %v4103_v41  ;;  %v14668_v16 = vld [vmem:[#allocation326_spill] sm:$0xff]  ;;  %v14674_v14 = vld [vmem:[#allocation232_spill] sm:$0xff] }
 0x8a0   : > { %4393 = vst [vmem:[%s11888_s22 + $0x48] sm:$0xff] %v4361_v43  ;;  %v4330_v25 = vadd.f32 %v4298_v6, %v14660_v20  ;;  %v4299_v15 = vadd.f32 %v11521_v55, %v4263_v51  ;;  %v4104_v49 = vmax.f32 %v4072_v4, 0.0  ;;  %v3946_v45 = vadd.f32 %v3882_v34, %v14662_v52  ;;  %v14669_v6 = vld [vmem:[#allocation48_spill] sm:$0xff]  ;;  %v14670_v51 = vld [vmem:[#allocation137_spill] sm:$0xff]  ;;  %v14672_v26 = vld [vmem:[#allocation198_spill] sm:$0xff] }
 0x8a1   : > { %v4264_v2 = vmul.f32 %v11512_v36, %v4228_v31  ;;  %v4073_v29 = vsub.f32 %v4009_v1, %v11753_v54  ;;  %v3883_v19 = vsel %vm6771_vm2, %v14664_v53, %v3807_v24  ;;  %4841 = vrsqrt.f32 %v4167_v11  ;;  %v3813_v54 = vpop.permute.xlu0 %3812  ;;  %v14673_v20 = vld [vmem:[#allocation327_spill] sm:$0xff] }
 0x8a2   : > { %v4362_v22 = vmax.f32 %v4330_v25, 0.0  ;;  %v4331_v7 = vadd.f32 %v4299_v15, %v14663_v13  ;;  %v4168_v18 = vadd.f32 1e-05, %v4104_v49  ;;  %v4010_v56 = vmul.f32 0.25, %v3946_v45  ;;  %v4838_v17 = vpop.eup %4837  ;;  %v14675_v45 = vld [vmem:[#allocation328_spill] sm:$0xff]  ;;  %v14676_v13 = vld [vmem:[#allocation51_spill] sm:$0xff] }
 0x8a3   : > { %v4300_v28 = vadd.f32 %v11521_v55, %v4264_v2  ;;  %v4105_v38 = vmax.f32 %v4073_v29, 0.0  ;;  %v3947_v0 = vadd.f32 %v3883_v19, %v14665_v40  ;;  %v3884_v60 = vsel %vm6771_vm2, %v14666_v57, %v3809_v58 }
 0x8a4   : > { %4394 = vst [vmem:[%s11888_s22 + $0x50] sm:$0xff] %v4362_v22  ;;  %v4363_v23 = vmax.f32 %v4331_v7, 0.0  ;;  %4843 = vrsqrt.f32 %v4168_v18  ;;  %v4074_v24 = vsub.f32 %v4010_v56, %v11759_v47  ;;  %v3948_v43 = vadd.f32 %v3884_v60, %v14668_v16  ;;  %v3815_v47 = vpop.permute.xlu1 %3814  ;;  %v14677_v7 = vld [vmem:[#allocation207_spill] sm:$0xff]  ;;  %v14681_v60 = vld [vmem:[#allocation254_spill] sm:$0xff]  ;;  %v14682_v16 = vld [vmem:[#allocation201_spill] sm:$0xff] }
 0x8a5   : > { %v4332_v32 = vadd.f32 %v4300_v28, %v14667_v12  ;;  %v14671_v46 = vsub.f32 %v14669_v6, %v14670_v51  ;;  %v4169_v44 = vadd.f32 1e-05, %v4105_v38  ;;  %v4011_v9 = vmul.f32 0.25, %v3947_v0  ;;  %v3817_v18 = vpop.permute.xlu0 %3816  ;;  %v14680_v38 = vld [vmem:[#allocation83_spill] sm:$0xff]  ;;  %v14683_v51 = vld [vmem:[#allocation53_spill] sm:$0xff] }
 0x8a6   : > { %4395 = vst [vmem:[%s11888_s22 + $0x58] sm:$0xff] %v4363_v23  ;;  %v3885_v58 = vsel %vm6771_vm2, %v14672_v26, %v3811_v10  ;;  %v4106_v41 = vmax.f32 %v4074_v24, 0.0  ;;  %v4012_v4 = vmul.f32 0.25, %v3948_v43  ;;  %v3886_v34 = vsel %vm6771_vm2, %v14674_v14, %v3813_v54  ;;  %v14690_v14 = vld [vmem:[#allocation329_spill] sm:$0xff] }
 0x8a7   : > { %v4229_v30 = vmul.f32 %v4838_v17, %v14671_v46  ;;  %v4364_v31 = vmax.f32 %v4332_v32, 0.0  ;;  %v3949_v25 = vadd.f32 %v3885_v58, %v14673_v20  ;;  %4845 = vrsqrt.f32 %v4169_v44  ;;  %v4840_v2 = vpop.eup %4839  ;;  %v14684_v46 = vld [vmem:[#allocation82_spill] sm:$0xff] }
 0x8a8   : > { %v4075_v1 = vsub.f32 %v4011_v9, %v11763_v62  ;;  %v4170_v11 = vadd.f32 1e-05, %v4106_v41  ;;  %v4076_v49 = vsub.f32 %v4012_v4, %v11767_v27  ;;  %v3950_v10 = vadd.f32 %v3886_v34, %v14675_v45  ;;  %v14679_v62 = vld [vmem:[#allocation106_spill] sm:$0xff]  ;;  %v3819_v9 = vpop.permute.xlu1 %3818 }
 0x8a9   : > { %v4265_v15 = vmul.f32 %v11512_v36, %v4229_v30  ;;  %4396 = vst [vmem:[%s11888_s22 + $0x60] sm:$0xff] %v4364_v31  ;;  %v4013_v52 = vmul.f32 0.25, %v3949_v25  ;;  %v14678_v29 = vsub.f32 %v14676_v13, %v14677_v7  ;;  %v3887_v28 = vsel %vm6771_vm2, %v14679_v62, %v3815_v47  ;;  %v14687_v25 = vld [vmem:[#allocation55_spill] sm:$0xff]  ;;  %v14688_v47 = vld [vmem:[#allocation9_spill] sm:$0xff] }
 0x8aa   : > { %v4107_v19 = vmax.f32 %v4075_v1, 0.0  ;;  %4847 = vrsqrt.f32 %v4170_v11  ;;  %v4108_v56 = vmax.f32 %v4076_v49, 0.0  ;;  %v4014_v27 = vmul.f32 0.25, %v3950_v10  ;;  %v14691_v11 = vld [vmem:[#allocation215_spill] sm:$0xff]  ;;  %v3821_v10 = vpop.permute.xlu0 %3820 }
 0x8ab   : > { %v4301_v22 = vadd.f32 %v11521_v55, %v4265_v15  ;;  %v4230_v53 = vmul.f32 %v4840_v2, %v14678_v29  ;;  %v4077_v23 = vsub.f32 %v4013_v52, %v11776_v3  ;;  %v3951_v54 = vadd.f32 %v3887_v28, %v14681_v60  ;;  %v4842_v17 = vpop.eup %4841  ;;  %v14692_v52 = vld [vmem:[#allocation199_spill] sm:$0xff]  ;;  %v14698_v60 = vld [vmem:[#allocation101_spill] sm:$0xff] }
 0x8ac   : > { %v4171_v57 = vadd.f32 1e-05, %v4107_v19  ;;  %v4172_v12 = vadd.f32 1e-05, %v4108_v56  ;;  %v4078_v24 = vsub.f32 %v4014_v27, %v11780_v50  ;;  %v3888_v43 = vsel %vm6771_vm2, %v14682_v16, %v3817_v18  ;;  %v14686_v50 = vld [vmem:[#allocation141_spill] sm:$0xff]  ;;  %v14694_v62 = vld [vmem:[#allocation43_spill] sm:$0xff] }
 0x8ad   : > { %v4333_v40 = vadd.f32 %v4301_v22, %v14680_v38  ;;  %v4266_v0 = vmul.f32 %v11512_v36, %v4230_v53  ;;  %v4109_v32 = vmax.f32 %v4077_v23, 0.0  ;;  %v14685_v30 = vsub.f32 %v14683_v51, %v14684_v46  ;;  %v14693_v19 = vld [vmem:[#allocation57_spill] sm:$0xff]  ;;  %v14696_v23 = vld [vmem:[#allocation256_spill] sm:$0xff]  ;;  %v14697_v38 = vld [vmem:[#allocation118_spill] sm:$0xff] }
 0x8ae   : > { %4849 = vrsqrt.f32 %v4171_v57  ;;  %v4844_v26 = vpop.eup %4843  ;;  %v4110_v31 = vmax.f32 %v4078_v24, 0.0  ;;  %v4015_v41 = vmul.f32 0.25, %v3951_v54  ;;  %v14689_v15 = vsub.f32 %v14687_v25, %v14688_v47  ;;  %v14699_v16 = vld [vmem:[#allocation330_spill] sm:$0xff]  ;;  %v14700_v51 = vld [vmem:[#allocation235_spill] sm:$0xff] }
 0x8af   : > { %v4365_v6 = vmax.f32 %v4333_v40, 0.0  ;;  %v4302_v3 = vadd.f32 %v11521_v55, %v4266_v0  ;;  %v4231_v44 = vmul.f32 %v4842_v17, %v14685_v30  ;;  %4851 = vrsqrt.f32 %v4172_v12  ;;  %v14701_v30 = vld [vmem:[#allocation59_spill] sm:$0xff] }
 0x8b0   : > { %v4173_v58 = vadd.f32 1e-05, %v4109_v32  ;;  %v4232_v1 = vmul.f32 %v4844_v26, %v14689_v15  ;;  %v3952_v34 = vadd.f32 %v3888_v43, %v14690_v14  ;;  %v4174_v2 = vadd.f32 1e-05, %v4110_v31  ;;  %v14704_v31 = vld [vmem:[#allocation87_spill] sm:$0xff]  ;;  %v14705_v15 = vld [vmem:[#allocation121_spill] sm:$0xff] }
 0x8b1   : > { %4397 = vst [vmem:[%s11888_s22 + $0x68] sm:$0xff] %v4365_v6  ;;  %v4334_v4 = vadd.f32 %v4302_v3, %v14686_v50  ;;  %v4267_v20 = vmul.f32 %v11512_v36, %v4231_v44  ;;  %v4079_v49 = vsub.f32 %v4015_v41, %v14691_v11  ;;  %v3889_v45 = vsel %vm6771_vm2, %v14692_v52, %v3819_v9  ;;  %v4846_v22 = vpop.eup %4845  ;;  %v3823_v6 = vpop.permute.xlu1 %3822  ;;  %v14702_v44 = vld [vmem:[#allocation75_spill] sm:$0xff]  ;;  %v14707_v11 = vld [vmem:[#allocation62_spill] sm:$0xff] }
 0x8b2   : > { %4853 = vrsqrt.f32 %v4173_v58  ;;  %v4268_v29 = vmul.f32 %v11512_v36, %v4232_v1  ;;  %v4016_v53 = vmul.f32 0.25, %v3952_v34  ;;  %v14695_v28 = vsub.f32 %v14693_v19, %v14694_v62  ;;  %v14706_v34 = vld [vmem:[#allocation41_spill] sm:$0xff]  ;;  %v14713_v62 = vld [vmem:[#allocation331_spill] sm:$0xff] }
 0x8b3   : > { %v4366_v13 = vmax.f32 %v4334_v4, 0.0  ;;  %v4303_v7 = vadd.f32 %v11521_v55, %v4267_v20  ;;  %4855 = vrsqrt.f32 %v4174_v2  ;;  %v4111_v56 = vmax.f32 %v4079_v49, 0.0  ;;  %v14708_v49 = vld [vmem:[#allocation228_spill] sm:$0xff] }
 0x8b4   : > { %v4233_v18 = vmul.f32 %v4846_v22, %v14695_v28  ;;  %v3953_v27 = vadd.f32 %v3889_v45, %v14696_v23  ;;  %v4304_v0 = vadd.f32 %v11521_v55, %v4268_v29  ;;  %v4080_v57 = vsub.f32 %v4016_v53, %v11792_v63  ;;  %v4848_v17 = vpop.eup %4847  ;;  %v14711_v29 = vld [vmem:[#allocation239_spill] sm:$0xff] }
 0x8b5   : > { %4398 = vst [vmem:[%s11888_s22 + $0x70] sm:$0xff] %v4366_v13  ;;  %v4335_v40 = vadd.f32 %v4303_v7, %v14697_v38  ;;  %v3890_v54 = vsel %vm6771_vm2, %v14698_v60, %v3821_v10  ;;  %v4175_v32 = vadd.f32 1e-05, %v4111_v56  ;;  %v14703_v9 = vsub.f32 %v14701_v30, %v14702_v44  ;;  %v14710_v7 = vld [vmem:[#allocation67_spill] sm:$0xff]  ;;  %v14715_v60 = vld [vmem:[#allocation69_spill] sm:$0xff] }
 0x8b6   : > { %v4269_v12 = vmul.f32 %v11512_v36, %v4233_v18  ;;  %v4017_v24 = vmul.f32 0.25, %v3953_v27  ;;  %v3954_v43 = vadd.f32 %v3890_v54, %v14699_v16  ;;  %v4336_v46 = vadd.f32 %v4304_v0, %v14700_v51  ;;  %v3825_v18 = vpop.permute.xlu0 %3824  ;;  %v14714_v0 = vld [vmem:[#allocation65_spill] sm:$0xff]  ;;  %v14716_v54 = vld [vmem:[#allocation152_spill] sm:$0xff]  ;;  %v3827_v51 = vpop.permute.xlu1 %3826 }
 0x8b7   : > { %v4367_v3 = vmax.f32 %v4335_v40, 0.0  ;;  %v4234_v63 = vmul.f32 %v4848_v17, %v14703_v9  ;;  %v4112_v26 = vmax.f32 %v4080_v57, 0.0  ;;  %4857 = vrsqrt.f32 %v4175_v32  ;;  %v14719_v9 = vld [vmem:[#allocation71_spill] sm:$0xff] }
 0x8b8   : > { %v4305_v58 = vadd.f32 %v11521_v55, %v4269_v12  ;;  %v4081_v41 = vsub.f32 %v4017_v24, %v14704_v31  ;;  %v4018_v50 = vmul.f32 0.25, %v3954_v43  ;;  %v4850_v4 = vpop.eup %4849  ;;  %v4368_v20 = vmax.f32 %v4336_v46, 0.0  ;;  %v14722_v31 = vld [vmem:[#allocation236_spill] sm:$0xff] }
 0x8b9   : > { %4399 = vst [vmem:[%s11888_s22 + $0x78] sm:$0xff] %v4367_v3  ;;  %v4270_v25 = vmul.f32 %v11512_v36, %v4234_v63  ;;  %v4176_v47 = vadd.f32 1e-05, %v4112_v26  ;;  %v3891_v1 = vsel %vm6771_vm2, %v14705_v15, %v3823_v6  ;;  %v4852_v14 = vpop.eup %4851  ;;  %v14709_v52 = vsub.f32 %v14707_v11, %v14708_v49  ;;  %v14718_v6 = vld [vmem:[#allocation114_spill] sm:$0xff]  ;;  %v14720_v63 = vld [vmem:[#allocation229_spill] sm:$0xff] }
 0x8ba   : > { %v4337_v2 = vadd.f32 %v4305_v58, %v14706_v34  ;;  %v4113_v10 = vmax.f32 %v4081_v41, 0.0  ;;  %v4082_v22 = vsub.f32 %v4018_v50, %v11805_v61  ;;  %4400 = vst [vmem:[%s11888_s22 + $0x80] sm:$0xff] %v4368_v20  ;;  %v14712_v53 = vsub.f32 %v14710_v7, %v14711_v29 }
 0x8bb   : > { %v4235_v45 = vmul.f32 %v4850_v4, %v14709_v52  ;;  %v4306_v13 = vadd.f32 %v11521_v55, %v4270_v25  ;;  %4859 = vrsqrt.f32 %v4176_v47  ;;  %v3955_v28 = vadd.f32 %v3891_v1, %v14713_v62  ;;  %v14723_v4 = vld [vmem:[#allocation332_spill] sm:$0xff]  ;;  %v14724_v25 = vld [vmem:[#allocation17_spill] sm:$0xff] }
 0x8bc   : > { %v4236_v19 = vmul.f32 %v4852_v14, %v14712_v53  ;;  %v4854_v56 = vpop.eup %4853  ;;  %v4369_v23 = vmax.f32 %v4337_v2, 0.0  ;;  %v4177_v38 = vadd.f32 1e-05, %v4113_v10  ;;  %v4114_v40 = vmax.f32 %v4082_v22, 0.0  ;;  %v14725_v14 = vld [vmem:[#allocation39_spill] sm:$0xff]  ;;  %v3829_v2 = vpop.permute.xlu0 %3828  ;;  %v14728_v53 = vld [vmem:[#allocation74_spill] sm:$0xff] }
 0x8bd   : > { %v4271_v27 = vmul.f32 %v11512_v36, %v4235_v45  ;;  %v4338_v61 = vadd.f32 %v4306_v13, %v14714_v0  ;;  %v14717_v17 = vsub.f32 %v14715_v60, %v14716_v54  ;;  %v4019_v32 = vmul.f32 0.25, %v3955_v28  ;;  %v4856_v24 = vpop.eup %4855  ;;  %v14726_v45 = vld [vmem:[#allocation333_spill] sm:$0xff]  ;;  %v14727_v13 = vld [vmem:[#allocation206_spill] sm:$0xff] }
 0x8be   : > { %v4272_v57 = vmul.f32 %v11512_v36, %v4236_v19  ;;  %4401 = vst [vmem:[%s11888_s22 + $0x88] sm:$0xff] %v4369_v23  ;;  %4861 = vrsqrt.f32 %v4177_v38  ;;  %v4178_v43 = vadd.f32 1e-05, %v4114_v40  ;;  %v3892_v3 = vsel %vm6771_vm2, %v14718_v6, %v3825_v18  ;;  %v14729_v19 = vld [vmem:[#allocation217_spill] sm:$0xff]  ;;  %v3831_v40 = vpop.permute.xlu1 %3830 }
 0x8bf   : > { %v4237_v12 = vmul.f32 %v4854_v56, %v14717_v17  ;;  %v4307_v16 = vadd.f32 %v11521_v55, %v4271_v27  ;;  %v4370_v46 = vmax.f32 %v4338_v61, 0.0  ;;  %v14721_v26 = vsub.f32 %v14719_v9, %v14720_v63  ;;  %v14731_v27 = vld [vmem:[#allocation197_spill] sm:$0xff]  ;;  %v14733_v17 = vld [vmem:[#allocation334_spill] sm:$0xff] }
 0x8c0   : > { %v4308_v30 = vadd.f32 %v11521_v55, %v4272_v57  ;;  %4863 = vrsqrt.f32 %v4178_v43  ;;  %v4083_v50 = vsub.f32 %v4019_v32, %v11814_v37  ;;  %v3956_v20 = vadd.f32 %v3892_v3, %v14723_v4  ;;  %v14732_v57 = vld [vmem:[#allocation227_spill] sm:$0xff] }
 0x8c1   : > { %v4273_v44 = vmul.f32 %v11512_v36, %v4237_v12  ;;  %v4238_v58 = vmul.f32 %v4856_v24, %v14721_v26  ;;  %v4339_v41 = vadd.f32 %v4307_v16, %v14722_v31  ;;  %4402 = vst [vmem:[%s11888_s22 + $0x90] sm:$0xff] %v4370_v46  ;;  %v3893_v34 = vsel %vm6771_vm2, %v14725_v14, %v3827_v51  ;;  %v4858_v11 = vpop.eup %4857  ;;  %v14734_v32 = vld [vmem:[#allocation7_spill] sm:$0xff]  ;;  %v14735_v24 = vld [vmem:[#allocation130_spill] sm:$0xff] }
 0x8c2   : > { %v4340_v47 = vadd.f32 %v4308_v30, %v14724_v25  ;;  %v4115_v52 = vmax.f32 %v4083_v50, 0.0  ;;  %v4020_v37 = vmul.f32 0.25, %v3956_v20  ;;  %v3957_v10 = vadd.f32 %v3893_v34, %v14726_v45  ;;  %v14737_v30 = vld [vmem:[#allocation233_spill] sm:$0xff]  ;;  %v14738_v31 = vld [vmem:[#allocation335_spill] sm:$0xff]  ;;  %v14741_v25 = vld [vmem:[#allocation12_spill] sm:$0xff] }
 0x8c3   : > { %v4309_v15 = vadd.f32 %v11521_v55, %v4273_v44  ;;  %v4274_v1 = vmul.f32 %v11512_v36, %v4238_v58  ;;  %v4371_v49 = vmax.f32 %v4339_v41, 0.0  ;;  %v14730_v62 = vsub.f32 %v14728_v53, %v14729_v19  ;;  %v14739_v50 = vld [vmem:[#allocation231_spill] sm:$0xff]  ;;  %v14748_v53 = vld [vmem:[#allocation30_spill] sm:$0xff] }
 0x8c4   : > { %v4372_v22 = vmax.f32 %v4340_v47, 0.0  ;;  %v4179_v18 = vadd.f32 1e-05, %v4115_v52  ;;  %v4084_v56 = vsub.f32 %v4020_v37, %v11823_v48  ;;  %v4021_v23 = vmul.f32 0.25, %v3957_v10  ;;  %v14742_v47 = vld [vmem:[#allocation34_spill] sm:$0xff]  ;;  %v14744_v37 = vld [vmem:[#allocation16_spill] sm:$0xff] }
 0x8c5   : > { %v4341_v7 = vadd.f32 %v4309_v15, %v14727_v13  ;;  %v4310_v29 = vadd.f32 %v11521_v55, %v4274_v1  ;;  %v4239_v28 = vmul.f32 %v4858_v11, %v14730_v62  ;;  %4403 = vst [vmem:[%s11888_s22 + $0x98] sm:$0xff] %v4371_v49  ;;  %v3894_v38 = vsel %vm6771_vm2, %v14731_v27, %v3829_v2  ;;  %v4860_v0 = vpop.eup %4859  ;;  %v14746_v13 = vld [vmem:[#allocation85_spill] sm:$0xff] }
 0x8c6   : > { %4404 = vst [vmem:[%s11888_s22 + $0xa0] sm:$0xff] %v4372_v22  ;;  %v3958_v12 = vadd.f32 %v3894_v38, %v14733_v17  ;;  %v14736_v16 = vsub.f32 %v14734_v32, %v14735_v24  ;;  %4865 = vrsqrt.f32 %v4179_v18  ;;  %v4116_v43 = vmax.f32 %v4084_v56, 0.0  ;;  %v14749_v62 = vld [vmem:[#allocation113_spill] sm:$0xff] }
 0x8c7   : > { %v4373_v61 = vmax.f32 %v4341_v7, 0.0  ;;  %v4342_v60 = vadd.f32 %v4310_v29, %v14732_v57  ;;  %v4275_v54 = vmul.f32 %v11512_v36, %v4239_v28  ;;  %v4085_v6 = vsub.f32 %v4021_v23, %v11833_v5  ;;  %v14740_v5 = vld [vmem:[#allocation238_spill] sm:$0xff]  ;;  %v14747_v7 = vld [vmem:[#allocation163_spill] sm:$0xff]  ;;  %v14752_v56 = vld [vmem:[#allocation61_spill] sm:$0xff] }
 0x8c8   : > { %v4240_v48 = vmul.f32 %v4860_v0, %v14736_v16  ;;  %v4022_v46 = vmul.f32 0.25, %v3958_v12  ;;  %v3895_v44 = vsel %vm6771_vm2, %v14737_v30, %v3831_v40  ;;  %v4862_v9 = vpop.eup %4861  ;;  %v4180_v26 = vadd.f32 1e-05, %v4116_v43  ;;  %v14750_v28 = vld [vmem:[#allocation6_spill] sm:$0xff]  ;;  %v14753_v40 = vld [vmem:[#allocation187_spill] sm:$0xff]  ;;  %v14754_v0 = vld [vmem:[#allocation153_spill] sm:$0xff] }
 0x8c9   : > { %4405 = vst [vmem:[%s11888_s22 + $0xa8] sm:$0xff] %v4373_v61  ;;  %v4374_v3 = vmax.f32 %v4342_v60, 0.0  ;;  %v4311_v51 = vadd.f32 %v11521_v55, %v4275_v54  ;;  %v4117_v58 = vmax.f32 %v4085_v6, 0.0  ;;  %v3959_v41 = vadd.f32 %v3895_v44, %v14738_v31  ;;  %v14755_v54 = vld [vmem:[#allocation216_spill] sm:$0xff]  ;;  %v14756_v16 = vld [vmem:[#allocation185_spill] sm:$0xff]  ;;  %v14762_v31 = vld [vmem:[#allocation230_spill] sm:$0xff] }
 0x8ca   : > { %v4276_v63 = vmul.f32 %v11512_v36, %v4240_v48  ;;  %v4055_v4 = vmul.f32 %v14739_v50, %v14739_v50  ;;  %v14743_v15 = vsub.f32 %v14741_v25, %v14742_v47  ;;  %v4086_v21 = vsub.f32 %v4022_v46, %v11842_v33  ;;  %v4864_v14 = vpop.eup %4863  ;;  %v14757_v48 = vld [vmem:[#allocation154_spill] sm:$0xff]  ;;  %v14758_v6 = vld [vmem:[#allocation25_spill] sm:$0xff]  ;;  %v14759_v46 = vld [vmem:[#allocation111_spill] sm:$0xff] }
 0x8cb   : > { %4406 = vst [vmem:[%s11888_s22 + $0xb0] sm:$0xff] %v4374_v3  ;;  %v4343_v20 = vadd.f32 %v4311_v51, %v14740_v5  ;;  %4867 = vrsqrt.f32 %v4180_v26  ;;  %v4181_v2 = vadd.f32 1e-05, %v4117_v58  ;;  %v4023_v11 = vmul.f32 0.25, %v3959_v41  ;;  %v14763_v25 = vld [vmem:[#allocation132_spill] sm:$0xff]  ;;  %v14764_v47 = vld [vmem:[#allocation107_spill] sm:$0xff] }
 0x8cc   : > { %v4241_v1 = vmul.f32 %v4862_v9, %v14743_v15  ;;  %v4312_v34 = vadd.f32 %v11521_v55, %v4276_v63  ;;  %v14745_v45 = vsub.f32 %v14744_v37, %v11621_v59  ;;  %v4118_v22 = vmax.f32 %v4086_v21, 0.0  ;;  %v14760_v63 = vld [vmem:[#allocation20_spill] sm:$0xff] }
 0x8cd   : > { %v4375_v49 = vmax.f32 %v4343_v20, 0.0  ;;  %v3153_v29 = vadd.f32 %v14747_v7, %v14746_v13  ;;  %4869 = vrsqrt.f32 %v4181_v2  ;;  %v4087_v33 = vsub.f32 %v4023_v11, %v4055_v4 }
 0x8ce   : > { %v4277_v52 = vmul.f32 %v11512_v36, %v4241_v1  ;;  %v4242_v10 = vmul.f32 %v4864_v14, %v14745_v45  ;;  %v4344_v19 = vadd.f32 %v4312_v34, %v14748_v53  ;;  %v14751_v18 = vsub.f32 %v14749_v62, %v14750_v28  ;;  %v14769_v45 = vld [vmem:[#allocation214_spill] sm:$0xff]  ;;  %v14770_v53 = vld [vmem:[#allocation28_spill] sm:$0xff] }
 0x8cf   : > { %4407 = vst [vmem:[%s11888_s22 + $0xb8] sm:$0xff] %v4375_v49  ;;  %v4182_v38 = vadd.f32 1e-05, %v4118_v22  ;;  %v2988_v61 = vsub.f32 %v14754_v0, %v14753_v40  ;;  %v4119_v60 = vmax.f32 %v4087_v33, 0.0  ;;  %v3154_v17 = vadd.f32 %v14747_v7, %v14755_v54  ;;  %v14767_v49 = vld [vmem:[#allocation26_spill] sm:$0xff] }
 0x8d0   : > { %v3083_v23 = vmul.f32 %v14752_v56, %v14751_v18  ;;  %v4313_v27 = vadd.f32 %v11521_v55, %v4277_v52  ;;  %v4278_v59 = vmul.f32 %v11512_v36, %v4242_v10  ;;  %v4376_v57 = vmax.f32 %v4344_v19, 0.0  ;;  %v4866_v24 = vpop.eup %4865  ;;  %v14768_v52 = vld [vmem:[#allocation72_spill] sm:$0xff]  ;;  %v14772_v28 = vld [vmem:[#allocation58_spill] sm:$0xff] }
 0x8d1   : > { %4871 = vrsqrt.f32 %v4182_v38  ;;  %v2989_v43 = vsub.f32 %v14757_v48, %v14756_v16  ;;  %v3084_v3 = vmul.f32 %v14758_v6, %v2988_v61  ;;  %v4183_v51 = vadd.f32 1e-05, %v4119_v60  ;;  %v14773_v38 = vld [vmem:[#allocation32_spill] sm:$0xff] }
 0x8d2   : > { %v4345_v12 = vadd.f32 %v4313_v27, %v3153_v29  ;;  %v4314_v32 = vadd.f32 %v11521_v55, %v4278_v59  ;;  %4408 = vst [vmem:[%s11888_s22 + $0xc0] sm:$0xff] %v4376_v57  ;;  %v3119_v30 = vmul.f32 %v14759_v46, %v3083_v23  ;;  %v14761_v26 = vsub.f32 %v14760_v63, %v11635_v8  ;;  %v14765_v8 = vld [vmem:[#allocation24_spill] sm:$0xff] }
 0x8d3   : > { %4873 = vrsqrt.f32 %v4183_v51  ;;  %v3085_v41 = vmul.f32 %v14762_v31, %v2989_v43  ;;  %v2990_v15 = vsub.f32 %v14764_v47, %v14763_v25  ;;  %v3120_v1 = vmul.f32 %v14759_v46, %v3084_v3 }
 0x8d4   : > { %v4377_v44 = vmax.f32 %v4345_v12, 0.0  ;;  %v4346_v9 = vadd.f32 %v4314_v32, %v3154_v17  ;;  %v4243_v58 = vmul.f32 %v4866_v24, %v14761_v26  ;;  %v3155_v21 = vadd.f32 %v14747_v7, %v3119_v30  ;;  %v14775_v24 = vld [vmem:[#allocation36_spill] sm:$0xff] }
 0x8d5   : > { %v4868_v20 = vpop.eup %4867  ;;  %v14766_v34 = vsub.f32 %v14765_v8, %v11653_v39  ;;  %v2991_v37 = vsub.f32 %v14768_v52, %v14767_v49  ;;  %v3086_v10 = vmul.f32 %v14769_v45, %v2990_v15  ;;  %v3121_v22 = vmul.f32 %v14759_v46, %v3085_v41 }
 0x8d6   : > { %4409 = vst [vmem:[%s11888_s22 + $0xc8] sm:$0xff] %v4377_v44  ;;  %v4378_v4 = vmax.f32 %v4346_v9, 0.0  ;;  %v4279_v5 = vmul.f32 %v11512_v36, %v4243_v58  ;;  %v14771_v19 = vsub.f32 %v14770_v53, %v11671_v42  ;;  %v3156_v62 = vadd.f32 %v14747_v7, %v3120_v1 }
 0x8d7   : > { %v4244_v2 = vmul.f32 %v4868_v20, %v14766_v34  ;;  %v4870_v11 = vpop.eup %4869  ;;  %v3087_v18 = vmul.f32 %v14772_v28, %v2991_v37  ;;  %v3122_v59 = vmul.f32 %v14759_v46, %v3086_v10  ;;  %v14774_v40 = vsub.f32 %v14773_v38, %v11691_v35 }
 0x8d8   : > { %4410 = vst [vmem:[%s11888_s22 + $0xd0] sm:$0xff] %v4378_v4  ;;  %v4315_v14 = vadd.f32 %v11521_v55, %v4279_v5  ;;  %v4245_v33 = vmul.f32 %v4870_v11, %v14771_v19  ;;  %v3157_v42 = vadd.f32 %v14747_v7, %v3121_v22  ;;  %v14776_v35 = vsub.f32 %v14775_v24, %v14739_v50 }
 0x8d9   : > { %v4280_v29 = vmul.f32 %v11512_v36, %v4244_v2  ;;  %v3123_v17 = vmul.f32 %v14759_v46, %v3087_v18  ;;  %v3158_v48 = vadd.f32 %v14747_v7, %v3122_v59 }
 0x8da   : > { %v4347_v13 = vadd.f32 %v4315_v14, %v3155_v21  ;;  %v4281_v27 = vmul.f32 %v11512_v36, %v4245_v33 }
 0x8db   : > { %v4872_v39 = vpop.eup %4871  ;;  %v4316_v23 = vadd.f32 %v11521_v55, %v4280_v29  ;;  %v3159_v46 = vadd.f32 %v14747_v7, %v3123_v17 }
 0x8dc   : > { %v4379_v56 = vmax.f32 %v4347_v13, 0.0  ;;  %v4246_v0 = vmul.f32 %v4872_v39, %v14774_v40  ;;  %v4317_v57 = vadd.f32 %v11521_v55, %v4281_v27 }
 0x8dd   : > { %v4348_v61 = vadd.f32 %v4316_v23, %v3156_v62  ;;  %v4874_v60 = vpop.eup %4873 }
 0x8de   : > { %4411 = vst [vmem:[%s11888_s22 + $0xd8] sm:$0xff] %v4379_v56  ;;  %v4282_v54 = vmul.f32 %v11512_v36, %v4246_v0  ;;  %v4349_v32 = vadd.f32 %v4317_v57, %v3157_v42  ;;  %v4247_v16 = vmul.f32 %v4874_v60, %v14776_v35 }
 0x8df   : > { %v4380_v12 = vmax.f32 %v4348_v61, 0.0 }
 0x8e0   : > { %v4318_v43 = vadd.f32 %v11521_v55, %v4282_v54  ;;  %v4381_v6 = vmax.f32 %v4349_v32, 0.0  ;;  %v4283_v3 = vmul.f32 %v11512_v36, %v4247_v16 }
 0x8e1   : > { %4412 = vst [vmem:[%s11888_s22 + $0xe0] sm:$0xff] %v4380_v12 }
 0x8e2   : > { %v4350_v51 = vadd.f32 %v4318_v43, %v3158_v48  ;;  %4413 = vst [vmem:[%s11888_s22 + $0xe8] sm:$0xff] %v4381_v6  ;;  %v4319_v30 = vadd.f32 %v11521_v55, %v4283_v3 }
 0x8e4   : > { %v4382_v50 = vmax.f32 %v4350_v51, 0.0  ;;  %v4351_v44 = vadd.f32 %v4319_v30, %v3159_v46 }
 0x8e6   : > { %4414 = vst [vmem:[%s11888_s22 + $0xf0] sm:$0xff] %v4382_v50  ;;  %v4383_v36 = vmax.f32 %v4351_v44, 0.0 }
 0x8e8   : > { %4415 = vst [vmem:[%s11888_s22 + $0xf8] sm:$0xff] %v4383_v36 }
 0x8e9   : > { %4890 = shalt.err (!%p4887_p3)
}
 0x8ea   : > { %s4891_s13 = scalar_lea.hbm %s12213_s30, 4096  ;;  %s4895_s7 = scalar_lea.hbm %s12265_s4, 8192 }
 0x8eb   : > { %p4892_p4 = scmp.ne.s32.totalorder %s12213_s30, %s4891_s13  ;;  %p4896_p9 = scmp.lt.u32.totalorder %s12213_s30, %s12265_s4 }
 0x8ec   : > { %p4897_p10 = scmp.lt.u32.totalorder %s4895_s7, %s4891_s13  ;;  %p4899_p12 = scmp.lt.u32.totalorder %s4891_s13, %s12213_s30 }
 0x8ed   : > { %p4893_p7 = pnand %p4892_p4, %p5012_p5 }
 0x8ee   : > { %p4898_p11 = por %p4897_p10, %p4896_p9 }
 0x8ef   : > { %p4894_p8 = pneg %p4893_p7 }
 0x8f0   : > { %p4900_p13 = por %p4899_p12, %p4898_p11 }
 0x8f2   : > { %p4901_p0 = pnand %p4900_p13, %p4894_p8 }
 0x8f4   : > { %4904 = shalt.err (!%p4901_p0)
}
 0x8f5   : > { %s4947_s20 = smov 128   ;;  %s4948_s22 = smov 8  }
 0x8f6   : > { %4617 = dma.vmem_to_hbm [thread:$0]  (%p5012_p5), %s12215_s27, 4096, %s12213_s30, %s12220_s9, %s4947_s20, %s4947_s20, %s4948_s22  }
 0x8f7 PF: > { %p4623_p1 = scmp.ge.s32.totalorder %s4939_s18, 2  ;;  %s4445_s23 = sand.u32 1, %s4927_s15  }
 0x8f8   : > { %s4446_s28 = scalar_lea.sflag [#allocation3], %s4445_s23 }
 0x8f9   : > { %p4620_p2 = pnand %p4623_p1, %p5016_p6 }
 0x8fb   : > { %4922 = dma.done.wait (!%p4620_p2), %s4446_s28, 4096  }
 0x8fc   : > { %4924 = vsyncadd (!%p4620_p2), %s4446_s28, 4294963200  ;;  %p14_p3 = scmp.ge.s32.totalorder %s4999_s21, 4   ;;  %s14777_s15 = smov %s4931_s16 }
 0x8fd   : > { %s14778_s16 = smov %s4935_s17  ;;  %s14779_s17 = smov %s5010_s24 }
 0x8fe   : > { %s14780_s18 = smov %s4999_s21  ;;  %16 = sbr.rel (!%p14_p3) target bundleno = 3 (0x3), region = 71 }
 0x905   :  { %4451 = vsyncpa [#allocation3], 1 }
 0x906   :  { %4453 = vsyncpa [#allocation3 + $0x1], 1 }

</bundles_post_ra>
